<compile_context>
chip_gen: v7x
topology: tpu7x:2x2x1
jax: 0.10.0
libtpu: 0.0.40
codegen_flags: <defaults>
</compile_context>

<pallas_src>
import functools

import jax
import jax.numpy as jnp
import numpy as np
from jax import lax
from jax.experimental import pallas as pl
from jax.experimental.pallas import tpu as pltpu


def _round_up(x, m):
    return ((x + m - 1) // m) * m


# ----------------------------------------------------------------------------
# Parameter construction (mirrors CornerActivationB.__init__ / forward expansion)
# ----------------------------------------------------------------------------
def init_corner_params(key, arity, input_groups, out_dim, act_init=1.0, act_factor=1.0):
    # torch.randint(2, ...) * 2 - 1, scaled by act_init / act_factor
    r = jax.random.randint(key, (input_groups, 2 ** arity, out_dim), 0, 2)
    return (r * 2 - 1).astype(jnp.float32) * (act_init / act_factor)


def expand_params(params, arity):
    """2**arity corner table -> 3**arity ternary table (midpoints = averages)."""
    G, P2, D = params.shape
    assert P2 == 2 ** arity
    ep = params.astype(jnp.float32)
    for i in range(arity):
        s0 = 3 ** i
        s1 = 2 ** (arity - i - 1)
        v = ep.reshape(G, s0, 2, s1, D)
        lo = v[:, :, 0]
        hi = v[:, :, 1]
        ep = jnp.stack([lo, (lo + hi) / 2.0, hi], axis=2)
    return ep.reshape(G, 3 ** arity, D)


# ----------------------------------------------------------------------------
# Pallas kernel
# ----------------------------------------------------------------------------
def corner_act_kernel(x_ref, p_ref, o_ref, *, arity, act_factor):
    # x_ref: (arity, tile_n, G) f32  -- slot-major so each slot is a static slice
    # p_ref: (G, 3**arity, D) f32    -- expanded ternary lattice table
    # o_ref: (tile_n, G*D) f32       -- lane-dense output slab
    K = arity
    P3 = 3 ** K
    center = (P3 - 1) // 2
    tile_n, G = x_ref.shape[1], x_ref.shape[2]

    xs = [x_ref[k] for k in range(K)]                       # K x (tile_n, G)
    aabs = [jnp.abs(x) for x in xs]
    # ternary digit offset per slot: sign(x) in {-1, 0, +1}
    sgn = [jnp.where(x > 0.0, 1, jnp.where(x < 0.0, -1, 0)).astype(jnp.int32)
           for x in xs]

    # --- pairwise |x| compares, computed once per pair (reused both ways) ----
    le = {}
    for j in range(K):
        for k in range(j + 1, K):
            le[(j, k)] = (aabs[j] <= aabs[k]).astype(jnp.int32)

    # rank of each slot among |x| (stable sort: ties broken by slot index)
    ranks = []
    for k in range(K):
        r = None
        for j in range(K):
            if j == k:
                continue
            term = le[(j, k)] if j < k else (1 - le[(k, j)])
            r = term if r is None else r + term
        if r is None:                                        # arity == 1
            r = jnp.zeros((tile_n, G), jnp.int32)
        ranks.append(r)

    # ascending sorted |x| recovered from ranks -> simplex coefficients
    srt = []
    for rk in range(K):
        v = None
        for k in range(K):
            t = jnp.where(ranks[k] == rk, aabs[k], 0.0)
            v = t if v is None else v + t
        srt.append(v)
    coef = [srt[0]] + [srt[rk] - srt[rk - 1] for rk in range(1, K)]

    # ternary lattice vertex for each sorted position:
    #   digit(slot k) = 1 + sign(x_k)  if rank_k >= rk   else 1 (midpoint)
    signed = [sgn[k] * (3 ** k) for k in range(K)]
    full = signed[0]
    for k in range(1, K):
        full = full + signed[k]
    verts = [full + center]                                  # rk = 0: no compares needed
    for rk in range(1, K):
        acc = None
        for k in range(K):
            t = jnp.where(ranks[k] >= rk, signed[k], 0)
            acc = t if acc is None else acc + t
        verts.append(acc + center)

    # --- dense per-vertex weights + per-group MXU matmul ---------------------
    # W[n, p] = sum_r coef_r[n] * onehot(vert_r[n] == p); out_g = W @ params[g].
    # (Per-group 2-D dots unrolled over G; for large G switch to one batched
    #  dot_general -- equivalent to einsum('ngp,gpd->ngd').)
    iota_p = lax.broadcasted_iota(jnp.int32, (tile_n, P3), 1)  # hoisted
    cols = []
    for g in range(G):
        w = None
        for rk in range(K):
            hit = verts[rk][:, g:g + 1] == iota_p              # (tile_n, P3)
            t = jnp.where(hit, coef[rk][:, g:g + 1], 0.0)
            w = t if w is None else w + t
        cols.append(jnp.dot(w, p_ref[g],
                            precision=lax.Precision.HIGHEST,
                            preferred_element_type=jnp.float32))  # (tile_n, D)

    # lane-dense store: one (tile_n, G*D) slab instead of D-wide partial stores
    o_ref[...] = jnp.concatenate(cols, axis=-1) * act_factor


# ----------------------------------------------------------------------------
# Wrapper
# ----------------------------------------------------------------------------
def corner_activation_b_forward(X, params, arity, act_factor=1.0, tile_n=256):
    N, F = X.shape
    G, P2, D = params.shape
    assert F == G * arity and P2 == 2 ** arity

    # 3**arity expansion: parameter-only preprocessing, tiny, done in plain JAX.
    ep = expand_params(params, arity)
    P3 = 3 ** arity

    # Tile sizing: large row tiles (256+) amortize per-step overhead; round to 8
    # and zero-pad N (padded rows produce zeros and are sliced off).  For v7x
    # (2 TCs / 64 MiB VMEM) keep N//tile even if possible and halve very large
    # tiles; raise vmem_limit_bytes if pushing tile_n toward 1024 on v6e.
    tile = max(8, min(tile_n, _round_up(N, 8)))
    tile = _round_up(tile, 8)
    n_pad = _round_up(N, tile)
    Xp = X if n_pad == N else jnp.pad(X, ((0, n_pad - N), (0, 0)))

    # Slot-major layout so each of the `arity` slots is a static (tile, G) slice.
    # NOTE: this transpose is one extra HBM round-trip of X; producing X in
    # slot-major layout upstream would remove it.
    x_t = jnp.transpose(Xp.reshape(n_pad, G, arity), (2, 0, 1)).astype(jnp.float32)

    kernel = functools.partial(corner_act_kernel, arity=arity,
                               act_factor=float(act_factor))

    out = pl.pallas_call(
        kernel,
        out_shape=jax.ShapeDtypeStruct((n_pad, G * D), jnp.float32),
        grid=(pl.cdiv(n_pad, tile),),
        in_specs=[
            pl.BlockSpec((arity, tile, G), lambda i: (0, i, 0)),
            pl.BlockSpec((G, P3, D), lambda i: (0, 0, 0)),
        ],
        out_specs=pl.BlockSpec((tile, G * D), lambda i: (i, 0)),
        compiler_params=pltpu.CompilerParams(
            dimension_semantics=("parallel",),
            vmem_limit_bytes=64 * 1024 * 1024),
    )(x_t, ep)

    return out[:N]


# ----------------------------------------------------------------------------
# Pure-JAX reference (reconstructed high_order_act_b) for correctness check
# ----------------------------------------------------------------------------
def corner_activation_b_ref(X, params, arity, act_factor):
    N, F = X.shape
    G, P2, D = params.shape
    ep = expand_params(params, arity)                        # (G, 3**arity, D)
    A = X.reshape(N, G, arity).astype(jnp.float32)
    a = jnp.abs(A)
    order = jnp.argsort(a, axis=2)                           # ascending, stable
    a_sort = jnp.take_along_axis(a, order, axis=2)
    s_sort = jnp.take_along_axis(jnp.sign(A), order, axis=2).astype(jnp.int32)
    coef = jnp.concatenate(
        [a_sort[:, :, :1], a_sort[:, :, 1:] - a_sort[:, :, :-1]], axis=2)
    signed = s_sort * (3 ** order)
    suffix = jnp.flip(jnp.cumsum(jnp.flip(signed, axis=2), axis=2), axis=2)
    vert = (3 ** arity - 1) // 2 + suffix                    # (N, G, arity) int32
    g_idx = jnp.arange(G)[None, :, None]
    gathered = ep[g_idx, vert, :]                            # (N, G, arity, D)
    out = (gathered * coef[..., None]).sum(axis=2) * act_factor
    return out.reshape(N, G * D)


if __name__ == "__main__":
    arity = 3
    input_groups = 4
    out_dim = 8
    act_init = 1.0
    act_factor = 2.0
    N = 100                      # not a tile multiple -> exercises cdiv/padding

    key = jax.random.PRNGKey(0)
    kp, kx = jax.random.split(key)
    params = init_corner_params(kp, arity, input_groups, out_dim,
                                act_init, act_factor)
    X = jax.random.normal(kx, (N, input_groups * arity), dtype=jnp.float32)

    out = corner_activation_b_forward(X, params, arity, act_factor, tile_n=256)
    out = jax.block_until_ready(out)

    ref = corner_activation_b_ref(X, params, arity, act_factor)
    np.testing.assert_allclose(np.asarray(out), np.asarray(ref),
                               rtol=1e-4, atol=1e-4)
    print("KERNEL_OK")
</pallas_src>

<mosaic_0001>
module attributes {stable_mosaic.version = 11 : i64} {
  func.func @corner_act_kernel(%arg0: i32, %arg1: memref<3x104x4xf32, #tpu.memory_space<vmem>>, %arg2: memref<4x27x8xf32, #tpu.memory_space<vmem>>, %arg3: memref<104x32xf32, #tpu.memory_space<vmem>>) attributes {dimension_semantics = [#tpu.dimension_semantics<parallel>], iteration_bounds = array<i64: 1>, scalar_prefetch = 0 : i64, scratch_operands = 0 : i64, tpu.core_type = #tpu.core_type<tc>, window_params = [{transform_indices = @transform_0, window_bounds = array<i64: 3, 104, 4>}, {pipeline_mode = #tpu.pipeline_mode<synchronous>, transform_indices = @transform_1, window_bounds = array<i64: 4, 27, 8>}, {transform_indices = @transform_2, window_bounds = array<i64: 104, 32>}]} {
    %c0 = arith.constant 0 : index
    %c0_0 = arith.constant 0 : index
    %c0_1 = arith.constant 0 : index
    %0 = vector.load %arg1[%c0, %c0_0, %c0_1] : memref<3x104x4xf32, #tpu.memory_space<vmem>>, vector<1x104x4xf32>
    %1 = vector.shape_cast %0 : vector<1x104x4xf32> to vector<104x4xf32>
    %c1 = arith.constant 1 : index
    %c0_2 = arith.constant 0 : index
    %c0_3 = arith.constant 0 : index
    %2 = vector.load %arg1[%c1, %c0_2, %c0_3] : memref<3x104x4xf32, #tpu.memory_space<vmem>>, vector<1x104x4xf32>
    %3 = vector.shape_cast %2 : vector<1x104x4xf32> to vector<104x4xf32>
    %c2 = arith.constant 2 : index
    %c0_4 = arith.constant 0 : index
    %c0_5 = arith.constant 0 : index
    %4 = vector.load %arg1[%c2, %c0_4, %c0_5] : memref<3x104x4xf32, #tpu.memory_space<vmem>>, vector<1x104x4xf32>
    %5 = vector.shape_cast %4 : vector<1x104x4xf32> to vector<104x4xf32>
    %6 = math.absf %1 : vector<104x4xf32>
    %7 = math.absf %3 : vector<104x4xf32>
    %8 = math.absf %5 : vector<104x4xf32>
    %cst = arith.constant 0.000000e+00 : f32
    %9 = vector.broadcast %cst : f32 to vector<104x4xf32>
    %10 = arith.cmpf ogt, %1, %9 : vector<104x4xf32>
    %cst_6 = arith.constant 0.000000e+00 : f32
    %11 = vector.broadcast %cst_6 : f32 to vector<104x4xf32>
    %12 = arith.cmpf olt, %1, %11 : vector<104x4xf32>
    %c-1_i32 = arith.constant -1 : i32
    %c0_i32 = arith.constant 0 : i32
    %13 = vector.broadcast %c-1_i32 : i32 to vector<104x4xi32>
    %14 = vector.broadcast %c0_i32 : i32 to vector<104x4xi32>
    %15 = arith.select %12, %13, %14 : vector<104x4xi1>, vector<104x4xi32>
    %c1_i32 = arith.constant 1 : i32
    %16 = vector.broadcast %c1_i32 : i32 to vector<104x4xi32>
    %17 = arith.select %10, %16, %15 : vector<104x4xi1>, vector<104x4xi32>
    %cst_7 = arith.constant 0.000000e+00 : f32
    %18 = vector.broadcast %cst_7 : f32 to vector<104x4xf32>
    %19 = arith.cmpf ogt, %3, %18 : vector<104x4xf32>
    %cst_8 = arith.constant 0.000000e+00 : f32
    %20 = vector.broadcast %cst_8 : f32 to vector<104x4xf32>
    %21 = arith.cmpf olt, %3, %20 : vector<104x4xf32>
    %c-1_i32_9 = arith.constant -1 : i32
    %c0_i32_10 = arith.constant 0 : i32
    %22 = vector.broadcast %c-1_i32_9 : i32 to vector<104x4xi32>
    %23 = vector.broadcast %c0_i32_10 : i32 to vector<104x4xi32>
    %24 = arith.select %21, %22, %23 : vector<104x4xi1>, vector<104x4xi32>
    %c1_i32_11 = arith.constant 1 : i32
    %25 = vector.broadcast %c1_i32_11 : i32 to vector<104x4xi32>
    %26 = arith.select %19, %25, %24 : vector<104x4xi1>, vector<104x4xi32>
    %cst_12 = arith.constant 0.000000e+00 : f32
    %27 = vector.broadcast %cst_12 : f32 to vector<104x4xf32>
    %28 = arith.cmpf ogt, %5, %27 : vector<104x4xf32>
    %cst_13 = arith.constant 0.000000e+00 : f32
    %29 = vector.broadcast %cst_13 : f32 to vector<104x4xf32>
    %30 = arith.cmpf olt, %5, %29 : vector<104x4xf32>
    %c-1_i32_14 = arith.constant -1 : i32
    %c0_i32_15 = arith.constant 0 : i32
    %31 = vector.broadcast %c-1_i32_14 : i32 to vector<104x4xi32>
    %32 = vector.broadcast %c0_i32_15 : i32 to vector<104x4xi32>
    %33 = arith.select %30, %31, %32 : vector<104x4xi1>, vector<104x4xi32>
    %c1_i32_16 = arith.constant 1 : i32
    %34 = vector.broadcast %c1_i32_16 : i32 to vector<104x4xi32>
    %35 = arith.select %28, %34, %33 : vector<104x4xi1>, vector<104x4xi32>
    %36 = arith.cmpf ole, %6, %7 : vector<104x4xf32>
    %37 = arith.extui %36 : vector<104x4xi1> to vector<104x4xi32>
    %38 = arith.cmpf ole, %6, %8 : vector<104x4xf32>
    %39 = arith.extui %38 : vector<104x4xi1> to vector<104x4xi32>
    %40 = arith.cmpf ole, %7, %8 : vector<104x4xf32>
    %41 = arith.extui %40 : vector<104x4xi1> to vector<104x4xi32>
    %c1_i32_17 = arith.constant 1 : i32
    %42 = vector.broadcast %c1_i32_17 : i32 to vector<104x4xi32>
    %43 = arith.subi %42, %37 : vector<104x4xi32>
    %c1_i32_18 = arith.constant 1 : i32
    %44 = vector.broadcast %c1_i32_18 : i32 to vector<104x4xi32>
    %45 = arith.subi %44, %39 : vector<104x4xi32>
    %46 = arith.addi %43, %45 : vector<104x4xi32>
    %c1_i32_19 = arith.constant 1 : i32
    %47 = vector.broadcast %c1_i32_19 : i32 to vector<104x4xi32>
    %48 = arith.subi %47, %41 : vector<104x4xi32>
    %49 = arith.addi %37, %48 : vector<104x4xi32>
    %50 = arith.addi %39, %41 : vector<104x4xi32>
    %c0_i32_20 = arith.constant 0 : i32
    %51 = vector.broadcast %c0_i32_20 : i32 to vector<104x4xi32>
    %52 = arith.cmpi eq, %46, %51 : vector<104x4xi32>
    %cst_21 = arith.constant 0.000000e+00 : f32
    %53 = vector.broadcast %cst_21 : f32 to vector<104x4xf32>
    %54 = arith.select %52, %6, %53 : vector<104x4xi1>, vector<104x4xf32>
    %c0_i32_22 = arith.constant 0 : i32
    %55 = vector.broadcast %c0_i32_22 : i32 to vector<104x4xi32>
    %56 = arith.cmpi eq, %49, %55 : vector<104x4xi32>
    %cst_23 = arith.constant 0.000000e+00 : f32
    %57 = vector.broadcast %cst_23 : f32 to vector<104x4xf32>
    %58 = arith.select %56, %7, %57 : vector<104x4xi1>, vector<104x4xf32>
    %59 = arith.addf %54, %58 : vector<104x4xf32>
    %c0_i32_24 = arith.constant 0 : i32
    %60 = vector.broadcast %c0_i32_24 : i32 to vector<104x4xi32>
    %61 = arith.cmpi eq, %50, %60 : vector<104x4xi32>
    %cst_25 = arith.constant 0.000000e+00 : f32
    %62 = vector.broadcast %cst_25 : f32 to vector<104x4xf32>
    %63 = arith.select %61, %8, %62 : vector<104x4xi1>, vector<104x4xf32>
    %64 = arith.addf %59, %63 : vector<104x4xf32>
    %c1_i32_26 = arith.constant 1 : i32
    %65 = vector.broadcast %c1_i32_26 : i32 to vector<104x4xi32>
    %66 = arith.cmpi eq, %46, %65 : vector<104x4xi32>
    %cst_27 = arith.constant 0.000000e+00 : f32
    %67 = vector.broadcast %cst_27 : f32 to vector<104x4xf32>
    %68 = arith.select %66, %6, %67 : vector<104x4xi1>, vector<104x4xf32>
    %c1_i32_28 = arith.constant 1 : i32
    %69 = vector.broadcast %c1_i32_28 : i32 to vector<104x4xi32>
    %70 = arith.cmpi eq, %49, %69 : vector<104x4xi32>
    %cst_29 = arith.constant 0.000000e+00 : f32
    %71 = vector.broadcast %cst_29 : f32 to vector<104x4xf32>
    %72 = arith.select %70, %7, %71 : vector<104x4xi1>, vector<104x4xf32>
    %73 = arith.addf %68, %72 : vector<104x4xf32>
    %c1_i32_30 = arith.constant 1 : i32
    %74 = vector.broadcast %c1_i32_30 : i32 to vector<104x4xi32>
    %75 = arith.cmpi eq, %50, %74 : vector<104x4xi32>
    %cst_31 = arith.constant 0.000000e+00 : f32
    %76 = vector.broadcast %cst_31 : f32 to vector<104x4xf32>
    %77 = arith.select %75, %8, %76 : vector<104x4xi1>, vector<104x4xf32>
    %78 = arith.addf %73, %77 : vector<104x4xf32>
    %c2_i32 = arith.constant 2 : i32
    %79 = vector.broadcast %c2_i32 : i32 to vector<104x4xi32>
    %80 = arith.cmpi eq, %46, %79 : vector<104x4xi32>
    %cst_32 = arith.constant 0.000000e+00 : f32
    %81 = vector.broadcast %cst_32 : f32 to vector<104x4xf32>
    %82 = arith.select %80, %6, %81 : vector<104x4xi1>, vector<104x4xf32>
    %c2_i32_33 = arith.constant 2 : i32
    %83 = vector.broadcast %c2_i32_33 : i32 to vector<104x4xi32>
    %84 = arith.cmpi eq, %49, %83 : vector<104x4xi32>
    %cst_34 = arith.constant 0.000000e+00 : f32
    %85 = vector.broadcast %cst_34 : f32 to vector<104x4xf32>
    %86 = arith.select %84, %7, %85 : vector<104x4xi1>, vector<104x4xf32>
    %87 = arith.addf %82, %86 : vector<104x4xf32>
    %c2_i32_35 = arith.constant 2 : i32
    %88 = vector.broadcast %c2_i32_35 : i32 to vector<104x4xi32>
    %89 = arith.cmpi eq, %50, %88 : vector<104x4xi32>
    %cst_36 = arith.constant 0.000000e+00 : f32
    %90 = vector.broadcast %cst_36 : f32 to vector<104x4xf32>
    %91 = arith.select %89, %8, %90 : vector<104x4xi1>, vector<104x4xf32>
    %92 = arith.addf %87, %91 : vector<104x4xf32>
    %93 = arith.subf %78, %64 : vector<104x4xf32>
    %94 = arith.subf %92, %78 : vector<104x4xf32>
    %c1_i32_37 = arith.constant 1 : i32
    %95 = vector.broadcast %c1_i32_37 : i32 to vector<104x4xi32>
    %96 = arith.muli %17, %95 : vector<104x4xi32>
    %c3_i32 = arith.constant 3 : i32
    %97 = vector.broadcast %c3_i32 : i32 to vector<104x4xi32>
    %98 = arith.muli %26, %97 : vector<104x4xi32>
    %c9_i32 = arith.constant 9 : i32
    %99 = vector.broadcast %c9_i32 : i32 to vector<104x4xi32>
    %100 = arith.muli %35, %99 : vector<104x4xi32>
    %101 = arith.addi %96, %98 : vector<104x4xi32>
    %102 = arith.addi %101, %100 : vector<104x4xi32>
    %c13_i32 = arith.constant 13 : i32
    %103 = vector.broadcast %c13_i32 : i32 to vector<104x4xi32>
    %104 = arith.addi %102, %103 : vector<104x4xi32>
    %c1_i32_38 = arith.constant 1 : i32
    %105 = vector.broadcast %c1_i32_38 : i32 to vector<104x4xi32>
    %106 = arith.cmpi sge, %46, %105 : vector<104x4xi32>
    %c0_i32_39 = arith.constant 0 : i32
    %107 = vector.broadcast %c0_i32_39 : i32 to vector<104x4xi32>
    %108 = arith.select %106, %96, %107 : vector<104x4xi1>, vector<104x4xi32>
    %c1_i32_40 = arith.constant 1 : i32
    %109 = vector.broadcast %c1_i32_40 : i32 to vector<104x4xi32>
    %110 = arith.cmpi sge, %49, %109 : vector<104x4xi32>
    %c0_i32_41 = arith.constant 0 : i32
    %111 = vector.broadcast %c0_i32_41 : i32 to vector<104x4xi32>
    %112 = arith.select %110, %98, %111 : vector<104x4xi1>, vector<104x4xi32>
    %113 = arith.addi %108, %112 : vector<104x4xi32>
    %c1_i32_42 = arith.constant 1 : i32
    %114 = vector.broadcast %c1_i32_42 : i32 to vector<104x4xi32>
    %115 = arith.cmpi sge, %50, %114 : vector<104x4xi32>
    %c0_i32_43 = arith.constant 0 : i32
    %116 = vector.broadcast %c0_i32_43 : i32 to vector<104x4xi32>
    %117 = arith.select %115, %100, %116 : vector<104x4xi1>, vector<104x4xi32>
    %118 = arith.addi %113, %117 : vector<104x4xi32>
    %c13_i32_44 = arith.constant 13 : i32
    %119 = vector.broadcast %c13_i32_44 : i32 to vector<104x4xi32>
    %120 = arith.addi %118, %119 : vector<104x4xi32>
    %c2_i32_45 = arith.constant 2 : i32
    %121 = vector.broadcast %c2_i32_45 : i32 to vector<104x4xi32>
    %122 = arith.cmpi sge, %46, %121 : vector<104x4xi32>
    %c0_i32_46 = arith.constant 0 : i32
    %123 = vector.broadcast %c0_i32_46 : i32 to vector<104x4xi32>
    %124 = arith.select %122, %96, %123 : vector<104x4xi1>, vector<104x4xi32>
    %c2_i32_47 = arith.constant 2 : i32
    %125 = vector.broadcast %c2_i32_47 : i32 to vector<104x4xi32>
    %126 = arith.cmpi sge, %49, %125 : vector<104x4xi32>
    %c0_i32_48 = arith.constant 0 : i32
    %127 = vector.broadcast %c0_i32_48 : i32 to vector<104x4xi32>
    %128 = arith.select %126, %98, %127 : vector<104x4xi1>, vector<104x4xi32>
    %129 = arith.addi %124, %128 : vector<104x4xi32>
    %c2_i32_49 = arith.constant 2 : i32
    %130 = vector.broadcast %c2_i32_49 : i32 to vector<104x4xi32>
    %131 = arith.cmpi sge, %50, %130 : vector<104x4xi32>
    %c0_i32_50 = arith.constant 0 : i32
    %132 = vector.broadcast %c0_i32_50 : i32 to vector<104x4xi32>
    %133 = arith.select %131, %100, %132 : vector<104x4xi1>, vector<104x4xi32>
    %134 = arith.addi %129, %133 : vector<104x4xi32>
    %c13_i32_51 = arith.constant 13 : i32
    %135 = vector.broadcast %c13_i32_51 : i32 to vector<104x4xi32>
    %136 = arith.addi %134, %135 : vector<104x4xi32>
    %137 = tpu.iota {dimensions = array<i32: 1>} : vector<104x27xi32>
    %138 = vector.extract_strided_slice %104 {offsets = [0, 0], sizes = [104, 1], strides = [1, 1]} : vector<104x4xi32> to vector<104x1xi32>
    %139 = vector.broadcast %138 : vector<104x1xi32> to vector<104x27xi32>
    %140 = arith.cmpi eq, %139, %137 : vector<104x27xi32>
    %141 = vector.extract_strided_slice %64 {offsets = [0, 0], sizes = [104, 1], strides = [1, 1]} : vector<104x4xf32> to vector<104x1xf32>
    %cst_52 = arith.constant 0.000000e+00 : f32
    %142 = vector.shape_cast %141 : vector<104x1xf32> to vector<104x1xf32>
    %143 = vector.broadcast %142 : vector<104x1xf32> to vector<104x27xf32>
    %144 = vector.broadcast %cst_52 : f32 to vector<104x27xf32>
    %145 = arith.select %140, %143, %144 : vector<104x27xi1>, vector<104x27xf32>
    %146 = vector.extract_strided_slice %120 {offsets = [0, 0], sizes = [104, 1], strides = [1, 1]} : vector<104x4xi32> to vector<104x1xi32>
    %147 = vector.broadcast %146 : vector<104x1xi32> to vector<104x27xi32>
    %148 = arith.cmpi eq, %147, %137 : vector<104x27xi32>
    %149 = vector.extract_strided_slice %93 {offsets = [0, 0], sizes = [104, 1], strides = [1, 1]} : vector<104x4xf32> to vector<104x1xf32>
    %cst_53 = arith.constant 0.000000e+00 : f32
    %150 = vector.shape_cast %149 : vector<104x1xf32> to vector<104x1xf32>
    %151 = vector.broadcast %150 : vector<104x1xf32> to vector<104x27xf32>
    %152 = vector.broadcast %cst_53 : f32 to vector<104x27xf32>
    %153 = arith.select %148, %151, %152 : vector<104x27xi1>, vector<104x27xf32>
    %154 = arith.addf %145, %153 : vector<104x27xf32>
    %155 = vector.extract_strided_slice %136 {offsets = [0, 0], sizes = [104, 1], strides = [1, 1]} : vector<104x4xi32> to vector<104x1xi32>
    %156 = vector.broadcast %155 : vector<104x1xi32> to vector<104x27xi32>
    %157 = arith.cmpi eq, %156, %137 : vector<104x27xi32>
    %158 = vector.extract_strided_slice %94 {offsets = [0, 0], sizes = [104, 1], strides = [1, 1]} : vector<104x4xf32> to vector<104x1xf32>
    %cst_54 = arith.constant 0.000000e+00 : f32
    %159 = vector.shape_cast %158 : vector<104x1xf32> to vector<104x1xf32>
    %160 = vector.broadcast %159 : vector<104x1xf32> to vector<104x27xf32>
    %161 = vector.broadcast %cst_54 : f32 to vector<104x27xf32>
    %162 = arith.select %157, %160, %161 : vector<104x27xi1>, vector<104x27xf32>
    %163 = arith.addf %154, %162 : vector<104x27xf32>
    %c0_55 = arith.constant 0 : index
    %c0_56 = arith.constant 0 : index
    %c0_57 = arith.constant 0 : index
    %164 = vector.load %arg2[%c0_55, %c0_56, %c0_57] : memref<4x27x8xf32, #tpu.memory_space<vmem>>, vector<1x27x8xf32>
    %165 = vector.shape_cast %164 : vector<1x27x8xf32> to vector<27x8xf32>
    %cst_58 = arith.constant dense<0.000000e+00> : vector<104x8xf32>
    %166 = tpu.matmul %163, %165, %cst_58 {dimension_numbers = #tpu.dot_dimension_numbers<[1], [0], [0], [1], [0, 0, 1, 1], [], []>, precision = #tpu.contract_precision<fp32>} : vector<104x27xf32>, vector<27x8xf32>, vector<104x8xf32> -> vector<104x8xf32>
    %167 = vector.extract_strided_slice %104 {offsets = [0, 1], sizes = [104, 1], strides = [1, 1]} : vector<104x4xi32> to vector<104x1xi32>
    %168 = vector.broadcast %167 : vector<104x1xi32> to vector<104x27xi32>
    %169 = arith.cmpi eq, %168, %137 : vector<104x27xi32>
    %170 = vector.extract_strided_slice %64 {offsets = [0, 1], sizes = [104, 1], strides = [1, 1]} : vector<104x4xf32> to vector<104x1xf32>
    %cst_59 = arith.constant 0.000000e+00 : f32
    %171 = vector.shape_cast %170 : vector<104x1xf32> to vector<104x1xf32>
    %172 = vector.broadcast %171 : vector<104x1xf32> to vector<104x27xf32>
    %173 = vector.broadcast %cst_59 : f32 to vector<104x27xf32>
    %174 = arith.select %169, %172, %173 : vector<104x27xi1>, vector<104x27xf32>
    %175 = vector.extract_strided_slice %120 {offsets = [0, 1], sizes = [104, 1], strides = [1, 1]} : vector<104x4xi32> to vector<104x1xi32>
    %176 = vector.broadcast %175 : vector<104x1xi32> to vector<104x27xi32>
    %177 = arith.cmpi eq, %176, %137 : vector<104x27xi32>
    %178 = vector.extract_strided_slice %93 {offsets = [0, 1], sizes = [104, 1], strides = [1, 1]} : vector<104x4xf32> to vector<104x1xf32>
    %cst_60 = arith.constant 0.000000e+00 : f32
    %179 = vector.shape_cast %178 : vector<104x1xf32> to vector<104x1xf32>
    %180 = vector.broadcast %179 : vector<104x1xf32> to vector<104x27xf32>
    %181 = vector.broadcast %cst_60 : f32 to vector<104x27xf32>
    %182 = arith.select %177, %180, %181 : vector<104x27xi1>, vector<104x27xf32>
    %183 = arith.addf %174, %182 : vector<104x27xf32>
    %184 = vector.extract_strided_slice %136 {offsets = [0, 1], sizes = [104, 1], strides = [1, 1]} : vector<104x4xi32> to vector<104x1xi32>
    %185 = vector.broadcast %184 : vector<104x1xi32> to vector<104x27xi32>
    %186 = arith.cmpi eq, %185, %137 : vector<104x27xi32>
    %187 = vector.extract_strided_slice %94 {offsets = [0, 1], sizes = [104, 1], strides = [1, 1]} : vector<104x4xf32> to vector<104x1xf32>
    %cst_61 = arith.constant 0.000000e+00 : f32
    %188 = vector.shape_cast %187 : vector<104x1xf32> to vector<104x1xf32>
    %189 = vector.broadcast %188 : vector<104x1xf32> to vector<104x27xf32>
    %190 = vector.broadcast %cst_61 : f32 to vector<104x27xf32>
    %191 = arith.select %186, %189, %190 : vector<104x27xi1>, vector<104x27xf32>
    %192 = arith.addf %183, %191 : vector<104x27xf32>
    %c1_62 = arith.constant 1 : index
    %c0_63 = arith.constant 0 : index
    %c0_64 = arith.constant 0 : index
    %193 = vector.load %arg2[%c1_62, %c0_63, %c0_64] : memref<4x27x8xf32, #tpu.memory_space<vmem>>, vector<1x27x8xf32>
    %194 = vector.shape_cast %193 : vector<1x27x8xf32> to vector<27x8xf32>
    %cst_65 = arith.constant dense<0.000000e+00> : vector<104x8xf32>
    %195 = tpu.matmul %192, %194, %cst_65 {dimension_numbers = #tpu.dot_dimension_numbers<[1], [0], [0], [1], [0, 0, 1, 1], [], []>, precision = #tpu.contract_precision<fp32>} : vector<104x27xf32>, vector<27x8xf32>, vector<104x8xf32> -> vector<104x8xf32>
    %196 = vector.extract_strided_slice %104 {offsets = [0, 2], sizes = [104, 1], strides = [1, 1]} : vector<104x4xi32> to vector<104x1xi32>
    %197 = vector.broadcast %196 : vector<104x1xi32> to vector<104x27xi32>
    %198 = arith.cmpi eq, %197, %137 : vector<104x27xi32>
    %199 = vector.extract_strided_slice %64 {offsets = [0, 2], sizes = [104, 1], strides = [1, 1]} : vector<104x4xf32> to vector<104x1xf32>
    %cst_66 = arith.constant 0.000000e+00 : f32
    %200 = vector.shape_cast %199 : vector<104x1xf32> to vector<104x1xf32>
    %201 = vector.broadcast %200 : vector<104x1xf32> to vector<104x27xf32>
    %202 = vector.broadcast %cst_66 : f32 to vector<104x27xf32>
    %203 = arith.select %198, %201, %202 : vector<104x27xi1>, vector<104x27xf32>
    %204 = vector.extract_strided_slice %120 {offsets = [0, 2], sizes = [104, 1], strides = [1, 1]} : vector<104x4xi32> to vector<104x1xi32>
    %205 = vector.broadcast %204 : vector<104x1xi32> to vector<104x27xi32>
    %206 = arith.cmpi eq, %205, %137 : vector<104x27xi32>
    %207 = vector.extract_strided_slice %93 {offsets = [0, 2], sizes = [104, 1], strides = [1, 1]} : vector<104x4xf32> to vector<104x1xf32>
    %cst_67 = arith.constant 0.000000e+00 : f32
    %208 = vector.shape_cast %207 : vector<104x1xf32> to vector<104x1xf32>
    %209 = vector.broadcast %208 : vector<104x1xf32> to vector<104x27xf32>
    %210 = vector.broadcast %cst_67 : f32 to vector<104x27xf32>
    %211 = arith.select %206, %209, %210 : vector<104x27xi1>, vector<104x27xf32>
    %212 = arith.addf %203, %211 : vector<104x27xf32>
    %213 = vector.extract_strided_slice %136 {offsets = [0, 2], sizes = [104, 1], strides = [1, 1]} : vector<104x4xi32> to vector<104x1xi32>
    %214 = vector.broadcast %213 : vector<104x1xi32> to vector<104x27xi32>
    %215 = arith.cmpi eq, %214, %137 : vector<104x27xi32>
    %216 = vector.extract_strided_slice %94 {offsets = [0, 2], sizes = [104, 1], strides = [1, 1]} : vector<104x4xf32> to vector<104x1xf32>
    %cst_68 = arith.constant 0.000000e+00 : f32
    %217 = vector.shape_cast %216 : vector<104x1xf32> to vector<104x1xf32>
    %218 = vector.broadcast %217 : vector<104x1xf32> to vector<104x27xf32>
    %219 = vector.broadcast %cst_68 : f32 to vector<104x27xf32>
    %220 = arith.select %215, %218, %219 : vector<104x27xi1>, vector<104x27xf32>
    %221 = arith.addf %212, %220 : vector<104x27xf32>
    %c2_69 = arith.constant 2 : index
    %c0_70 = arith.constant 0 : index
    %c0_71 = arith.constant 0 : index
    %222 = vector.load %arg2[%c2_69, %c0_70, %c0_71] : memref<4x27x8xf32, #tpu.memory_space<vmem>>, vector<1x27x8xf32>
    %223 = vector.shape_cast %222 : vector<1x27x8xf32> to vector<27x8xf32>
    %cst_72 = arith.constant dense<0.000000e+00> : vector<104x8xf32>
    %224 = tpu.matmul %221, %223, %cst_72 {dimension_numbers = #tpu.dot_dimension_numbers<[1], [0], [0], [1], [0, 0, 1, 1], [], []>, precision = #tpu.contract_precision<fp32>} : vector<104x27xf32>, vector<27x8xf32>, vector<104x8xf32> -> vector<104x8xf32>
    %225 = vector.extract_strided_slice %104 {offsets = [0, 3], sizes = [104, 1], strides = [1, 1]} : vector<104x4xi32> to vector<104x1xi32>
    %226 = vector.broadcast %225 : vector<104x1xi32> to vector<104x27xi32>
    %227 = arith.cmpi eq, %226, %137 : vector<104x27xi32>
    %228 = vector.extract_strided_slice %64 {offsets = [0, 3], sizes = [104, 1], strides = [1, 1]} : vector<104x4xf32> to vector<104x1xf32>
    %cst_73 = arith.constant 0.000000e+00 : f32
    %229 = vector.shape_cast %228 : vector<104x1xf32> to vector<104x1xf32>
    %230 = vector.broadcast %229 : vector<104x1xf32> to vector<104x27xf32>
    %231 = vector.broadcast %cst_73 : f32 to vector<104x27xf32>
    %232 = arith.select %227, %230, %231 : vector<104x27xi1>, vector<104x27xf32>
    %233 = vector.extract_strided_slice %120 {offsets = [0, 3], sizes = [104, 1], strides = [1, 1]} : vector<104x4xi32> to vector<104x1xi32>
    %234 = vector.broadcast %233 : vector<104x1xi32> to vector<104x27xi32>
    %235 = arith.cmpi eq, %234, %137 : vector<104x27xi32>
    %236 = vector.extract_strided_slice %93 {offsets = [0, 3], sizes = [104, 1], strides = [1, 1]} : vector<104x4xf32> to vector<104x1xf32>
    %cst_74 = arith.constant 0.000000e+00 : f32
    %237 = vector.shape_cast %236 : vector<104x1xf32> to vector<104x1xf32>
    %238 = vector.broadcast %237 : vector<104x1xf32> to vector<104x27xf32>
    %239 = vector.broadcast %cst_74 : f32 to vector<104x27xf32>
    %240 = arith.select %235, %238, %239 : vector<104x27xi1>, vector<104x27xf32>
    %241 = arith.addf %232, %240 : vector<104x27xf32>
    %242 = vector.extract_strided_slice %136 {offsets = [0, 3], sizes = [104, 1], strides = [1, 1]} : vector<104x4xi32> to vector<104x1xi32>
    %243 = vector.broadcast %242 : vector<104x1xi32> to vector<104x27xi32>
    %244 = arith.cmpi eq, %243, %137 : vector<104x27xi32>
    %245 = vector.extract_strided_slice %94 {offsets = [0, 3], sizes = [104, 1], strides = [1, 1]} : vector<104x4xf32> to vector<104x1xf32>
    %cst_75 = arith.constant 0.000000e+00 : f32
    %246 = vector.shape_cast %245 : vector<104x1xf32> to vector<104x1xf32>
    %247 = vector.broadcast %246 : vector<104x1xf32> to vector<104x27xf32>
    %248 = vector.broadcast %cst_75 : f32 to vector<104x27xf32>
    %249 = arith.select %244, %247, %248 : vector<104x27xi1>, vector<104x27xf32>
    %250 = arith.addf %241, %249 : vector<104x27xf32>
    %c3 = arith.constant 3 : index
    %c0_76 = arith.constant 0 : index
    %c0_77 = arith.constant 0 : index
    %251 = vector.load %arg2[%c3, %c0_76, %c0_77] : memref<4x27x8xf32, #tpu.memory_space<vmem>>, vector<1x27x8xf32>
    %252 = vector.shape_cast %251 : vector<1x27x8xf32> to vector<27x8xf32>
    %cst_78 = arith.constant dense<0.000000e+00> : vector<104x8xf32>
    %253 = tpu.matmul %250, %252, %cst_78 {dimension_numbers = #tpu.dot_dimension_numbers<[1], [0], [0], [1], [0, 0, 1, 1], [], []>, precision = #tpu.contract_precision<fp32>} : vector<104x27xf32>, vector<27x8xf32>, vector<104x8xf32> -> vector<104x8xf32>
    %254 = tpu.concatenate %166, %195, %224, %253 in 1 : vector<104x8xf32>, vector<104x8xf32>, vector<104x8xf32>, vector<104x8xf32> -> vector<104x32xf32>
    %cst_79 = arith.constant 2.000000e+00 : f32
    %255 = vector.broadcast %cst_79 : f32 to vector<104x32xf32>
    %256 = arith.mulf %254, %255 : vector<104x32xf32>
    %c0_80 = arith.constant 0 : index
    %c0_81 = arith.constant 0 : index
    %257 = vector.load %arg3[%c0_80, %c0_81] : memref<104x32xf32, #tpu.memory_space<vmem>>, vector<104x32xf32>
    tpu.vector_store %arg3[%c0_80, %c0_81], %256 {strides = array<i32>} : memref<104x32xf32, #tpu.memory_space<vmem>>, vector<104x32xf32>,
    return
  }
  func.func @transform_0(%arg0: i32) -> (i32, i32, i32) {
    %c0_i32 = arith.constant 0 : i32
    %c0_i32_0 = arith.constant 0 : i32
    %c0_i32_1 = arith.constant 0 : i32
    return %c0_i32, %arg0, %c0_i32_0 : i32, i32, i32
  }
  func.func @transform_1(%arg0: i32) -> (i32, i32, i32) {
    %c0_i32 = arith.constant 0 : i32
    %c0_i32_0 = arith.constant 0 : i32
    %c0_i32_1 = arith.constant 0 : i32
    %c0_i32_2 = arith.constant 0 : i32
    return %c0_i32, %c0_i32_0, %c0_i32_1 : i32, i32, i32
  }
  func.func @transform_2(%arg0: i32) -> (i32, i32) {
    %c0_i32 = arith.constant 0 : i32
    %c0_i32_0 = arith.constant 0 : i32
    return %arg0, %c0_i32 : i32, i32
  }
}

</mosaic_0001>

<bundles_post_ra>
// kernel: tpu_custom_call.1
= control target key start
LH: loop header
LB: loop body
LE: loop exit
PB: predicated region body
PF: predicated region fallthrough
CT: control target
= control target key end

     0   :  { %7 = vsyncpa [#allocation3], 0  ;;  %s13588_s0 = inlined_call_operand.hbm [shape: f32[3,104,4], index: 0, kind: input, shape index: {}]   ;;  %s13589_s1 = inlined_call_operand.hbm [shape: f32[4,27,8], index: 1, kind: input, shape index: {}]   ;;  %s13590_s2 = inlined_call_operand.hbm [shape: f32[104,32], index: 2, kind: output, shape index: {}]  }
   0x1   :  { %8 = vsyncpa [#allocation6], 0 }
   0x2   :  { %9 = vsyncpa [#allocation4], 0  ;;  %s9405_s9 = smov [#allocation2]   ;;  %s9333_s13 = scalar_lea.hbm %s13588_s0, 4992 }
   0x3   :  { %s15_s10 = sshll.u32 %s9405_s9, 4  ;;  %p9334_p0 = scmp.ne.s32.totalorder %s13588_s0, %s9333_s13  ;;  %s16_s10 = int_to_ptr.vmem [resolvable:$true] %s15_s10 }
   0x4   :  { %p9337_p1 = scmp.lt.u32.totalorder %s9333_s13, %s13588_s0 }
   0x6   :  { %p9339_p2 = pnand %p9337_p1, %p9334_p0 }
   0x8   :  { %9342 = shalt.err (!%p9339_p2)
}
   0x9   :  { %s9343_s18 = scalar_lea.vmem %s16_s10, 4992  ;;  %p9348_p4 = scmp.lt.s32.totalorder %s16_s10, %s16_s10 }
   0xa   :  { %p9344_p3 = scmp.ne.s32.totalorder %s16_s10, %s9343_s18  ;;  %p9349_p5 = scmp.lt.s32.totalorder %s9343_s18, %s9343_s18 }
   0xc   :  { %p9350_p6 = por %p9349_p5, %p9348_p4 }
   0xe   :  { %p9351_p7 = pnand %p9350_p6, %p9344_p3 }
  0x10   :  { %9354 = shalt.err (!%p9351_p7)
}
  0x11   :  { %s9406_s19 = smov 128   ;;  %s9407_s20 = smov 8  }
  0x12   :  { %21 = dma.hbm_to_vmem [thread:$0]  %s13588_s0, 4992, %s16_s10, [#allocation3], %s9406_s19, %s9406_s19, %s9407_s20  }
  0x13   :  { %s9408_s23 = smov [#allocation5]   ;;  %s9355_s27 = scalar_lea.hbm %s13589_s1, 2048 }
  0x14   :  { %s27_s24 = sshll.u32 %s9408_s23, 4  ;;  %p9356_p8 = scmp.ne.s32.totalorder %s13589_s1, %s9355_s27  ;;  %s28_s24 = int_to_ptr.vmem [resolvable:$true] %s27_s24 }
  0x15   :  { %p9359_p9 = scmp.lt.u32.totalorder %s9355_s27, %s13589_s1 }
  0x17   :  { %p9361_p10 = pnand %p9359_p9, %p9356_p8 }
  0x19   :  { %9364 = shalt.err (!%p9361_p10)
}
  0x1a   :  { %s9365_s4 = scalar_lea.vmem %s28_s24, 2048  ;;  %p9370_p12 = scmp.lt.s32.totalorder %s28_s24, %s28_s24 }
  0x1b   :  { %p9366_p11 = scmp.ne.s32.totalorder %s28_s24, %s9365_s4  ;;  %p9371_p13 = scmp.lt.s32.totalorder %s9365_s4, %s9365_s4 }
  0x1d   :  { %p9372_p0 = por %p9371_p13, %p9370_p12 }
  0x1f   :  { %p9373_p1 = pnand %p9372_p0, %p9366_p11 }
  0x21   :  { %9376 = shalt.err (!%p9373_p1)
}
  0x22   :  { %33 = dma.hbm_to_vmem [thread:$0]  %s13589_s1, 2048, %s28_s24, [#allocation6], %s9406_s19, %s9406_s19, %s9407_s20  }
  0x23   :  { %9399 = dma.done.wait [#allocation3], 4992  }
  0x24   :  { %9400 = vsyncadd [#allocation3], 4294962304 }
  0x25   :  { %9401 = dma.done.wait [#allocation6], 2048  }
  0x26   :  { %9402 = vsyncadd [#allocation6], 4294965248  ;;  %v9409_v0 = vmov 0   ;;  %v42_v1 = vld [vmem:[#allocation2 + $0x10] sm:$0xff]  ;;  %v56_v2 = vld [vmem:[#allocation2 + $0x78] sm:$0xff]  ;;  %s9416_s1 = smov 16  }
  0x27   :  { %9269 = vset.pattern.permute.xlu1 %v9409_v0  ;;  %9268 = vset.pattern.permute.xlu0 %v9409_v0  ;;  %v70_v3 = vld [vmem:[#allocation2 + $0xe0] sm:$0xff]  ;;  %vm122_vm0 = vcmp.gt.f32.partialorder %v42_v1, 0.0  ;;  %vm135_vm1 = vcmp.lt.f32.partialorder %v42_v1, 0.0  ;;  %vm174_vm2 = vcmp.gt.f32.partialorder %v56_v2, 0.0  ;;  %vm187_vm3 = vcmp.lt.f32.partialorder %v56_v2, 0.0  ;;  %v9470_v7 = vld [vmem:[#allocation2 + $0x68] sm:$0xff] }
  0x28   :  { %v148_v4 = vsel %vm135_vm1, 4294967295, %v9409_v0  ;;  %vm226_vm4 = vcmp.gt.f32.partialorder %v70_v3, 0.0  ;;  %v9467_v5 = vld [vmem:[#allocation2] sm:$0xff]  ;;  %v200_v6 = vsel %vm187_vm3, 4294967295, %v9409_v0  ;;  %vm239_vm5 = vcmp.lt.f32.partialorder %v70_v3, 0.0  ;;  %v9475_v11 = vld [vmem:[#allocation2 + $0xd0] sm:$0xff] }
  0x29   :  { %v9472_v8 = vsel %vm122_vm0, 1, %v148_v4  ;;  %v213_v9 = vsel %vm174_vm2, 1, %v200_v6  ;;  %v252_v10 = vsel %vm239_vm5, 4294967295, %v9409_v0  ;;  %vm120_vm6 = vcmp.gt.f32.partialorder %v9467_v5, 0.0  ;;  %v9493_v20 = vld [vmem:[#allocation2 + $0x18] sm:$0xff]  ;;  %v9499_v24 = vld [vmem:[#allocation2 + $0x80] sm:$0xff] }
  0x2a   :  { %14127 = vst [vmem:[#allocation11_spill] sm:$0xff] %v9472_v8  ;;  %v265_v12 = vsel %vm226_vm4, 1, %v252_v10  ;;  %v9477_v13 = vmul.u32 3, %v213_v9  ;;  %vm133_vm7 = vcmp.lt.f32.partialorder %v9467_v5, 0.0  ;;  %vm172_vm8 = vcmp.gt.f32.partialorder %v9470_v7, 0.0  ;;  %v9501_v25 = vld [vmem:[#allocation2 + $0xe8] sm:$0xff] }
  0x2b   :  { %v9480_v14 = vmul.u32 9, %v265_v12  ;;  %vm185_vm9 = vcmp.lt.f32.partialorder %v9470_v7, 0.0  ;;  %v146_v16 = vsel %vm133_vm7, 4294967295, %v9409_v0  ;;  %vm224_vm10 = vcmp.gt.f32.partialorder %v9475_v11, 0.0  ;;  %v41_v33 = vld [vmem:[#allocation2 + $0x8] sm:$0xff]  ;;  %v9522_v37 = vld [vmem:[#allocation2 + $0x70] sm:$0xff] }
  0x2c   :  { %14128 = vst [vmem:[#allocation12_spill] sm:$0xff] %v9477_v13  ;;  %v798_v15 = vadd.s32 %v9477_v13, %v9472_v8  ;;  %v198_v17 = vsel %vm185_vm9, 4294967295, %v9409_v0  ;;  %v9490_v18 = vsel %vm120_vm6, 1, %v146_v16  ;;  %vm237_vm11 = vcmp.lt.f32.partialorder %v9475_v11, 0.0  ;;  %v69_v42 = vld [vmem:[#allocation2 + $0xd8] sm:$0xff]  ;;  %v45_v53 = vld [vmem:[#allocation2 + $0x28] sm:$0xff] }
  0x2d   :  { %14129 = vst [vmem:[#allocation13_spill] sm:$0xff] %v9480_v14  ;;  %14130 = vst [vmem:[#allocation14_spill] sm:$0xff] %v9490_v18  ;;  %v211_v19 = vsel %vm172_vm8, 1, %v198_v17  ;;  %v250_v22 = vsel %vm237_vm11, 4294967295, %v9409_v0  ;;  %vm123_vm12 = vcmp.gt.f32.partialorder %v9493_v20, 0.0  ;;  %vm136_vm13 = vcmp.lt.f32.partialorder %v9493_v20, 0.0 }
  0x2e   :  { %v811_v21 = vadd.s32 %v798_v15, %v9480_v14  ;;  %v9497_v23 = vmul.u32 3, %v211_v19  ;;  %v263_v26 = vsel %vm224_vm10, 1, %v250_v22  ;;  %vm175_vm14 = vcmp.gt.f32.partialorder %v9499_v24, 0.0  ;;  %v59_v54 = vld [vmem:[#allocation2 + $0x90] sm:$0xff]  ;;  %v73_v58 = vld [vmem:[#allocation2 + $0xf8] sm:$0xff]  ;;  %v44_v6 = vld [vmem:[#allocation2 + $0x20] sm:$0xff] }
  0x2f   :  { %v9505_v28 = vmul.u32 9, %v263_v26  ;;  %vm188_vm15 = vcmp.lt.f32.partialorder %v9499_v24, 0.0  ;;  %vm227_vm0 = vcmp.gt.f32.partialorder %v9501_v25, 0.0  ;;  %v149_v31 = vsel %vm136_vm13, 4294967295, %v9409_v0  ;;  %v72_v15 = vld [vmem:[#allocation2 + $0xf0] sm:$0xff]  ;;  %s9417_s6 = smov 24  }
  0x30   :  { %14131 = vst [vmem:[#allocation15_spill] sm:$0xff] %v9497_v23  ;;  %v9503_v27 = vadd.s32 13, %v811_v21  ;;  %v796_v29 = vadd.s32 %v9497_v23, %v9490_v18  ;;  %v201_v32 = vsel %vm188_vm15, 4294967295, %v9409_v0  ;;  %vm240_vm1 = vcmp.lt.f32.partialorder %v9501_v25, 0.0  ;;  %s9418_s7 = smov [#allocation7]  }
  0x31   :  { %14133 = vst [vmem:[#allocation17_spill] sm:$0xff] %v9505_v28  ;;  %v9519_v34 = vsel %vm123_vm12, 1, %v149_v31  ;;  %v214_v35 = vsel %vm175_vm14, 1, %v201_v32  ;;  %v253_v36 = vsel %vm240_vm1, 4294967295, %v9409_v0  ;;  %v9524_v38 = vand.u32 2147483647, %v56_v2 }
  0x32   :  { %14132 = vst [vmem:[#allocation16_spill] sm:$0xff] %v9503_v27  ;;  %1078 = vperm.xlu1 %9269, %v9503_v27   ;;  %v809_v30 = vadd.s32 %v796_v29, %v9505_v28  ;;  %14134 = vst [vmem:[#allocation18_spill] sm:$0xff] %v9519_v34  ;;  %v266_v40 = vsel %vm227_vm0, 1, %v253_v36  ;;  %v9528_v41 = vmul.u32 3, %v214_v35  ;;  %v9530_v43 = vand.u32 2147483647, %v70_v3 }
  0x33   :  { %14135 = vst [vmem:[#allocation19_spill] sm:$0xff] %v9524_v38  ;;  %v9532_v44 = vand.u32 2147483647, %v42_v1  ;;  %v9534_v45 = vmul.u32 9, %v266_v40  ;;  %vm121_vm2 = vcmp.gt.f32.partialorder %v41_v33, 0.0  ;;  %vm134_vm3 = vcmp.lt.f32.partialorder %v41_v33, 0.0 }
  0x34   :  { %v9526_v39 = vadd.s32 13, %v809_v30  ;;  %14137 = vst [vmem:[#allocation21_spill] sm:$0xff] %v9528_v41  ;;  %14138 = vst [vmem:[#allocation22_spill] sm:$0xff] %v9530_v43  ;;  %v799_v46 = vadd.s32 %v9528_v41, %v9519_v34  ;;  %vm173_vm4 = vcmp.gt.f32.partialorder %v9522_v37, 0.0  ;;  %vm186_vm5 = vcmp.lt.f32.partialorder %v9522_v37, 0.0  ;;  %v61_v36 = vld [vmem:[#allocation2 + $0xa0] sm:$0xff] }
  0x35   :  { %14139 = vst [vmem:[#allocation23_spill] sm:$0xff] %v9532_v44  ;;  %14140 = vst [vmem:[#allocation24_spill] sm:$0xff] %v9534_v45  ;;  %v147_v47 = vsel %vm134_vm3, 4294967295, %v9409_v0  ;;  %v199_v48 = vsel %vm186_vm5, 4294967295, %v9409_v0  ;;  %vm225_vm6 = vcmp.gt.f32.partialorder %v69_v42, 0.0  ;;  %vm238_vm7 = vcmp.lt.f32.partialorder %v69_v42, 0.0 }
  0x36   :  { %14136 = vst [vmem:[#allocation20_spill] sm:$0xff] %v9526_v39  ;;  %1072 = vperm.xlu0 %9268, %v9526_v39   ;;  %v812_v49 = vadd.s32 %v799_v46, %v9534_v45  ;;  %v9544_v50 = vsel %vm121_vm2, 1, %v147_v47  ;;  %v212_v51 = vsel %vm173_vm4, 1, %v199_v48  ;;  %v251_v52 = vsel %vm238_vm7, 4294967295, %v9409_v0  ;;  %v75_v40 = vld [vmem:[#allocation2 + $0x108] sm:$0xff]  ;;  %s7041_s8 = sshll.u32 %s9418_s7, 4  ;;  %s7042_s8 = int_to_ptr.vmem [resolvable:$true] %s7041_s8 }
  0x37   :  { %14141 = vst [vmem:[#allocation25_spill] sm:$0xff] %v9544_v50  ;;  %v9548_v55 = vand.u32 2147483647, %v9470_v7  ;;  %v264_v56 = vsel %vm225_vm6, 1, %v251_v52  ;;  %v9550_v57 = vmul.u32 3, %v212_v51  ;;  %vm125_vm8 = vcmp.gt.f32.partialorder %v45_v53, 0.0  ;;  %p9382_p3 = scmp.lt.s32.totalorder %s7042_s8, %s7042_s8 }
  0x38   :  { %v9553_v59 = vand.u32 2147483647, %v9475_v11  ;;  %v9556_v60 = vand.u32 2147483647, %v9467_v5  ;;  %v9558_v61 = vadd.s32 13, %v812_v49  ;;  %v9560_v62 = vmul.u32 9, %v264_v56 }
  0x39   :  { %14142 = vst [vmem:[#allocation26_spill] sm:$0xff] %v9548_v55  ;;  %14143 = vst [vmem:[#allocation27_spill] sm:$0xff] %v9550_v57  ;;  %v797_v63 = vadd.s32 %v9550_v57, %v9544_v50  ;;  %vm138_vm9 = vcmp.lt.f32.partialorder %v45_v53, 0.0  ;;  %vm177_vm10 = vcmp.gt.f32.partialorder %v59_v54, 0.0  ;;  %vm190_vm11 = vcmp.lt.f32.partialorder %v59_v54, 0.0  ;;  %v58_v7 = vld [vmem:[#allocation2 + $0x88] sm:$0xff] }
  0x3a   :  { %14144 = vst [vmem:[#allocation28_spill] sm:$0xff] %v9553_v59  ;;  %14145 = vst [vmem:[#allocation29_spill] sm:$0xff] %v9556_v60  ;;  %1081 = vperm.xlu1 %9269, %v9558_v61   ;;  %v151_v1 = vsel %vm138_vm9, 4294967295, %v9409_v0  ;;  %vm229_vm12 = vcmp.gt.f32.partialorder %v73_v58, 0.0  ;;  %vm242_vm13 = vcmp.lt.f32.partialorder %v73_v58, 0.0  ;;  %v203_v4 = vsel %vm190_vm11, 4294967295, %v9409_v0 }
  0x3b   :  { %14146 = vst [vmem:[#allocation30_spill] sm:$0xff] %v9558_v61  ;;  %14147 = vst [vmem:[#allocation31_spill] sm:$0xff] %v9560_v62  ;;  %v9567_v2 = vand.u32 2147483647, %v9493_v20  ;;  %v810_v3 = vadd.s32 %v797_v63, %v9560_v62  ;;  %v255_v5 = vsel %vm242_vm13, 4294967295, %v9409_v0  ;;  %v9575_v10 = vsel %vm125_vm8, 1, %v151_v1 }
  0x3c   :  { %v9573_v9 = vand.u32 2147483647, %v9499_v24  ;;  %14150 = vst [vmem:[#allocation34_spill] sm:$0xff] %v9575_v10  ;;  %v216_v11 = vsel %vm177_vm10, 1, %v203_v4  ;;  %v268_v12 = vsel %vm229_vm12, 1, %v255_v5  ;;  %vm124_vm14 = vcmp.gt.f32.partialorder %v44_v6, 0.0 }
  0x3d   :  { %14148 = vst [vmem:[#allocation32_spill] sm:$0xff] %v9567_v2  ;;  %v9578_v16 = vand.u32 2147483647, %v9501_v25  ;;  %v9580_v17 = vadd.s32 13, %v810_v3  ;;  %v9582_v19 = vmul.u32 3, %v216_v11  ;;  %v9584_v20 = vmul.u32 9, %v268_v12 }
  0x3e   :  { %14149 = vst [vmem:[#allocation33_spill] sm:$0xff] %v9573_v9  ;;  %v9586_v21 = vand.u32 2147483647, %v41_v33  ;;  %vm137_vm15 = vcmp.lt.f32.partialorder %v44_v6, 0.0  ;;  %vm176_vm0 = vcmp.gt.f32.partialorder %v58_v7, 0.0  ;;  %vm189_vm1 = vcmp.lt.f32.partialorder %v58_v7, 0.0 }
  0x3f   :  { %14151 = vst [vmem:[#allocation35_spill] sm:$0xff] %v9578_v16  ;;  %14152 = vst [vmem:[#allocation36_spill] sm:$0xff] %v9580_v17  ;;  %1075 = vperm.xlu0 %9268, %v9580_v17   ;;  %v801_v22 = vadd.s32 %v9582_v19, %v9575_v10  ;;  %v150_v24 = vsel %vm137_vm15, 4294967295, %v9409_v0  ;;  %vm228_vm2 = vcmp.gt.f32.partialorder %v72_v15, 0.0  ;;  %v47_v25 = vld [vmem:[#allocation2 + $0x38] sm:$0xff]  ;;  %v202_v30 = vsel %vm189_vm1, 4294967295, %v9409_v0 }
  0x40   :  { %14153 = vst [vmem:[#allocation37_spill] sm:$0xff] %v9582_v19  ;;  %14154 = vst [vmem:[#allocation38_spill] sm:$0xff] %v9584_v20  ;;  %v9593_v26 = vand.u32 2147483647, %v9522_v37  ;;  %v9595_v29 = vand.u32 2147483647, %v69_v42 }
  0x41   :  { %14155 = vst [vmem:[#allocation39_spill] sm:$0xff] %v9586_v21  ;;  %vm241_vm3 = vcmp.lt.f32.partialorder %v72_v15, 0.0  ;;  %v814_v31 = vadd.s32 %v801_v22, %v9584_v20  ;;  %v9599_v32 = vsel %vm124_vm14, 1, %v150_v24  ;;  %v215_v33 = vsel %vm176_vm0, 1, %v202_v30  ;;  %v46_v56 = vld [vmem:[#allocation2 + $0x30] sm:$0xff]  ;;  %v60_v5 = vld [vmem:[#allocation2 + $0x98] sm:$0xff] }
  0x42   :  { %14156 = vst [vmem:[#allocation40_spill] sm:$0xff] %v9593_v26  ;;  %14157 = vst [vmem:[#allocation41_spill] sm:$0xff] %v9595_v29  ;;  %v254_v35 = vsel %vm241_vm3, 4294967295, %v9409_v0  ;;  %v9602_v46 = vand.u32 2147483647, %v45_v53  ;;  %v9606_v48 = vmul.u32 3, %v215_v33 }
  0x43   :  { %14158 = vst [vmem:[#allocation42_spill] sm:$0xff] %v9599_v32  ;;  %v9604_v47 = vand.u32 2147483647, %v59_v54  ;;  %v267_v37 = vsel %vm228_vm2, 1, %v254_v35  ;;  %v9608_v42 = vadd.s32 13, %v814_v31  ;;  %vm127_vm4 = vcmp.gt.f32.partialorder %v47_v25, 0.0 }
  0x44   :  { %14159 = vst [vmem:[#allocation43_spill] sm:$0xff] %v9602_v46  ;;  %14161 = vst [vmem:[#allocation45_spill] sm:$0xff] %v9606_v48  ;;  %v9610_v49 = vmul.u32 9, %v267_v37  ;;  %vm140_vm5 = vcmp.lt.f32.partialorder %v47_v25, 0.0  ;;  %v800_v51 = vadd.s32 %v9606_v48, %v9599_v32  ;;  %vm179_vm6 = vcmp.gt.f32.partialorder %v61_v36, 0.0  ;;  %v74_v11 = vld [vmem:[#allocation2 + $0x100] sm:$0xff] }
  0x45   :  { %14160 = vst [vmem:[#allocation44_spill] sm:$0xff] %v9604_v47  ;;  %14162 = vst [vmem:[#allocation46_spill] sm:$0xff] %v9608_v42  ;;  %v153_v52 = vsel %vm140_vm5, 4294967295, %v9409_v0  ;;  %vm192_vm7 = vcmp.lt.f32.partialorder %v61_v36, 0.0  ;;  %v9615_v53 = vand.u32 2147483647, %v73_v58  ;;  %1087 = vperm.xlu1 %9269, %v9608_v42  }
  0x46   :  { %14163 = vst [vmem:[#allocation47_spill] sm:$0xff] %v9610_v49  ;;  %v205_v54 = vsel %vm192_vm7, 4294967295, %v9409_v0  ;;  %vm231_vm8 = vcmp.gt.f32.partialorder %v75_v40, 0.0  ;;  %vm244_vm9 = vcmp.lt.f32.partialorder %v75_v40, 0.0  ;;  %v813_v63 = vadd.s32 %v800_v51, %v9610_v49  ;;  %s9377_s9 = scalar_lea.vmem %s7042_s8, 1664 }
  0x47   :  { %14164 = vst [vmem:[#allocation48_spill] sm:$0xff] %v9615_v53  ;;  %v9620_v1 = vsel %vm127_vm4, 1, %v153_v52  ;;  %v218_v3 = vsel %vm179_vm6, 1, %v205_v54  ;;  %v257_v4 = vsel %vm244_vm9, 4294967295, %v9409_v0  ;;  %v9623_v12 = vand.u32 2147483647, %v44_v6  ;;  %p9378_p2 = scmp.ne.s32.totalorder %s7042_s8, %s9377_s9  ;;  %p9383_p4 = scmp.lt.s32.totalorder %s9377_s9, %s9377_s9 }
  0x48   :  { %14165 = vst [vmem:[#allocation49_spill] sm:$0xff] %v9620_v1  ;;  %v9625_v58 = vand.u32 2147483647, %v58_v7  ;;  %v270_v22 = vsel %vm231_vm8, 1, %v257_v4  ;;  %v9627_v24 = vmul.u32 3, %v218_v3  ;;  %v9631_v31 = vadd.s32 13, %v813_v63 }
  0x49   :  { %14166 = vst [vmem:[#allocation50_spill] sm:$0xff] %v9623_v12  ;;  %v9629_v30 = vand.u32 2147483647, %v72_v15  ;;  %v9633_v33 = vmul.u32 9, %v270_v22  ;;  %vm126_vm10 = vcmp.gt.f32.partialorder %v46_v56, 0.0  ;;  %vm139_vm11 = vcmp.lt.f32.partialorder %v46_v56, 0.0  ;;  %p9384_p5 = por %p9383_p4, %p9382_p3 }
  0x4a   :  { %14167 = vst [vmem:[#allocation51_spill] sm:$0xff] %v9625_v58  ;;  %14168 = vst [vmem:[#allocation52_spill] sm:$0xff] %v9627_v24  ;;  %v803_v35 = vadd.s32 %v9627_v24, %v9620_v1  ;;  %vm178_vm12 = vcmp.gt.f32.partialorder %v60_v5, 0.0  ;;  %vm191_vm13 = vcmp.lt.f32.partialorder %v60_v5, 0.0  ;;  %1084 = vperm.xlu0 %9268, %v9631_v31   ;;  %v152_v6 = vsel %vm139_vm11, 4294967295, %v9409_v0  ;;  %v49_v54 = vld [vmem:[#allocation2 + $0x48] sm:$0xff] }
  0x4b   :  { %14169 = vst [vmem:[#allocation53_spill] sm:$0xff] %v9629_v30  ;;  %14170 = vst [vmem:[#allocation54_spill] sm:$0xff] %v9631_v31  ;;  %v204_v7 = vsel %vm191_vm13, 4294967295, %v9409_v0  ;;  %vm230_vm14 = vcmp.gt.f32.partialorder %v74_v11, 0.0  ;;  %vm243_vm15 = vcmp.lt.f32.partialorder %v74_v11, 0.0  ;;  %v9641_v37 = vsel %vm126_vm10, 1, %v152_v6  ;;  %p9385_p6 = pnand %p9384_p5, %p9378_p2 }
  0x4c   :  { %14171 = vst [vmem:[#allocation55_spill] sm:$0xff] %v9633_v33  ;;  %v816_v15 = vadd.s32 %v803_v35, %v9633_v33  ;;  %14172 = vst [vmem:[#allocation56_spill] sm:$0xff] %v9641_v37  ;;  %v217_v51 = vsel %vm178_vm12, 1, %v204_v7  ;;  %v256_v52 = vsel %vm243_vm15, 4294967295, %v9409_v0  ;;  %v63_v63 = vld [vmem:[#allocation2 + $0xb0] sm:$0xff]  ;;  %v77_v3 = vld [vmem:[#allocation2 + $0x118] sm:$0xff] }
  0x4d   :  { %v9644_v4 = vand.u32 2147483647, %v47_v25  ;;  %v9646_v22 = vand.u32 2147483647, %v61_v36  ;;  %v269_v31 = vsel %vm230_vm14, 1, %v256_v52  ;;  %v9648_v42 = vmul.u32 3, %v217_v51 }
  0x4e   :  { %v9650_v27 = vand.u32 2147483647, %v75_v40  ;;  %v9652_v61 = vadd.s32 13, %v816_v15  ;;  %v9654_v35 = vand.u32 2147483647, %v46_v56  ;;  %v9656_v6 = vmul.u32 9, %v269_v31 }
  0x4f   :  { %14173 = vst [vmem:[#allocation57_spill] sm:$0xff] %v9644_v4  ;;  %14174 = vst [vmem:[#allocation58_spill] sm:$0xff] %v9646_v22  ;;  %v802_v7 = vadd.s32 %v9648_v42, %v9641_v37  ;;  %vm129_vm0 = vcmp.gt.f32.partialorder %v49_v54, 0.0  ;;  %vm142_vm1 = vcmp.lt.f32.partialorder %v49_v54, 0.0  ;;  %vm181_vm2 = vcmp.gt.f32.partialorder %v63_v63, 0.0  ;;  %v48_v15 = vld [vmem:[#allocation2 + $0x40] sm:$0xff] }
  0x50   :  { %14175 = vst [vmem:[#allocation59_spill] sm:$0xff] %v9648_v42  ;;  %14176 = vst [vmem:[#allocation60_spill] sm:$0xff] %v9650_v27  ;;  %1093 = vperm.xlu1 %9269, %v9652_v61   ;;  %v155_v25 = vsel %vm142_vm1, 4294967295, %v9409_v0  ;;  %vm194_vm3 = vcmp.lt.f32.partialorder %v63_v63, 0.0  ;;  %vm233_vm4 = vcmp.gt.f32.partialorder %v77_v3, 0.0  ;;  %vm246_vm5 = vcmp.lt.f32.partialorder %v77_v3, 0.0 }
  0x51   :  { %14177 = vst [vmem:[#allocation61_spill] sm:$0xff] %v9652_v61  ;;  %14178 = vst [vmem:[#allocation62_spill] sm:$0xff] %v9654_v35  ;;  %v9662_v36 = vand.u32 2147483647, %v60_v5  ;;  %v815_v40 = vadd.s32 %v802_v7, %v9656_v6  ;;  %v207_v56 = vsel %vm194_vm3, 4294967295, %v9409_v0  ;;  %v259_v31 = vsel %vm246_vm5, 4294967295, %v9409_v0 }
  0x52   :  { %14179 = vst [vmem:[#allocation63_spill] sm:$0xff] %v9656_v6  ;;  %v62_v51 = vld [vmem:[#allocation2 + $0xa8] sm:$0xff]  ;;  %v9667_v52 = vand.u32 2147483647, %v74_v11  ;;  %v9669_v17 = vsel %vm129_vm0, 1, %v155_v25  ;;  %v220_v61 = vsel %vm181_vm2, 1, %v207_v56  ;;  %vm276_vm2 = vcmp.le.f32.partialorder %v9556_v60, %v9548_v55 }
  0x53   :  { %14180 = vst [vmem:[#allocation64_spill] sm:$0xff] %v9662_v36  ;;  %14182 = vst [vmem:[#allocation66_spill] sm:$0xff] %v9669_v17  ;;  %v272_v39 = vsel %vm233_vm4, 1, %v259_v31  ;;  %v76_v33 = vld [vmem:[#allocation2 + $0x110] sm:$0xff]  ;;  %v9671_v24 = vadd.s32 13, %v815_v40  ;;  %v9675_v5 = vmul.u32 3, %v220_v61  ;;  %vm277_vm3 = vcmp.le.f32.partialorder %v9586_v21, %v9593_v26 }
  0x54   :  { %14181 = vst [vmem:[#allocation65_spill] sm:$0xff] %v9667_v52  ;;  %v9673_v1 = vand.u32 2147483647, %v49_v54  ;;  %v9677_v7 = vmul.u32 9, %v272_v39  ;;  %v9679_v6 = vand.u32 2147483647, %v63_v63 }
  0x55   :  { %14183 = vst [vmem:[#allocation67_spill] sm:$0xff] %v9671_v24  ;;  %14185 = vst [vmem:[#allocation69_spill] sm:$0xff] %v9675_v5  ;;  %vm128_vm6 = vcmp.gt.f32.partialorder %v48_v15, 0.0  ;;  %vm141_vm7 = vcmp.lt.f32.partialorder %v48_v15, 0.0  ;;  %vm180_vm8 = vcmp.gt.f32.partialorder %v62_v51, 0.0  ;;  %1090 = vperm.xlu0 %9268, %v9671_v24   ;;  %v805_v11 = vadd.s32 %v9675_v5, %v9669_v17  ;;  %v51_v54 = vld [vmem:[#allocation2 + $0x58] sm:$0xff] }
  0x56   :  { %14184 = vst [vmem:[#allocation68_spill] sm:$0xff] %v9673_v1  ;;  %14186 = vst [vmem:[#allocation70_spill] sm:$0xff] %v9677_v7  ;;  %v154_v25 = vsel %vm141_vm7, 4294967295, %v9409_v0  ;;  %vm193_vm9 = vcmp.lt.f32.partialorder %v62_v51, 0.0  ;;  %vm232_vm10 = vcmp.gt.f32.partialorder %v76_v33, 0.0  ;;  %vm245_vm11 = vcmp.lt.f32.partialorder %v76_v33, 0.0 }
  0x57   :  { %14187 = vst [vmem:[#allocation71_spill] sm:$0xff] %v9679_v6  ;;  %v9685_v40 = vand.u32 2147483647, %v77_v3  ;;  %v9687_v61 = vand.u32 2147483647, %v48_v15  ;;  %v206_v39 = vsel %vm193_vm9, 4294967295, %v9409_v0  ;;  %v818_v63 = vadd.s32 %v805_v11, %v9677_v7 }
  0x58   :  { %v9691_v56 = vsel %vm128_vm6, 1, %v154_v25  ;;  %v219_v31 = vsel %vm180_vm8, 1, %v206_v39  ;;  %v258_v24 = vsel %vm245_vm11, 4294967295, %v9409_v0  ;;  %v65_v5 = vld [vmem:[#allocation2 + $0xc0] sm:$0xff]  ;;  %v79_v17 = vld [vmem:[#allocation2 + $0x128] sm:$0xff]  ;;  %vm131_vm12 = vcmp.gt.f32.partialorder %v51_v54, 0.0 }
  0x59   :  { %14188 = vst [vmem:[#allocation72_spill] sm:$0xff] %v9685_v40  ;;  %14189 = vst [vmem:[#allocation73_spill] sm:$0xff] %v9687_v61  ;;  %v9694_v42 = vand.u32 2147483647, %v62_v51  ;;  %v9696_v37 = vand.u32 2147483647, %v76_v33 }
  0x5a   :  { %14190 = vst [vmem:[#allocation74_spill] sm:$0xff] %v9691_v56  ;;  %v271_v3 = vsel %vm232_vm10, 1, %v258_v24  ;;  %v9698_v20 = vmul.u32 3, %v219_v31  ;;  %v9700_v15 = vadd.s32 13, %v818_v63  ;;  %vm144_vm13 = vcmp.lt.f32.partialorder %v51_v54, 0.0  ;;  %v50_v51 = vld [vmem:[#allocation2 + $0x50] sm:$0xff] }
  0x5b   :  { %14191 = vst [vmem:[#allocation75_spill] sm:$0xff] %v9694_v42  ;;  %14192 = vst [vmem:[#allocation76_spill] sm:$0xff] %v9696_v37  ;;  %v9702_v19 = vmul.u32 9, %v271_v3  ;;  %v157_v25 = vsel %vm144_vm13, 4294967295, %v9409_v0  ;;  %vm183_vm14 = vcmp.gt.f32.partialorder %v65_v5, 0.0  ;;  %vm196_vm15 = vcmp.lt.f32.partialorder %v65_v5, 0.0 }
  0x5c   :  { %14193 = vst [vmem:[#allocation77_spill] sm:$0xff] %v9698_v20  ;;  %14194 = vst [vmem:[#allocation78_spill] sm:$0xff] %v9700_v15  ;;  %v804_v11 = vadd.s32 %v9698_v20, %v9691_v56  ;;  %1099 = vperm.xlu1 %9269, %v9700_v15   ;;  %v9708_v33 = vand.u32 2147483647, %v51_v54  ;;  %v209_v24 = vsel %vm196_vm15, 4294967295, %v9409_v0  ;;  %vm235_vm0 = vcmp.gt.f32.partialorder %v79_v17, 0.0 }
  0x5d   :  { %14195 = vst [vmem:[#allocation79_spill] sm:$0xff] %v9702_v19  ;;  %vm248_vm1 = vcmp.lt.f32.partialorder %v79_v17, 0.0  ;;  %v9714_v63 = vsel %vm131_vm12, 1, %v157_v25  ;;  %v222_v31 = vsel %vm183_vm14, 1, %v209_v24  ;;  %v64_v7 = vld [vmem:[#allocation2 + $0xb8] sm:$0xff]  ;;  %v78_v20 = vld [vmem:[#allocation2 + $0x120] sm:$0xff]  ;;  %vm278_vm13 = vcmp.le.f32.partialorder %v9532_v44, %v9524_v38 }
  0x5e   :  { %14196 = vst [vmem:[#allocation80_spill] sm:$0xff] %v9708_v33  ;;  %v817_v39 = vadd.s32 %v804_v11, %v9702_v19  ;;  %14197 = vst [vmem:[#allocation81_spill] sm:$0xff] %v9714_v63  ;;  %v261_v3 = vsel %vm248_vm1, 4294967295, %v9409_v0  ;;  %v9717_v15 = vand.u32 2147483647, %v65_v5  ;;  %v9721_v10 = vmul.u32 3, %v222_v31 }
  0x5f   :  { %v9719_v54 = vand.u32 2147483647, %v79_v17  ;;  %v274_v56 = vsel %vm235_vm0, 1, %v261_v3  ;;  %v9729_v25 = vand.u32 2147483647, %v50_v51  ;;  %vm130_vm4 = vcmp.gt.f32.partialorder %v50_v51, 0.0 }
  0x60   :  { %14198 = vst [vmem:[#allocation82_spill] sm:$0xff] %v9717_v15  ;;  %14200 = vst [vmem:[#allocation84_spill] sm:$0xff] %v9721_v10  ;;  %v9725_v49 = vadd.s32 13, %v817_v39  ;;  %v9727_v11 = vmul.u32 9, %v274_v56  ;;  %v807_v24 = vadd.s32 %v9721_v10, %v9714_v63  ;;  %vm143_vm5 = vcmp.lt.f32.partialorder %v50_v51, 0.0  ;;  %v52_v19 = vld [vmem:[#allocation2 + $0x60] sm:$0xff] }
  0x61   :  { %14199 = vst [vmem:[#allocation83_spill] sm:$0xff] %v9719_v54  ;;  %14203 = vst [vmem:[#allocation87_spill] sm:$0xff] %v9729_v25  ;;  %vm182_vm6 = vcmp.gt.f32.partialorder %v64_v7, 0.0  ;;  %vm195_vm7 = vcmp.lt.f32.partialorder %v64_v7, 0.0  ;;  %v156_v17 = vsel %vm143_vm5, 4294967295, %v9409_v0  ;;  %vm234_vm8 = vcmp.gt.f32.partialorder %v78_v20, 0.0 }
  0x62   :  { %14201 = vst [vmem:[#allocation85_spill] sm:$0xff] %v9725_v49  ;;  %14202 = vst [vmem:[#allocation86_spill] sm:$0xff] %v9727_v11  ;;  %1096 = vperm.xlu0 %9268, %v9725_v49   ;;  %v208_v5 = vsel %vm195_vm7, 4294967295, %v9409_v0  ;;  %vm247_vm9 = vcmp.lt.f32.partialorder %v78_v20, 0.0  ;;  %v820_v56 = vadd.s32 %v807_v24, %v9727_v11  ;;  %v9737_v39 = vsel %vm130_vm4, 1, %v156_v17  ;;  %v66_v10 = vld [vmem:[#allocation2 + $0xc8] sm:$0xff] }
  0x63   :  { %14204 = vst [vmem:[#allocation88_spill] sm:$0xff] %v9737_v39  ;;  %v221_v31 = vsel %vm182_vm6, 1, %v208_v5  ;;  %v260_v3 = vsel %vm247_vm9, 4294967295, %v9409_v0  ;;  %v80_v51 = vld [vmem:[#allocation2 + $0x130] sm:$0xff]  ;;  %v9740_v63 = vand.u32 2147483647, %v64_v7  ;;  %vm302_vm1 = vcmp.le.f32.partialorder %v9556_v60, %v9553_v59 }
  0x64   :  { %v9742_v48 = vand.u32 2147483647, %v78_v20  ;;  %v273_v49 = vsel %vm234_vm8, 1, %v260_v3  ;;  %v9744_v32 = vmul.u32 3, %v221_v31  ;;  %v9746_v45 = vadd.s32 13, %v820_v56 }
  0x65   :  { %14205 = vst [vmem:[#allocation89_spill] sm:$0xff] %v9740_v63  ;;  %v9748_v41 = vmul.u32 9, %v273_v49  ;;  %v9750_v24 = vand.u32 2147483647, %v52_v19  ;;  %v9752_v17 = vand.u32 2147483647, %v66_v10  ;;  %vm279_vm4 = vcmp.le.f32.partialorder %v9567_v2, %v9573_v9 }
  0x66   :  { %14206 = vst [vmem:[#allocation90_spill] sm:$0xff] %v9742_v48  ;;  %14207 = vst [vmem:[#allocation91_spill] sm:$0xff] %v9744_v32  ;;  %v806_v5 = vadd.s32 %v9744_v32, %v9737_v39  ;;  %vm132_vm10 = vcmp.gt.f32.partialorder %v52_v19, 0.0  ;;  %vm145_vm11 = vcmp.lt.f32.partialorder %v52_v19, 0.0  ;;  %vm184_vm12 = vcmp.gt.f32.partialorder %v66_v10, 0.0  ;;  %1105 = vperm.xlu1 %9269, %v9746_v45  }
  0x67   :  { %14208 = vst [vmem:[#allocation92_spill] sm:$0xff] %v9746_v45  ;;  %14209 = vst [vmem:[#allocation93_spill] sm:$0xff] %v9748_v41  ;;  %v158_v20 = vsel %vm145_vm11, 4294967295, %v9409_v0  ;;  %vm197_vm14 = vcmp.lt.f32.partialorder %v66_v10, 0.0  ;;  %vm236_vm15 = vcmp.gt.f32.partialorder %v80_v51, 0.0  ;;  %vm249_vm0 = vcmp.lt.f32.partialorder %v80_v51, 0.0 }
  0x68   :  { %14210 = vst [vmem:[#allocation94_spill] sm:$0xff] %v9750_v24  ;;  %14211 = vst [vmem:[#allocation95_spill] sm:$0xff] %v9752_v17  ;;  %v819_v49 = vadd.s32 %v806_v5, %v9748_v41  ;;  %v9761_v7 = vand.u32 2147483647, %v80_v51  ;;  %v210_v56 = vsel %vm197_vm14, 4294967295, %v9409_v0  ;;  %v262_v31 = vsel %vm249_vm0, 4294967295, %v9409_v0 }
  0x69   :  { %v9765_v19 = vsel %vm132_vm10, 1, %v158_v20  ;;  %v223_v3 = vsel %vm184_vm12, 1, %v210_v56  ;;  %v275_v11 = vsel %vm236_vm15, 1, %v262_v31  ;;  %v289_v45 = vsel %vm276_vm2, 1, %v9409_v0 }
  0x6a   :  { %14212 = vst [vmem:[#allocation96_spill] sm:$0xff] %v9761_v7  ;;  %14213 = vst [vmem:[#allocation97_spill] sm:$0xff] %v9765_v19  ;;  %v9771_v10 = vadd.s32 13, %v819_v49  ;;  %v9773_v32 = vmul.u32 3, %v223_v3  ;;  %v9775_v5 = vmul.u32 9, %v275_v11  ;;  %v315_v51 = vsel %vm302_vm1, 1, %v9409_v0 }
  0x6b   :  { %vm328_vm5 = vcmp.le.f32.partialorder %v9548_v55, %v9553_v59  ;;  %v354_v20 = vsub.s32 1, %v289_v45  ;;  %v290_v49 = vsel %vm277_vm3, 1, %v9409_v0  ;;  %v367_v31 = vsub.s32 1, %v315_v51 }
  0x6c   :  { %14214 = vst [vmem:[#allocation98_spill] sm:$0xff] %v9771_v10  ;;  %14215 = vst [vmem:[#allocation99_spill] sm:$0xff] %v9773_v32  ;;  %1102 = vperm.xlu0 %9268, %v9771_v10   ;;  %v808_v11 = vadd.s32 %v9773_v32, %v9765_v19  ;;  %v341_v56 = vsel %vm328_vm5, 1, %v9409_v0  ;;  %vm303_vm2 = vcmp.le.f32.partialorder %v9586_v21, %v9595_v29  ;;  %v355_v34 = vsub.s32 1, %v290_v49 }
  0x6d   :  { %v393_v3 = vsub.s32 1, %v341_v56  ;;  %v9794_v41 = vadd.s32 %v341_v56, %v315_v51  ;;  %v316_v39 = vsel %vm303_vm2, 1, %v9409_v0  ;;  %vm329_vm6 = vcmp.le.f32.partialorder %v9593_v26, %v9595_v29 }
  0x6e   :  { %vm280_vm3 = vcmp.le.f32.partialorder %v9623_v12, %v9625_v58  ;;  %v821_v10 = vadd.s32 %v808_v11, %v9775_v5  ;;  %v9802_v32 = vadd.s32 %v367_v31, %v354_v20  ;;  %v342_v19 = vsel %vm329_vm6, 1, %v9409_v0 }
  0x6f   :  { %v9805_v14 = vadd.s32 %v393_v3, %v289_v45  ;;  %vm497_vm7 = vcmp.eq.s32.totalorder %v9794_v41, 0  ;;  %v368_v51 = vsub.s32 1, %v316_v39  ;;  %v394_v56 = vsub.s32 1, %v342_v19 }
  0x70   :  { %v9808_v13 = vadd.s32 13, %v821_v10  ;;  %vm432_vm8 = vcmp.eq.s32.totalorder %v9802_v32, 0  ;;  %v510_v8 = vsel %vm497_vm7, %v9553_v59, 0.0  ;;  %v9812_v62 = vadd.s32 %v342_v19, %v316_v39 }
  0x71   :  { %v445_v20 = vsel %vm432_vm8, %v9556_v60, 0.0  ;;  %vm458_vm9 = vcmp.eq.s32.totalorder %v9805_v14, 0  ;;  %v9816_v11 = vadd.s32 %v368_v51, %v355_v34  ;;  %v9818_v45 = vadd.s32 %v394_v56, %v290_v49 }
  0x72   :  { %14216 = vst [vmem:[#allocation100_spill] sm:$0xff] %v9808_v13  ;;  %1108 = vperm.xlu0 %9268, %v9808_v13   ;;  %v471_v31 = vsel %vm458_vm9, %v9548_v55, 0.0  ;;  %vm498_vm10 = vcmp.eq.s32.totalorder %v9812_v62, 0  ;;  %v291_v39 = vsel %vm278_vm13, 1, %v9409_v0  ;;  %vm304_vm11 = vcmp.le.f32.partialorder %v9532_v44, %v9530_v43 }
  0x73   :  { %v484_v19 = vadd.f32 %v471_v31, %v445_v20  ;;  %vm433_vm12 = vcmp.eq.s32.totalorder %v9816_v11, 0  ;;  %vm459_vm14 = vcmp.eq.s32.totalorder %v9818_v45, 0  ;;  %v511_v34 = vsel %vm498_vm10, %v9595_v29, 0.0 }
  0x74   :  { %v446_v10 = vsel %vm433_vm12, %v9586_v21, 0.0  ;;  %v472_v49 = vsel %vm459_vm14, %v9593_v26, 0.0  ;;  %v317_v3 = vsel %vm304_vm11, 1, %v9409_v0  ;;  %vm330_vm15 = vcmp.le.f32.partialorder %v9524_v38, %v9530_v43 }
  0x75   :  { %vm281_vm13 = vcmp.le.f32.partialorder %v9602_v46, %v9604_v47  ;;  %v9839_v51 = vadd.f32 %v510_v8, %v484_v19  ;;  %v485_v56 = vadd.f32 %v472_v49, %v446_v10  ;;  %v343_v20 = vsel %vm330_vm15, 1, %v9409_v0 }
  0x76   :  { %v356_v31 = vsub.s32 1, %v291_v39  ;;  %v369_v13 = vsub.s32 1, %v317_v3  ;;  %v395_v29 = vsub.s32 1, %v343_v20  ;;  %v9842_v59 = vadd.s32 %v343_v20, %v317_v3 }
  0x77   :  { %14217 = vst [vmem:[#allocation101_spill] sm:$0xff] %v9839_v51  ;;  %v292_v26 = vsel %vm279_vm4, 1, %v9409_v0  ;;  %1125 = vperm.xlu1 %9269, %v9839_v51   ;;  %v9849_v21 = vadd.f32 %v511_v34, %v485_v56  ;;  %vm305_vm0 = vcmp.le.f32.partialorder %v9567_v2, %v9578_v16  ;;  %vm331_vm1 = vcmp.le.f32.partialorder %v9573_v9, %v9578_v16 }
  0x78   :  { %v357_v8 = vsub.s32 1, %v292_v26  ;;  %v9855_v19 = vadd.s32 %v369_v13, %v356_v31  ;;  %v9857_v10 = vadd.s32 %v395_v29, %v291_v39  ;;  %vm499_vm5 = vcmp.eq.s32.totalorder %v9842_v59, 0 }
  0x79   :  { %14218 = vst [vmem:[#allocation102_spill] sm:$0xff] %v9849_v21  ;;  %v318_v49 = vsel %vm305_vm0, 1, %v9409_v0  ;;  %vm282_vm4 = vcmp.le.f32.partialorder %v9654_v35, %v9662_v36  ;;  %1130 = vperm.xlu0 %9268, %v9849_v21   ;;  %v512_v34 = vsel %vm499_vm5, %v9530_v43, 0.0  ;;  %v344_v3 = vsel %vm331_vm1, 1, %v9409_v0 }
  0x7a   :  { %v370_v56 = vsub.s32 1, %v318_v49  ;;  %v293_v13 = vsel %vm280_vm3, 1, %v9409_v0  ;;  %vm434_vm2 = vcmp.eq.s32.totalorder %v9855_v19, 0  ;;  %vm460_vm6 = vcmp.eq.s32.totalorder %v9857_v10, 0 }
  0x7b   :  { %v396_v29 = vsub.s32 1, %v344_v3  ;;  %v9872_v39 = vadd.s32 %v344_v3, %v318_v49  ;;  %v447_v20 = vsel %vm434_vm2, %v9532_v44, 0.0  ;;  %v473_v31 = vsel %vm460_vm6, %v9524_v38, 0.0 }
  0x7c   :  { %v9876_v21 = vadd.s32 %v370_v56, %v357_v8  ;;  %vm306_vm7 = vcmp.le.f32.partialorder %v9623_v12, %v9629_v30  ;;  %v486_v43 = vadd.f32 %v473_v31, %v447_v20  ;;  %vm332_vm9 = vcmp.le.f32.partialorder %v9625_v58, %v9629_v30 }
  0x7d   :  { %v9880_v51 = vadd.s32 %v396_v29, %v292_v26  ;;  %vm500_vm3 = vcmp.eq.s32.totalorder %v9872_v39, 0  ;;  %v319_v55 = vsel %vm306_vm7, 1, %v9409_v0  ;;  %v358_v3 = vsub.s32 1, %v293_v13 }
  0x7e   :  { %vm435_vm8 = vcmp.eq.s32.totalorder %v9876_v21, 0  ;;  %v513_v49 = vsel %vm500_vm3, %v9578_v16, 0.0  ;;  %vm283_vm10 = vcmp.le.f32.partialorder %v9644_v4, %v9646_v22  ;;  %v9890_v8 = vadd.f32 %v512_v34, %v486_v43 }
  0x7f   :  { %v448_v26 = vsel %vm435_vm8, %v9567_v2, 0.0  ;;  %vm461_vm11 = vcmp.eq.s32.totalorder %v9880_v51, 0  ;;  %v345_v56 = vsel %vm332_vm9, 1, %v9409_v0  ;;  %v371_v20 = vsub.s32 1, %v319_v55 }
  0x80   :  { %14219 = vst [vmem:[#allocation103_spill] sm:$0xff] %v9890_v8  ;;  %v474_v29 = vsel %vm461_vm11, %v9573_v9, 0.0  ;;  %v397_v31 = vsub.s32 1, %v345_v56  ;;  %v9896_v16 = vadd.s32 %v345_v56, %v319_v55  ;;  %1135 = vperm.xlu1 %9269, %v9890_v8   ;;  %v294_v43 = vsel %vm281_vm13, 1, %v9409_v0 }
  0x81   :  { %v487_v38 = vadd.f32 %v474_v29, %v448_v26  ;;  %vm307_vm12 = vcmp.le.f32.partialorder %v9602_v46, %v9615_v53  ;;  %vm333_vm14 = vcmp.le.f32.partialorder %v9604_v47, %v9615_v53  ;;  %v9907_v34 = vadd.s32 %v371_v20, %v358_v3 }
  0x82   :  { %v9909_v9 = vadd.s32 %v397_v31, %v293_v13  ;;  %vm501_vm15 = vcmp.eq.s32.totalorder %v9896_v16, 0  ;;  %v320_v55 = vsel %vm307_vm12, 1, %v9409_v0  ;;  %v346_v29 = vsel %vm333_vm14, 1, %v9409_v0 }
  0x83   :  { %v9913_v26 = vadd.f32 %v513_v49, %v487_v38  ;;  %v514_v56 = vsel %vm501_vm15, %v9629_v30, 0.0  ;;  %v359_v8 = vsub.s32 1, %v294_v43  ;;  %vm284_vm13 = vcmp.le.f32.partialorder %v9687_v61, %v9694_v42 }
  0x84   :  { %vm436_vm0 = vcmp.eq.s32.totalorder %v9907_v34, 0  ;;  %vm462_vm1 = vcmp.eq.s32.totalorder %v9909_v9, 0  ;;  %v372_v13 = vsub.s32 1, %v320_v55  ;;  %v398_v3 = vsub.s32 1, %v346_v29 }
  0x85   :  { %14220 = vst [vmem:[#allocation104_spill] sm:$0xff] %v9913_v26  ;;  %1140 = vperm.xlu0 %9268, %v9913_v26   ;;  %v449_v20 = vsel %vm436_vm0, %v9623_v12, 0.0  ;;  %v475_v38 = vsel %vm462_vm1, %v9625_v58, 0.0  ;;  %v9924_v49 = vadd.s32 %v346_v29, %v320_v55  ;;  %v295_v31 = vsel %vm282_vm4, 1, %v9409_v0 }
  0x86   :  { %v488_v30 = vadd.f32 %v475_v38, %v449_v20  ;;  %v9930_v2 = vadd.s32 %v372_v13, %v359_v8  ;;  %v9932_v44 = vadd.s32 %v398_v3, %v294_v43  ;;  %vm308_vm5 = vcmp.le.f32.partialorder %v9654_v35, %v9667_v52 }
  0x87   :  { %vm502_vm2 = vcmp.eq.s32.totalorder %v9924_v49, 0  ;;  %v321_v26 = vsel %vm308_vm5, 1, %v9409_v0  ;;  %vm334_vm6 = vcmp.le.f32.partialorder %v9662_v36, %v9667_v52  ;;  %v360_v55 = vsub.s32 1, %v295_v31 }
  0x88   :  { %v9940_v29 = vadd.f32 %v514_v56, %v488_v30  ;;  %vm437_vm4 = vcmp.eq.s32.totalorder %v9930_v2, 0  ;;  %vm463_vm7 = vcmp.eq.s32.totalorder %v9932_v44, 0  ;;  %v515_v8 = vsel %vm502_vm2, %v9615_v53, 0.0 }
  0x89   :  { %vm285_vm3 = vcmp.le.f32.partialorder %v9673_v1, %v9679_v6  ;;  %v450_v43 = vsel %vm437_vm4, %v9602_v46, 0.0  ;;  %v476_v13 = vsel %vm463_vm7, %v9604_v47, 0.0  ;;  %v347_v3 = vsel %vm334_vm6, 1, %v9409_v0 }
  0x8a   :  { %14221 = vst [vmem:[#allocation105_spill] sm:$0xff] %v9940_v29  ;;  %v373_v20 = vsub.s32 1, %v321_v26  ;;  %1145 = vperm.xlu1 %9269, %v9940_v29   ;;  %v489_v30 = vadd.f32 %v476_v13, %v450_v43  ;;  %v399_v56 = vsub.s32 1, %v347_v3  ;;  %v9951_v38 = vadd.s32 %v347_v3, %v321_v26 }
  0x8b   :  { %v296_v53 = vsel %vm283_vm10, 1, %v9409_v0  ;;  %vm309_vm8 = vcmp.le.f32.partialorder %v9644_v4, %v9650_v27  ;;  %vm335_vm9 = vcmp.le.f32.partialorder %v9646_v22, %v9650_v27  ;;  %vm286_vm10 = vcmp.le.f32.partialorder %v9729_v25, %v9740_v63 }
  0x8c   :  { %v9957_v58 = vadd.s32 %v373_v20, %v360_v55  ;;  %v361_v47 = vsub.s32 1, %v296_v53  ;;  %v9963_v46 = vadd.f32 %v515_v8, %v489_v30  ;;  %v9965_v43 = vadd.s32 %v399_v56, %v295_v31 }
  0x8d   :  { %vm503_vm11 = vcmp.eq.s32.totalorder %v9951_v38, 0  ;;  %v322_v26 = vsel %vm309_vm8, 1, %v9409_v0  ;;  %v348_v13 = vsel %vm335_vm9, 1, %v9409_v0  ;;  %vm310_vm15 = vcmp.le.f32.partialorder %v9687_v61, %v9696_v37 }
  0x8e   :  { %14222 = vst [vmem:[#allocation106_spill] sm:$0xff] %v9963_v46  ;;  %vm438_vm12 = vcmp.eq.s32.totalorder %v9957_v58, 0  ;;  %v516_v55 = vsel %vm503_vm11, %v9667_v52, 0.0  ;;  %v374_v3 = vsub.s32 1, %v322_v26  ;;  %1150 = vperm.xlu0 %9268, %v9963_v46   ;;  %vm464_vm14 = vcmp.eq.s32.totalorder %v9965_v43, 0 }
  0x8f   :  { %v451_v8 = vsel %vm438_vm12, %v9654_v35, 0.0  ;;  %v400_v31 = vsub.s32 1, %v348_v13  ;;  %v9977_v20 = vadd.s32 %v348_v13, %v322_v26  ;;  %v477_v30 = vsel %vm464_vm14, %v9662_v36, 0.0 }
  0x90   :  { %v9980_v56 = vadd.s32 %v374_v3, %v361_v47  ;;  %v297_v52 = vsel %vm284_vm13, 1, %v9409_v0  ;;  %v490_v46 = vadd.f32 %v477_v30, %v451_v8  ;;  %v323_v26 = vsel %vm310_vm15, 1, %v9409_v0 }
  0x91   :  { %v9988_v29 = vadd.s32 %v400_v31, %v296_v53  ;;  %vm504_vm0 = vcmp.eq.s32.totalorder %v9977_v20, 0  ;;  %vm336_vm5 = vcmp.le.f32.partialorder %v9694_v42, %v9696_v37  ;;  %v362_v13 = vsub.s32 1, %v297_v52 }
  0x92   :  { %vm439_vm1 = vcmp.eq.s32.totalorder %v9980_v56, 0  ;;  %v517_v47 = vsel %vm504_vm0, %v9650_v27, 0.0  ;;  %vm287_vm13 = vcmp.le.f32.partialorder %v9708_v33, %v9717_v15  ;;  %v9998_v3 = vadd.f32 %v516_v55, %v490_v46 }
  0x93   :  { %v452_v53 = vsel %vm439_vm1, %v9644_v4, 0.0  ;;  %vm465_vm2 = vcmp.eq.s32.totalorder %v9988_v29, 0  ;;  %v349_v8 = vsel %vm336_vm5, 1, %v9409_v0  ;;  %v375_v30 = vsub.s32 1, %v323_v26 }
  0x94   :  { %14223 = vst [vmem:[#allocation107_spill] sm:$0xff] %v9998_v3  ;;  %v478_v31 = vsel %vm465_vm2, %v9646_v22, 0.0  ;;  %v401_v36 = vsub.s32 1, %v349_v8  ;;  %v10004_v27 = vadd.s32 %v349_v8, %v323_v26  ;;  %1155 = vperm.xlu1 %9269, %v9998_v3   ;;  %v298_v46 = vsel %vm285_vm3, 1, %v9409_v0 }
  0x95   :  { %v491_v35 = vadd.f32 %v478_v31, %v452_v53  ;;  %vm311_vm6 = vcmp.le.f32.partialorder %v9673_v1, %v9685_v40  ;;  %vm337_vm4 = vcmp.le.f32.partialorder %v9679_v6, %v9685_v40  ;;  %v10015_v55 = vadd.s32 %v375_v30, %v362_v13 }
  0x96   :  { %v10017_v22 = vadd.s32 %v401_v36, %v297_v52  ;;  %vm505_vm7 = vcmp.eq.s32.totalorder %v10004_v27, 0  ;;  %v324_v26 = vsel %vm311_vm6, 1, %v9409_v0  ;;  %v350_v31 = vsel %vm337_vm4, 1, %v9409_v0 }
  0x97   :  { %v10021_v53 = vadd.f32 %v517_v47, %v491_v35  ;;  %v518_v8 = vsel %vm505_vm7, %v9696_v37, 0.0  ;;  %v363_v3 = vsub.s32 1, %v298_v46  ;;  %vm288_vm3 = vcmp.le.f32.partialorder %v9750_v24, %v9752_v17 }
  0x98   :  { %vm440_vm8 = vcmp.eq.s32.totalorder %v10015_v55, 0  ;;  %vm466_vm9 = vcmp.eq.s32.totalorder %v10017_v22, 0  ;;  %v376_v36 = vsub.s32 1, %v324_v26  ;;  %v402_v52 = vsub.s32 1, %v350_v31 }
  0x99   :  { %14224 = vst [vmem:[#allocation108_spill] sm:$0xff] %v10021_v53  ;;  %1160 = vperm.xlu0 %9268, %v10021_v53   ;;  %v453_v13 = vsel %vm440_vm8, %v9687_v61, 0.0  ;;  %v479_v35 = vsel %vm466_vm9, %v9694_v42, 0.0  ;;  %v10032_v47 = vadd.s32 %v350_v31, %v324_v26  ;;  %v299_v30 = vsel %vm286_vm10, 1, %v9409_v0 }
  0x9a   :  { %v492_v37 = vadd.f32 %v479_v35, %v453_v13  ;;  %v10038_v4 = vadd.s32 %v376_v36, %v363_v3  ;;  %v10040_v12 = vadd.s32 %v402_v52, %v298_v46  ;;  %vm312_vm11 = vcmp.le.f32.partialorder %v9729_v25, %v9742_v48 }
  0x9b   :  { %vm506_vm12 = vcmp.eq.s32.totalorder %v10032_v47, 0  ;;  %v325_v53 = vsel %vm312_vm11, 1, %v9409_v0  ;;  %vm338_vm14 = vcmp.le.f32.partialorder %v9740_v63, %v9742_v48  ;;  %v364_v26 = vsub.s32 1, %v299_v30 }
  0x9c   :  { %v10048_v31 = vadd.f32 %v518_v8, %v492_v37  ;;  %vm441_vm10 = vcmp.eq.s32.totalorder %v10038_v4, 0  ;;  %vm467_vm15 = vcmp.eq.s32.totalorder %v10040_v12, 0  ;;  %v519_v3 = vsel %vm506_vm12, %v9685_v40, 0.0 }
  0x9d   :  { %v454_v46 = vsel %vm441_vm10, %v9673_v1, 0.0  ;;  %v480_v36 = vsel %vm467_vm15, %v9679_v6, 0.0  ;;  %v351_v52 = vsel %vm338_vm14, 1, %v9409_v0  ;;  %v377_v13 = vsub.s32 1, %v325_v53 }
  0x9e   :  { %14225 = vst [vmem:[#allocation109_spill] sm:$0xff] %v10048_v31  ;;  %1165 = vperm.xlu1 %9269, %v10048_v31   ;;  %v493_v35 = vadd.f32 %v480_v36, %v454_v46  ;;  %v403_v42 = vsub.s32 1, %v351_v52  ;;  %v10057_v61 = vadd.s32 %v351_v52, %v325_v53  ;;  %v300_v37 = vsel %vm287_vm13, 1, %v9409_v0 }
  0x9f   :  { %v10063_v8 = vadd.s32 %v377_v13, %v364_v26  ;;  %vm313_vm0 = vcmp.le.f32.partialorder %v9708_v33, %v9719_v54  ;;  %vm339_vm1 = vcmp.le.f32.partialorder %v9717_v15, %v9719_v54  ;;  %v365_v40 = vsub.s32 1, %v300_v37 }
  0xa0   :  { %v10069_v6 = vadd.f32 %v519_v3, %v493_v35  ;;  %v10071_v46 = vadd.s32 %v403_v42, %v299_v30  ;;  %vm507_vm5 = vcmp.eq.s32.totalorder %v10057_v61, 0  ;;  %v326_v53 = vsel %vm313_vm0, 1, %v9409_v0 }
  0xa1   :  { %vm442_vm2 = vcmp.eq.s32.totalorder %v10063_v8, 0  ;;  %v520_v26 = vsel %vm507_vm5, %v9742_v48, 0.0  ;;  %v352_v36 = vsel %vm339_vm1, 1, %v9409_v0  ;;  %v378_v52 = vsub.s32 1, %v326_v53 }
  0xa2   :  { %14226 = vst [vmem:[#allocation110_spill] sm:$0xff] %v10069_v6  ;;  %1170 = vperm.xlu0 %9268, %v10069_v6   ;;  %v455_v13 = vsel %vm442_vm2, %v9729_v25, 0.0  ;;  %vm468_vm13 = vcmp.eq.s32.totalorder %v10071_v46, 0  ;;  %v404_v3 = vsub.s32 1, %v352_v36  ;;  %v10081_v42 = vadd.s32 %v352_v36, %v326_v53 }
  0xa3   :  { %v481_v30 = vsel %vm468_vm13, %v9740_v63, 0.0  ;;  %v10084_v35 = vadd.s32 %v378_v52, %v365_v40  ;;  %v301_v48 = vsel %vm288_vm3, 1, %v9409_v0  ;;  %vm314_vm6 = vcmp.le.f32.partialorder %v9750_v24, %v9761_v7 }
  0xa4   :  { %v494_v6 = vadd.f32 %v481_v30, %v455_v13  ;;  %v10092_v31 = vadd.s32 %v404_v3, %v300_v37  ;;  %vm508_vm4 = vcmp.eq.s32.totalorder %v10081_v42, 0  ;;  %v327_v53 = vsel %vm314_vm6, 1, %v9409_v0 }
  0xa5   :  { %vm443_vm7 = vcmp.eq.s32.totalorder %v10084_v35, 0  ;;  %v521_v40 = vsel %vm508_vm4, %v9719_v54, 0.0  ;;  %vm340_vm8 = vcmp.le.f32.partialorder %v9752_v17, %v9761_v7  ;;  %v366_v36 = vsub.s32 1, %v301_v48 }
  0xa6   :  { %v10100_v52 = vadd.f32 %v520_v26, %v494_v6  ;;  %v456_v63 = vsel %vm443_vm7, %v9708_v33, 0.0  ;;  %vm469_vm3 = vcmp.eq.s32.totalorder %v10092_v31, 0  ;;  %v353_v37 = vsel %vm340_vm8, 1, %v9409_v0 }
  0xa7   :  { %v482_v13 = vsel %vm469_vm3, %v9717_v15, 0.0  ;;  %v379_v3 = vsub.s32 1, %v327_v53  ;;  %v405_v30 = vsub.s32 1, %v353_v37  ;;  %v10106_v25 = vadd.s32 %v353_v37, %v327_v53 }
  0xa8   :  { %14227 = vst [vmem:[#allocation111_spill] sm:$0xff] %v10100_v52  ;;  %1175 = vperm.xlu1 %9269, %v10100_v52   ;;  %v495_v54 = vadd.f32 %v482_v13, %v456_v63  ;;  %vm835_vm9 = vcmp.ge.s32.totalorder %v9802_v32, 1  ;;  %vm861_vm11 = vcmp.ge.s32.totalorder %v9805_v14, 1  ;;  %vm900_vm12 = vcmp.ge.s32.totalorder %v9794_v41, 1 }
  0xa9   :  { %v10112_v6 = vadd.s32 %v379_v3, %v366_v36  ;;  %v10114_v26 = vadd.s32 %v405_v30, %v301_v48  ;;  %vm509_vm14 = vcmp.eq.s32.totalorder %v10106_v25, 0  ;;  %v848_v0 = vsel %vm835_vm9, %v9490_v18, 0 }
  0xaa   :  { %v10118_v15 = vadd.f32 %v521_v40, %v495_v54  ;;  %v522_v53 = vsel %vm509_vm14, %v9761_v7, 0.0  ;;  %v874_v63 = vsel %vm861_vm11, %v9497_v23, 0  ;;  %v913_v37 = vsel %vm900_vm12, %v9505_v28, 0  ;;  %v14233_v7 = vld [vmem:[#allocation12_spill] sm:$0xff] }
  0xab   :  { %vm444_vm10 = vcmp.eq.s32.totalorder %v10112_v6, 0  ;;  %vm470_vm15 = vcmp.eq.s32.totalorder %v10114_v26, 0  ;;  %v887_v36 = vadd.s32 %v874_v63, %v848_v0  ;;  %vm836_vm0 = vcmp.ge.s32.totalorder %v9816_v11, 1  ;;  %v14229_v0 = vld [vmem:[#allocation31_spill] sm:$0xff] }
  0xac   :  { %14228 = vst [vmem:[#allocation112_spill] sm:$0xff] %v10118_v15  ;;  %1180 = vperm.xlu0 %9268, %v10118_v15   ;;  %v457_v48 = vsel %vm444_vm10, %v9750_v24, 0.0  ;;  %v483_v54 = vsel %vm470_vm15, %v9752_v17, 0.0  ;;  %v849_v40 = vsel %vm836_vm0, %v9544_v50, 0  ;;  %vm862_vm1 = vcmp.ge.s32.totalorder %v9818_v45, 1  ;;  %v14232_v50 = vld [vmem:[#allocation11_spill] sm:$0xff] }
  0xad   :  { %v496_v13 = vadd.f32 %v483_v54, %v457_v48  ;;  %v926_v3 = vadd.s32 %v913_v37, %v887_v36  ;;  %v875_v30 = vsel %vm862_vm1, %v9550_v57, 0  ;;  %vm901_vm5 = vcmp.ge.s32.totalorder %v9812_v62, 1  ;;  %v14234_v54 = vld [vmem:[#allocation13_spill] sm:$0xff] }
  0xae   :  { %v888_v28 = vadd.s32 %v875_v30, %v849_v40  ;;  %v914_v63 = vsel %vm901_vm5, %v14229_v0, 0  ;;  %vm837_vm2 = vcmp.ge.s32.totalorder %v9855_v19, 1  ;;  %vm863_vm13 = vcmp.ge.s32.totalorder %v9857_v10, 1 }
  0xaf   :  { %v10136_v23 = vadd.f32 %v522_v53, %v496_v13  ;;  %v10138_v15 = vadd.s32 13, %v926_v3  ;;  %v850_v18 = vsel %vm837_vm2, %v14232_v50, 0  ;;  %v876_v48 = vsel %vm863_vm13, %v14233_v7, 0  ;;  %v14235_v53 = vld [vmem:[#allocation18_spill] sm:$0xff]  ;;  %v14241_v50 = vld [vmem:[#allocation45_spill] sm:$0xff] }
  0xb0   :  { %v927_v37 = vadd.s32 %v914_v63, %v888_v28  ;;  %v889_v36 = vadd.s32 %v876_v48, %v850_v18  ;;  %vm902_vm6 = vcmp.ge.s32.totalorder %v9842_v59, 1  ;;  %vm838_vm4 = vcmp.ge.s32.totalorder %v9876_v21, 1  ;;  %v14237_v18 = vld [vmem:[#allocation21_spill] sm:$0xff]  ;;  %v14238_v63 = vld [vmem:[#allocation24_spill] sm:$0xff] }
  0xb1   :  { %14230 = vst [vmem:[#allocation113_spill] sm:$0xff] %v10136_v23  ;;  %14231 = vst [vmem:[#allocation114_spill] sm:$0xff] %v10138_v15  ;;  %1185 = vperm.xlu1 %9269, %v10136_v23   ;;  %1202 = vperm.xlu0 %9268, %v10138_v15   ;;  %v915_v40 = vsel %vm902_vm6, %v14234_v54, 0  ;;  %v851_v13 = vsel %vm838_vm4, %v14235_v53, 0  ;;  %vm864_vm7 = vcmp.ge.s32.totalorder %v9880_v51, 1  ;;  %vm903_vm8 = vcmp.ge.s32.totalorder %v9872_v39, 1 }
  0xb2   :  { %v10150_v3 = vadd.s32 13, %v927_v37  ;;  %v928_v28 = vadd.s32 %v915_v40, %v889_v36  ;;  %v877_v30 = vsel %vm864_vm7, %v14237_v18, 0  ;;  %v916_v48 = vsel %vm903_vm8, %v14238_v63, 0  ;;  %v14240_v53 = vld [vmem:[#allocation42_spill] sm:$0xff]  ;;  %v14242_v37 = vld [vmem:[#allocation47_spill] sm:$0xff] }
  0xb3   :  { %v890_v7 = vadd.s32 %v877_v30, %v851_v13  ;;  %vm839_vm3 = vcmp.ge.s32.totalorder %v9907_v34, 1  ;;  %vm865_vm9 = vcmp.ge.s32.totalorder %v9909_v9, 1  ;;  %vm904_vm11 = vcmp.ge.s32.totalorder %v9896_v16, 1  ;;  %v14243_v13 = vld [vmem:[#allocation34_spill] sm:$0xff] }
  0xb4   :  { %14236 = vst [vmem:[#allocation115_spill] sm:$0xff] %v10150_v3  ;;  %v10157_v15 = vadd.s32 13, %v928_v28  ;;  %v852_v54 = vsel %vm839_vm3, %v14240_v53, 0  ;;  %v878_v0 = vsel %vm865_vm9, %v14241_v50, 0  ;;  %v917_v57 = vsel %vm904_vm11, %v14242_v37, 0  ;;  %v14244_v28 = vld [vmem:[#allocation37_spill] sm:$0xff] }
  0xb5   :  { %1205 = vperm.xlu1 %9269, %v10150_v3   ;;  %v929_v36 = vadd.s32 %v916_v48, %v890_v7  ;;  %v891_v40 = vadd.s32 %v878_v0, %v852_v54  ;;  %vm840_vm12 = vcmp.ge.s32.totalorder %v9930_v2, 1  ;;  %vm866_vm14 = vcmp.ge.s32.totalorder %v9932_v44, 1  ;;  %v14246_v7 = vld [vmem:[#allocation38_spill] sm:$0xff]  ;;  %v14247_v54 = vld [vmem:[#allocation56_spill] sm:$0xff]  ;;  %v14250_v53 = vld [vmem:[#allocation63_spill] sm:$0xff] }
  0xb6   :  { %14239 = vst [vmem:[#allocation116_spill] sm:$0xff] %v10157_v15  ;;  %1208 = vperm.xlu0 %9268, %v10157_v15   ;;  %v853_v30 = vsel %vm840_vm12, %v14243_v13, 0  ;;  %v879_v63 = vsel %vm866_vm14, %v14244_v28, 0  ;;  %vm905_vm10 = vcmp.ge.s32.totalorder %v9924_v49, 1  ;;  %vm841_vm15 = vcmp.ge.s32.totalorder %v9957_v58, 1  ;;  %v14249_v13 = vld [vmem:[#allocation59_spill] sm:$0xff] }
  0xb7   :  { %v10170_v50 = vadd.s32 13, %v929_v36  ;;  %v930_v37 = vadd.s32 %v917_v57, %v891_v40  ;;  %v892_v3 = vadd.s32 %v879_v63, %v853_v30  ;;  %v918_v0 = vsel %vm905_vm10, %v14246_v7, 0  ;;  %v14251_v40 = vld [vmem:[#allocation49_spill] sm:$0xff]  ;;  %v14253_v7 = vld [vmem:[#allocation52_spill] sm:$0xff] }
  0xb8   :  { %v854_v48 = vsel %vm841_vm15, %v14247_v54, 0  ;;  %vm867_vm0 = vcmp.ge.s32.totalorder %v9965_v43, 1  ;;  %vm906_vm1 = vcmp.ge.s32.totalorder %v9951_v38, 1  ;;  %vm842_vm5 = vcmp.ge.s32.totalorder %v9980_v56, 1 }
  0xb9   :  { %14245 = vst [vmem:[#allocation117_spill] sm:$0xff] %v10170_v50  ;;  %1211 = vperm.xlu1 %9269, %v10170_v50   ;;  %v10178_v15 = vadd.s32 13, %v930_v37  ;;  %v931_v28 = vadd.s32 %v918_v0, %v892_v3  ;;  %v880_v36 = vsel %vm867_vm0, %v14249_v13, 0  ;;  %v919_v57 = vsel %vm906_vm1, %v14250_v53, 0  ;;  %v14254_v37 = vld [vmem:[#allocation55_spill] sm:$0xff]  ;;  %v14255_v53 = vld [vmem:[#allocation74_spill] sm:$0xff] }
  0xba   :  { %v893_v63 = vadd.s32 %v880_v36, %v854_v48  ;;  %v855_v30 = vsel %vm842_vm5, %v14251_v40, 0  ;;  %vm868_vm2 = vcmp.ge.s32.totalorder %v9988_v29, 1  ;;  %vm907_vm13 = vcmp.ge.s32.totalorder %v9977_v20, 1  ;;  %v14256_v36 = vld [vmem:[#allocation77_spill] sm:$0xff] }
  0xbb   :  { %14248 = vst [vmem:[#allocation118_spill] sm:$0xff] %v10178_v15  ;;  %1214 = vperm.xlu0 %9268, %v10178_v15   ;;  %v10186_v54 = vadd.s32 13, %v931_v28  ;;  %v881_v50 = vsel %vm868_vm2, %v14253_v7, 0  ;;  %v920_v18 = vsel %vm907_vm13, %v14254_v37, 0  ;;  %vm843_vm6 = vcmp.ge.s32.totalorder %v10015_v55, 1 }
  0xbc   :  { %v932_v3 = vadd.s32 %v919_v57, %v893_v63  ;;  %v894_v0 = vadd.s32 %v881_v50, %v855_v30  ;;  %v856_v48 = vsel %vm843_vm6, %v14255_v53, 0  ;;  %vm869_vm4 = vcmp.ge.s32.totalorder %v10017_v22, 1  ;;  %v14258_v57 = vld [vmem:[#allocation79_spill] sm:$0xff]  ;;  %v14259_v63 = vld [vmem:[#allocation66_spill] sm:$0xff]  ;;  %v14260_v53 = vld [vmem:[#allocation69_spill] sm:$0xff] }
  0xbd   :  { %14252 = vst [vmem:[#allocation119_spill] sm:$0xff] %v10186_v54  ;;  %1217 = vperm.xlu1 %9269, %v10186_v54   ;;  %v882_v40 = vsel %vm869_vm4, %v14256_v36, 0  ;;  %vm908_vm7 = vcmp.ge.s32.totalorder %v10004_v27, 1  ;;  %vm844_vm8 = vcmp.ge.s32.totalorder %v10038_v4, 1  ;;  %vm870_vm3 = vcmp.ge.s32.totalorder %v10040_v12, 1 }
  0xbe   :  { %v10198_v28 = vadd.s32 13, %v932_v3  ;;  %v933_v15 = vadd.s32 %v920_v18, %v894_v0  ;;  %v895_v37 = vadd.s32 %v882_v40, %v856_v48  ;;  %v921_v50 = vsel %vm908_vm7, %v14258_v57, 0  ;;  %v14262_v3 = vld [vmem:[#allocation70_spill] sm:$0xff]  ;;  %v14263_v18 = vld [vmem:[#allocation88_spill] sm:$0xff] }
  0xbf   :  { %v857_v30 = vsel %vm844_vm8, %v14259_v63, 0  ;;  %v883_v7 = vsel %vm870_vm3, %v14260_v53, 0  ;;  %vm909_vm9 = vcmp.ge.s32.totalorder %v10032_v47, 1  ;;  %vm845_vm11 = vcmp.ge.s32.totalorder %v10063_v8, 1  ;;  %v14266_v53 = vld [vmem:[#allocation93_spill] sm:$0xff] }
  0xc0   :  { %14257 = vst [vmem:[#allocation120_spill] sm:$0xff] %v10198_v28  ;;  %1220 = vperm.xlu0 %9268, %v10198_v28   ;;  %v10206_v54 = vadd.s32 13, %v933_v15  ;;  %v934_v36 = vadd.s32 %v921_v50, %v895_v37  ;;  %v896_v13 = vadd.s32 %v883_v7, %v857_v30  ;;  %v922_v23 = vsel %vm909_vm9, %v14262_v3, 0  ;;  %v14265_v28 = vld [vmem:[#allocation91_spill] sm:$0xff]  ;;  %v14267_v50 = vld [vmem:[#allocation81_spill] sm:$0xff]  ;;  %v14269_v3 = vld [vmem:[#allocation84_spill] sm:$0xff] }
  0xc1   :  { %v858_v40 = vsel %vm845_vm11, %v14263_v18, 0  ;;  %vm871_vm12 = vcmp.ge.s32.totalorder %v10071_v46, 1  ;;  %vm910_vm14 = vcmp.ge.s32.totalorder %v10057_v61, 1  ;;  %vm846_vm10 = vcmp.ge.s32.totalorder %v10084_v35, 1 }
  0xc2   :  { %14261 = vst [vmem:[#allocation79_spill] sm:$0xff] %v10206_v54  ;;  %1223 = vperm.xlu1 %9269, %v10206_v54   ;;  %v10214_v0 = vadd.s32 13, %v934_v36  ;;  %v935_v48 = vadd.s32 %v922_v23, %v896_v13  ;;  %v884_v15 = vsel %vm871_vm12, %v14265_v28, 0  ;;  %v923_v37 = vsel %vm910_vm14, %v14266_v53, 0  ;;  %v14270_v36 = vld [vmem:[#allocation86_spill] sm:$0xff]  ;;  %v14271_v53 = vld [vmem:[#allocation97_spill] sm:$0xff] }
  0xc3   :  { %v897_v7 = vadd.s32 %v884_v15, %v858_v40  ;;  %v859_v30 = vsel %vm846_vm10, %v14267_v50, 0  ;;  %vm872_vm15 = vcmp.ge.s32.totalorder %v10092_v31, 1  ;;  %vm911_vm0 = vcmp.ge.s32.totalorder %v10081_v42, 1  ;;  %v14272_v15 = vld [vmem:[#allocation99_spill] sm:$0xff] }
  0xc4   :  { %14264 = vst [vmem:[#allocation121_spill] sm:$0xff] %v10214_v0  ;;  %1226 = vperm.xlu0 %9268, %v10214_v0   ;;  %v10222_v18 = vadd.s32 13, %v935_v48  ;;  %v885_v54 = vsel %vm872_vm15, %v14269_v3, 0  ;;  %v924_v63 = vsel %vm911_vm0, %v14270_v36, 0  ;;  %vm847_vm1 = vcmp.ge.s32.totalorder %v10112_v6, 1 }
  0xc5   :  { %v936_v23 = vadd.s32 %v923_v37, %v897_v7  ;;  %v898_v13 = vadd.s32 %v885_v54, %v859_v30  ;;  %v860_v40 = vsel %vm847_vm1, %v14271_v53, 0  ;;  %vm873_vm5 = vcmp.ge.s32.totalorder %v10114_v26, 1  ;;  %v14274_v7 = vld [vmem:[#allocation26_spill] sm:$0xff] }
  0xc6   :  { %14268 = vst [vmem:[#allocation91_spill] sm:$0xff] %v10222_v18  ;;  %1229 = vperm.xlu1 %9269, %v10222_v18   ;;  %v886_v50 = vsel %vm873_vm5, %v14272_v15, 0  ;;  %vm912_vm2 = vcmp.ge.s32.totalorder %v10106_v25, 1  ;;  %vm536_vm13 = vcmp.eq.s32.totalorder %v9802_v32, 1  ;;  %vm562_vm6 = vcmp.eq.s32.totalorder %v9805_v14, 1 }
  0xc7   :  { %v10234_v48 = vadd.s32 13, %v936_v23  ;;  %v937_v0 = vadd.s32 %v924_v63, %v898_v13  ;;  %v899_v36 = vadd.s32 %v886_v50, %v860_v40  ;;  %v925_v54 = vsel %vm912_vm2, %v9775_v5, 0  ;;  %v14276_v23 = vld [vmem:[#allocation28_spill] sm:$0xff]  ;;  %v14277_v63 = vld [vmem:[#allocation39_spill] sm:$0xff] }
  0xc8   :  { %v549_v37 = vsel %vm536_vm13, %v9556_v60, 0.0  ;;  %v575_v30 = vsel %vm562_vm6, %v14274_v7, 0.0  ;;  %vm601_vm4 = vcmp.eq.s32.totalorder %v9794_v41, 1  ;;  %vm537_vm7 = vcmp.eq.s32.totalorder %v9816_v11, 1 }
  0xc9   :  { %14273 = vst [vmem:[#allocation122_spill] sm:$0xff] %v10234_v48  ;;  %1232 = vperm.xlu0 %9268, %v10234_v48   ;;  %v10242_v18 = vadd.s32 13, %v937_v0  ;;  %v938_v15 = vadd.s32 %v925_v54, %v899_v36  ;;  %v588_v53 = vadd.f32 %v575_v30, %v549_v37  ;;  %v614_v3 = vsel %vm601_vm4, %v14276_v23, 0.0  ;;  %v14280_v0 = vld [vmem:[#allocation40_spill] sm:$0xff]  ;;  %v14281_v36 = vld [vmem:[#allocation41_spill] sm:$0xff]  ;;  %v14282_v30 = vld [vmem:[#allocation23_spill] sm:$0xff] }
  0xca   :  { %v550_v50 = vsel %vm537_vm7, %v14277_v63, 0.0  ;;  %vm563_vm8 = vcmp.eq.s32.totalorder %v9818_v45, 1  ;;  %vm602_vm3 = vcmp.eq.s32.totalorder %v9812_v62, 1  ;;  %vm538_vm9 = vcmp.eq.s32.totalorder %v9855_v19, 1  ;;  %v14283_v63 = vld [vmem:[#allocation101_spill] sm:$0xff] }
  0xcb   :  { %14275 = vst [vmem:[#allocation123_spill] sm:$0xff] %v10242_v18  ;;  %1235 = vperm.xlu1 %9269, %v10242_v18   ;;  %v10250_v13 = vadd.s32 13, %v938_v15  ;;  %v10252_v40 = vadd.f32 %v614_v3, %v588_v53  ;;  %v576_v48 = vsel %vm563_vm8, %v14280_v0, 0.0  ;;  %v615_v54 = vsel %vm602_vm3, %v14281_v36, 0.0  ;;  %v14285_v15 = vld [vmem:[#allocation19_spill] sm:$0xff]  ;;  %v14286_v3 = vld [vmem:[#allocation22_spill] sm:$0xff] }
  0xcc   :  { %v589_v37 = vadd.f32 %v576_v48, %v550_v50  ;;  %v551_v23 = vsel %vm538_vm9, %v14282_v30, 0.0  ;;  %vm564_vm11 = vcmp.eq.s32.totalorder %v9857_v10, 1  ;;  %vm603_vm12 = vcmp.eq.s32.totalorder %v9842_v59, 1  ;;  %v14288_v50 = vld [vmem:[#allocation32_spill] sm:$0xff] }
  0xcd   :  { %14278 = vst [vmem:[#allocation124_spill] sm:$0xff] %v10250_v13  ;;  %14279 = vst [vmem:[#allocation125_spill] sm:$0xff] %v10252_v40  ;;  %1238 = vperm.xlu0 %9268, %v10250_v13   ;;  %v10262_v18 = vsub.f32 %v10252_v40, %v14283_v63  ;;  %v577_v53 = vsel %vm564_vm11, %v14285_v15, 0.0  ;;  %v616_v7 = vsel %vm603_vm12, %v14286_v3, 0.0  ;;  %vm539_vm14 = vcmp.eq.s32.totalorder %v9876_v21, 1  ;;  %v14289_v13 = vld [vmem:[#allocation33_spill] sm:$0xff] }
  0xce   :  { %v10267_v36 = vadd.f32 %v615_v54, %v589_v37  ;;  %v590_v48 = vadd.f32 %v577_v53, %v551_v23  ;;  %v552_v30 = vsel %vm539_vm14, %v14288_v50, 0.0  ;;  %vm565_vm10 = vcmp.eq.s32.totalorder %v9880_v51, 1  ;;  %v14290_v63 = vld [vmem:[#allocation102_spill] sm:$0xff]  ;;  %v14293_v37 = vld [vmem:[#allocation35_spill] sm:$0xff] }
  0xcf   :  { %14284 = vst [vmem:[#allocation126_spill] sm:$0xff] %v10262_v18  ;;  %1255 = vperm.xlu1 %9269, %v10262_v18   ;;  %v578_v0 = vsel %vm565_vm10, %v14289_v13, 0.0  ;;  %vm604_vm15 = vcmp.eq.s32.totalorder %v9872_v39, 1  ;;  %vm540_vm0 = vcmp.eq.s32.totalorder %v9907_v34, 1  ;;  %vm566_vm1 = vcmp.eq.s32.totalorder %v9909_v9, 1  ;;  %v14294_v50 = vld [vmem:[#allocation50_spill] sm:$0xff] }
  0xd0   :  { %14287 = vst [vmem:[#allocation127_spill] sm:$0xff] %v10267_v36  ;;  %v10278_v3 = vsub.f32 %v10267_v36, %v14290_v63  ;;  %v10280_v54 = vadd.f32 %v616_v7, %v590_v48  ;;  %v591_v23 = vadd.f32 %v578_v0, %v552_v30  ;;  %v617_v53 = vsel %vm604_vm15, %v14293_v37, 0.0  ;;  %v14295_v18 = vld [vmem:[#allocation51_spill] sm:$0xff]  ;;  %v14299_v0 = vld [vmem:[#allocation53_spill] sm:$0xff] }
  0xd1   :  { %v553_v15 = vsel %vm540_vm0, %v14294_v50, 0.0  ;;  %v579_v40 = vsel %vm566_vm1, %v14295_v18, 0.0  ;;  %vm605_vm5 = vcmp.eq.s32.totalorder %v9896_v16, 1  ;;  %vm541_vm2 = vcmp.eq.s32.totalorder %v9930_v2, 1  ;;  %v14296_v13 = vld [vmem:[#allocation103_spill] sm:$0xff] }
  0xd2   :  { %14291 = vst [vmem:[#allocation128_spill] sm:$0xff] %v10278_v3  ;;  %14292 = vst [vmem:[#allocation129_spill] sm:$0xff] %v10280_v54  ;;  %1260 = vperm.xlu0 %9268, %v10278_v3   ;;  %v10290_v60 = vsub.f32 %v10280_v54, %v14296_v13  ;;  %v10292_v63 = vadd.f32 %v617_v53, %v591_v23  ;;  %v592_v7 = vadd.f32 %v579_v40, %v553_v15  ;;  %v14300_v48 = vld [vmem:[#allocation43_spill] sm:$0xff]  ;;  %v14301_v3 = vld [vmem:[#allocation104_spill] sm:$0xff] }
  0xd3   :  { %v618_v30 = vsel %vm605_vm5, %v14299_v0, 0.0  ;;  %v554_v37 = vsel %vm541_vm2, %v14300_v48, 0.0  ;;  %vm567_vm13 = vcmp.eq.s32.totalorder %v9932_v44, 1  ;;  %vm606_vm6 = vcmp.eq.s32.totalorder %v9924_v49, 1  ;;  %v14304_v23 = vld [vmem:[#allocation44_spill] sm:$0xff]  ;;  %v14306_v48 = vld [vmem:[#allocation62_spill] sm:$0xff] }
  0xd4   :  { %14297 = vst [vmem:[#allocation130_spill] sm:$0xff] %v10290_v60  ;;  %14298 = vst [vmem:[#allocation131_spill] sm:$0xff] %v10292_v63  ;;  %vm542_vm4 = vcmp.eq.s32.totalorder %v9957_v58, 1  ;;  %1265 = vperm.xlu1 %9269, %v10290_v60   ;;  %v10302_v18 = vsub.f32 %v10292_v63, %v14301_v3  ;;  %v10304_v13 = vadd.f32 %v618_v30, %v592_v7  ;;  %v580_v40 = vsel %vm567_vm13, %v14304_v23, 0.0  ;;  %v14305_v15 = vld [vmem:[#allocation48_spill] sm:$0xff]  ;;  %v14307_v60 = vld [vmem:[#allocation105_spill] sm:$0xff] }
  0xd5   :  { %v619_v53 = vsel %vm606_vm6, %v14305_v15, 0.0  ;;  %v593_v0 = vadd.f32 %v580_v40, %v554_v37  ;;  %v555_v54 = vsel %vm542_vm4, %v14306_v48, 0.0  ;;  %vm568_vm7 = vcmp.eq.s32.totalorder %v9965_v43, 1  ;;  %v14309_v3 = vld [vmem:[#allocation64_spill] sm:$0xff]  ;;  %v14310_v30 = vld [vmem:[#allocation65_spill] sm:$0xff] }
  0xd6   :  { %14302 = vst [vmem:[#allocation132_spill] sm:$0xff] %v10302_v18  ;;  %14303 = vst [vmem:[#allocation133_spill] sm:$0xff] %v10304_v13  ;;  %vm607_vm8 = vcmp.eq.s32.totalorder %v9951_v38, 1  ;;  %1270 = vperm.xlu0 %9268, %v10302_v18   ;;  %v10314_v50 = vsub.f32 %v10304_v13, %v14307_v60  ;;  %v581_v7 = vsel %vm568_vm7, %v14309_v3, 0.0  ;;  %vm543_vm3 = vcmp.eq.s32.totalorder %v9980_v56, 1  ;;  %v14311_v40 = vld [vmem:[#allocation57_spill] sm:$0xff] }
  0xd7   :  { %v620_v63 = vsel %vm607_vm8, %v14310_v30, 0.0  ;;  %v10319_v15 = vadd.f32 %v619_v53, %v593_v0  ;;  %v594_v37 = vadd.f32 %v581_v7, %v555_v54  ;;  %v556_v48 = vsel %vm543_vm3, %v14311_v40, 0.0  ;;  %v14312_v18 = vld [vmem:[#allocation58_spill] sm:$0xff]  ;;  %v14316_v53 = vld [vmem:[#allocation60_spill] sm:$0xff]  ;;  %v14317_v40 = vld [vmem:[#allocation73_spill] sm:$0xff] }
  0xd8   :  { %14308 = vst [vmem:[#allocation134_spill] sm:$0xff] %v10314_v50  ;;  %vm569_vm9 = vcmp.eq.s32.totalorder %v9988_v29, 1  ;;  %1275 = vperm.xlu1 %9269, %v10314_v50   ;;  %vm608_vm11 = vcmp.eq.s32.totalorder %v9977_v20, 1  ;;  %vm544_vm12 = vcmp.eq.s32.totalorder %v10015_v55, 1  ;;  %vm570_vm14 = vcmp.eq.s32.totalorder %v10017_v22, 1  ;;  %v14313_v60 = vld [vmem:[#allocation106_spill] sm:$0xff] }
  0xd9   :  { %v582_v23 = vsel %vm569_vm9, %v14312_v18, 0.0  ;;  %v10330_v30 = vsub.f32 %v10319_v15, %v14313_v60  ;;  %v10332_v0 = vadd.f32 %v620_v63, %v594_v37  ;;  %v621_v7 = vsel %vm608_vm11, %v14316_v53, 0.0  ;;  %v14318_v50 = vld [vmem:[#allocation75_spill] sm:$0xff] }
  0xda   :  { %v595_v54 = vadd.f32 %v582_v23, %v556_v48  ;;  %v557_v3 = vsel %vm544_vm12, %v14317_v40, 0.0  ;;  %v583_v13 = vsel %vm570_vm14, %v14318_v50, 0.0  ;;  %vm609_vm10 = vcmp.eq.s32.totalorder %v10004_v27, 1  ;;  %v14319_v18 = vld [vmem:[#allocation107_spill] sm:$0xff]  ;;  %v14322_v48 = vld [vmem:[#allocation76_spill] sm:$0xff] }
  0xdb   :  { %14314 = vst [vmem:[#allocation135_spill] sm:$0xff] %v10330_v30  ;;  %14315 = vst [vmem:[#allocation136_spill] sm:$0xff] %v10332_v0  ;;  %vm545_vm15 = vcmp.eq.s32.totalorder %v10038_v4, 1  ;;  %1280 = vperm.xlu0 %9268, %v10330_v30   ;;  %v10342_v36 = vsub.f32 %v10332_v0, %v14319_v18  ;;  %v596_v63 = vadd.f32 %v583_v13, %v557_v3  ;;  %v622_v23 = vsel %vm609_vm10, %v14322_v48, 0.0  ;;  %v14323_v30 = vld [vmem:[#allocation108_spill] sm:$0xff] }
  0xdc   :  { %v10344_v60 = vadd.f32 %v621_v7, %v595_v54  ;;  %v558_v37 = vsel %vm545_vm15, %v9673_v1, 0.0  ;;  %vm571_vm0 = vcmp.eq.s32.totalorder %v10040_v12, 1  ;;  %vm610_vm1 = vcmp.eq.s32.totalorder %v10032_v47, 1  ;;  %v14325_v54 = vld [vmem:[#allocation71_spill] sm:$0xff]  ;;  %v14326_v3 = vld [vmem:[#allocation72_spill] sm:$0xff] }
  0xdd   :  { %14320 = vst [vmem:[#allocation60_spill] sm:$0xff] %v10342_v36  ;;  %vm546_vm5 = vcmp.eq.s32.totalorder %v10063_v8, 1  ;;  %1285 = vperm.xlu1 %9269, %v10342_v36   ;;  %v10356_v18 = vadd.f32 %v622_v23, %v596_v63  ;;  %v584_v13 = vsel %vm571_vm0, %v14325_v54, 0.0  ;;  %v623_v7 = vsel %vm610_vm1, %v14326_v3, 0.0  ;;  %v14327_v1 = vld [vmem:[#allocation87_spill] sm:$0xff]  ;;  %v14328_v36 = vld [vmem:[#allocation109_spill] sm:$0xff] }
  0xde   :  { %14321 = vst [vmem:[#allocation137_spill] sm:$0xff] %v10344_v60  ;;  %v10354_v50 = vsub.f32 %v10344_v60, %v14323_v30  ;;  %v597_v48 = vadd.f32 %v584_v13, %v558_v37  ;;  %v559_v0 = vsel %vm546_vm5, %v14327_v1, 0.0  ;;  %vm572_vm2 = vcmp.eq.s32.totalorder %v10071_v46, 1  ;;  %v14330_v30 = vld [vmem:[#allocation89_spill] sm:$0xff]  ;;  %v14331_v23 = vld [vmem:[#allocation90_spill] sm:$0xff] }
  0xdf   :  { %vm611_vm13 = vcmp.eq.s32.totalorder %v10057_v61, 1  ;;  %v10366_v40 = vsub.f32 %v10356_v18, %v14328_v36  ;;  %v585_v63 = vsel %vm572_vm2, %v14330_v30, 0.0  ;;  %vm547_vm6 = vcmp.eq.s32.totalorder %v10084_v35, 1  ;;  %v14334_v36 = vld [vmem:[#allocation110_spill] sm:$0xff] }
  0xe0   :  { %14324 = vst [vmem:[#allocation138_spill] sm:$0xff] %v10354_v50  ;;  %1290 = vperm.xlu0 %9268, %v10354_v50   ;;  %v624_v60 = vsel %vm611_vm13, %v14331_v23, 0.0  ;;  %v10371_v3 = vadd.f32 %v623_v7, %v597_v48  ;;  %v598_v37 = vadd.f32 %v585_v63, %v559_v0  ;;  %v560_v13 = vsel %vm547_vm6, %v9708_v33, 0.0  ;;  %v14333_v50 = vld [vmem:[#allocation82_spill] sm:$0xff]  ;;  %v14337_v7 = vld [vmem:[#allocation83_spill] sm:$0xff] }
  0xe1   :  { %14329 = vst [vmem:[#allocation71_spill] sm:$0xff] %v10366_v40  ;;  %vm573_vm4 = vcmp.eq.s32.totalorder %v10092_v31, 1  ;;  %1295 = vperm.xlu1 %9269, %v10366_v40   ;;  %vm612_vm7 = vcmp.eq.s32.totalorder %v10081_v42, 1  ;;  %vm548_vm8 = vcmp.eq.s32.totalorder %v10112_v6, 1  ;;  %vm574_vm3 = vcmp.eq.s32.totalorder %v10114_v26, 1 }
  0xe2   :  { %14332 = vst [vmem:[#allocation139_spill] sm:$0xff] %v10371_v3  ;;  %v586_v1 = vsel %vm573_vm4, %v14333_v50, 0.0  ;;  %v10382_v23 = vsub.f32 %v10371_v3, %v14334_v36  ;;  %v10384_v48 = vadd.f32 %v624_v60, %v598_v37  ;;  %v625_v63 = vsel %vm612_vm7, %v14337_v7, 0.0  ;;  %v10391_v50 = vpop.permute.xlu0 %1072  ;;  %v14341_v37 = vld [vmem:[#allocation96_spill] sm:$0xff] }
  0xe3   :  { %v599_v0 = vadd.f32 %v586_v1, %v560_v13  ;;  %v561_v33 = vsel %vm548_vm8, %v9750_v24, 0.0  ;;  %v587_v40 = vsel %vm574_vm3, %v9752_v17, 0.0  ;;  %vm613_vm9 = vcmp.eq.s32.totalorder %v10106_v25, 1  ;;  %14338 = vst [vmem:[#allocation142_spill] sm:$0xff] %v10391_v50  ;;  %v14342_v24 = vld [vmem:[#allocation14_spill] sm:$0xff] }
  0xe4   :  { %14335 = vst [vmem:[#allocation140_spill] sm:$0xff] %v10382_v23  ;;  %14336 = vst [vmem:[#allocation141_spill] sm:$0xff] %v10384_v48  ;;  %vm952_vm11 = vcmp.ge.s32.totalorder %v9802_v32, 2  ;;  %1300 = vperm.xlu0 %9268, %v10382_v23   ;;  %v10396_v36 = vsub.f32 %v10384_v48, %v10100_v52  ;;  %v600_v1 = vadd.f32 %v587_v40, %v561_v33  ;;  %v626_v13 = vsel %vm613_vm9, %v14341_v37, 0.0  ;;  %v14343_v23 = vld [vmem:[#allocation112_spill] sm:$0xff]  ;;  %v14347_v40 = vld [vmem:[#allocation17_spill] sm:$0xff] }
  0xe5   :  { %v10398_v60 = vadd.f32 %v625_v63, %v599_v0  ;;  %v965_v7 = vsel %vm952_vm11, %v14342_v24, 0  ;;  %vm978_vm12 = vcmp.ge.s32.totalorder %v9805_v14, 2  ;;  %vm1017_vm14 = vcmp.ge.s32.totalorder %v9794_v41, 2  ;;  %v14346_v0 = vld [vmem:[#allocation15_spill] sm:$0xff]  ;;  %v14348_v24 = vld [vmem:[#allocation25_spill] sm:$0xff] }
  0xe6   :  { %14339 = vst [vmem:[#allocation143_spill] sm:$0xff] %v10396_v36  ;;  %vm953_vm10 = vcmp.ge.s32.totalorder %v9816_v11, 2  ;;  %1305 = vperm.xlu1 %9269, %v10396_v36   ;;  %v10410_v52 = vadd.f32 %v626_v13, %v600_v1  ;;  %v991_v33 = vsel %vm978_vm12, %v14346_v0, 0  ;;  %v1030_v63 = vsel %vm1017_vm14, %v14347_v40, 0  ;;  %v14349_v36 = vld [vmem:[#allocation113_spill] sm:$0xff]  ;;  %v14352_v13 = vld [vmem:[#allocation31_spill] sm:$0xff]  ;;  %v10425_v0 = vpop.permute.xlu1 %1078  ;;  %v10429_v3 = vpop.permute.xlu0 %1075 }
  0xe7   :  { %14340 = vst [vmem:[#allocation144_spill] sm:$0xff] %v10398_v60  ;;  %v10408_v50 = vsub.f32 %v10398_v60, %v14343_v23  ;;  %v1004_v37 = vadd.s32 %v991_v33, %v965_v7  ;;  %v966_v17 = vsel %vm953_vm10, %v14348_v24, 0  ;;  %vm979_vm15 = vcmp.ge.s32.totalorder %v9818_v45, 2  ;;  %v14351_v23 = vld [vmem:[#allocation27_spill] sm:$0xff]  ;;  %14353 = vst [vmem:[#allocation17_spill] sm:$0xff] %v10425_v0  ;;  %v14360_v0 = vld [vmem:[#allocation21_spill] sm:$0xff] }
  0xe8   :  { %14345 = vst [vmem:[#allocation145_spill] sm:$0xff] %v10410_v52  ;;  %vm1018_vm0 = vcmp.ge.s32.totalorder %v9812_v62, 2  ;;  %v10420_v48 = vsub.f32 %v10410_v52, %v14349_v36  ;;  %v992_v1 = vsel %vm979_vm15, %v14351_v23, 0  ;;  %vm954_vm1 = vcmp.ge.s32.totalorder %v9855_v19, 2  ;;  %v14354_v40 = vld [vmem:[#allocation11_spill] sm:$0xff]  ;;  %14355 = vst [vmem:[#allocation25_spill] sm:$0xff] %v10429_v3 }
  0xe9   :  { %14344 = vst [vmem:[#allocation14_spill] sm:$0xff] %v10408_v50  ;;  %1310 = vperm.xlu0 %9268, %v10408_v50   ;;  %v1031_v60 = vsel %vm1018_vm0, %v14352_v13, 0  ;;  %v1043_v7 = vadd.s32 %v1030_v63, %v1004_v37  ;;  %v1005_v33 = vadd.s32 %v992_v1, %v966_v17  ;;  %v967_v24 = vsel %vm954_vm1, %v14354_v40, 0  ;;  %v14356_v36 = vld [vmem:[#allocation12_spill] sm:$0xff]  ;;  %v14358_v63 = vld [vmem:[#allocation13_spill] sm:$0xff]  ;;  %v14359_v13 = vld [vmem:[#allocation18_spill] sm:$0xff] }
  0xea   :  { %14350 = vst [vmem:[#allocation15_spill] sm:$0xff] %v10420_v48  ;;  %vm980_vm5 = vcmp.ge.s32.totalorder %v9857_v10, 2  ;;  %1315 = vperm.xlu1 %9269, %v10420_v48   ;;  %vm1019_vm2 = vcmp.ge.s32.totalorder %v9842_v59, 2  ;;  %vm955_vm13 = vcmp.ge.s32.totalorder %v9876_v21, 2  ;;  %vm981_vm6 = vcmp.ge.s32.totalorder %v9880_v51, 2 }
  0xeb   :  { %v993_v50 = vsel %vm980_vm5, %v14356_v36, 0  ;;  %v10436_v23 = vadd.s32 13, %v1043_v7  ;;  %v1044_v37 = vadd.s32 %v1031_v60, %v1005_v33  ;;  %v1032_v1 = vsel %vm1019_vm2, %v14358_v63, 0  ;;  %v14362_v7 = vld [vmem:[#allocation24_spill] sm:$0xff]  ;;  %v14363_v60 = vld [vmem:[#allocation42_spill] sm:$0xff] }
  0xec   :  { %v1006_v17 = vadd.s32 %v993_v50, %v967_v24  ;;  %v968_v40 = vsel %vm955_vm13, %v14359_v13, 0  ;;  %v994_v3 = vsel %vm981_vm6, %v14360_v0, 0  ;;  %vm1020_vm4 = vcmp.ge.s32.totalorder %v9872_v39, 2  ;;  %v10451_v0 = vpop.permute.xlu1 %1081 }
  0xed   :  { %14357 = vst [vmem:[#allocation27_spill] sm:$0xff] %v10436_v23  ;;  %vm956_vm7 = vcmp.ge.s32.totalorder %v9907_v34, 2  ;;  %1345 = vperm.xlu0 %9268, %v10436_v23   ;;  %v10444_v36 = vadd.s32 13, %v1044_v37  ;;  %v1007_v52 = vadd.s32 %v994_v3, %v968_v40  ;;  %v1033_v30 = vsel %vm1020_vm4, %v14362_v7, 0  ;;  %14364 = vst [vmem:[#allocation11_spill] sm:$0xff] %v10451_v0  ;;  %v14366_v37 = vld [vmem:[#allocation45_spill] sm:$0xff] }
  0xee   :  { %v1045_v48 = vadd.s32 %v1032_v1, %v1006_v17  ;;  %v969_v50 = vsel %vm956_vm7, %v14363_v60, 0  ;;  %vm982_vm8 = vcmp.ge.s32.totalorder %v9909_v9, 2  ;;  %vm1021_vm3 = vcmp.ge.s32.totalorder %v9896_v16, 2  ;;  %v14367_v3 = vld [vmem:[#allocation47_spill] sm:$0xff]  ;;  %v10458_v1 = vpop.permute.xlu0 %1084  ;;  %v14369_v40 = vld [vmem:[#allocation34_spill] sm:$0xff] }
  0xef   :  { %14361 = vst [vmem:[#allocation31_spill] sm:$0xff] %v10444_v36  ;;  %vm957_vm9 = vcmp.ge.s32.totalorder %v9930_v2, 2  ;;  %1348 = vperm.xlu1 %9269, %v10444_v36   ;;  %v1046_v24 = vadd.s32 %v1033_v30, %v1007_v52  ;;  %v995_v17 = vsel %vm982_vm8, %v14366_v37, 0  ;;  %v1034_v63 = vsel %vm1021_vm3, %v14367_v3, 0  ;;  %14368 = vst [vmem:[#allocation13_spill] sm:$0xff] %v10458_v1  ;;  %v14372_v52 = vld [vmem:[#allocation38_spill] sm:$0xff] }
  0xf0   :  { %v10454_v33 = vadd.s32 13, %v1045_v48  ;;  %v1008_v13 = vadd.s32 %v995_v17, %v969_v50  ;;  %v970_v7 = vsel %vm957_vm9, %v14369_v40, 0  ;;  %vm983_vm11 = vcmp.ge.s32.totalorder %v9932_v44, 2  ;;  %v14371_v48 = vld [vmem:[#allocation37_spill] sm:$0xff]  ;;  %v14373_v1 = vld [vmem:[#allocation56_spill] sm:$0xff]  ;;  %v14374_v17 = vld [vmem:[#allocation59_spill] sm:$0xff] }
  0xf1   :  { %vm1022_vm12 = vcmp.ge.s32.totalorder %v9924_v49, 2  ;;  %v10464_v60 = vadd.s32 13, %v1046_v24  ;;  %v996_v0 = vsel %vm983_vm11, %v14371_v48, 0  ;;  %vm958_vm14 = vcmp.ge.s32.totalorder %v9957_v58, 2 }
  0xf2   :  { %14365 = vst [vmem:[#allocation12_spill] sm:$0xff] %v10454_v33  ;;  %1351 = vperm.xlu0 %9268, %v10454_v33   ;;  %v1035_v30 = vsel %vm1022_vm12, %v14372_v52, 0  ;;  %v1047_v37 = vadd.s32 %v1034_v63, %v1008_v13  ;;  %v1009_v3 = vadd.s32 %v996_v0, %v970_v7  ;;  %v971_v50 = vsel %vm958_vm14, %v14373_v1, 0  ;;  %v14376_v63 = vld [vmem:[#allocation63_spill] sm:$0xff]  ;;  %v10479_v13 = vpop.permute.xlu1 %1087  ;;  %v14378_v1 = vld [vmem:[#allocation49_spill] sm:$0xff]  ;;  %v14379_v33 = vld [vmem:[#allocation52_spill] sm:$0xff] }
  0xf3   :  { %14370 = vst [vmem:[#allocation18_spill] sm:$0xff] %v10464_v60  ;;  %vm984_vm10 = vcmp.ge.s32.totalorder %v9965_v43, 2  ;;  %1354 = vperm.xlu1 %9269, %v10464_v60   ;;  %vm1023_vm15 = vcmp.ge.s32.totalorder %v9951_v38, 2  ;;  %vm959_vm0 = vcmp.ge.s32.totalorder %v9980_v56, 2  ;;  %vm985_vm1 = vcmp.ge.s32.totalorder %v9988_v29, 2  ;;  %14377 = vst [vmem:[#allocation24_spill] sm:$0xff] %v10479_v13 }
  0xf4   :  { %v997_v40 = vsel %vm984_vm10, %v14374_v17, 0  ;;  %v10476_v24 = vadd.s32 13, %v1047_v37  ;;  %v1048_v48 = vadd.s32 %v1035_v30, %v1009_v3  ;;  %v1036_v0 = vsel %vm1023_vm15, %v14376_v63, 0  ;;  %v10485_v17 = vpop.permute.xlu0 %1090  ;;  %v14383_v63 = vld [vmem:[#allocation74_spill] sm:$0xff] }
  0xf5   :  { %v1010_v52 = vadd.s32 %v997_v40, %v971_v50  ;;  %v972_v7 = vsel %vm959_vm0, %v14378_v1, 0  ;;  %v998_v60 = vsel %vm985_vm1, %v14379_v33, 0  ;;  %vm1024_vm5 = vcmp.ge.s32.totalorder %v9977_v20, 2  ;;  %14380 = vst [vmem:[#allocation42_spill] sm:$0xff] %v10485_v17  ;;  %v14382_v50 = vld [vmem:[#allocation55_spill] sm:$0xff]  ;;  %v14385_v17 = vld [vmem:[#allocation77_spill] sm:$0xff] }
  0xf6   :  { %14375 = vst [vmem:[#allocation21_spill] sm:$0xff] %v10476_v24  ;;  %vm960_vm2 = vcmp.ge.s32.totalorder %v10015_v55, 2  ;;  %1357 = vperm.xlu0 %9268, %v10476_v24   ;;  %v10488_v37 = vadd.s32 13, %v1048_v48  ;;  %v1011_v3 = vadd.s32 %v998_v60, %v972_v7  ;;  %v1037_v40 = vsel %vm1024_vm5, %v14382_v50, 0 }
  0xf7   :  { %v1049_v30 = vadd.s32 %v1036_v0, %v1010_v52  ;;  %v973_v13 = vsel %vm960_vm2, %v14383_v63, 0  ;;  %vm986_vm13 = vcmp.ge.s32.totalorder %v10017_v22, 2  ;;  %vm1025_vm6 = vcmp.ge.s32.totalorder %v10004_v27, 2  ;;  %v14386_v0 = vld [vmem:[#allocation66_spill] sm:$0xff]  ;;  %v14388_v63 = vld [vmem:[#allocation69_spill] sm:$0xff] }
  0xf8   :  { %14381 = vst [vmem:[#allocation45_spill] sm:$0xff] %v10488_v37  ;;  %vm961_vm4 = vcmp.ge.s32.totalorder %v10038_v4, 2  ;;  %1360 = vperm.xlu1 %9269, %v10488_v37   ;;  %v1050_v1 = vadd.s32 %v1037_v40, %v1011_v3  ;;  %v999_v48 = vsel %vm986_vm13, %v14385_v17, 0  ;;  %v1038_v52 = vsel %vm1025_vm6, %v14258_v57, 0  ;;  %v10509_v17 = vpop.permute.xlu1 %1093  ;;  %v14391_v3 = vld [vmem:[#allocation88_spill] sm:$0xff] }
  0xf9   :  { %v10496_v33 = vadd.s32 13, %v1049_v30  ;;  %v1012_v60 = vadd.s32 %v999_v48, %v973_v13  ;;  %v974_v7 = vsel %vm961_vm4, %v14386_v0, 0  ;;  %vm987_vm7 = vcmp.ge.s32.totalorder %v10040_v12, 2  ;;  %v14389_v30 = vld [vmem:[#allocation70_spill] sm:$0xff]  ;;  %14390 = vst [vmem:[#allocation37_spill] sm:$0xff] %v10509_v17  ;;  %v10513_v48 = vpop.permute.xlu0 %1096 }
  0xfa   :  { %vm1026_vm8 = vcmp.ge.s32.totalorder %v10032_v47, 2  ;;  %v10504_v50 = vadd.s32 13, %v1050_v1  ;;  %v1000_v37 = vsel %vm987_vm7, %v14388_v63, 0  ;;  %vm962_vm3 = vcmp.ge.s32.totalorder %v10063_v8, 2  ;;  %14392 = vst [vmem:[#allocation38_spill] sm:$0xff] %v10513_v48  ;;  %v14395_v63 = vld [vmem:[#allocation81_spill] sm:$0xff] }
  0xfb   :  { %14384 = vst [vmem:[#allocation47_spill] sm:$0xff] %v10496_v33  ;;  %1363 = vperm.xlu0 %9268, %v10496_v33   ;;  %v1039_v24 = vsel %vm1026_vm8, %v14389_v30, 0  ;;  %v1051_v57 = vadd.s32 %v1038_v52, %v1012_v60  ;;  %v1013_v13 = vadd.s32 %v1000_v37, %v974_v7  ;;  %v975_v40 = vsel %vm962_vm3, %v14391_v3, 0  ;;  %v14394_v60 = vld [vmem:[#allocation93_spill] sm:$0xff]  ;;  %v14396_v3 = vld [vmem:[#allocation84_spill] sm:$0xff]  ;;  %v14398_v33 = vld [vmem:[#allocation86_spill] sm:$0xff] }
  0xfc   :  { %14387 = vst [vmem:[#allocation34_spill] sm:$0xff] %v10504_v50  ;;  %vm988_vm9 = vcmp.ge.s32.totalorder %v10071_v46, 2  ;;  %1366 = vperm.xlu1 %9269, %v10504_v50   ;;  %vm1027_vm11 = vcmp.ge.s32.totalorder %v10057_v61, 2  ;;  %vm963_vm12 = vcmp.ge.s32.totalorder %v10084_v35, 2  ;;  %vm989_vm14 = vcmp.ge.s32.totalorder %v10092_v31, 2 }
  0xfd   :  { %v1001_v1 = vsel %vm988_vm9, %v14265_v28, 0  ;;  %v10520_v0 = vadd.s32 13, %v1051_v57  ;;  %v1052_v52 = vadd.s32 %v1039_v24, %v1013_v13  ;;  %v1040_v7 = vsel %vm1027_vm11, %v14394_v60, 0  ;;  %v10533_v24 = vpop.permute.xlu1 %1099 }
  0xfe   :  { %v1014_v37 = vadd.s32 %v1001_v1, %v975_v40  ;;  %v976_v30 = vsel %vm963_vm12, %v14395_v63, 0  ;;  %v1002_v48 = vsel %vm989_vm14, %v14396_v3, 0  ;;  %vm1028_vm10 = vcmp.ge.s32.totalorder %v10081_v42, 2  ;;  %v14400_v40 = vld [vmem:[#allocation97_spill] sm:$0xff]  ;;  %v14404_v63 = vld [vmem:[#allocation26_spill] sm:$0xff]  ;;  %v14405_v3 = vld [vmem:[#allocation28_spill] sm:$0xff] }
  0xff   :  { %14393 = vst [vmem:[#allocation56_spill] sm:$0xff] %v10520_v0  ;;  %1369 = vperm.xlu0 %9268, %v10520_v0   ;;  %v10527_v28 = vadd.s32 13, %v1052_v52  ;;  %v1015_v17 = vadd.s32 %v1002_v48, %v976_v30  ;;  %v1041_v36 = vsel %vm1028_vm10, %v14398_v33, 0  ;;  %vm964_vm15 = vcmp.ge.s32.totalorder %v10112_v6, 2  ;;  %v14401_v52 = vld [vmem:[#allocation99_spill] sm:$0xff]  ;;  %v10540_v48 = vpop.permute.xlu0 %1102 }
 0x100   :  { %v1053_v50 = vadd.s32 %v1040_v7, %v1014_v37  ;;  %vm990_vm0 = vcmp.ge.s32.totalorder %v10114_v26, 2  ;;  %vm1029_vm1 = vcmp.ge.s32.totalorder %v10106_v25, 2  ;;  %v977_v1 = vsel %vm964_vm15, %v14400_v40, 0 }
 0x101   :  { %14397 = vst [vmem:[#allocation59_spill] sm:$0xff] %v10527_v28  ;;  %1372 = vperm.xlu1 %9269, %v10527_v28   ;;  %v1054_v13 = vadd.s32 %v1041_v36, %v1015_v17  ;;  %v1003_v37 = vsel %vm990_vm0, %v14401_v52, 0  ;;  %v1042_v60 = vsel %vm1029_vm1, %v9775_v5, 0  ;;  %vm640_vm5 = vcmp.eq.s32.totalorder %v9802_v32, 2  ;;  %v14409_v52 = vld [vmem:[#allocation40_spill] sm:$0xff] }
 0x102   :  { %v10536_v57 = vadd.s32 13, %v1053_v50  ;;  %v1016_v33 = vadd.s32 %v1003_v37, %v977_v1  ;;  %vm666_vm2 = vcmp.eq.s32.totalorder %v9805_v14, 2  ;;  %vm705_vm13 = vcmp.eq.s32.totalorder %v9794_v41, 2  ;;  %v14403_v50 = vld [vmem:[#allocation29_spill] sm:$0xff]  ;;  %v14407_v1 = vld [vmem:[#allocation39_spill] sm:$0xff]  ;;  %v10559_v14 = vpop.permute.xlu1 %1105  ;;  %v14524_v28 = vld [vmem:[#allocation60_spill] sm:$0xff] }
 0x103   :  { %v10544_v7 = vadd.s32 13, %v1054_v13  ;;  %v653_v17 = vsel %vm640_vm5, %v14403_v50, 0.0  ;;  %v679_v30 = vsel %vm666_vm2, %v14404_v63, 0.0  ;;  %v718_v40 = vsel %vm705_vm13, %v14405_v3, 0.0  ;;  %14408 = vst [vmem:[#allocation55_spill] sm:$0xff] %v10559_v14  ;;  %v10564_v50 = vpop.permute.xlu0 %1108  ;;  %v14415_v63 = vld [vmem:[#allocation19_spill] sm:$0xff] }
 0x104   :  { %14399 = vst [vmem:[#allocation63_spill] sm:$0xff] %v10536_v57  ;;  %1375 = vperm.xlu0 %9268, %v10536_v57   ;;  %v1055_v36 = vadd.s32 %v1042_v60, %v1016_v33  ;;  %v692_v5 = vadd.f32 %v679_v30, %v653_v17  ;;  %vm641_vm6 = vcmp.eq.s32.totalorder %v9816_v11, 2  ;;  %vm667_vm4 = vcmp.eq.s32.totalorder %v9818_v45, 2  ;;  %v14410_v33 = vld [vmem:[#allocation41_spill] sm:$0xff]  ;;  %14411 = vst [vmem:[#allocation74_spill] sm:$0xff] %v10564_v50  ;;  %v14416_v3 = vld [vmem:[#allocation22_spill] sm:$0xff] }
 0x105   :  { %14402 = vst [vmem:[#allocation49_spill] sm:$0xff] %v10544_v7  ;;  %1378 = vperm.xlu1 %9269, %v10544_v7   ;;  %v654_v32 = vsel %vm641_vm6, %v14407_v1, 0.0  ;;  %vm706_vm7 = vcmp.eq.s32.totalorder %v9812_v62, 2  ;;  %v680_v37 = vsel %vm667_vm4, %v14409_v52, 0.0  ;;  %vm642_vm8 = vcmp.eq.s32.totalorder %v9855_v19, 2  ;;  %v14413_v62 = vld [vmem:[#allocation125_spill] sm:$0xff] }
 0x106   :  { %v10554_v13 = vadd.s32 13, %v1055_v36  ;;  %v731_v41 = vadd.f32 %v718_v40, %v692_v5  ;;  %v719_v60 = vsel %vm706_vm7, %v14410_v33, 0.0  ;;  %v693_v11 = vadd.f32 %v680_v37, %v654_v32  ;;  %v14412_v36 = vld [vmem:[#allocation23_spill] sm:$0xff]  ;;  %v14417_v1 = vld [vmem:[#allocation32_spill] sm:$0xff]  ;;  %v14420_v52 = vld [vmem:[#allocation33_spill] sm:$0xff] }
 0x107   :  { %v655_v17 = vsel %vm642_vm8, %v14412_v36, 0.0  ;;  %vm668_vm3 = vcmp.eq.s32.totalorder %v9857_v10, 2  ;;  %vm707_vm9 = vcmp.eq.s32.totalorder %v9842_v59, 2  ;;  %vm643_vm11 = vcmp.eq.s32.totalorder %v9876_v21, 2  ;;  %v14418_v59 = vld [vmem:[#allocation127_spill] sm:$0xff]  ;;  %v14422_v36 = vld [vmem:[#allocation50_spill] sm:$0xff] }
 0x108   :  { %14406 = vst [vmem:[#allocation52_spill] sm:$0xff] %v10554_v13  ;;  %1381 = vperm.xlu0 %9268, %v10554_v13   ;;  %v10571_v45 = vsub.f32 %v731_v41, %v14413_v62  ;;  %v681_v30 = vsel %vm668_vm3, %v14415_v63, 0.0  ;;  %v720_v40 = vsel %vm707_vm9, %v14416_v3, 0.0  ;;  %v732_v5 = vadd.f32 %v719_v60, %v693_v11  ;;  %v14421_v33 = vld [vmem:[#allocation35_spill] sm:$0xff]  ;;  %v10586_v11 = vpop.permute.xlu1 %1125  ;;  %v2917_v7 = vld [vmem:[#allocation5 + $0x38] sm:$0x7] }
 0x109   :  { %v694_v19 = vadd.f32 %v681_v30, %v655_v17  ;;  %v656_v32 = vsel %vm643_vm11, %v14417_v1, 0.0  ;;  %vm669_vm12 = vcmp.eq.s32.totalorder %v9880_v51, 2  ;;  %vm708_vm14 = vcmp.eq.s32.totalorder %v9872_v39, 2  ;;  %v10591_v51 = vpop.permute.xlu0 %1130  ;;  %v14423_v39 = vld [vmem:[#allocation129_spill] sm:$0xff]  ;;  %v14425_v62 = vld [vmem:[#allocation51_spill] sm:$0xff] }
 0x10a   :  { %14414 = vst [vmem:[#allocation77_spill] sm:$0xff] %v10571_v45  ;;  %1398 = vperm.xlu1 %9269, %v10571_v45   ;;  %vm644_vm10 = vcmp.eq.s32.totalorder %v9907_v34, 2  ;;  %v10582_v10 = vsub.f32 %v732_v5, %v14418_v59  ;;  %v682_v37 = vsel %vm669_vm12, %v14420_v52, 0.0  ;;  %v721_v60 = vsel %vm708_vm14, %v14421_v33, 0.0  ;;  %v14426_v30 = vld [vmem:[#allocation53_spill] sm:$0xff]  ;;  %v14430_v59 = vld [vmem:[#allocation44_spill] sm:$0xff] }
 0x10b   :  { %v733_v41 = vadd.f32 %v720_v40, %v694_v19  ;;  %v695_v21 = vadd.f32 %v682_v37, %v656_v32  ;;  %v657_v17 = vsel %vm644_vm10, %v14422_v36, 0.0  ;;  %vm670_vm15 = vcmp.eq.s32.totalorder %v9909_v9, 2  ;;  %v14427_v9 = vld [vmem:[#allocation43_spill] sm:$0xff]  ;;  %v14431_v52 = vld [vmem:[#allocation48_spill] sm:$0xff]  ;;  %v14520_v14 = vld [vmem:[#allocation45_spill] sm:$0xff] }
 0x10c   :  { %14419 = vst [vmem:[#allocation66_spill] sm:$0xff] %v10582_v10  ;;  %vm709_vm0 = vcmp.eq.s32.totalorder %v9896_v16, 2  ;;  %1403 = vperm.xlu0 %9268, %v10582_v10   ;;  %v683_v63 = vsel %vm670_vm15, %v14425_v62, 0.0  ;;  %vm645_vm1 = vcmp.eq.s32.totalorder %v9930_v2, 2  ;;  %vm671_vm5 = vcmp.eq.s32.totalorder %v9932_v44, 2  ;;  %v14428_v16 = vld [vmem:[#allocation131_spill] sm:$0xff]  ;;  %v10613_v44 = vpop.permute.xlu1 %1135 }
 0x10d   :  { %v10595_v34 = vsub.f32 %v733_v41, %v14423_v39  ;;  %v722_v3 = vsel %vm709_vm0, %v14426_v30, 0.0  ;;  %v734_v40 = vadd.f32 %v721_v60, %v695_v21  ;;  %v696_v5 = vadd.f32 %v683_v63, %v657_v17  ;;  %v14432_v2 = vld [vmem:[#allocation62_spill] sm:$0xff]  ;;  %v14435_v21 = vld [vmem:[#allocation64_spill] sm:$0xff]  ;;  %v14436_v17 = vld [vmem:[#allocation65_spill] sm:$0xff]  ;;  %v10621_v62 = vpop.permute.xlu0 %1140 }
 0x10e   :  { %v658_v19 = vsel %vm645_vm1, %v14427_v9, 0.0  ;;  %vm710_vm2 = vcmp.eq.s32.totalorder %v9924_v49, 2  ;;  %vm646_vm13 = vcmp.eq.s32.totalorder %v9957_v58, 2  ;;  %v684_v41 = vsel %vm671_vm5, %v14430_v59, 0.0  ;;  %v14433_v58 = vld [vmem:[#allocation133_spill] sm:$0xff]  ;;  %v14444_v59 = vld [vmem:[#allocation76_spill] sm:$0xff] }
 0x10f   :  { %14424 = vst [vmem:[#allocation69_spill] sm:$0xff] %v10595_v34  ;;  %1408 = vperm.xlu1 %9269, %v10595_v34   ;;  %v10606_v1 = vsub.f32 %v734_v40, %v14428_v16  ;;  %v735_v32 = vadd.f32 %v722_v3, %v696_v5  ;;  %v723_v37 = vsel %vm710_vm2, %v14431_v52, 0.0  ;;  %v697_v33 = vadd.f32 %v684_v41, %v658_v19  ;;  %v14439_v5 = vld [vmem:[#allocation58_spill] sm:$0xff] }
 0x110   :  { %v659_v60 = vsel %vm646_vm13, %v14432_v2, 0.0  ;;  %vm672_vm6 = vcmp.eq.s32.totalorder %v9965_v43, 2  ;;  %vm711_vm4 = vcmp.eq.s32.totalorder %v9951_v38, 2  ;;  %vm647_vm7 = vcmp.eq.s32.totalorder %v9980_v56, 2  ;;  %v14437_v38 = vld [vmem:[#allocation57_spill] sm:$0xff]  ;;  %v10643_v52 = vpop.permute.xlu1 %1145 }
 0x111   :  { %14429 = vst [vmem:[#allocation70_spill] sm:$0xff] %v10606_v1  ;;  %1413 = vperm.xlu0 %9268, %v10606_v1   ;;  %v10617_v49 = vsub.f32 %v735_v32, %v14433_v58  ;;  %v685_v36 = vsel %vm672_vm6, %v14435_v21, 0.0  ;;  %v724_v39 = vsel %vm711_vm4, %v14436_v17, 0.0  ;;  %v736_v63 = vadd.f32 %v723_v37, %v697_v33  ;;  %v14440_v56 = vld [vmem:[#allocation73_spill] sm:$0xff]  ;;  %v10646_v33 = vpop.permute.xlu0 %1150 }
 0x112   :  { %v698_v30 = vadd.f32 %v685_v36, %v659_v60  ;;  %v660_v43 = vsel %vm647_vm7, %v14437_v38, 0.0  ;;  %vm673_vm8 = vcmp.eq.s32.totalorder %v9988_v29, 2  ;;  %vm712_vm3 = vcmp.eq.s32.totalorder %v9977_v20, 2  ;;  %v14441_v29 = vld [vmem:[#allocation136_spill] sm:$0xff]  ;;  %v14446_v2 = vld [vmem:[#allocation137_spill] sm:$0xff] }
 0x113   :  { %14434 = vst [vmem:[#allocation88_spill] sm:$0xff] %v10617_v49  ;;  %1418 = vperm.xlu1 %9269, %v10617_v49   ;;  %vm648_vm9 = vcmp.eq.s32.totalorder %v10015_v55, 2  ;;  %v10630_v3 = vsub.f32 %v736_v63, %v10319_v15  ;;  %v686_v9 = vsel %vm673_vm8, %v14439_v5, 0.0  ;;  %v725_v19 = vsel %vm712_vm3, %v14316_v53, 0.0  ;;  %v14443_v55 = vld [vmem:[#allocation75_spill] sm:$0xff]  ;;  %v14448_v36 = vld [vmem:[#allocation72_spill] sm:$0xff] }
 0x114   :  { %v737_v40 = vadd.f32 %v724_v39, %v698_v30  ;;  %v699_v16 = vadd.f32 %v686_v9, %v660_v43  ;;  %v661_v32 = vsel %vm648_vm9, %v14440_v56, 0.0  ;;  %vm674_vm11 = vcmp.eq.s32.totalorder %v10017_v22, 2  ;;  %v14449_v39 = vld [vmem:[#allocation87_spill] sm:$0xff]  ;;  %v14452_v30 = vld [vmem:[#allocation90_spill] sm:$0xff] }
 0x115   :  { %14438 = vst [vmem:[#allocation93_spill] sm:$0xff] %v10630_v3  ;;  %vm713_vm12 = vcmp.eq.s32.totalorder %v10004_v27, 2  ;;  %1423 = vperm.xlu0 %9268, %v10630_v3   ;;  %v687_v15 = vsel %vm674_vm11, %v14443_v55, 0.0  ;;  %vm649_vm14 = vcmp.eq.s32.totalorder %v10038_v4, 2  ;;  %v14445_v27 = vld [vmem:[#allocation68_spill] sm:$0xff]  ;;  %vm675_vm10 = vcmp.eq.s32.totalorder %v10040_v12, 2 }
 0x116   :  { %v10639_v20 = vsub.f32 %v737_v40, %v14441_v29  ;;  %v726_v41 = vsel %vm713_vm12, %v14444_v59, 0.0  ;;  %v738_v37 = vadd.f32 %v725_v19, %v699_v16  ;;  %v700_v53 = vadd.f32 %v687_v15, %v661_v32  ;;  %v10668_v40 = vpop.permute.xlu1 %1155  ;;  %v14456_v16 = vld [vmem:[#allocation82_spill] sm:$0xff]  ;;  %v14457_v56 = vld [vmem:[#allocation83_spill] sm:$0xff] }
 0x117   :  { %v662_v22 = vsel %vm649_vm14, %v14445_v27, 0.0  ;;  %vm714_vm15 = vcmp.eq.s32.totalorder %v10032_v47, 2  ;;  %vm650_vm0 = vcmp.eq.s32.totalorder %v10063_v8, 2  ;;  %v688_v21 = vsel %vm675_vm10, %v14325_v54, 0.0  ;;  %v14451_v47 = vld [vmem:[#allocation89_spill] sm:$0xff]  ;;  %v14458_v55 = vld [vmem:[#allocation94_spill] sm:$0xff] }
 0x118   :  { %14442 = vst [vmem:[#allocation81_spill] sm:$0xff] %v10639_v20  ;;  %1428 = vperm.xlu1 %9269, %v10639_v20   ;;  %v10654_v60 = vsub.f32 %v738_v37, %v14446_v2  ;;  %v739_v58 = vadd.f32 %v726_v41, %v700_v53  ;;  %v727_v4 = vsel %vm714_vm15, %v14448_v36, 0.0  ;;  %v701_v17 = vadd.f32 %v688_v21, %v662_v22  ;;  %v14462_v41 = vld [vmem:[#allocation96_spill] sm:$0xff]  ;;  %v1487_v22 = vld [vmem:[#allocation5] sm:$0xff] }
 0x119   :  { %v663_v63 = vsel %vm650_vm0, %v14449_v39, 0.0  ;;  %vm676_vm1 = vcmp.eq.s32.totalorder %v10071_v46, 2  ;;  %vm715_vm5 = vcmp.eq.s32.totalorder %v10057_v61, 2  ;;  %vm651_vm2 = vcmp.eq.s32.totalorder %v10084_v35, 2  ;;  %v14453_v46 = vld [vmem:[#allocation80_spill] sm:$0xff]  ;;  %v10675_v61 = vpop.permute.xlu0 %1160 }
 0x11a   :  { %14447 = vst [vmem:[#allocation84_spill] sm:$0xff] %v10654_v60  ;;  %1433 = vperm.xlu0 %9268, %v10654_v60   ;;  %v10663_v12 = vsub.f32 %v739_v58, %v10356_v18  ;;  %v689_v8 = vsel %vm676_vm1, %v14451_v47, 0.0  ;;  %v728_v38 = vsel %vm715_vm5, %v14452_v30, 0.0  ;;  %v740_v43 = vadd.f32 %v727_v4, %v701_v17  ;;  %v14454_v18 = vld [vmem:[#allocation139_spill] sm:$0xff]  ;;  %v14463_v21 = vld [vmem:[#allocation144_spill] sm:$0xff] }
 0x11b   :  { %v702_v54 = vadd.f32 %v689_v8, %v663_v63  ;;  %v664_v5 = vsel %vm651_vm2, %v14453_v46, 0.0  ;;  %vm677_vm13 = vcmp.eq.s32.totalorder %v10092_v31, 2  ;;  %vm716_vm6 = vcmp.eq.s32.totalorder %v10081_v42, 2  ;;  %v14459_v31 = vld [vmem:[#allocation141_spill] sm:$0xff]  ;;  %v1488_v58 = vld [vmem:[#allocation5 + $0x8] sm:$0xff] }
 0x11c   :  { %14450 = vst [vmem:[#allocation86_spill] sm:$0xff] %v10663_v12  ;;  %1438 = vperm.xlu1 %9269, %v10663_v12   ;;  %vm652_vm4 = vcmp.eq.s32.totalorder %v10112_v6, 2  ;;  %v10678_v9 = vsub.f32 %v740_v43, %v14454_v18  ;;  %v690_v35 = vsel %vm677_vm13, %v14456_v16, 0.0  ;;  %v729_v32 = vsel %vm716_vm6, %v14457_v56, 0.0  ;;  %v14461_v6 = vld [vmem:[#allocation95_spill] sm:$0xff]  ;;  %v14465_v63 = vld [vmem:[#allocation145_spill] sm:$0xff] }
 0x11d   :  { %v741_v19 = vadd.f32 %v728_v38, %v702_v54  ;;  %v703_v29 = vadd.f32 %v690_v35, %v664_v5  ;;  %v665_v15 = vsel %vm652_vm4, %v14458_v55, 0.0  ;;  %vm678_vm7 = vcmp.eq.s32.totalorder %v10114_v26, 2  ;;  %v10692_v2 = vpop.permute.xlu1 %1165  ;;  %v1489_v26 = vld [vmem:[#allocation5 + $0x10] sm:$0xff]  ;;  %v1490_v17 = vld [vmem:[#allocation5 + $0x18] sm:$0x7] }
 0x11e   :  { %14455 = vst [vmem:[#allocation97_spill] sm:$0xff] %v10678_v9  ;;  %vm717_vm8 = vcmp.eq.s32.totalorder %v10106_v25, 2  ;;  %1443 = vperm.xlu0 %9268, %v10678_v9   ;;  %v691_v59 = vsel %vm678_vm7, %v14461_v6, 0.0  ;;  %v1536_v39 = vand.u32 4294901760, %v1487_v22  ;;  %v13869_v8 = vmov 0.0|0.0   ;;  %v14475_v55 = vld [vmem:[#allocation20_spill] sm:$0xff] }
 0x11f   :  { %v10687_v42 = vsub.f32 %v741_v19, %v14459_v31  ;;  %v730_v37 = vsel %vm717_vm8, %v14462_v41, 0.0  ;;  %v742_v53 = vadd.f32 %v729_v32, %v703_v29  ;;  %v704_v27 = vadd.f32 %v691_v59, %v665_v15  ;;  %8590 = vmatprep.subr.bf16.mxu0 %v13869_v8  ;;  %8626 = vmatprep.subr.bf16.mxu1 %v13869_v8  ;;  %v14476_v31 = vld [vmem:[#allocation36_spill] sm:$0xff]  ;;  %v14477_v6 = vld [vmem:[#allocation30_spill] sm:$0xff] }
 0x120   :  { %v1539_v30 = vand.u32 4294901760, %v1488_v58  ;;  %vm1531_vm3 = vcmask 1042432   ;;  %v1542_v38 = vand.u32 4294901760, %v1489_v26  ;;  %v10704_v43 = vsub.f32 %v1487_v22, %v1536_v39 }
 0x121   :  { %14460 = vst [vmem:[#allocation99_spill] sm:$0xff] %v10687_v42  ;;  %1448 = vperm.xlu1 %9269, %v10687_v42   ;;  %v10695_v25 = vsub.f32 %v742_v53, %v14463_v21  ;;  %v743_v36 = vadd.f32 %v730_v37, %v704_v27  ;;  %v10697_v4 = vpop.permute.xlu0 %1170  ;;  %v1533_v54 = vsel %vm1531_vm3, %v1490_v17, 0  ;;  %v9411_v35 = vmov 1   ;;  %v14479_v37 = vld [vmem:[#allocation16_spill] sm:$0xff]  ;;  %v14480_v53 = vld [vmem:[#allocation46_spill] sm:$0xff] }
 0x122   :  { %14467 = vst [vmem:[#allocation28_spill] sm:$0xff] %v10704_v43  ;;  %v10709_v46 = vpack.c.bf16 %v1539_v30, %v1536_v39  ;;  %v10711_v5 = vsub.f32 %v1488_v58, %v1539_v30  ;;  %v1545_v18 = vand.u32 4294901760, %v1533_v54  ;;  %v10713_v19 = vsub.f32 %v1489_v26, %v1542_v38  ;;  %v14481_v58 = vld [vmem:[#allocation54_spill] sm:$0xff]  ;;  %v14482_v26 = vld [vmem:[#allocation61_spill] sm:$0xff] }
 0x123   :  { %14464 = vst [vmem:[#allocation29_spill] sm:$0xff] %v10695_v25  ;;  %1453 = vperm.xlu0 %9268, %v10695_v25   ;;  %v10701_v47 = vsub.f32 %v743_v36, %v14465_v63  ;;  %vm9412_vm9 = vmmov 0   ;;  %v13867_v15 = vmov 0.0   ;;  %v14483_v36 = vld [vmem:[#allocation67_spill] sm:$0xff]  ;;  %v14484_v39 = vld [vmem:[#allocation78_spill] sm:$0xff]  ;;  %v14485_v30 = vld [vmem:[#allocation85_spill] sm:$0xff] }
 0x124   :  { %14468 = vst [vmem:[#allocation39_spill] sm:$0xff] %v10709_v46  ;;  %14469 = vst [vmem:[#allocation40_spill] sm:$0xff] %v10711_v5  ;;  %8592 = vmatpush3.bf16.msra.mxu0 %v10709_v46  ;;  %v10720_v32 = vpack.c.bf16 %v1545_v18, %v1542_v38  ;;  %v10722_v29 = vsub.f32 %v1533_v54, %v1545_v18  ;;  %7470 = vmatprep.mubr.msk.f32.mxu0 %vm9412_vm9, %v13867_v15  ;;  %v14486_v54 = vld [vmem:[#allocation101_spill] sm:$0xff]  ;;  %vm1491_vm8 = vcmask 220160  }
 0x125   :  { %14466 = vst [vmem:[#allocation26_spill] sm:$0xff] %v10701_v47  ;;  %1458 = vperm.xlu1 %9269, %v10701_v47   ;;  %14470 = vst [vmem:[#allocation41_spill] sm:$0xff] %v10713_v19  ;;  %8593 = vmatprep.subr.bf16.mxu0 %v13869_v8 }
 0x126   :  { %14473 = vst [vmem:[#allocation19_spill] sm:$0xff] %v10720_v32  ;;  %14474 = vst [vmem:[#allocation22_spill] sm:$0xff] %v10722_v29  ;;  %7752 = vmatprep.mubr.msk.f32.mxu1 %vm9412_vm9, %v13867_v15 }
 0x127   :  { %v10715_v16 = vpop.permute.xlu1 %1175  ;;  %9270 = vset.pattern.permute.xlu0 %v9411_v35 }
 0x128   :  { %14471 = vst [vmem:[#allocation23_spill] sm:$0xff] %v10715_v16  ;;  %2537 = vperm.xlu0 %9270, %v14475_v55   ;;  %8595 = vmatpush3.bf16.msra.mxu0 %v10720_v32  ;;  %v14488_v32 = vld [vmem:[#allocation126_spill] sm:$0xff] }
 0x129   :  { %9271 = vset.pattern.permute.xlu1 %v9411_v35  ;;  %8596 = vmatprep.subr.bf16.mxu0 %v13869_v8  ;;  %v14487_v35 = vld [vmem:[#allocation114_spill] sm:$0xff]  ;;  %v13878_v8 = vand.u32 4294901760, %v10704_v43 }
 0x12a   :  { %2540 = vperm.xlu1 %9271, %v14476_v31   ;;  %v14489_v31 = vld [vmem:[#allocation115_spill] sm:$0xff]  ;;  %v2914_v55 = vld [vmem:[#allocation5 + $0x20] sm:$0xff] }
 0x12b   :  { %v10717_v56 = vpop.permute.xlu0 %1180 }
 0x12c   :  { %14472 = vst [vmem:[#allocation125_spill] sm:$0xff] %v10717_v56  ;;  %2546 = vperm.xlu0 %9270, %v14477_v6   ;;  %v13888_v6 = vand.u32 4294901760, %v10722_v29 }
 0x12e   :  { %2543 = vperm.xlu1 %9271, %v14479_v37  }
 0x130   :  { %v10733_v59 = vpop.permute.xlu1 %1185  ;;  %v10735_v41 = vpop.permute.xlu0 %1202  ;;  %2552 = vperm.xlu0 %9270, %v14480_v53   ;;  %v13885_v53 = vand.u32 4294901760, %v10713_v19 }
 0x131   :  { %14478 = vst [vmem:[#allocation32_spill] sm:$0xff] %v10733_v59 }
 0x132   :  { %2549 = vperm.xlu1 %9271, %v14481_v58  }
 0x134   :  { %v10740_v27 = vpop.permute.xlu1 %1205  ;;  %2558 = vperm.xlu0 %9270, %v14482_v26  }
 0x135   :  { %v10742_v22 = vpop.permute.xlu0 %1208 }
 0x136   :  { %2555 = vperm.xlu1 %9271, %v14483_v36   ;;  %v13877_v36 = vand.u32 4294901760, %v10711_v5 }
 0x138   :  { %v10746_v21 = vpop.permute.xlu1 %1211  ;;  %2564 = vperm.xlu0 %9270, %v14484_v39   ;;  %v1745_v46 = vsub.f32 %v10711_v5, %v13877_v36  ;;  %v1752_v36 = vsub.f32 %v10713_v19, %v13885_v53 }
 0x13a   :  { %v10749_v17 = vpop.permute.xlu0 %1214  ;;  %2561 = vperm.xlu1 %9271, %v14485_v30   ;;  %v1738_v30 = vsub.f32 %v10704_v43, %v13878_v8  ;;  %v1746_v26 = vand.u32 4294901760, %v1745_v46  ;;  %v1759_v8 = vsub.f32 %v10722_v29, %v13888_v6 }
 0x13c   :  { %v10752_v63 = vpop.permute.xlu1 %1217  ;;  %2589 = vperm.xlu0 %9270, %v14486_v54   ;;  %v1739_v39 = vand.u32 4294901760, %v1738_v30  ;;  %v14491_v30 = vld [vmem:[#allocation128_spill] sm:$0xff] }
 0x13e   :  { %2654 = vperm.xlu1 %9271, %v14487_v35   ;;  %v10783_v37 = vpack.c.bf16 %v1746_v26, %v1739_v39  ;;  %v2961_v35 = vand.u32 4294901760, %v2914_v55  ;;  %v14493_v26 = vld [vmem:[#allocation102_spill] sm:$0xff] }
 0x13f   :  { %v10755_v38 = vpop.permute.xlu0 %1220 }
 0x140   :  { %2784 = vperm.xlu0 %9270, %v10436_v23   ;;  %v10802_v6 = vsub.f32 %v2914_v55, %v2961_v35  ;;  %v14500_v55 = vld [vmem:[#allocation103_spill] sm:$0xff] }
 0x141   :  { %v10758_v18 = vpop.permute.xlu1 %1223 }
 0x142   :  { %2706 = vperm.xlu1 %9271, %v14488_v32   ;;  %v1760_v32 = vand.u32 4294901760, %v1759_v8  ;;  %14495 = vst [vmem:[#allocation50_spill] sm:$0xff] %v10802_v6  ;;  %v2916_v8 = vld [vmem:[#allocation5 + $0x30] sm:$0xff] }
 0x143   :  { %v10761_v15 = vpop.permute.xlu0 %1226 }
 0x144   :  { %2657 = vperm.xlu0 %9270, %v14489_v31   ;;  %v1753_v31 = vand.u32 4294901760, %v1752_v36  ;;  %v2958_v36 = vsel %vm1531_vm3, %v2917_v7, 0  ;;  %v14501_v7 = vld [vmem:[#allocation116_spill] sm:$0xff] }
 0x145   :  { %v10766_v58 = vpop.permute.xlu1 %1229  ;;  %v2970_v57 = vand.u32 4294901760, %v2958_v36 }
 0x146   :  { %2836 = vperm.xlu1 %9271, %v10571_v45   ;;  %v2915_v45 = vld [vmem:[#allocation5 + $0x28] sm:$0xff]  ;;  %v10797_v47 = vpack.c.bf16 %v1760_v32, %v1753_v31  ;;  %v14498_v31 = vmov 0.0|0.0  }
 0x147   :  { %v2964_v13 = vand.u32 4294901760, %v2915_v45  ;;  %v14497_v32 = vld [vmem:[#allocation31_spill] sm:$0xff] }
 0x148   :  { %v10776_v54 = vpop.permute.xlu0 %1232  ;;  %2710 = vperm.xlu0 %9270, %v14491_v30  }
 0x149   :  { %v10799_v53 = vpack.c.bf16 %v2964_v13, %v2961_v35  ;;  %v10804_v30 = vsub.f32 %v2915_v45, %v2964_v13  ;;  %v14502_v35 = vld [vmem:[#allocation12_spill] sm:$0xff] }
 0x14a   :  { %v10781_v23 = vpop.permute.xlu1 %1235  ;;  %2593 = vperm.xlu1 %9271, %v14493_v26   ;;  %v2967_v26 = vand.u32 4294901760, %v2916_v8 }
 0x14b   :  { %14490 = vst [vmem:[#allocation127_spill] sm:$0xff] %v10781_v23  ;;  %14494 = vst [vmem:[#allocation35_spill] sm:$0xff] %v10799_v53  ;;  %8628 = vmatpush3.bf16.msra.mxu1 %v10799_v53  ;;  %v14523_v23 = vld [vmem:[#allocation47_spill] sm:$0xff] }
 0x14c   :  { %v10792_v46 = vpop.permute.xlu0 %1238  ;;  %2840 = vperm.xlu0 %9270, %v10582_v10   ;;  %14496 = vst [vmem:[#allocation129_spill] sm:$0xff] %v10804_v30  ;;  %8629 = vmatprep.subr.bf16.mxu1 %v14498_v31  ;;  %v10814_v10 = vpack.c.bf16 %v2970_v57, %v2967_v26  ;;  %v10825_v53 = vsub.f32 %v2916_v8, %v2967_v26  ;;  %v14505_v30 = vld [vmem:[#allocation130_spill] sm:$0xff]  ;;  %v14508_v26 = vld [vmem:[#allocation104_spill] sm:$0xff] }
 0x14d   :  { %14492 = vst [vmem:[#allocation33_spill] sm:$0xff] %v10792_v46  ;;  %v14522_v46 = vld [vmem:[#allocation120_spill] sm:$0xff] }
 0x14e   :  { %v10795_v39 = vpop.permute.xlu1 %1255  ;;  %2787 = vperm.xlu1 %9271, %v14497_v32   ;;  %14499 = vst [vmem:[#allocation51_spill] sm:$0xff] %v10814_v10  ;;  %14503 = vst [vmem:[#allocation53_spill] sm:$0xff] %v10825_v53  ;;  %v10827_v32 = vsub.f32 %v2958_v36, %v2970_v57  ;;  %v14510_v36 = vld [vmem:[#allocation18_spill] sm:$0xff] }
 0x14f   :  { %8631 = vmatpush3.bf16.msra.mxu1 %v10814_v10 }
 0x150   :  { %2597 = vperm.xlu0 %9270, %v14500_v55   ;;  %8632 = vmatprep.subr.bf16.mxu1 %v14498_v31  ;;  %14504 = vst [vmem:[#allocation43_spill] sm:$0xff] %v10827_v32  ;;  %v14506_v55 = vld [vmem:[#allocation117_spill] sm:$0xff] }
 0x151   :  { %v10807_v25 = vpop.permute.xlu0 %1260 }
 0x152   :  { %2660 = vperm.xlu1 %9271, %v14501_v7   ;;  %v14507_v7 = vld [vmem:[#allocation132_spill] sm:$0xff] }
 0x153   :  { %v10812_v59 = vpop.permute.xlu1 %1265 }
 0x154   :  { %2790 = vperm.xlu0 %9270, %v14502_v35   ;;  %v14512_v35 = vld [vmem:[#allocation105_spill] sm:$0xff] }
 0x155   :  { %v10817_v13 = vpop.permute.xlu0 %1270 }
 0x156   :  { %2714 = vperm.xlu1 %9271, %v14505_v30   ;;  %v14514_v30 = vld [vmem:[#allocation118_spill] sm:$0xff] }
 0x157   :  { %v10822_v45 = vpop.permute.xlu1 %1275 }
 0x158   :  { %2663 = vperm.xlu0 %9270, %v14506_v55  }
 0x15a   :  { %v10830_v6 = vpop.permute.xlu0 %1280  ;;  %2844 = vperm.xlu1 %9271, %v10595_v34  }
 0x15c   :  { %v10833_v42 = vpop.permute.xlu1 %1285  ;;  %2718 = vperm.xlu0 %9270, %v14507_v7   ;;  %v14515_v7 = vld [vmem:[#allocation21_spill] sm:$0xff] }
 0x15e   :  { %2601 = vperm.xlu1 %9271, %v14508_v26   ;;  %v14516_v26 = vld [vmem:[#allocation134_spill] sm:$0xff] }
 0x15f   :  { %v10836_v10 = vpop.permute.xlu0 %1290 }
 0x160   :  { %v10839_v50 = vpop.permute.xlu1 %1295  ;;  %2848 = vperm.xlu0 %9270, %v10606_v1   ;;  %v14517_v1 = vld [vmem:[#allocation119_spill] sm:$0xff] }
 0x162   :  { %2793 = vperm.xlu1 %9271, %v14510_v36  }
 0x163   :  { %v10842_v57 = vpop.permute.xlu0 %1300 }
 0x164   :  { %2605 = vperm.xlu0 %9270, %v14512_v35   ;;  %v14518_v35 = vld [vmem:[#allocation135_spill] sm:$0xff] }
 0x165   :  { %v10845_v8 = vpop.permute.xlu1 %1305 }
 0x166   :  { %14509 = vst [vmem:[#allocation131_spill] sm:$0xff] %v10845_v8  ;;  %2666 = vperm.xlu1 %9271, %v14514_v30   ;;  %v14519_v30 = vld [vmem:[#allocation106_spill] sm:$0xff] }
 0x168   :  { %v10848_v55 = vpop.permute.xlu0 %1310  ;;  %2796 = vperm.xlu0 %9270, %v14515_v7  }
 0x169   :  { %14511 = vst [vmem:[#allocation44_spill] sm:$0xff] %v10848_v55  ;;  %v10851_v34 = vpop.permute.xlu1 %1315  ;;  %v14521_v55 = vld [vmem:[#allocation107_spill] sm:$0xff] }
 0x16a   :  { %14513 = vst [vmem:[#allocation48_spill] sm:$0xff] %v10851_v34  ;;  %2722 = vperm.xlu1 %9271, %v14516_v26  }
 0x16c   :  { %v1346_v32 = vpop.permute.xlu0 %1345  ;;  %2669 = vperm.xlu0 %9270, %v14517_v1  }
 0x16e   :  { %v10856_v53 = vpop.permute.xlu1 %1348  ;;  %2852 = vperm.xlu1 %9271, %v10617_v49   ;;  %v1069_v49 = vlaneseq }
 0x170   :  { %2726 = vperm.xlu0 %9270, %v14518_v35  }
 0x171   :  { %v10859_v56 = vpop.permute.xlu0 %1351 }
 0x172   :  { %v10862_v36 = vpop.permute.xlu1 %1354  ;;  %2609 = vperm.xlu1 %9271, %v14519_v30   ;;  %v14526_v30 = vld [vmem:[#allocation142_spill] sm:$0xff] }
 0x174   :  { %2856 = vperm.xlu0 %9270, %v10630_v3   ;;  %v10885_v3 = vand.u32 127, %v1069_v49  ;;  %v14527_v49 = vld [vmem:[#allocation25_spill] sm:$0xff] }
 0x175   :  { %v10865_v34 = vpop.permute.xlu0 %1357 }
 0x176   :  { %2799 = vperm.xlu1 %9271, %v14520_v14   ;;  %vm1240_vm11 = vcmp.eq.s32.totalorder %v10735_v41, %v10885_v3  ;;  %vm1110_vm12 = vcmp.eq.s32.totalorder %v14526_v30, %v10885_v3  ;;  %vm1111_vm14 = vcmp.eq.s32.totalorder %v14527_v49, %v10885_v3  ;;  %v14531_v41 = vld [vmem:[#allocation24_spill] sm:$0xff]  ;;  %v14533_v30 = vld [vmem:[#allocation42_spill] sm:$0xff]  ;;  %vm1241_vm6 = vcmp.eq.s32.totalorder %v10740_v27, %v10885_v3 }
 0x177   :  { %v10868_v7 = vpop.permute.xlu1 %1360  ;;  %vm1115_vm1 = vcmp.eq.s32.totalorder %v14531_v41, %v10885_v3  ;;  %vm1116_vm2 = vcmp.eq.s32.totalorder %v14533_v30, %v10885_v3  ;;  %v1318_v49 = vsel %vm1240_vm11, %v10795_v39, 0.0  ;;  %v14535_v41 = vld [vmem:[#allocation138_spill] sm:$0xff]  ;;  %vm1242_vm4 = vcmp.eq.s32.totalorder %v10742_v22, %v10885_v3 }
 0x178   :  { %2613 = vperm.xlu0 %9270, %v14521_v55   ;;  %v14530_v55 = vld [vmem:[#allocation13_spill] sm:$0xff]  ;;  %v1193_v39 = vsel %vm1115_vm1, %v10646_v33, 0.0  ;;  %vm1383_vm7 = vcmp.eq.s32.totalorder %v1346_v32, %v10885_v3  ;;  %vm1243_vm11 = vcmp.eq.s32.totalorder %v10746_v21, %v10885_v3  ;;  %v1320_v27 = vsel %vm1242_vm4, %v10812_v59, 0.0  ;;  %v14537_v59 = vld [vmem:[#allocation34_spill] sm:$0xff] }
 0x179   :  { %vm1114_vm0 = vcmp.eq.s32.totalorder %v14530_v55, %v10885_v3  ;;  %v1188_v55 = vsel %vm1110_vm12, %v10586_v11, 0.0  ;;  %v1319_v11 = vsel %vm1241_vm6, %v10807_v25, 0.0  ;;  %vm1244_vm12 = vcmp.eq.s32.totalorder %v10749_v17, %v10885_v3 }
 0x17a   :  { %v10871_v26 = vpop.permute.xlu0 %1363  ;;  %2672 = vperm.xlu1 %9271, %v14522_v46   ;;  %v14525_v46 = vld [vmem:[#allocation79_spill] sm:$0xff]  ;;  %v1192_v43 = vsel %vm1114_vm0, %v10643_v52, 0.0  ;;  %v1331_v5 = vadd.f32 %v1318_v49, %v1188_v55  ;;  %v1321_v22 = vsel %vm1243_vm11, %v10817_v13, 0.0  ;;  %vm1385_vm0 = vcmp.eq.s32.totalorder %v10859_v56, %v10885_v3  ;;  %v14539_v13 = vld [vmem:[#allocation109_spill] sm:$0xff] }
 0x17b   :  { %v10874_v1 = vpop.permute.xlu1 %1366  ;;  %vm1247_vm1 = vcmp.eq.s32.totalorder %v10758_v18, %v10885_v3  ;;  %vm1387_vm6 = vcmp.eq.s32.totalorder %v10865_v34, %v10885_v3  ;;  %v14542_v34 = vld [vmem:[#allocation71_spill] sm:$0xff]  ;;  %vm1119_vm4 = vcmp.eq.s32.totalorder %v10533_v24, %v10885_v3  ;;  %vm1389_vm11 = vcmp.eq.s32.totalorder %v10871_v26, %v10885_v3 }
 0x17c   :  { %2802 = vperm.xlu0 %9270, %v14523_v23   ;;  %v14528_v23 = vld [vmem:[#allocation17_spill] sm:$0xff] }
 0x17d   :  { %vm1112_vm10 = vcmp.eq.s32.totalorder %v14528_v23, %v10885_v3 }
 0x17e   :  { %v10878_v35 = vpop.permute.xlu0 %1369  ;;  %2730 = vperm.xlu1 %9271, %v14524_v28   ;;  %v14529_v28 = vld [vmem:[#allocation11_spill] sm:$0xff]  ;;  %v1190_v19 = vsel %vm1112_vm10, %v10613_v44, 0.0  ;;  %vm1384_vm10 = vcmp.eq.s32.totalorder %v10856_v53, %v10885_v3  ;;  %v1322_v53 = vsel %vm1244_vm12, %v10822_v45, 0.0  ;;  %vm1250_vm12 = vcmp.eq.s32.totalorder %v10776_v54, %v10885_v3 }
 0x17f   :  { %vm1113_vm15 = vcmp.eq.s32.totalorder %v14529_v28, %v10885_v3  ;;  %v14534_v28 = vld [vmem:[#allocation38_spill] sm:$0xff] }
 0x180   :  { %v10883_v16 = vpop.permute.xlu1 %1372  ;;  %2675 = vperm.xlu0 %9270, %v14525_v46   ;;  %v14532_v46 = vld [vmem:[#allocation37_spill] sm:$0xff]  ;;  %vm1118_vm13 = vcmp.eq.s32.totalorder %v14534_v28, %v10885_v3  ;;  %v1191_v29 = vsel %vm1113_vm15, %v10621_v62, 0.0  ;;  %v1194_v62 = vsel %vm1116_vm2, %v10668_v40, 0.0  ;;  %vm1246_vm15 = vcmp.eq.s32.totalorder %v10755_v38, %v10885_v3 }
 0x181   :  { %vm1117_vm5 = vcmp.eq.s32.totalorder %v14532_v46, %v10885_v3  ;;  %v10947_v25 = vsel %vm1118_vm13, %v10692_v2, 0.0  ;;  %v1333_v46 = vadd.f32 %v1320_v27, %v1190_v19  ;;  %v1334_v49 = vadd.f32 %v1321_v22, %v1191_v29  ;;  %v14540_v29 = vld [vmem:[#allocation121_spill] sm:$0xff] }
 0x182   :  { %2860 = vperm.xlu1 %9271, %v10639_v20   ;;  %v1189_v20 = vsel %vm1111_vm14, %v10591_v51, 0.0  ;;  %v14536_v51 = vld [vmem:[#allocation108_spill] sm:$0xff]  ;;  %v10941_v52 = vsel %vm1117_vm5, %v10675_v61, 0.0  ;;  %vm1245_vm14 = vcmp.eq.s32.totalorder %v10752_v63, %v10885_v3  ;;  %vm1248_vm5 = vcmp.eq.s32.totalorder %v10761_v15, %v10885_v3 }
 0x183   :  { %v10888_v14 = vpop.permute.xlu0 %1375  ;;  %v1332_v61 = vadd.f32 %v1319_v11, %v1189_v20  ;;  %v1323_v11 = vsel %vm1245_vm14, %v10830_v6, 0.0  ;;  %v1324_v17 = vsel %vm1246_vm15, %v10833_v42, 0.0  ;;  %vm1386_vm2 = vcmp.eq.s32.totalorder %v10862_v36, %v10885_v3 }
 0x184   :  { %v10895_v8 = vpop.permute.xlu1 %1378  ;;  %2734 = vperm.xlu0 %9270, %v14535_v41   ;;  %vm1249_vm13 = vcmp.eq.s32.totalorder %v10766_v58, %v10885_v3  ;;  %v1336_v36 = vadd.f32 %v1323_v11, %v1193_v39  ;;  %v1325_v39 = vsel %vm1247_vm1, %v10836_v10, 0.0  ;;  %vm1390_vm14 = vcmp.eq.s32.totalorder %v10874_v1, %v10885_v3  ;;  %v14548_v1 = vld [vmem:[#allocation110_spill] sm:$0xff] }
 0x185   :  { %vm1120_vm15 = vcmp.eq.s32.totalorder %v10540_v48, %v10885_v3  ;;  %vm1393_vm1 = vcmp.eq.s32.totalorder %v10888_v14, %v10885_v3 }
 0x186   :  { %2617 = vperm.xlu1 %9271, %v14536_v51   ;;  %v14586_v51 = vld [vmem:[#allocation26_spill] sm:$0xff] }
 0x187   :  { %v10915_v23 = vpop.permute.xlu0 %1381 }
 0x188   :  { %2864 = vperm.xlu0 %9270, %v10654_v60  }
 0x189   :  { %v1399_v44 = vpop.permute.xlu1 %1398 }
 0x18a   :  { %v1461_v33 = vsel %vm1383_vm7, %v1399_v44, 0.0  ;;  %2805 = vperm.xlu1 %9271, %v14537_v59   ;;  %vm1388_vm7 = vcmp.eq.s32.totalorder %v10868_v7, %v10885_v3  ;;  %v13943_v59 = vmov 3  }
 0x18b   :  { %v1474_v40 = vadd.f32 %v1461_v33, %v1331_v5  ;;  %v1404_v2 = vpop.permute.xlu0 %1403  ;;  %v1335_v33 = vadd.f32 %v1322_v53, %v1192_v43 }
 0x18c   :  { %v1462_v21 = vsel %vm1384_vm10, %v1404_v2, 0.0  ;;  %2621 = vperm.xlu0 %9270, %v14539_v13   ;;  %vm1391_vm10 = vcmp.eq.s32.totalorder %v10878_v35, %v10885_v3  ;;  %v14582_v13 = vld [vmem:[#allocation124_spill] sm:$0xff] }
 0x18d   :  { %v1493_v5 = vsel %vm1491_vm8, %v1474_v40, 0  ;;  %v1475_v20 = vadd.f32 %v1462_v21, %v1332_v61  ;;  %v1337_v61 = vadd.f32 %v1324_v17, %v1194_v62 }
 0x18e   :  { %v10966_v32 = vand.u32 4294901760, %v1493_v5  ;;  %v1409_v30 = vpop.permute.xlu1 %1408  ;;  %2678 = vperm.xlu1 %9271, %v14540_v29  }
 0x18f   :  { %v1463_v19 = vsel %vm1385_vm0, %v1409_v30, 0.0  ;;  %v1496_v28 = vsel %vm1491_vm8, %v1475_v20, 0  ;;  %vm1392_vm0 = vcmp.eq.s32.totalorder %v10883_v16, %v10885_v3 }
 0x190   :  { %14538 = vst [vmem:[#allocation62_spill] sm:$0xff] %v10966_v32  ;;  %v10978_v56 = vsub.f32 %v1493_v5, %v10966_v32  ;;  %v1476_v55 = vadd.f32 %v1463_v19, %v1333_v46  ;;  %v10992_v45 = vand.u32 4294901760, %v1496_v28  ;;  %v1414_v44 = vpop.permute.xlu0 %1413  ;;  %2808 = vperm.xlu0 %9270, %v10520_v0  }
 0x191   :  { %v1464_v40 = vsel %vm1386_vm2, %v1414_v44, 0.0  ;;  %v1326_v44 = vsel %vm1248_vm5, %v10839_v50, 0.0  ;;  %v1338_v50 = vadd.f32 %v1325_v39, %v10941_v52 }
 0x192   :  { %14541 = vst [vmem:[#allocation133_spill] sm:$0xff] %v10992_v45  ;;  %v1499_v27 = vsel %vm1491_vm8, %v1476_v55, 0  ;;  %v13933_v63 = vand.u32 4294901760, %v10978_v56  ;;  %v11001_v42 = vsub.f32 %v1496_v28, %v10992_v45  ;;  %v1477_v38 = vadd.f32 %v1464_v40, %v1334_v49  ;;  %v1419_v43 = vpop.permute.xlu1 %1418  ;;  %2738 = vperm.xlu1 %9271, %v14542_v34   ;;  %v14543_v49 = vld [vmem:[#allocation91_spill] sm:$0xff] }
 0x193   :  { %v11003_v6 = vand.u32 4294901760, %v1499_v27  ;;  %v1465_v2 = vsel %vm1387_vm6, %v1419_v43, 0.0  ;;  %vm1394_vm6 = vcmp.eq.s32.totalorder %v10895_v8, %v10885_v3 }
 0x194   :  { %v1607_v22 = vsub.f32 %v10978_v56, %v13933_v63  ;;  %v1502_v21 = vsel %vm1491_vm8, %v1477_v38, 0  ;;  %v1478_v46 = vadd.f32 %v1465_v2, %v1335_v33  ;;  %v13932_v20 = vand.u32 4294901760, %v11001_v42  ;;  %v1424_v30 = vpop.permute.xlu0 %1423  ;;  %2681 = vperm.xlu0 %9270, %v14543_v49  }
 0x195   :  { %v11010_v5 = vsub.f32 %v1499_v27, %v11003_v6  ;;  %v11023_v62 = vand.u32 4294901760, %v1502_v21  ;;  %v1466_v28 = vsel %vm1388_vm7, %v1424_v30, 0.0  ;;  %v14545_v27 = vmov 0.0  }
 0x196   :  { %v1608_v53 = vand.u32 4294901760, %v1607_v22  ;;  %v1505_v19 = vsel %vm1491_vm8, %v1478_v46, 0  ;;  %v1617_v55 = vsub.f32 %v11001_v42, %v13932_v20  ;;  %v1479_v7 = vadd.f32 %v1466_v28, %v1336_v36  ;;  %2868 = vperm.xlu1 %9271, %v10663_v12   ;;  %v14547_v22 = vld [vmem:[#allocation140_spill] sm:$0xff]  ;;  %v14575_v20 = vld [vmem:[#allocation14_spill] sm:$0xff] }
 0x197   :  { %v13930_v11 = vand.u32 4294901760, %v11010_v5  ;;  %v11034_v10 = vsub.f32 %v1502_v21, %v11023_v62  ;;  %v11036_v18 = vand.u32 4294901760, %v1505_v19  ;;  %v1429_v17 = vpop.permute.xlu1 %1428  ;;  %v1197_v28 = vsel %vm1119_vm4, %v10697_v4, 0.0  ;;  %v14551_v4 = vld [vmem:[#allocation59_spill] sm:$0xff] }
 0x198   :  { %7471 = vmatmul.mubr.f32.vlgmr.msra.gmra.mrb[0].mxu0 %v1608_v53  ;;  %v1467_v33 = vsel %vm1389_vm11, %v1429_v17, 0.0  ;;  %v1618_v26 = vand.u32 4294901760, %v1617_v55  ;;  %v1508_v43 = vsel %vm1491_vm8, %v1479_v7, 0  ;;  %2742 = vperm.xlu0 %9270, %v14547_v22   ;;  %vm1395_vm7 = vcmp.eq.s32.totalorder %v10915_v23, %v10885_v3 }
 0x199   :  { %14544 = vst [vmem:[#allocation64_spill] sm:$0xff] %v11036_v18  ;;  %7473 = vmatprep.mubr.msk.f32.mxu0 %vm9412_vm9, %v14545_v27  ;;  %v1627_v40 = vsub.f32 %v11010_v5, %v13930_v11  ;;  %v11049_v38 = vsub.f32 %v1505_v19, %v11036_v18  ;;  %v1480_v36 = vadd.f32 %v1467_v33, %v1337_v61  ;;  %v13928_v15 = vand.u32 4294901760, %v11034_v10  ;;  %v1434_v21 = vpop.permute.xlu0 %1433  ;;  %v14572_v11 = vld [vmem:[#allocation92_spill] sm:$0xff] }
 0x19a   :  { %8598 = vmatpush3.bf16.msra.mxu0 %v10783_v37  ;;  %v11059_v2 = vand.u32 4294901760, %v1508_v43  ;;  %v1339_v61 = vadd.f32 %v1326_v44, %v10947_v25  ;;  %v1327_v37 = vsel %vm1249_vm13, %v10842_v57, 0.0  ;;  %v1468_v52 = vsel %vm1390_vm14, %v1434_v21, 0.0  ;;  %2625 = vperm.xlu1 %9271, %v14548_v1   ;;  %v14550_v44 = vld [vmem:[#allocation131_spill] sm:$0xff] }
 0x19b   :  { %8599 = vmatprep.subr.bf16.mxu0 %v14498_v31  ;;  %v1511_v46 = vsel %vm1491_vm8, %v1480_v36, 0  ;;  %v1481_v39 = vadd.f32 %v1468_v52, %v1338_v50  ;;  %v1439_v30 = vpop.permute.xlu1 %1438  ;;  %v1637_v25 = vsub.f32 %v11034_v10, %v13928_v15  ;;  %v13927_v58 = vand.u32 4294901760, %v11049_v38  ;;  %v14569_v15 = vld [vmem:[#allocation63_spill] sm:$0xff] }
 0x19c   :  { %14546 = vst [vmem:[#allocation65_spill] sm:$0xff] %v11059_v2  ;;  %7474 = vmatmul.mubr.f32.gmra.mrb[2].mxu0 %v1618_v26  ;;  %v11079_v57 = vsub.f32 %v1508_v43, %v11059_v2  ;;  %v11081_v53 = vand.u32 4294901760, %v1511_v46  ;;  %v1469_v19 = vsel %vm1391_vm10, %v1439_v30, 0.0  ;;  %v1628_v35 = vand.u32 4294901760, %v1627_v40  ;;  %2872 = vperm.xlu0 %9270, %v10678_v9   ;;  %v14556_v30 = vld [vmem:[#allocation33_spill] sm:$0xff] }
 0x19d   :  { %7476 = vmatprep.mubr.msk.f32.mxu0 %vm9412_vm9, %v14545_v27  ;;  %v1514_v55 = vsel %vm1491_vm8, %v1481_v39, 0  ;;  %v1482_v7 = vadd.f32 %v1469_v19, %v1339_v61  ;;  %v1340_v17 = vadd.f32 %v1327_v37, %v1197_v28  ;;  %v1328_v24 = vsel %vm1250_vm12, %v14550_v44, 0.0  ;;  %v14553_v61 = vld [vmem:[#allocation122_spill] sm:$0xff]  ;;  %v14554_v37 = vld [vmem:[#allocation23_spill] sm:$0xff]  ;;  %v14557_v19 = vld [vmem:[#allocation44_spill] sm:$0xff] }
 0x19e   :  { %14549 = vst [vmem:[#allocation57_spill] sm:$0xff] %v11081_v53  ;;  %8601 = vmatpush3.bf16.msra.mxu0 %v10797_v47  ;;  %v1444_v47 = vpop.permute.xlu0 %1443  ;;  %2811 = vperm.xlu1 %9271, %v14551_v4   ;;  %v1638_v26 = vand.u32 4294901760, %v1637_v25  ;;  %v1647_v40 = vsub.f32 %v11049_v38, %v13927_v58  ;;  %v11106_v16 = vsub.f32 %v1511_v46, %v11081_v53  ;;  %v11108_v43 = vand.u32 4294901760, %v1514_v55  ;;  %v14555_v46 = vld [vmem:[#allocation127_spill] sm:$0xff]  ;;  %v14559_v28 = vld [vmem:[#allocation98_spill] sm:$0xff]  ;;  %v14580_v9 = vld [vmem:[#allocation49_spill] sm:$0xff] }
 0x19f   :  { %8602 = vmatprep.subr.bf16.mxu0 %v14498_v31  ;;  %v1470_v33 = vsel %vm1392_vm0, %v1444_v47, 0.0  ;;  %v1517_v36 = vsel %vm1491_vm8, %v1482_v7, 0  ;;  %v13926_v50 = vand.u32 4294901760, %v11079_v57  ;;  %v1198_v52 = vsel %vm1120_vm15, %v14554_v37, 0.0  ;;  %v14561_v37 = vld [vmem:[#allocation143_spill] sm:$0xff]  ;;  %v14587_v4 = vld [vmem:[#allocation52_spill] sm:$0xff] }
 0x1a0   :  { %7477 = vmatmul.mubr.f32.gmra.mrb[4].mxu0 %v1628_v35  ;;  %14552 = vst [vmem:[#allocation58_spill] sm:$0xff] %v11108_v43  ;;  %v1449_v54 = vpop.permute.xlu1 %1448  ;;  %v1483_v21 = vadd.f32 %v1470_v33, %v1340_v17  ;;  %2684 = vperm.xlu0 %9270, %v14553_v61   ;;  %vm1251_vm5 = vcmp.eq.s32.totalorder %v14555_v46, %v10885_v3  ;;  %v11124_v14 = vand.u32 4294901760, %v1517_v36  ;;  %v1648_v17 = vand.u32 4294901760, %v1647_v40  ;;  %v14563_v46 = vld [vmem:[#allocation74_spill] sm:$0xff] }
 0x1a1   :  { %7479 = vmatprep.mubr.msk.f32.mxu0 %vm9412_vm9, %v14545_v27  ;;  %v1471_v39 = vsel %vm1393_vm1, %v1449_v54, 0.0  ;;  %vm1252_vm2 = vcmp.eq.s32.totalorder %v14556_v30, %v10885_v3  ;;  %v1341_v25 = vadd.f32 %v1328_v24, %v1198_v52  ;;  %v1329_v35 = vsel %vm1251_vm5, %v14557_v19, 0.0  ;;  %v14560_v24 = vld [vmem:[#allocation55_spill] sm:$0xff] }
 0x1a2   :  { %14558 = vst [vmem:[#allocation73_spill] sm:$0xff] %v11124_v14  ;;  %2567 = vperm.xlu1 %9271, %v14559_v28   ;;  %v1454_v7 = vpop.permute.xlu0 %1453  ;;  %v11130_v48 = vsub.f32 %v1514_v55, %v11108_v43  ;;  %v1657_v47 = vsub.f32 %v11079_v57, %v13926_v50  ;;  %v13929_v44 = vand.u32 4294901760, %v11106_v16  ;;  %vm1121_vm13 = vcmp.eq.s32.totalorder %v14560_v24, %v10885_v3  ;;  %v14562_v55 = vld [vmem:[#allocation125_spill] sm:$0xff]  ;;  %v14564_v50 = vld [vmem:[#allocation48_spill] sm:$0xff] }
 0x1a3   :  { %v1520_v33 = vsel %vm1491_vm8, %v1483_v21, 0  ;;  %v1199_v40 = vsel %vm1121_vm13, %v14562_v55, 0.0  ;;  %v1472_v52 = vsel %vm1394_vm6, %v1454_v7, 0.0  ;;  %vm1122_vm4 = vcmp.eq.s32.totalorder %v14563_v46, %v10885_v3  ;;  %v14565_v21 = vld [vmem:[#allocation111_spill] sm:$0xff]  ;;  %v14568_v55 = vld [vmem:[#allocation32_spill] sm:$0xff] }
 0x1a4   :  { %7480 = vmatmul.mubr.f32.gmra.mrb[6].mxu0 %v1638_v26  ;;  %v1484_v26 = vadd.f32 %v1471_v39, %v1341_v25  ;;  %v1459_v54 = vpop.permute.xlu1 %1458  ;;  %2746 = vperm.xlu0 %9270, %v14561_v37   ;;  %v1342_v19 = vadd.f32 %v1329_v35, %v1199_v40  ;;  %v1330_v24 = vsel %vm1252_vm2, %v14564_v50, 0.0  ;;  %v11150_v8 = vsub.f32 %v1517_v36, %v11124_v14 }
 0x1a5   :  { %7482 = vmatprep.mubr.msk.f32.mxu0 %vm9412_vm9, %v14545_v27  ;;  %v11155_v39 = vand.u32 4294901760, %v1520_v33  ;;  %v1658_v7 = vand.u32 4294901760, %v1657_v47  ;;  %v1667_v35 = vsub.f32 %v11106_v16, %v13929_v44  ;;  %v13931_v30 = vand.u32 4294901760, %v11130_v48 }
 0x1a6   :  { %2629 = vperm.xlu1 %9271, %v14565_v21   ;;  %v1523_v36 = vsel %vm1491_vm8, %v1484_v26, 0  ;;  %v1485_v50 = vadd.f32 %v1472_v52, %v1342_v19  ;;  %v1200_v40 = vsel %vm1122_vm4, %v14568_v55, 0.0  ;;  %v1473_v46 = vsel %vm1395_vm7, %v1459_v54, 0.0  ;;  %v14571_v55 = vld [vmem:[#allocation123_spill] sm:$0xff] }
 0x1a7   :  { %14566 = vst [vmem:[#allocation136_spill] sm:$0xff] %v11155_v39  ;;  %v11157_v25 = vpop.permute.xlu0 %2537  ;;  %v1343_v47 = vadd.f32 %v1330_v24, %v1200_v40  ;;  %v13934_v44 = vand.u32 4294901760, %v11150_v8  ;;  %v11175_v23 = vsub.f32 %v1520_v33, %v11155_v39  ;;  %v11177_v26 = vand.u32 4294901760, %v1523_v36 }
 0x1a8   :  { %7483 = vmatmul.mubr.f32.gmra.mrb[8].mxu0 %v1648_v17  ;;  %v14567_v17 = vld [vmem:[#allocation99_spill] sm:$0xff]  ;;  %v1668_v19 = vand.u32 4294901760, %v1667_v35  ;;  %v1677_v54 = vsub.f32 %v11130_v48, %v13931_v30  ;;  %v1526_v24 = vsel %vm1491_vm8, %v1485_v50, 0  ;;  %vm2575_vm11 = vcmp.eq.s32.totalorder %v11157_v25, %v10885_v3 }
 0x1a9   :  { %7485 = vmatprep.mubr.msk.f32.mxu0 %vm9412_vm9, %v14545_v27  ;;  %2876 = vperm.xlu0 %9270, %v14567_v17   ;;  %v11168_v58 = vpop.permute.xlu1 %2540  ;;  %14570 = vst [vmem:[#allocation75_spill] sm:$0xff] %v11177_v26  ;;  %v1687_v33 = vsub.f32 %v11150_v8, %v13934_v44  ;;  %v11195_v35 = vsub.f32 %v1523_v36, %v11177_v26  ;;  %v11197_v30 = vand.u32 4294901760, %v1526_v24 }
 0x1aa   :  { %2814 = vperm.xlu1 %9271, %v14569_v15   ;;  %v14576_v15 = vld [vmem:[#allocation112_spill] sm:$0xff]  ;;  %vm2576_vm15 = vcmp.eq.s32.totalorder %v11168_v58, %v10885_v3 }
 0x1ab   :  { %v11179_v52 = vpop.permute.xlu0 %2546  ;;  %14573 = vst [vmem:[#allocation76_spill] sm:$0xff] %v11195_v35  ;;  %14574 = vst [vmem:[#allocation68_spill] sm:$0xff] %v11197_v30  ;;  %v1688_v36 = vand.u32 4294901760, %v1687_v33  ;;  %v11210_v44 = vsub.f32 %v1526_v24, %v11197_v30 }
 0x1ac   :  { %7486 = vmatmul.mubr.f32.gmra.mrb[10].mxu0 %v1658_v7  ;;  %v1486_v7 = vadd.f32 %v1473_v46, %v1343_v47  ;;  %v1678_v46 = vand.u32 4294901760, %v1677_v54  ;;  %v13937_v47 = vand.u32 4294901760, %v11175_v23  ;;  %vm2578_vm13 = vcmp.eq.s32.totalorder %v11179_v52, %v10885_v3  ;;  %v14614_v52 = vld [vmem:[#allocation101_spill] sm:$0xff] }
 0x1ad   :  { %7488 = vmatprep.mubr.msk.f32.mxu0 %vm9412_vm9, %v14545_v27  ;;  %2687 = vperm.xlu0 %9270, %v14571_v55   ;;  %v11186_v40 = vpop.permute.xlu1 %2543  ;;  %14577 = vst [vmem:[#allocation137_spill] sm:$0xff] %v11210_v44  ;;  %v13941_v49 = vand.u32 4294901760, %v11210_v44 }
 0x1ae   :  { %2570 = vperm.xlu1 %9271, %v14572_v11   ;;  %v14597_v11 = vld [vmem:[#allocation16_spill] sm:$0xff]  ;;  %vm2577_vm5 = vcmp.eq.s32.totalorder %v11186_v40, %v10885_v3 }
 0x1af   :  { %v11199_v50 = vpop.permute.xlu0 %2552 }
 0x1b0   :  { %7489 = vmatmul.mubr.f32.gmra.mrb[12].mxu0 %v1668_v19  ;;  %v1529_v19 = vsel %vm1491_vm8, %v1486_v7, 0  ;;  %v1697_v7 = vsub.f32 %v11175_v23, %v13937_v47 }
 0x1b1   :  { %7491 = vmatprep.mubr.msk.f32.mxu0 %vm9412_vm9, %v14545_v27  ;;  %2750 = vperm.xlu0 %9270, %v14575_v20   ;;  %v11204_v63 = vpop.permute.xlu1 %2549  ;;  %v11212_v37 = vand.u32 4294901760, %v1529_v19  ;;  %v13940_v20 = vand.u32 4294901760, %v11195_v35 }
 0x1b2   :  { %2633 = vperm.xlu1 %9271, %v14576_v15   ;;  %v1698_v1 = vand.u32 4294901760, %v1697_v7  ;;  %v1717_v7 = vsub.f32 %v11210_v44, %v13941_v49 }
 0x1b3   :  { %14578 = vst [vmem:[#allocation72_spill] sm:$0xff] %v11212_v37  ;;  %v11214_v54 = vpop.permute.xlu0 %2558  ;;  %v11227_v24 = vsub.f32 %v1529_v19, %v11212_v37  ;;  %v1707_v47 = vsub.f32 %v11195_v35, %v13940_v20 }
 0x1b4   :  { %7492 = vmatmul.mubr.f32.gmra.mrb[14].mxu0 %v1678_v46  ;;  %v14579_v46 = vld [vmem:[#allocation29_spill] sm:$0xff] }
 0x1b5   :  { %7494 = vmatprep.mubr.msk.f32.mxu0 %vm9412_vm9, %v14545_v27  ;;  %2880 = vperm.xlu0 %9270, %v14579_v46   ;;  %v11221_v61 = vpop.permute.xlu1 %2555  ;;  %14581 = vst [vmem:[#allocation87_spill] sm:$0xff] %v11227_v24  ;;  %v1708_v60 = vand.u32 4294901760, %v1707_v47  ;;  %v13942_v20 = vand.u32 4294901760, %v11227_v24  ;;  %v14584_v46 = vld [vmem:[#allocation15_spill] sm:$0xff]  ;;  %v1718_v47 = vand.u32 4294901760, %v1717_v7 }
 0x1b6   :  { %2817 = vperm.xlu1 %9271, %v14580_v9   ;;  %v14583_v9 = vld [vmem:[#allocation100_spill] sm:$0xff] }
 0x1b7   :  { %v11229_v33 = vpop.permute.xlu0 %2564  ;;  %v1727_v49 = vsub.f32 %v11227_v24, %v13942_v20  ;;  %v14599_v24 = vld [vmem:[#allocation43_spill] sm:$0xff] }
 0x1b8   :  { %7495 = vmatmul.mubr.f32.gmra.mrb[16].mxu0 %v1688_v36  ;;  %v13962_v21 = vand.u32 4294901760, %v14599_v24 }
 0x1b9   :  { %7497 = vmatprep.mubr.msk.f32.mxu0 %vm9412_vm9, %v14545_v27  ;;  %2690 = vperm.xlu0 %9270, %v14582_v13   ;;  %v11236_v36 = vpop.permute.xlu1 %2561  ;;  %v14585_v13 = vld [vmem:[#allocation113_spill] sm:$0xff]  ;;  %v1728_v7 = vand.u32 4294901760, %v1727_v49 }
 0x1ba   :  { %2573 = vperm.xlu1 %9271, %v14583_v9   ;;  %v14591_v9 = vld [vmem:[#allocation20_spill] sm:$0xff] }
 0x1bb   :  { %v2590_v19 = vpop.permute.xlu0 %2589 }
 0x1bc   :  { %7498 = vmatmul.mubr.f32.gmra.mrb[18].mxu0 %v1698_v1 }
 0x1bd   :  { %7500 = vmatprep.mubr.msk.f32.mxu0 %vm9412_vm9, %v14545_v27  ;;  %2754 = vperm.xlu0 %9270, %v14584_v46   ;;  %v2655_v55 = vpop.permute.xlu1 %2654 }
 0x1be   :  { %2637 = vperm.xlu1 %9271, %v14585_v13   ;;  %vm2692_vm12 = vcmp.eq.s32.totalorder %v2655_v55, %v10885_v3  ;;  %v14588_v13 = vld [vmem:[#allocation114_spill] sm:$0xff] }
 0x1bf   :  { %v2785_v1 = vpop.permute.xlu0 %2784 }
 0x1c0   :  { %7501 = vmatmul.mubr.f32.gmra.mrb[20].mxu0 %v1708_v60  ;;  %v2640_v60 = vsel %vm2575_vm11, %v2590_v19, 0.0  ;;  %vm2822_vm14 = vcmp.eq.s32.totalorder %v2785_v1, %v10885_v3  ;;  %v13945_v19 = vmov 2   ;;  %v14590_v1 = vld [vmem:[#allocation129_spill] sm:$0xff]  ;;  %vm2579_vm11 = vcmp.eq.s32.totalorder %v11204_v63, %v10885_v3 }
 0x1c1   :  { %7503 = vmatprep.mubr.msk.f32.mxu0 %vm9412_vm9, %v14545_v27  ;;  %2884 = vperm.xlu0 %9270, %v14586_v51   ;;  %v2707_v46 = vpop.permute.xlu1 %2706 }
 0x1c2   :  { %v2757_v17 = vsel %vm2692_vm12, %v2707_v46, 0.0  ;;  %2820 = vperm.xlu1 %9271, %v14587_v4   ;;  %v14589_v46 = vld [vmem:[#allocation50_spill] sm:$0xff]  ;;  %v13948_v4 = vand.u32 4294901760, %v14590_v1 }
 0x1c3   :  { %v2658_v25 = vpop.permute.xlu0 %2657  ;;  %v2770_v20 = vadd.f32 %v2757_v17, %v2640_v60 }
 0x1c4   :  { %7504 = vmatmul.mubr.f32.gmra.mrb[22].mxu0 %v1718_v47  ;;  %v13947_v47 = vand.u32 4294901760, %v14589_v46  ;;  %vm2693_vm10 = vcmp.eq.s32.totalorder %v2658_v25, %v10885_v3  ;;  %v3170_v17 = vsub.f32 %v14590_v1, %v13948_v4  ;;  %v14594_v25 = vld [vmem:[#allocation40_spill] sm:$0xff] }
 0x1c5   :  { %7506 = vmatprep.mubr.msk.f32.mxu0 %vm9412_vm9, %v14545_v27  ;;  %9274 = vset.pattern.permute.xlu0 %v13943_v59  ;;  %v2837_v51 = vpop.permute.xlu1 %2836 }
 0x1c6   :  { %5504 = vperm.xlu0 %9274, %v14588_v13   ;;  %v2887_v55 = vsel %vm2822_vm14, %v2837_v51, 0.0  ;;  %9272 = vset.pattern.permute.xlu1 %v13945_v19  ;;  %v3163_v51 = vsub.f32 %v14589_v46, %v13947_v47  ;;  %v14592_v19 = vld [vmem:[#allocation126_spill] sm:$0xff]  ;;  %v3171_v13 = vand.u32 4294901760, %v3170_v17  ;;  %vm2580_vm14 = vcmp.eq.s32.totalorder %v11199_v50, %v10885_v3 }
 0x1c7   :  { %v2900_v49 = vadd.f32 %v2887_v55, %v2770_v20  ;;  %3962 = vperm.xlu1 %9272, %v14591_v9   ;;  %v2711_v59 = vpop.permute.xlu0 %2710  ;;  %v14595_v55 = vld [vmem:[#allocation28_spill] sm:$0xff] }
 0x1c8   :  { %7507 = vmatmul.mubr.f32.gmra.mrb[24].mxu0 %v1728_v7  ;;  %v14596_v47 = vpack.c.bf16 %v14594_v25, %v14595_v55  ;;  %v3164_v4 = vand.u32 4294901760, %v3163_v51  ;;  %v14601_v25 = vld [vmem:[#allocation27_spill] sm:$0xff]  ;;  %v14606_v55 = vld [vmem:[#allocation77_spill] sm:$0xff] }
 0x1c9   :  { %7517 = vmatprep.mubr.msk.f32.mxu0 %vm9412_vm9, %v14545_v27  ;;  %v2919_v60 = vsel %vm1491_vm8, %v2900_v49, 0  ;;  %v2594_v7 = vpop.permute.xlu1 %2593  ;;  %v2758_v49 = vsel %vm2693_vm10, %v2711_v59, 0.0 }
 0x1ca   :  { %5556 = vperm.xlu0 %9274, %v14592_v19   ;;  %v11280_v20 = vand.u32 4294901760, %v2919_v60  ;;  %v2641_v15 = vsel %vm2576_vm15, %v2594_v7, 0.0  ;;  %v8633_v28 = vpack.c.bf16 %v3171_v13, %v3164_v4  ;;  %v14602_v13 = vld [vmem:[#allocation22_spill] sm:$0xff]  ;;  %v14603_v4 = vld [vmem:[#allocation41_spill] sm:$0xff] }
 0x1cb   :  { %3968 = vperm.xlu1 %9272, %v14597_v11   ;;  %v2841_v19 = vpop.permute.xlu0 %2840  ;;  %v2771_v51 = vadd.f32 %v2758_v49, %v2641_v15 }
 0x1cc   :  { %7518 = vmatmul.mubr.f32.vlgmr.msra.gmra.mrb[0].mxu0 %v10966_v32  ;;  %14593 = vst [vmem:[#allocation89_spill] sm:$0xff] %v11280_v20  ;;  %v14598_v32 = vld [vmem:[#allocation53_spill] sm:$0xff]  ;;  %v11292_v44 = vsub.f32 %v2919_v60, %v11280_v20  ;;  %v14604_v60 = vpack.c.bf16 %v14602_v13, %v14603_v4 }
 0x1cd   :  { %7520 = vmatprep.mubr.msk.f32.mxu0 %vm9412_vm9, %v14545_v27  ;;  %8604 = vmatpush3.bf16.msra.mxu0 %v14596_v47  ;;  %v13959_v58 = vand.u32 4294901760, %v14598_v32  ;;  %v2788_v35 = vpop.permute.xlu1 %2787  ;;  %v3184_v47 = vsub.f32 %v14599_v24, %v13962_v21 }
 0x1ce   :  { %8605 = vmatprep.subr.bf16.mxu0 %v14498_v31  ;;  %14600 = vst [vmem:[#allocation90_spill] sm:$0xff] %v11292_v44  ;;  %5634 = vperm.xlu0 %9274, %v14601_v25   ;;  %vm2823_vm0 = vcmp.eq.s32.totalorder %v2788_v35, %v10885_v3  ;;  %v13963_v17 = vand.u32 4294901760, %v11292_v44 }
 0x1cf   :  { %v3177_v59 = vsub.f32 %v14598_v32, %v13959_v58  ;;  %v2888_v7 = vsel %vm2823_vm0, %v2841_v19, 0.0  ;;  %v2598_v58 = vpop.permute.xlu0 %2597  ;;  %v3185_v21 = vand.u32 4294901760, %v3184_v47 }
 0x1d0   :  { %7521 = vmatmul.mubr.f32.gmra.mrb[2].mxu0 %v10992_v45  ;;  %v14605_v45 = vld [vmem:[#allocation30_spill] sm:$0xff]  ;;  %v2901_v15 = vadd.f32 %v2888_v7, %v2771_v51  ;;  %v3032_v35 = vsub.f32 %v11292_v44, %v13963_v17  ;;  %v14609_v17 = vld [vmem:[#allocation128_spill] sm:$0xff] }
 0x1d1   :  { %7523 = vmatprep.mubr.msk.f32.mxu0 %vm9412_vm9, %v14545_v27  ;;  %8607 = vmatpush3.bf16.msra.mxu0 %v14604_v60  ;;  %v3178_v20 = vand.u32 4294901760, %v3177_v59  ;;  %v2661_v49 = vpop.permute.xlu1 %2660  ;;  %v14607_v59 = vld [vmem:[#allocation46_spill] sm:$0xff] }
 0x1d2   :  { %3971 = vperm.xlu1 %9272, %v14605_v45   ;;  %8608 = vmatprep.subr.bf16.mxu0 %v14498_v31  ;;  %v2922_v19 = vsel %vm1491_vm8, %v2901_v15, 0  ;;  %v3033_v60 = vand.u32 4294901760, %v3032_v35  ;;  %vm2694_vm1 = vcmp.eq.s32.totalorder %v2661_v49, %v10885_v3  ;;  %v2642_v49 = vsel %vm2577_vm5, %v2598_v58, 0.0 }
 0x1d3   :  { %5686 = vperm.xlu0 %9274, %v14606_v55   ;;  %v8636_v13 = vpack.c.bf16 %v3185_v21, %v3178_v20  ;;  %v11319_v45 = vand.u32 4294901760, %v2922_v19  ;;  %v2791_v47 = vpop.permute.xlu0 %2790  ;;  %v14610_v20 = vld [vmem:[#allocation61_spill] sm:$0xff] }
 0x1d4   :  { %7524 = vmatmul.mubr.f32.gmra.mrb[4].mxu0 %v11003_v6  ;;  %7753 = vmatmul.mubr.f32.vlgmr.msra.gmra.mrb[0].mxu1 %v3033_v60  ;;  %vm2824_vm2 = vcmp.eq.s32.totalorder %v2791_v47, %v10885_v3 }
 0x1d5   :  { %7526 = vmatprep.mubr.msk.f32.mxu0 %vm9412_vm9, %v14545_v27  ;;  %v11323_v51 = vsub.f32 %v2922_v19, %v11319_v45  ;;  %v2715_v7 = vpop.permute.xlu1 %2714  ;;  %7755 = vmatprep.mubr.msk.f32.mxu1 %vm9412_vm9, %v14545_v27 }
 0x1d6   :  { %3977 = vperm.xlu1 %9272, %v14607_v59   ;;  %v2759_v21 = vsel %vm2694_vm1, %v2715_v7, 0.0  ;;  %8634 = vmatpush3.bf16.msra.mxu1 %v8633_v28  ;;  %v14611_v7 = vld [vmem:[#allocation116_spill] sm:$0xff]  ;;  %vm2581_vm1 = vcmp.eq.s32.totalorder %v11221_v61, %v10885_v3 }
 0x1d7   :  { %14608 = vst [vmem:[#allocation80_spill] sm:$0xff] %v11323_v51  ;;  %5560 = vperm.xlu0 %9274, %v14609_v17   ;;  %v2664_v15 = vpop.permute.xlu0 %2663  ;;  %v13966_v35 = vand.u32 4294901760, %v11323_v51  ;;  %8635 = vmatprep.subr.bf16.mxu1 %v14498_v31  ;;  %v2772_v19 = vadd.f32 %v2759_v21, %v2642_v49 }
 0x1d8   :  { %7527 = vmatmul.mubr.f32.gmra.mrb[6].mxu0 %v11023_v62  ;;  %vm2695_vm6 = vcmp.eq.s32.totalorder %v2664_v15, %v10885_v3 }
 0x1d9   :  { %7529 = vmatprep.mubr.msk.f32.mxu0 %vm9412_vm9, %v14545_v27  ;;  %v2845_v60 = vpop.permute.xlu1 %2844  ;;  %v3042_v44 = vsub.f32 %v11323_v51, %v13966_v35 }
 0x1da   :  { %3983 = vperm.xlu1 %9272, %v14610_v20   ;;  %v2889_v40 = vsel %vm2824_vm2, %v2845_v60, 0.0  ;;  %v14612_v20 = vld [vmem:[#allocation78_spill] sm:$0xff]  ;;  %8637 = vmatpush3.bf16.msra.mxu1 %v8636_v13  ;;  %vm2582_vm2 = vcmp.eq.s32.totalorder %v11214_v54, %v10885_v3 }
 0x1db   :  { %5510 = vperm.xlu0 %9274, %v14611_v7   ;;  %v2902_v47 = vadd.f32 %v2889_v40, %v2772_v19  ;;  %v2719_v28 = vpop.permute.xlu0 %2718  ;;  %v3043_v58 = vand.u32 4294901760, %v3042_v44  ;;  %8638 = vmatprep.subr.bf16.mxu1 %v14498_v31  ;;  %v14613_v60 = vld [vmem:[#allocation130_spill] sm:$0xff] }
 0x1dc   :  { %7530 = vmatmul.mubr.f32.gmra.mrb[8].mxu0 %v11036_v18  ;;  %v2760_v44 = vsel %vm2695_vm6, %v2719_v28, 0.0 }
 0x1dd   :  { %7532 = vmatprep.mubr.msk.f32.mxu0 %vm9412_vm9, %v14545_v27  ;;  %v2925_v21 = vsel %vm1491_vm8, %v2902_v47, 0  ;;  %7756 = vmatmul.mubr.f32.gmra.mrb[2].mxu1 %v3043_v58  ;;  %v2602_v49 = vpop.permute.xlu1 %2601  ;;  %v14616_v47 = vld [vmem:[#allocation12_spill] sm:$0xff] }
 0x1de   :  { %3989 = vperm.xlu1 %9272, %v14612_v20   ;;  %v11352_v35 = vand.u32 4294901760, %v2925_v21  ;;  %7758 = vmatprep.mubr.msk.f32.mxu1 %vm9412_vm9, %v14545_v27  ;;  %v2643_v13 = vsel %vm2578_vm13, %v2602_v49, 0.0  ;;  %v14617_v20 = vmov 3  }
 0x1df   :  { %5564 = vperm.xlu0 %9274, %v14613_v60   ;;  %v2849_v15 = vpop.permute.xlu0 %2848  ;;  %v2773_v58 = vadd.f32 %v2760_v44, %v2643_v13  ;;  %v14618_v13 = vld [vmem:[#allocation69_spill] sm:$0xff] }
 0x1e0   :  { %7533 = vmatmul.mubr.f32.gmra.mrb[10].mxu0 %v11059_v2  ;;  %v11361_v19 = vsub.f32 %v2925_v21, %v11352_v35 }
 0x1e1   :  { %7535 = vmatprep.mubr.msk.f32.mxu0 %vm9412_vm9, %v14545_v27  ;;  %v2794_v40 = vpop.permute.xlu1 %2793 }
 0x1e2   :  { %4014 = vperm.xlu1 %9272, %v14614_v52   ;;  %14615 = vst [vmem:[#allocation139_spill] sm:$0xff] %v11361_v19  ;;  %vm2825_vm4 = vcmp.eq.s32.totalorder %v2794_v40, %v10885_v3  ;;  %v13975_v28 = vand.u32 4294901760, %v11361_v19 }
 0x1e3   :  { %5640 = vperm.xlu0 %9274, %v14616_v47   ;;  %v2890_v49 = vsel %vm2825_vm4, %v2849_v15, 0.0  ;;  %v2606_v51 = vpop.permute.xlu0 %2605 }
 0x1e4   :  { %7536 = vmatmul.mubr.f32.gmra.mrb[12].mxu0 %v11081_v53  ;;  %v2903_v2 = vadd.f32 %v2890_v49, %v2773_v58  ;;  %v3052_v21 = vsub.f32 %v11361_v19, %v13975_v28  ;;  %v14619_v58 = vmov 2   ;;  %v14621_v49 = vld [vmem:[#allocation132_spill] sm:$0xff]  ;;  %v14622_v28 = vld [vmem:[#allocation118_spill] sm:$0xff] }
 0x1e5   :  { %7538 = vmatprep.mubr.msk.f32.mxu0 %vm9412_vm9, %v14545_v27  ;;  %v2667_v44 = vpop.permute.xlu1 %2666 }
 0x1e6   :  { %9273 = vset.pattern.permute.xlu1 %v14617_v20  ;;  %v2928_v40 = vsel %vm1491_vm8, %v2903_v2, 0  ;;  %v3053_v53 = vand.u32 4294901760, %v3052_v21  ;;  %vm2696_vm7 = vcmp.eq.s32.totalorder %v2667_v44, %v10885_v3 }
 0x1e7   :  { %5387 = vperm.xlu1 %9273, %v14591_v9   ;;  %5694 = vperm.xlu0 %9274, %v14618_v13   ;;  %v11377_v15 = vand.u32 4294901760, %v2928_v40  ;;  %v2797_v18 = vpop.permute.xlu0 %2796 }
 0x1e8   :  { %7539 = vmatmul.mubr.f32.gmra.mrb[14].mxu0 %v11108_v43  ;;  %7759 = vmatmul.mubr.f32.gmra.mrb[4].mxu1 %v3053_v53  ;;  %vm2826_vm12 = vcmp.eq.s32.totalorder %v2797_v18, %v10885_v3 }
 0x1e9   :  { %7541 = vmatprep.mubr.msk.f32.mxu0 %vm9412_vm9, %v14545_v27  ;;  %v11383_v9 = vsub.f32 %v2928_v40, %v11377_v15  ;;  %v2723_v2 = vpop.permute.xlu1 %2722  ;;  %7761 = vmatprep.mubr.msk.f32.mxu1 %vm9412_vm9, %v14545_v27 }
 0x1ea   :  { %v2761_v21 = vsel %vm2696_vm7, %v2723_v2, 0.0  ;;  %vm2583_vm7 = vcmp.eq.s32.totalorder %v11236_v36, %v10885_v3 }
 0x1eb   :  { %9275 = vset.pattern.permute.xlu1 %v14619_v58  ;;  %14620 = vst [vmem:[#allocation82_spill] sm:$0xff] %v11383_v9  ;;  %5568 = vperm.xlu0 %9274, %v14621_v49   ;;  %v2670_v53 = vpop.permute.xlu0 %2669  ;;  %v13982_v40 = vand.u32 4294901760, %v11383_v9 }
 0x1ec   :  { %4209 = vperm.xlu1 %9275, %v14601_v25   ;;  %7542 = vmatmul.mubr.f32.gmra.mrb[16].mxu0 %v11124_v14  ;;  %v2644_v25 = vsel %vm2579_vm11, %v2606_v51, 0.0  ;;  %vm2697_vm10 = vcmp.eq.s32.totalorder %v2670_v53, %v10885_v3  ;;  %v14625_v53 = vld [vmem:[#allocation21_spill] sm:$0xff] }
 0x1ed   :  { %7544 = vmatprep.mubr.msk.f32.mxu0 %vm9412_vm9, %v14545_v27  ;;  %v2774_v44 = vadd.f32 %v2761_v21, %v2644_v25  ;;  %v2853_v2 = vpop.permute.xlu1 %2852  ;;  %v3062_v19 = vsub.f32 %v11383_v9, %v13982_v40  ;;  %v14623_v25 = vld [vmem:[#allocation134_spill] sm:$0xff] }
 0x1ee   :  { %v2891_v63 = vsel %vm2826_vm12, %v2853_v2, 0.0  ;;  %vm2584_vm12 = vcmp.eq.s32.totalorder %v11229_v33, %v10885_v3 }
 0x1ef   :  { %5516 = vperm.xlu0 %9274, %v14622_v28   ;;  %v2904_v18 = vadd.f32 %v2891_v63, %v2774_v44  ;;  %v2727_v14 = vpop.permute.xlu0 %2726  ;;  %v3063_v43 = vand.u32 4294901760, %v3062_v19 }
 0x1f0   :  { %9276 = vset.pattern.permute.xlu1 %v14617_v20  ;;  %7545 = vmatmul.mubr.f32.gmra.mrb[18].mxu0 %v11155_v39  ;;  %v2762_v19 = vsel %vm2697_vm10, %v2727_v14, 0.0  ;;  %v14634_v39 = vld [vmem:[#allocation120_spill] sm:$0xff] }
 0x1f1   :  { %5439 = vperm.xlu1 %9276, %v14614_v52   ;;  %7547 = vmatprep.mubr.msk.f32.mxu0 %vm9412_vm9, %v14545_v27  ;;  %v2931_v51 = vsel %vm1491_vm8, %v2904_v18, 0  ;;  %v2610_v21 = vpop.permute.xlu1 %2609  ;;  %v14626_v18 = vld [vmem:[#allocation115_spill] sm:$0xff] }
 0x1f2   :  { %7762 = vmatmul.mubr.f32.gmra.mrb[6].mxu1 %v3063_v43  ;;  %v11411_v52 = vand.u32 4294901760, %v2931_v51  ;;  %v2645_v44 = vsel %vm2580_vm14, %v2610_v21, 0.0 }
 0x1f3   :  { %5572 = vperm.xlu0 %9274, %v14623_v25   ;;  %v2857_v2 = vpop.permute.xlu0 %2856  ;;  %7764 = vmatprep.mubr.msk.f32.mxu1 %vm9412_vm9, %v14545_v27  ;;  %v2775_v63 = vadd.f32 %v2762_v19, %v2645_v44  ;;  %v14627_v19 = vld [vmem:[#allocation88_spill] sm:$0xff] }
 0x1f4   :  { %7548 = vmatmul.mubr.f32.gmra.mrb[20].mxu0 %v11177_v26  ;;  %v11419_v50 = vsub.f32 %v2931_v51, %v11411_v52 }
 0x1f5   :  { %9277 = vset.pattern.permute.xlu1 %v14619_v58  ;;  %7550 = vmatprep.mubr.msk.f32.mxu0 %vm9412_vm9, %v14545_v27  ;;  %v2800_v43 = vpop.permute.xlu1 %2799 }
 0x1f6   :  { %4261 = vperm.xlu1 %9277, %v14606_v55   ;;  %14624 = vst [vmem:[#allocation83_spill] sm:$0xff] %v11419_v50  ;;  %vm2827_vm15 = vcmp.eq.s32.totalorder %v2800_v43, %v10885_v3  ;;  %v13989_v14 = vand.u32 4294901760, %v11419_v50 }
 0x1f7   :  { %5646 = vperm.xlu0 %9274, %v14625_v53   ;;  %v2892_v55 = vsel %vm2827_vm15, %v2857_v2, 0.0  ;;  %v2614_v21 = vpop.permute.xlu0 %2613 }
 0x1f8   :  { %7551 = vmatmul.mubr.f32.gmra.mrb[22].mxu0 %v11197_v30  ;;  %v2905_v51 = vadd.f32 %v2892_v55, %v2775_v63  ;;  %v3072_v40 = vsub.f32 %v11419_v50, %v13989_v14  ;;  %v14629_v30 = vld [vmem:[#allocation102_spill] sm:$0xff]  ;;  %v14631_v14 = vld [vmem:[#allocation135_spill] sm:$0xff] }
 0x1f9   :  { %7553 = vmatprep.mubr.msk.f32.mxu0 %vm9412_vm9, %v14545_v27  ;;  %v2673_v9 = vpop.permute.xlu1 %2672  ;;  %v14633_v50 = vld [vmem:[#allocation39_spill] sm:$0xff] }
 0x1fa   :  { %4082 = vperm.xlu1 %9277, %v14626_v18   ;;  %v2934_v44 = vsel %vm1491_vm8, %v2905_v51, 0  ;;  %v3073_v43 = vand.u32 4294901760, %v3072_v40  ;;  %vm2698_vm0 = vcmp.eq.s32.totalorder %v2673_v9, %v10885_v3  ;;  %v2646_v9 = vsel %vm2581_vm1, %v2614_v21, 0.0 }
 0x1fb   :  { %5702 = vperm.xlu0 %9274, %v14627_v19   ;;  %v11436_v2 = vand.u32 4294901760, %v2934_v44  ;;  %v2803_v26 = vpop.permute.xlu0 %2802 }
 0x1fc   :  { %7554 = vmatmul.mubr.f32.gmra.mrb[24].mxu0 %v11212_v37  ;;  %7765 = vmatmul.mubr.f32.gmra.mrb[8].mxu1 %v3073_v43  ;;  %vm2828_vm5 = vcmp.eq.s32.totalorder %v2803_v26, %v10885_v3  ;;  %v14632_v43 = vld [vmem:[#allocation36_spill] sm:$0xff] }
 0x1fd   :  { %14628 = vst [vmem:[#allocation94_spill] sm:$0xff] %v11436_v2  ;;  %7564 = vmatprep.mubr.msk.f32.mxu0 %vm9412_vm9, %v14545_v27  ;;  %v11442_v63 = vsub.f32 %v2934_v44, %v11436_v2  ;;  %v2731_v55 = vpop.permute.xlu1 %2730  ;;  %7767 = vmatprep.mubr.msk.f32.mxu1 %vm9412_vm9, %v14545_v27 }
 0x1fe   :  { %4018 = vperm.xlu1 %9277, %v14629_v30   ;;  %v2763_v40 = vsel %vm2698_vm0, %v2731_v55, 0.0 }
 0x1ff   :  { %14630 = vst [vmem:[#allocation141_spill] sm:$0xff] %v11442_v63  ;;  %5576 = vperm.xlu0 %9274, %v14631_v14   ;;  %v2676_v51 = vpop.permute.xlu0 %2675  ;;  %v13996_v44 = vand.u32 4294901760, %v11442_v63  ;;  %v2776_v37 = vadd.f32 %v2763_v40, %v2646_v9  ;;  %v14635_v40 = vld [vmem:[#allocation19_spill] sm:$0xff] }
 0x200   :  { %7565 = vmatmul.mubr.f32.vlgmr.msra.gmra.mrb[0].mxu0 %v10978_v56  ;;  %vm2699_vm13 = vcmp.eq.s32.totalorder %v2676_v51, %v10885_v3 }
 0x201   :  { %7567 = vmatprep.mubr.msk.f32.mxu0 %vm9412_vm9, %v14545_v27  ;;  %8610 = vmatpush3.bf16.msra.mxu0 %v14633_v50  ;;  %v2861_v61 = vpop.permute.xlu1 %2860  ;;  %v3082_v26 = vsub.f32 %v11442_v63, %v13996_v44  ;;  %v14639_v44 = vld [vmem:[#allocation47_spill] sm:$0xff] }
 0x202   :  { %9278 = vset.pattern.permute.xlu1 %v14617_v20  ;;  %8611 = vmatprep.subr.bf16.mxu0 %v14498_v31  ;;  %v2893_v14 = vsel %vm2828_vm5, %v2861_v61, 0.0 }
 0x203   :  { %5390 = vperm.xlu1 %9278, %v14632_v43   ;;  %5522 = vperm.xlu0 %9274, %v14634_v39   ;;  %v2906_v21 = vadd.f32 %v2893_v14, %v2776_v37  ;;  %v2735_v59 = vpop.permute.xlu0 %2734  ;;  %v3083_v25 = vand.u32 4294901760, %v3082_v26  ;;  %v14636_v14 = vld [vmem:[#allocation60_spill] sm:$0xff] }
 0x204   :  { %7568 = vmatmul.mubr.f32.gmra.mrb[2].mxu0 %v11001_v42  ;;  %v2764_v54 = vsel %vm2699_vm13, %v2735_v59, 0.0 }
 0x205   :  { %7570 = vmatprep.mubr.msk.f32.mxu0 %vm9412_vm9, %v14545_v27  ;;  %8613 = vmatpush3.bf16.msra.mxu0 %v14635_v40  ;;  %v2937_v61 = vsel %vm1491_vm8, %v2906_v21, 0  ;;  %v2618_v37 = vpop.permute.xlu1 %2617 }
 0x206   :  { %7768 = vmatmul.mubr.f32.gmra.mrb[10].mxu1 %v3083_v25  ;;  %v11477_v26 = vand.u32 4294901760, %v2937_v61  ;;  %8614 = vmatprep.subr.bf16.mxu0 %v14498_v31 }
 0x207   :  { %5507 = vperm.xlu1 %9278, %v14626_v18   ;;  %5580 = vperm.xlu0 %9274, %v14636_v14   ;;  %v2647_v18 = vsel %vm2582_vm2, %v2618_v37, 0.0  ;;  %v2865_v51 = vpop.permute.xlu0 %2864 }
 0x208   :  { %14637 = vst [vmem:[#allocation95_spill] sm:$0xff] %v11477_v26  ;;  %7571 = vmatmul.mubr.f32.gmra.mrb[4].mxu0 %v11010_v5  ;;  %7770 = vmatprep.mubr.msk.f32.mxu1 %vm9412_vm9, %v14545_v27  ;;  %v11486_v25 = vsub.f32 %v2937_v61, %v11477_v26  ;;  %v2777_v9 = vadd.f32 %v2764_v54, %v2647_v18  ;;  %v14640_v61 = vld [vmem:[#allocation66_spill] sm:$0xff]  ;;  %v14641_v18 = vld [vmem:[#allocation81_spill] sm:$0xff] }
 0x209   :  { %7573 = vmatprep.mubr.msk.f32.mxu0 %vm9412_vm9, %v14545_v27  ;;  %v2806_v21 = vpop.permute.xlu1 %2805 }
 0x20a   :  { %14638 = vst [vmem:[#allocation96_spill] sm:$0xff] %v11486_v25  ;;  %vm2829_vm6 = vcmp.eq.s32.totalorder %v2806_v21, %v10885_v3  ;;  %v13999_v59 = vand.u32 4294901760, %v11486_v25 }
 0x20b   :  { %5443 = vperm.xlu1 %9278, %v14629_v30   ;;  %5652 = vperm.xlu0 %9274, %v14639_v44   ;;  %v2894_v37 = vsel %vm2829_vm6, %v2865_v51, 0.0  ;;  %v2622_v55 = vpop.permute.xlu0 %2621 }
 0x20c   :  { %7574 = vmatmul.mubr.f32.gmra.mrb[6].mxu0 %v11034_v10  ;;  %v2907_v63 = vadd.f32 %v2894_v37, %v2777_v9  ;;  %v3092_v30 = vsub.f32 %v11486_v25, %v13999_v59 }
 0x20d   :  { %7576 = vmatprep.mubr.msk.f32.mxu0 %vm9412_vm9, %v14545_v27  ;;  %v2679_v54 = vpop.permute.xlu1 %2678 }
 0x20e   :  { %v2940_v21 = vsel %vm1491_vm8, %v2907_v63, 0  ;;  %v3093_v44 = vand.u32 4294901760, %v3092_v30  ;;  %vm2700_vm4 = vcmp.eq.s32.totalorder %v2679_v54, %v10885_v3  ;;  %v14644_v30 = vld [vmem:[#allocation31_spill] sm:$0xff] }
 0x20f   :  { %9279 = vset.pattern.permute.xlu1 %v14619_v58  ;;  %5710 = vperm.xlu0 %9274, %v14641_v18   ;;  %v11503_v51 = vand.u32 4294901760, %v2940_v21  ;;  %v2809_v14 = vpop.permute.xlu0 %2808 }
 0x210   :  { %4265 = vperm.xlu1 %9279, %v14640_v61   ;;  %7577 = vmatmul.mubr.f32.gmra.mrb[8].mxu0 %v11049_v38  ;;  %vm2830_vm11 = vcmp.eq.s32.totalorder %v2809_v14, %v10885_v3 }
 0x211   :  { %14642 = vst [vmem:[#allocation144_spill] sm:$0xff] %v11503_v51  ;;  %7579 = vmatprep.mubr.msk.f32.mxu0 %vm9412_vm9, %v14545_v27  ;;  %7771 = vmatmul.mubr.f32.gmra.mrb[12].mxu1 %v3093_v44  ;;  %v11508_v9 = vsub.f32 %v2940_v21, %v11503_v51  ;;  %v2739_v37 = vpop.permute.xlu1 %2738  ;;  %v2648_v21 = vsel %vm2583_vm7, %v2622_v55, 0.0 }
 0x212   :  { %v2765_v63 = vsel %vm2700_vm4, %v2739_v37, 0.0  ;;  %7773 = vmatprep.mubr.msk.f32.mxu1 %vm9412_vm9, %v14545_v27 }
 0x213   :  { %14643 = vst [vmem:[#allocation145_spill] sm:$0xff] %v11508_v9  ;;  %5584 = vperm.xlu0 %9274, %v14535_v41   ;;  %v2682_v44 = vpop.permute.xlu0 %2681  ;;  %v14003_v54 = vand.u32 4294901760, %v11508_v9  ;;  %v2778_v37 = vadd.f32 %v2765_v63, %v2648_v21  ;;  %v14646_v21 = vld [vmem:[#allocation103_spill] sm:$0xff] }
 0x214   :  { %9280 = vset.pattern.permute.xlu1 %v14617_v20  ;;  %7580 = vmatmul.mubr.f32.gmra.mrb[10].mxu0 %v11079_v57  ;;  %vm2701_vm14 = vcmp.eq.s32.totalorder %v2682_v44, %v10885_v3 }
 0x215   :  { %5637 = vperm.xlu1 %9280, %v14644_v30   ;;  %7582 = vmatprep.mubr.msk.f32.mxu0 %vm9412_vm9, %v14545_v27  ;;  %v2869_v59 = vpop.permute.xlu1 %2868  ;;  %v3102_v36 = vsub.f32 %v11508_v9, %v14003_v54 }
 0x216   :  { %v2895_v18 = vsel %vm2830_vm11, %v2869_v59, 0.0 }
 0x217   :  { %5528 = vperm.xlu0 %9274, %v14540_v29   ;;  %v2908_v14 = vadd.f32 %v2895_v18, %v2778_v37  ;;  %v2743_v25 = vpop.permute.xlu0 %2742  ;;  %v3103_v41 = vand.u32 4294901760, %v3102_v36 }
 0x218   :  { %7583 = vmatmul.mubr.f32.gmra.mrb[12].mxu0 %v11106_v16 }
 0x219   :  { %5690 = vperm.xlu1 %9280, %v14640_v61   ;;  %7585 = vmatprep.mubr.msk.f32.mxu0 %vm9412_vm9, %v14545_v27  ;;  %v2943_v55 = vsel %vm1491_vm8, %v2908_v14, 0  ;;  %v2626_v63 = vpop.permute.xlu1 %2625  ;;  %v2766_v61 = vsel %vm2701_vm14, %v2743_v25, 0.0 }
 0x21a   :  { %7774 = vmatmul.mubr.f32.gmra.mrb[14].mxu1 %v3103_v41  ;;  %v11536_v59 = vand.u32 4294901760, %v2943_v55  ;;  %v2649_v18 = vsel %vm2584_vm12, %v2626_v63, 0.0 }
 0x21b   :  { %5588 = vperm.xlu0 %9274, %v14542_v34   ;;  %v2873_v37 = vpop.permute.xlu0 %2872  ;;  %7776 = vmatprep.mubr.msk.f32.mxu1 %vm9412_vm9, %v14545_v27  ;;  %v2779_v44 = vadd.f32 %v2766_v61, %v2649_v18  ;;  %v14662_v34 = vld [vmem:[#allocation117_spill] sm:$0xff] }
 0x21c   :  { %14645 = vst [vmem:[#allocation142_spill] sm:$0xff] %v11536_v59  ;;  %7586 = vmatmul.mubr.f32.gmra.mrb[14].mxu0 %v11130_v48  ;;  %v11544_v33 = vsub.f32 %v2943_v55, %v11536_v59 }
 0x21d   :  { %9281 = vset.pattern.permute.xlu1 %v14619_v58  ;;  %7588 = vmatprep.mubr.msk.f32.mxu0 %vm9412_vm9, %v14545_v27  ;;  %v2812_v41 = vpop.permute.xlu1 %2811 }
 0x21e   :  { %4022 = vperm.xlu1 %9281, %v14646_v21   ;;  %14647 = vst [vmem:[#allocation25_spill] sm:$0xff] %v11544_v33  ;;  %vm2831_vm10 = vcmp.eq.s32.totalorder %v2812_v41, %v10885_v3  ;;  %v14004_v25 = vand.u32 4294901760, %v11544_v33 }
 0x21f   :  { %5658 = vperm.xlu0 %9274, %v10520_v0   ;;  %v2896_v36 = vsel %vm2831_vm10, %v2873_v37, 0.0  ;;  %v2685_v14 = vpop.permute.xlu0 %2684 }
 0x220   :  { %7589 = vmatmul.mubr.f32.gmra.mrb[16].mxu0 %v11150_v8  ;;  %v2909_v55 = vadd.f32 %v2896_v36, %v2779_v44  ;;  %v3112_v63 = vsub.f32 %v11544_v33, %v14004_v25  ;;  %vm2702_vm15 = vcmp.eq.s32.totalorder %v2685_v14, %v10885_v3  ;;  %v14650_v36 = vld [vmem:[#allocation76_spill] sm:$0xff]  ;;  %v14651_v25 = vld [vmem:[#allocation98_spill] sm:$0xff] }
 0x221   :  { %7591 = vmatprep.mubr.msk.f32.mxu0 %vm9412_vm9, %v14545_v27  ;;  %v2568_v61 = vpop.permute.xlu1 %2567 }
 0x222   :  { %9282 = vset.pattern.permute.xlu1 %v14617_v20  ;;  %v2946_v18 = vsel %vm1491_vm8, %v2909_v55, 0  ;;  %v3113_v41 = vand.u32 4294901760, %v3112_v63  ;;  %vm2585_vm0 = vcmp.eq.s32.totalorder %v2568_v61, %v10885_v3 }
 0x223   :  { %5393 = vperm.xlu1 %9282, %v14597_v11   ;;  %5718 = vperm.xlu0 %9274, %v10663_v12   ;;  %v11562_v37 = vand.u32 4294901760, %v2946_v18  ;;  %v2747_v54 = vpop.permute.xlu0 %2746 }
 0x224   :  { %7592 = vmatmul.mubr.f32.gmra.mrb[18].mxu0 %v11175_v23  ;;  %7777 = vmatmul.mubr.f32.gmra.mrb[16].mxu1 %v3113_v41  ;;  %v2767_v55 = vsel %vm2702_vm15, %v2747_v54, 0.0  ;;  %v14652_v54 = vld [vmem:[#allocation137_spill] sm:$0xff] }
 0x225   :  { %14648 = vst [vmem:[#allocation17_spill] sm:$0xff] %v11562_v37  ;;  %7594 = vmatprep.mubr.msk.f32.mxu0 %vm9412_vm9, %v14545_v27  ;;  %v11568_v11 = vsub.f32 %v2946_v18, %v11562_v37  ;;  %v2630_v44 = vpop.permute.xlu1 %2629  ;;  %7779 = vmatprep.mubr.msk.f32.mxu1 %vm9412_vm9, %v14545_v27 }
 0x226   :  { %v2650_v63 = vsel %vm2585_vm0, %v2630_v44, 0.0 }
 0x227   :  { %9283 = vset.pattern.permute.xlu1 %v14619_v58  ;;  %14649 = vst [vmem:[#allocation11_spill] sm:$0xff] %v11568_v11  ;;  %5592 = vperm.xlu0 %9274, %v14547_v22   ;;  %v14011_v18 = vand.u32 4294901760, %v11568_v11  ;;  %v2780_v61 = vadd.f32 %v2767_v55, %v2650_v63  ;;  %v14654_v55 = vld [vmem:[#allocation87_spill] sm:$0xff] }
 0x228   :  { %4215 = vperm.xlu1 %9283, %v14616_v47   ;;  %7595 = vmatmul.mubr.f32.gmra.mrb[20].mxu0 %v14650_v36  ;;  %v2877_v41 = vpop.permute.xlu0 %2876 }
 0x229   :  { %7597 = vmatprep.mubr.msk.f32.mxu0 %vm9412_vm9, %v14545_v27  ;;  %v2815_v47 = vpop.permute.xlu1 %2814  ;;  %v3122_v14 = vsub.f32 %v11568_v11, %v14011_v18  ;;  %v14660_v11 = vld [vmem:[#allocation92_spill] sm:$0xff] }
 0x22a   :  { %vm2832_vm1 = vcmp.eq.s32.totalorder %v2815_v47, %v10885_v3  ;;  %v14658_v47 = vld [vmem:[#allocation40_spill] sm:$0xff] }
 0x22b   :  { %5417 = vperm.xlu0 %9274, %v14651_v25   ;;  %v2897_v44 = vsel %vm2832_vm1, %v2877_v41, 0.0  ;;  %v3123_v0 = vand.u32 4294901760, %v3122_v14  ;;  %v14653_v25 = vld [vmem:[#allocation111_spill] sm:$0xff]  ;;  %v14659_v14 = vand.u32 4294901760, %v14658_v47  ;;  %v14664_v47 = vld [vmem:[#allocation22_spill] sm:$0xff] }
 0x22c   :  { %9284 = vset.pattern.permute.xlu1 %v14617_v20  ;;  %7598 = vmatmul.mubr.f32.gmra.mrb[22].mxu0 %v14652_v54  ;;  %v2688_v12 = vpop.permute.xlu0 %2687  ;;  %v2910_v33 = vadd.f32 %v2897_v44, %v2780_v61 }
 0x22d   :  { %5447 = vperm.xlu1 %9284, %v14646_v21   ;;  %7600 = vmatprep.mubr.msk.f32.mxu0 %vm9412_vm9, %v14545_v27  ;;  %v2571_v9 = vpop.permute.xlu1 %2570  ;;  %vm2703_vm5 = vcmp.eq.s32.totalorder %v2688_v12, %v10885_v3  ;;  %v14665_v12 = vand.u32 4294901760, %v14664_v47 }
 0x22e   :  { %7780 = vmatmul.mubr.f32.gmra.mrb[18].mxu1 %v3123_v0  ;;  %v2949_v18 = vsel %vm1491_vm8, %v2910_v33, 0  ;;  %v14656_v0 = vld [vmem:[#allocation28_spill] sm:$0xff]  ;;  %vm2586_vm2 = vcmp.eq.s32.totalorder %v2571_v9, %v10885_v3 }
 0x22f   :  { %5479 = vperm.xlu0 %9274, %v14653_v25   ;;  %v11594_v21 = vand.u32 4294901760, %v2949_v18  ;;  %7782 = vmatprep.mubr.msk.f32.mxu1 %vm9412_vm9, %v14545_v27  ;;  %v14657_v41 = vand.u32 4294901760, %v14656_v0 }
 0x230   :  { %7601 = vmatmul.mubr.f32.gmra.mrb[24].mxu0 %v14654_v55  ;;  %v2751_v63 = vpop.permute.xlu0 %2750 }
 0x231   :  { %9285 = vset.pattern.permute.xlu1 %v14619_v58  ;;  %14655 = vst [vmem:[#allocation13_spill] sm:$0xff] %v11594_v21  ;;  %7611 = vmatprep.mubr.msk.f32.mxu0 %vm9412_vm9, %v14545_v27  ;;  %v8615_v33 = vpack.c.bf16 %v14659_v14, %v14657_v41  ;;  %v11606_v61 = vsub.f32 %v2949_v18, %v11594_v21  ;;  %v2634_v44 = vpop.permute.xlu1 %2633  ;;  %v2768_v25 = vsel %vm2703_vm5, %v2751_v63, 0.0  ;;  %v14663_v18 = vand.u32 4294901760, %v14603_v4  ;;  %v14668_v4 = vld [vmem:[#allocation104_spill] sm:$0xff] }
 0x232   :  { %4269 = vperm.xlu1 %9285, %v14618_v13   ;;  %v14661_v13 = vand.u32 4294901760, %v10978_v56  ;;  %v2651_v22 = vsel %vm2586_vm2, %v2634_v44, 0.0  ;;  %v14667_v44 = vand.u32 4294901760, %v11001_v42 }
 0x233   :  { %5420 = vperm.xlu0 %9274, %v14660_v11   ;;  %v14016_v41 = vand.u32 4294901760, %v11606_v61  ;;  %v8618_v14 = vpack.c.bf16 %v14665_v12, %v14663_v18  ;;  %v14666_v11 = vld [vmem:[#allocation112_spill] sm:$0xff]  ;;  %v2781_v63 = vadd.f32 %v2768_v25, %v2651_v22  ;;  %v14670_v25 = vand.u32 4294901760, %v11010_v5 }
 0x234   :  { %7612 = vmatmul.mubr.f32.vlgmr.msra.gmra.mrb[0].mxu0 %v14661_v13  ;;  %v2881_v0 = vpop.permute.xlu0 %2880 }
 0x235   :  { %7614 = vmatprep.mubr.msk.f32.mxu0 %vm9412_vm9, %v14545_v27  ;;  %8616 = vmatpush3.bf16.msra.mxu0 %v8615_v33  ;;  %v2818_v9 = vpop.permute.xlu1 %2817  ;;  %v3132_v56 = vsub.f32 %v11606_v61, %v14016_v41  ;;  %v14669_v41 = vld [vmem:[#allocation100_spill] sm:$0xff] }
 0x236   :  { %4088 = vperm.xlu1 %9285, %v14662_v34   ;;  %8617 = vmatprep.subr.bf16.mxu0 %v14498_v31  ;;  %vm2833_vm13 = vcmp.eq.s32.totalorder %v2818_v9, %v10885_v3 }
 0x237   :  { %5483 = vperm.xlu0 %9274, %v14666_v11   ;;  %v2898_v33 = vsel %vm2833_vm13, %v2881_v0, 0.0  ;;  %v3133_v18 = vand.u32 4294901760, %v3132_v56  ;;  %v14673_v56 = vld [vmem:[#allocation113_spill] sm:$0xff] }
 0x238   :  { %7615 = vmatmul.mubr.f32.gmra.mrb[2].mxu0 %v14667_v44  ;;  %v2691_v13 = vpop.permute.xlu0 %2690  ;;  %v2911_v47 = vadd.f32 %v2898_v33, %v2781_v63  ;;  %v14674_v63 = vand.u32 4294901760, %v11034_v10  ;;  %v14675_v10 = vand.u32 4294901760, %v11049_v38  ;;  %v14678_v38 = vand.u32 4294901760, %v11079_v57  ;;  %v14682_v57 = vld [vmem:[#allocation67_spill] sm:$0xff] }
 0x239   :  { %7617 = vmatprep.mubr.msk.f32.mxu0 %vm9412_vm9, %v14545_v27  ;;  %8619 = vmatpush3.bf16.msra.mxu0 %v8618_v14  ;;  %v2574_v12 = vpop.permute.xlu1 %2573  ;;  %v14672_v14 = vld [vmem:[#allocation30_spill] sm:$0xff]  ;;  %vm2704_vm6 = vcmp.eq.s32.totalorder %v2691_v13, %v10885_v3 }
 0x23a   :  { %4026 = vperm.xlu1 %9285, %v14668_v4   ;;  %7783 = vmatmul.mubr.f32.gmra.mrb[20].mxu1 %v3133_v18  ;;  %v2952_v22 = vsel %vm1491_vm8, %v2911_v47, 0  ;;  %vm2587_vm4 = vcmp.eq.s32.totalorder %v2574_v12, %v10885_v3 }
 0x23b   :  { %5423 = vperm.xlu0 %9274, %v14669_v41   ;;  %7785 = vmatprep.mubr.msk.f32.mxu1 %vm9412_vm9, %v14545_v27  ;;  %v11638_v42 = vand.u32 4294901760, %v2952_v22  ;;  %v14698_v41 = vpack.c.bf16 %v14590_v1, %v14589_v46 }
 0x23c   :  { %7618 = vmatmul.mubr.f32.gmra.mrb[4].mxu0 %v14670_v25  ;;  %v2755_v0 = vpop.permute.xlu0 %2754  ;;  %8620 = vmatprep.subr.bf16.mxu0 %v14498_v31 }
 0x23d   :  { %14671 = vst [vmem:[#allocation24_spill] sm:$0xff] %v11638_v42  ;;  %7620 = vmatprep.mubr.msk.f32.mxu0 %vm9412_vm9, %v14545_v27  ;;  %v11646_v9 = vsub.f32 %v2952_v22, %v11638_v42  ;;  %v2638_v5 = vpop.permute.xlu1 %2637  ;;  %v2769_v44 = vsel %vm2704_vm6, %v2755_v0, 0.0 }
 0x23e   :  { %9286 = vset.pattern.permute.xlu1 %v14617_v20  ;;  %v2652_v33 = vsel %vm2587_vm4, %v2638_v5, 0.0 }
 0x23f   :  { %5396 = vperm.xlu1 %9286, %v14672_v14   ;;  %5487 = vperm.xlu0 %9274, %v14673_v56   ;;  %v14017_v18 = vand.u32 4294901760, %v11646_v9  ;;  %v2782_v12 = vadd.f32 %v2769_v44, %v2652_v33  ;;  %v14677_v44 = vld [vmem:[#allocation54_spill] sm:$0xff] }
 0x240   :  { %7621 = vmatmul.mubr.f32.gmra.mrb[6].mxu0 %v14674_v63  ;;  %v2885_v47 = vpop.permute.xlu0 %2884 }
 0x241   :  { %7623 = vmatprep.mubr.msk.f32.mxu0 %vm9412_vm9, %v14545_v27  ;;  %v2821_v22 = vpop.permute.xlu1 %2820  ;;  %v3142_v13 = vsub.f32 %v11646_v9, %v14017_v18 }
 0x242   :  { %vm2834_vm7 = vcmp.eq.s32.totalorder %v2821_v22, %v10885_v3 }
 0x243   :  { %5513 = vperm.xlu1 %9286, %v14662_v34   ;;  %9330 = vset.pattern.permute.xlu0 %v14619_v58  ;;  %v2899_v25 = vsel %vm2834_vm7, %v2885_v47, 0.0  ;;  %v3143_v0 = vand.u32 4294901760, %v3142_v13  ;;  %v14681_v47 = vld [vmem:[#allocation70_spill] sm:$0xff]  ;;  %v14683_v13 = vand.u32 4294901760, %v11106_v16 }
 0x244   :  { %3965 = vperm.xlu0 %9330, %v14632_v43   ;;  %7624 = vmatmul.mubr.f32.gmra.mrb[8].mxu0 %v14675_v10  ;;  %v2912_v34 = vadd.f32 %v2899_v25, %v2782_v12 }
 0x245   :  { %7626 = vmatprep.mubr.msk.f32.mxu0 %vm9412_vm9, %v14545_v27  ;;  %v11668_v14 = vpop.permute.xlu0 %5504  ;;  %7786 = vmatmul.mubr.f32.gmra.mrb[22].mxu1 %v3143_v0  ;;  %v14685_v0 = vld [vmem:[#allocation18_spill] sm:$0xff] }
 0x246   :  { %14676 = vst [vmem:[#allocation37_spill] sm:$0xff] %v11668_v14  ;;  %v2955_v5 = vsel %vm1491_vm8, %v2912_v34, 0  ;;  %v11671_v63 = vpop.permute.xlu1 %3962  ;;  %7788 = vmatprep.mubr.msk.f32.mxu1 %vm9412_vm9, %v14545_v27 }
 0x247   :  { %5451 = vperm.xlu1 %9286, %v14668_v4   ;;  %v11676_v43 = vand.u32 4294901760, %v2955_v5  ;;  %vm4000_vm12 = vcmp.eq.s32.totalorder %v11671_v63, %v10885_v3 }
 0x248   :  { %3974 = vperm.xlu0 %9330, %v14677_v44   ;;  %7627 = vmatmul.mubr.f32.gmra.mrb[10].mxu0 %v14678_v38  ;;  %v14687_v38 = vand.u32 4294901760, %v11130_v48 }
 0x249   :  { %14679 = vst [vmem:[#allocation42_spill] sm:$0xff] %v11676_v43  ;;  %7629 = vmatprep.mubr.msk.f32.mxu0 %vm9412_vm9, %v14545_v27  ;;  %v11683_v4 = vpop.permute.xlu0 %5556  ;;  %v11686_v33 = vsub.f32 %v2955_v5, %v11676_v43  ;;  %v14686_v5 = vld [vmem:[#allocation85_spill] sm:$0xff] }
 0x24a   :  { %14680 = vst [vmem:[#allocation38_spill] sm:$0xff] %v11683_v4  ;;  %v11689_v22 = vpop.permute.xlu1 %3968  ;;  %v14750_v4 = vld [vmem:[#allocation51_spill] sm:$0xff] }
 0x24b   :  { %9287 = vset.pattern.permute.xlu1 %v14619_v58  ;;  %v14018_v12 = vand.u32 4294901760, %v11686_v33  ;;  %vm4002_vm5 = vcmp.eq.s32.totalorder %v11689_v22, %v10885_v3 }
 0x24c   :  { %4273 = vperm.xlu1 %9287, %v14681_v47   ;;  %3980 = vperm.xlu0 %9330, %v14682_v57  }
 0x24d   :  { %7630 = vmatmul.mubr.f32.gmra.mrb[12].mxu0 %v14683_v13  ;;  %v11697_v10 = vpop.permute.xlu0 %5634  ;;  %v3152_v25 = vsub.f32 %v11686_v33, %v14018_v12  ;;  %v14689_v12 = vld [vmem:[#allocation114_spill] sm:$0xff] }
 0x24e   :  { %7632 = vmatprep.mubr.msk.f32.mxu0 %vm9412_vm9, %v14545_v27  ;;  %14684 = vst [vmem:[#allocation121_spill] sm:$0xff] %v11697_v10  ;;  %v14745_v10 = vld [vmem:[#allocation35_spill] sm:$0xff] }
 0x24f   :  { %v3153_v16 = vand.u32 4294901760, %v3152_v25  ;;  %v14690_v25 = vand.u32 4294901760, %v11150_v8 }
 0x250   :  { %9288 = vset.pattern.permute.xlu1 %v14617_v20  ;;  %3986 = vperm.xlu0 %9330, %v14686_v5  }
 0x251   :  { %5643 = vperm.xlu1 %9288, %v14685_v0   ;;  %v11704_v34 = vpop.permute.xlu1 %3971  ;;  %7633 = vmatmul.mubr.f32.gmra.mrb[14].mxu0 %v14687_v38  ;;  %v14692_v38 = vld [vmem:[#allocation89_spill] sm:$0xff] }
 0x252   :  { %v11709_v13 = vpop.permute.xlu0 %5686  ;;  %7635 = vmatprep.mubr.msk.f32.mxu0 %vm9412_vm9, %v14545_v27  ;;  %7789 = vmatmul.mubr.f32.gmra.mrb[24].mxu1 %v3153_v16  ;;  %v14694_v16 = vld [vmem:[#allocation126_spill] sm:$0xff]  ;;  %vm4003_vm6 = vcmp.eq.s32.totalorder %v11704_v34, %v10885_v3 }
 0x253   :  { %14688 = vst [vmem:[#allocation131_spill] sm:$0xff] %v11709_v13  ;;  %7799 = vmatprep.mubr.msk.f32.mxu1 %vm9412_vm9, %v14545_v27  ;;  %v14742_v13 = vld [vmem:[#allocation138_spill] sm:$0xff] }
 0x254   :  { %4079 = vperm.xlu0 %9330, %v14689_v12   ;;  %v14695_v12 = vld [vmem:[#allocation105_spill] sm:$0xff] }
 0x255   :  { %5698 = vperm.xlu1 %9288, %v14681_v47   ;;  %v11714_v18 = vpop.permute.xlu1 %3977  ;;  %7636 = vmatmul.mubr.f32.gmra.mrb[16].mxu0 %v14690_v25  ;;  %v14697_v25 = vand.u32 4294901760, %v11175_v23 }
 0x256   :  { %v11721_v48 = vpop.permute.xlu0 %5560  ;;  %7638 = vmatprep.mubr.msk.f32.mxu0 %vm9412_vm9, %v14545_v27  ;;  %7800 = vmatmul.mubr.f32.vlgmr.msra.gmra.mrb[0].mxu1 %v14692_v38 }
 0x257   :  { %14691 = vst [vmem:[#allocation23_spill] sm:$0xff] %v11721_v48  ;;  %7802 = vmatprep.mubr.msk.f32.mxu1 %vm9412_vm9, %v14545_v27  ;;  %8640 = vmatpush3.bf16.msra.mxu1 %v14698_v41  ;;  %v14701_v41 = vand.u32 4294901760, %v14650_v36 }
 0x258   :  { %4131 = vperm.xlu0 %9330, %v14694_v16   ;;  %8641 = vmatprep.subr.bf16.mxu1 %v14498_v31 }
 0x259   :  { %9289 = vset.pattern.permute.xlu1 %v14619_v58  ;;  %v11727_v47 = vpop.permute.xlu1 %3983  ;;  %7639 = vmatmul.mubr.f32.gmra.mrb[18].mxu0 %v14697_v25  ;;  %v4342_v25 = vld [vmem:[#allocation5 + $0x58] sm:$0x7] }
 0x25a   :  { %14693 = vst [vmem:[#allocation127_spill] sm:$0xff] %v11727_v47  ;;  %4030 = vperm.xlu1 %9289, %v14695_v12   ;;  %v11733_v8 = vpop.permute.xlu0 %5510  ;;  %7803 = vmatmul.mubr.f32.gmra.mrb[2].mxu1 %v11319_v45 }
 0x25b   :  { %14696 = vst [vmem:[#allocation33_spill] sm:$0xff] %v11733_v8  ;;  %7641 = vmatprep.mubr.msk.f32.mxu0 %vm9412_vm9, %v14545_v27  ;;  %7805 = vmatprep.mubr.msk.f32.mxu1 %vm9412_vm9, %v14545_v27 }
 0x25c   :  { %4135 = vperm.xlu0 %9330, %v14609_v17  }
 0x25d   :  { %v11743_v16 = vpop.permute.xlu1 %3989  ;;  %7642 = vmatmul.mubr.f32.gmra.mrb[20].mxu0 %v14701_v41  ;;  %v14704_v41 = vand.u32 4294901760, %v14652_v54 }
 0x25e   :  { %14699 = vst [vmem:[#allocation44_spill] sm:$0xff] %v11743_v16  ;;  %9290 = vset.pattern.permute.xlu1 %v14617_v20  ;;  %v11751_v23 = vpop.permute.xlu0 %5564  ;;  %7806 = vmatmul.mubr.f32.gmra.mrb[4].mxu1 %v11352_v35  ;;  %v11771_v16 = vld [vmem:[#allocation5 + $0x40] sm:$0xff] }
 0x25f   :  { %5399 = vperm.xlu1 %9290, %v14677_v44   ;;  %14700 = vst [vmem:[#allocation55_spill] sm:$0xff] %v11751_v23  ;;  %7644 = vmatprep.mubr.msk.f32.mxu0 %vm9412_vm9, %v14545_v27  ;;  %v14702_v44 = vpack.c.bf16 %v14599_v24, %v14598_v32  ;;  %v11773_v23 = vld [vmem:[#allocation5 + $0x48] sm:$0xff] }
 0x260   :  { %4212 = vperm.xlu0 %9330, %v14644_v30   ;;  %7808 = vmatprep.mubr.msk.f32.mxu1 %vm9412_vm9, %v14545_v27  ;;  %v11775_v30 = vld [vmem:[#allocation5 + $0x50] sm:$0xff] }
 0x261   :  { %v11758_v17 = vpop.permute.xlu1 %4014  ;;  %8643 = vmatpush3.bf16.msra.mxu1 %v14702_v44  ;;  %7645 = vmatmul.mubr.f32.gmra.mrb[22].mxu0 %v14704_v41  ;;  %v11780_v44 = vsel %vm1531_vm3, %v4342_v25, 0  ;;  %v14020_v41 = vand.u32 4294901760, %v11771_v16 }
 0x262   :  { %v11767_v36 = vpop.permute.xlu0 %5640  ;;  %7809 = vmatmul.mubr.f32.gmra.mrb[6].mxu1 %v11377_v15  ;;  %7647 = vmatprep.mubr.msk.f32.mxu0 %vm9412_vm9, %v14545_v27  ;;  %v14021_v48 = vand.u32 4294901760, %v11780_v44 }
 0x263   :  { %9291 = vset.pattern.permute.xlu1 %v14619_v58  ;;  %14703 = vst [vmem:[#allocation125_spill] sm:$0xff] %v11767_v36  ;;  %7811 = vmatprep.mubr.msk.f32.mxu1 %vm9412_vm9, %v14545_v27  ;;  %v11803_v47 = vsub.f32 %v11771_v16, %v14020_v41 }
 0x264   :  { %4221 = vperm.xlu1 %9291, %v14625_v53   ;;  %4085 = vperm.xlu0 %9330, %v14611_v7   ;;  %v14019_v53 = vand.u32 4294901760, %v11773_v23  ;;  %v14707_v7 = vand.u32 4294901760, %v14654_v55 }
 0x265   :  { %8644 = vmatprep.subr.bf16.mxu1 %v14498_v31  ;;  %14708 = vst [vmem:[#allocation32_spill] sm:$0xff] %v11803_v47  ;;  %v14725_v47 = vld [vmem:[#allocation64_spill] sm:$0xff] }
 0x266   :  { %v11785_v54 = vpop.permute.xlu1 %5387  ;;  %v11793_v25 = vpop.permute.xlu0 %5694  ;;  %7648 = vmatmul.mubr.f32.gmra.mrb[24].mxu0 %v14707_v7  ;;  %7812 = vmatmul.mubr.f32.gmra.mrb[8].mxu1 %v11411_v52  ;;  %v11808_v36 = vsub.f32 %v11773_v23, %v14019_v53  ;;  %v11820_v7 = vsub.f32 %v11780_v44, %v14021_v48 }
 0x267   :  { %14705 = vst [vmem:[#allocation74_spill] sm:$0xff] %v11785_v54  ;;  %14706 = vst [vmem:[#allocation48_spill] sm:$0xff] %v11793_v25  ;;  %v14710_v25 = vand.u32 4294901760, %v11775_v30  ;;  %7814 = vmatprep.mubr.msk.f32.mxu1 %vm9412_vm9, %v14545_v27  ;;  %7658 = vmatprep.mubr.msk.f32.mxu0 %vm9412_vm9, %v14545_v27  ;;  %v14751_v54 = vld [vmem:[#allocation139_spill] sm:$0xff] }
 0x268   :  { %9292 = vset.pattern.permute.xlu1 %v14617_v20  ;;  %14709 = vst [vmem:[#allocation50_spill] sm:$0xff] %v11808_v36  ;;  %4139 = vperm.xlu0 %9330, %v14613_v60   ;;  %14712 = vst [vmem:[#allocation20_spill] sm:$0xff] %v11820_v7 }
 0x269   :  { %v11813_v55 = vsub.f32 %v11775_v30, %v14710_v25  ;;  %5455 = vperm.xlu1 %9292, %v14695_v12   ;;  %v14714_v25 = vld [vmem:[#allocation62_spill] sm:$0xff]  ;;  %v14716_v12 = vld [vmem:[#allocation133_spill] sm:$0xff] }
 0x26a   :  { %v11828_v41 = vpop.permute.xlu0 %5568  ;;  %7659 = vmatmul.mubr.f32.vlgmr.msra.gmra.mrb[0].mxu0 %v14714_v25  ;;  %7815 = vmatmul.mubr.f32.gmra.mrb[10].mxu1 %v11436_v2  ;;  %v14768_v2 = vld [vmem:[#allocation141_spill] sm:$0xff] }
 0x26b   :  { %14711 = vst [vmem:[#allocation129_spill] sm:$0xff] %v11813_v55  ;;  %v11826_v53 = vpop.permute.xlu1 %4209  ;;  %14713 = vst [vmem:[#allocation16_spill] sm:$0xff] %v11828_v41  ;;  %7661 = vmatprep.mubr.msk.f32.mxu0 %vm9412_vm9, %v14545_v27  ;;  %7817 = vmatprep.mubr.msk.f32.mxu1 %vm9412_vm9, %v14545_v27 }
 0x26c   :  { %4143 = vperm.xlu0 %9330, %v14621_v49   ;;  %v14718_v49 = vld [vmem:[#allocation119_spill] sm:$0xff]  ;;  %8622 = vmatpush3.bf16.msra.mxu0 %v14633_v50  ;;  %vm4247_vm14 = vcmp.eq.s32.totalorder %v11826_v53, %v10885_v3 }
 0x26d   :  { %9293 = vset.pattern.permute.xlu1 %v14619_v58  ;;  %8623 = vmatprep.subr.bf16.mxu0 %v14498_v31 }
 0x26e   :  { %4277 = vperm.xlu1 %9293, %v14627_v19   ;;  %v11839_v60 = vpop.permute.xlu0 %5516  ;;  %7662 = vmatmul.mubr.f32.gmra.mrb[2].mxu0 %v14716_v12 }
 0x26f   :  { %14715 = vst [vmem:[#allocation53_spill] sm:$0xff] %v11839_v60  ;;  %7818 = vmatmul.mubr.f32.gmra.mrb[12].mxu1 %v11477_v26  ;;  %7664 = vmatprep.mubr.msk.f32.mxu0 %vm9412_vm9, %v14545_v27  ;;  %v14767_v26 = vld [vmem:[#allocation47_spill] sm:$0xff] }
 0x270   :  { %v11843_v48 = vpop.permute.xlu1 %5439  ;;  %4218 = vperm.xlu0 %9330, %v14685_v0   ;;  %7820 = vmatprep.mubr.msk.f32.mxu1 %vm9412_vm9, %v14545_v27  ;;  %v14720_v0 = vld [vmem:[#allocation106_spill] sm:$0xff] }
 0x271   :  { %14717 = vst [vmem:[#allocation43_spill] sm:$0xff] %v11843_v48  ;;  %8625 = vmatpush3.bf16.msra.mxu0 %v14635_v40  ;;  %v14723_v40 = vld [vmem:[#allocation46_spill] sm:$0xff]  ;;  %v14746_v48 = vld [vmem:[#allocation80_spill] sm:$0xff] }
 0x272   :  { %4094 = vperm.xlu1 %9293, %v14718_v49   ;;  %v11852_v19 = vpop.permute.xlu0 %5572  ;;  %7665 = vmatmul.mubr.f32.gmra.mrb[4].mxu0 %v11003_v6 }
 0x273   :  { %14719 = vst [vmem:[#allocation27_spill] sm:$0xff] %v11852_v19  ;;  %7821 = vmatmul.mubr.f32.gmra.mrb[14].mxu1 %v11503_v51  ;;  %7667 = vmatprep.mubr.msk.f32.mxu0 %vm9412_vm9, %v14545_v27 }
 0x274   :  { %4091 = vperm.xlu0 %9330, %v14622_v28   ;;  %7823 = vmatprep.mubr.msk.f32.mxu1 %vm9412_vm9, %v14545_v27  ;;  %v14722_v28 = vld [vmem:[#allocation134_spill] sm:$0xff] }
 0x275   :  { %v11859_v7 = vpop.permute.xlu1 %4261  ;;  %8662 = vmatprep.subr.bf16.mxu0 %v14498_v31 }
 0x276   :  { %4034 = vperm.xlu1 %9293, %v14720_v0   ;;  %v11866_v50 = vpop.permute.xlu0 %5646  ;;  %7668 = vmatmul.mubr.f32.gmra.mrb[6].mxu0 %v11023_v62 }
 0x277   :  { %14721 = vst [vmem:[#allocation41_spill] sm:$0xff] %v11866_v50  ;;  %7824 = vmatmul.mubr.f32.gmra.mrb[16].mxu1 %v11536_v59  ;;  %7670 = vmatprep.mubr.msk.f32.mxu0 %vm9412_vm9, %v14545_v27  ;;  %v14726_v50 = vld [vmem:[#allocation135_spill] sm:$0xff]  ;;  %v14762_v59 = vld [vmem:[#allocation140_spill] sm:$0xff] }
 0x278   :  { %4147 = vperm.xlu0 %9330, %v14722_v28   ;;  %7826 = vmatprep.mubr.msk.f32.mxu1 %vm9412_vm9, %v14545_v27 }
 0x279   :  { %v11873_v55 = vpop.permute.xlu1 %4082 }
 0x27a   :  { %9294 = vset.pattern.permute.xlu1 %v14617_v20  ;;  %v11880_v36 = vpop.permute.xlu0 %5702  ;;  %7671 = vmatmul.mubr.f32.gmra.mrb[8].mxu0 %v14725_v47  ;;  %vm4118_vm15 = vcmp.eq.s32.totalorder %v11873_v55, %v10885_v3 }
 0x27b   :  { %5402 = vperm.xlu1 %9294, %v14723_v40   ;;  %14724 = vst [vmem:[#allocation77_spill] sm:$0xff] %v11880_v36  ;;  %7827 = vmatmul.mubr.f32.gmra.mrb[18].mxu1 %v11562_v37  ;;  %v14728_v40 = vld [vmem:[#allocation65_spill] sm:$0xff]  ;;  %v14761_v37 = vld [vmem:[#allocation83_spill] sm:$0xff] }
 0x27c   :  { %7673 = vmatprep.mubr.msk.f32.mxu0 %vm9412_vm9, %v14545_v27  ;;  %4151 = vperm.xlu0 %9330, %v14726_v50   ;;  %v14729_v36 = vld [vmem:[#allocation45_spill] sm:$0xff] }
 0x27d   :  { %v11886_v41 = vpop.permute.xlu1 %4018  ;;  %7829 = vmatprep.mubr.msk.f32.mxu1 %vm9412_vm9, %v14545_v27 }
 0x27e   :  { %v11892_v28 = vpop.permute.xlu0 %5576  ;;  %7674 = vmatmul.mubr.f32.gmra.mrb[10].mxu0 %v14728_v40 }
 0x27f   :  { %5519 = vperm.xlu1 %9294, %v14718_v49   ;;  %14727 = vst [vmem:[#allocation128_spill] sm:$0xff] %v11892_v28  ;;  %7830 = vmatmul.mubr.f32.gmra.mrb[20].mxu1 %v11594_v21  ;;  %v14732_v49 = vld [vmem:[#allocation57_spill] sm:$0xff]  ;;  %v14758_v21 = vld [vmem:[#allocation71_spill] sm:$0xff] }
 0x280   :  { %7676 = vmatprep.mubr.msk.f32.mxu0 %vm9412_vm9, %v14545_v27  ;;  %7832 = vmatprep.mubr.msk.f32.mxu1 %vm9412_vm9, %v14545_v27 }
 0x281   :  { %4224 = vperm.xlu0 %9330, %v14729_v36  }
 0x282   :  { %v11901_v50 = vpop.permute.xlu1 %5390  ;;  %v11904_v19 = vpop.permute.xlu0 %5522  ;;  %7677 = vmatmul.mubr.f32.gmra.mrb[12].mxu0 %v14732_v49 }
 0x283   :  { %14730 = vst [vmem:[#allocation116_spill] sm:$0xff] %v11901_v50  ;;  %5459 = vperm.xlu1 %9294, %v14720_v0   ;;  %14731 = vst [vmem:[#allocation130_spill] sm:$0xff] %v11904_v19  ;;  %7833 = vmatmul.mubr.f32.gmra.mrb[22].mxu1 %v11638_v42  ;;  %v14735_v0 = vld [vmem:[#allocation58_spill] sm:$0xff]  ;;  %v14736_v19 = vld [vmem:[#allocation93_spill] sm:$0xff] }
 0x284   :  { %7679 = vmatprep.mubr.msk.f32.mxu0 %vm9412_vm9, %v14545_v27  ;;  %7835 = vmatprep.mubr.msk.f32.mxu1 %vm9412_vm9, %v14545_v27  ;;  %v14740_v50 = vld [vmem:[#allocation73_spill] sm:$0xff]  ;;  %v14756_v42 = vld [vmem:[#allocation82_spill] sm:$0xff] }
 0x285   :  { %4097 = vperm.xlu0 %9330, %v14634_v39   ;;  %v14738_v39 = vld [vmem:[#allocation60_spill] sm:$0xff] }
 0x286   :  { %v11913_v28 = vpop.permute.xlu1 %5507  ;;  %v11916_v60 = vpop.permute.xlu0 %5580  ;;  %7680 = vmatmul.mubr.f32.gmra.mrb[14].mxu0 %v14735_v0 }
 0x287   :  { %14733 = vst [vmem:[#allocation101_spill] sm:$0xff] %v11913_v28  ;;  %9295 = vset.pattern.permute.xlu1 %v14619_v58  ;;  %14734 = vst [vmem:[#allocation12_spill] sm:$0xff] %v11916_v60  ;;  %7836 = vmatmul.mubr.f32.gmra.mrb[24].mxu1 %v11676_v43  ;;  %v14741_v60 = vld [vmem:[#allocation90_spill] sm:$0xff]  ;;  %v14755_v43 = vld [vmem:[#allocation68_spill] sm:$0xff] }
 0x288   :  { %4281 = vperm.xlu1 %9295, %v14736_v19   ;;  %7846 = vmatprep.mubr.msk.f32.mxu1 %vm9412_vm9, %v14545_v27 }
 0x289   :  { %7682 = vmatprep.mubr.msk.f32.mxu0 %vm9412_vm9, %v14545_v27  ;;  %4155 = vperm.xlu0 %9330, %v14738_v39  }
 0x28a   :  { %v11925_v8 = vpop.permute.xlu1 %5443  ;;  %v11928_v28 = vpop.permute.xlu0 %5652  ;;  %7683 = vmatmul.mubr.f32.gmra.mrb[16].mxu0 %v14740_v50 }
 0x28b   :  { %14737 = vst [vmem:[#allocation69_spill] sm:$0xff] %v11925_v8  ;;  %14739 = vst [vmem:[#allocation132_spill] sm:$0xff] %v11928_v28  ;;  %7847 = vmatmul.mubr.f32.vlgmr.msra.gmra.mrb[0].mxu1 %v14741_v60  ;;  %7685 = vmatprep.mubr.msk.f32.mxu0 %vm9412_vm9, %v14545_v27  ;;  %v14744_v28 = vld [vmem:[#allocation136_spill] sm:$0xff] }
 0x28c   :  { %9296 = vset.pattern.permute.xlu1 %v14617_v20  ;;  %7849 = vmatprep.mubr.msk.f32.mxu1 %vm9412_vm9, %v14545_v27 }
 0x28d   :  { %5649 = vperm.xlu1 %9296, %v14729_v36   ;;  %4159 = vperm.xlu0 %9330, %v14742_v13   ;;  %v14747_v36 = vld [vmem:[#allocation34_spill] sm:$0xff] }
 0x28e   :  { %v11941_v39 = vpop.permute.xlu0 %5710  ;;  %7686 = vmatmul.mubr.f32.gmra.mrb[18].mxu0 %v14744_v28  ;;  %8646 = vmatpush3.bf16.msra.mxu1 %v14745_v10 }
 0x28f   :  { %v11939_v8 = vpop.permute.xlu1 %4265  ;;  %14743 = vst [vmem:[#allocation118_spill] sm:$0xff] %v11941_v39  ;;  %7850 = vmatmul.mubr.f32.gmra.mrb[2].mxu1 %v14746_v48  ;;  %7688 = vmatprep.mubr.msk.f32.mxu0 %vm9412_vm9, %v14545_v27  ;;  %v14749_v39 = vld [vmem:[#allocation75_spill] sm:$0xff] }
 0x290   :  { %7852 = vmatprep.mubr.msk.f32.mxu1 %vm9412_vm9, %v14545_v27  ;;  %8647 = vmatprep.subr.bf16.mxu1 %v14498_v31 }
 0x291   :  { %5706 = vperm.xlu1 %9296, %v14736_v19   ;;  %4230 = vperm.xlu0 %9330, %v14747_v36   ;;  %v14753_v19 = vld [vmem:[#allocation107_spill] sm:$0xff] }
 0x292   :  { %v11953_v13 = vpop.permute.xlu0 %5584  ;;  %7689 = vmatmul.mubr.f32.gmra.mrb[20].mxu0 %v14749_v39  ;;  %8649 = vmatpush3.bf16.msra.mxu1 %v14750_v4 }
 0x293   :  { %14748 = vst [vmem:[#allocation21_spill] sm:$0xff] %v11953_v13  ;;  %7853 = vmatmul.mubr.f32.gmra.mrb[4].mxu1 %v14751_v54  ;;  %7691 = vmatprep.mubr.msk.f32.mxu0 %vm9412_vm9, %v14545_v27 }
 0x294   :  { %v11958_v14 = vpop.permute.xlu1 %5637  ;;  %7855 = vmatprep.mubr.msk.f32.mxu1 %vm9412_vm9, %v14545_v27  ;;  %8650 = vmatprep.subr.bf16.mxu1 %v14498_v31 }
 0x295   :  { %14752 = vst [vmem:[#allocation115_spill] sm:$0xff] %v11958_v14  ;;  %9297 = vset.pattern.permute.xlu1 %v14619_v58  ;;  %4103 = vperm.xlu0 %9330, %v14540_v29  }
 0x296   :  { %4038 = vperm.xlu1 %9297, %v14753_v19   ;;  %v11967_v13 = vpop.permute.xlu0 %5528  ;;  %7692 = vmatmul.mubr.f32.gmra.mrb[22].mxu0 %v14755_v43 }
 0x297   :  { %14754 = vst [vmem:[#allocation88_spill] sm:$0xff] %v11967_v13  ;;  %7856 = vmatmul.mubr.f32.gmra.mrb[6].mxu1 %v14756_v42  ;;  %7694 = vmatprep.mubr.msk.f32.mxu0 %vm9412_vm9, %v14545_v27  ;;  %v14760_v13 = vld [vmem:[#allocation72_spill] sm:$0xff] }
 0x298   :  { %v11972_v14 = vpop.permute.xlu1 %5690  ;;  %7858 = vmatprep.mubr.msk.f32.mxu1 %vm9412_vm9, %v14545_v27 }
 0x299   :  { %14757 = vst [vmem:[#allocation102_spill] sm:$0xff] %v11972_v14  ;;  %4163 = vperm.xlu0 %9330, %v14758_v21   ;;  %v14763_v21 = vand.u32 4294901760, %v11771_v16  ;;  %v14770_v16 = vld [vmem:[#allocation59_spill] sm:$0xff] }
 0x29a   :  { %9298 = vset.pattern.permute.xlu1 %v14617_v20  ;;  %v11981_v29 = vpop.permute.xlu0 %5588  ;;  %7695 = vmatmul.mubr.f32.gmra.mrb[24].mxu0 %v14760_v13 }
 0x29b   :  { %5405 = vperm.xlu1 %9298, %v14682_v57   ;;  %14759 = vst [vmem:[#allocation36_spill] sm:$0xff] %v11981_v29  ;;  %7859 = vmatmul.mubr.f32.gmra.mrb[8].mxu1 %v14761_v37  ;;  %v14764_v57 = vand.u32 4294901760, %v11773_v23 }
 0x29c   :  { %7705 = vmatprep.mubr.msk.f32.mxu0 %vm9412_vm9, %v14545_v27  ;;  %7861 = vmatprep.mubr.msk.f32.mxu1 %vm9412_vm9, %v14545_v27 }
 0x29d   :  { %v11987_v14 = vpop.permute.xlu1 %4022  ;;  %4167 = vperm.xlu0 %9330, %v14762_v59   ;;  %v11996_v51 = vpack.c.bf16 %v14764_v57, %v14763_v21 }
 0x29e   :  { %v11999_v29 = vpop.permute.xlu0 %5658  ;;  %7706 = vmatmul.mubr.f32.vlgmr.msra.gmra.mrb[0].mxu0 %v14714_v25  ;;  %v14773_v25 = vld [vmem:[#allocation98_spill] sm:$0xff] }
 0x29f   :  { %14765 = vst [vmem:[#allocation39_spill] sm:$0xff] %v11996_v51  ;;  %9299 = vset.pattern.permute.xlu1 %v14619_v58  ;;  %14766 = vst [vmem:[#allocation120_spill] sm:$0xff] %v11999_v29  ;;  %7862 = vmatmul.mubr.f32.gmra.mrb[10].mxu1 %v14768_v2  ;;  %v14782_v29 = vld [vmem:[#allocation25_spill] sm:$0xff] }
 0x2a0   :  { %4227 = vperm.xlu1 %9299, %v14767_v26   ;;  %7864 = vmatprep.mubr.msk.f32.mxu1 %vm9412_vm9, %v14545_v27  ;;  %v14772_v26 = vld [vmem:[#allocation96_spill] sm:$0xff] }
 0x2a1   :  { %7708 = vmatprep.mubr.msk.f32.mxu0 %vm9412_vm9, %v14545_v27  ;;  %4236 = vperm.xlu0 %9330, %v14770_v16  }
 0x2a2   :  { %v12008_v59 = vpop.permute.xlu1 %5393  ;;  %8664 = vmatpush3.bf16.msra.mxu0 %v11996_v51  ;;  %v12012_v23 = vpop.permute.xlu0 %5718 }
 0x2a3   :  { %14769 = vst [vmem:[#allocation19_spill] sm:$0xff] %v12008_v59  ;;  %14771 = vst [vmem:[#allocation66_spill] sm:$0xff] %v12012_v23  ;;  %7709 = vmatmul.mubr.f32.gmra.mrb[2].mxu0 %v14716_v12  ;;  %8665 = vmatprep.subr.bf16.mxu0 %v14498_v31  ;;  %v14775_v12 = vld [vmem:[#allocation145_spill] sm:$0xff] }
 0x2a4   :  { %9300 = vset.pattern.permute.xlu1 %v14617_v20  ;;  %7865 = vmatmul.mubr.f32.gmra.mrb[12].mxu1 %v14772_v26  ;;  %v14779_v23 = vld [vmem:[#allocation81_spill] sm:$0xff] }
 0x2a5   :  { %5463 = vperm.xlu1 %9300, %v14753_v19   ;;  %7867 = vmatprep.mubr.msk.f32.mxu1 %vm9412_vm9, %v14545_v27  ;;  %v14776_v19 = vand.u32 4294901760, %v11775_v30  ;;  %v14783_v30 = vld [vmem:[#allocation79_spill] sm:$0xff] }
 0x2a6   :  { %7711 = vmatprep.mubr.msk.f32.mxu0 %vm9412_vm9, %v14545_v27  ;;  %3992 = vperm.xlu0 %9330, %v14773_v25   ;;  %v12026_v57 = vpop.permute.xlu0 %5592  ;;  %v14777_v25 = vand.u32 4294901760, %v11780_v44  ;;  %v14784_v44 = vld [vmem:[#allocation99_spill] sm:$0xff] }
 0x2a7   :  { %v12024_v21 = vpop.permute.xlu1 %4215  ;;  %14774 = vst [vmem:[#allocation31_spill] sm:$0xff] %v12026_v57  ;;  %7712 = vmatmul.mubr.f32.gmra.mrb[4].mxu0 %v11003_v6  ;;  %v14780_v57 = vld [vmem:[#allocation111_spill] sm:$0xff] }
 0x2a8   :  { %7868 = vmatmul.mubr.f32.gmra.mrb[14].mxu1 %v14775_v12  ;;  %7714 = vmatprep.mubr.msk.f32.mxu0 %vm9412_vm9, %v14545_v27  ;;  %v12039_v51 = vpack.c.bf16 %v14777_v25, %v14776_v19  ;;  %v14787_v19 = vld [vmem:[#allocation108_spill] sm:$0xff]  ;;  %v14788_v25 = vld [vmem:[#allocation123_spill] sm:$0xff]  ;;  %vm4249_vm2 = vcmp.eq.s32.totalorder %v12024_v21, %v10885_v3 }
 0x2a9   :  { %9301 = vset.pattern.permute.xlu1 %v14619_v58  ;;  %7870 = vmatprep.mubr.msk.f32.mxu1 %vm9412_vm9, %v14545_v27 }
 0x2aa   :  { %14778 = vst [vmem:[#allocation103_spill] sm:$0xff] %v12039_v51  ;;  %4285 = vperm.xlu1 %9301, %v14779_v23   ;;  %4054 = vperm.xlu0 %9330, %v14780_v57   ;;  %v12043_v6 = vpop.permute.xlu0 %5417 }
 0x2ab   :  { %14781 = vst [vmem:[#allocation76_spill] sm:$0xff] %v12043_v6  ;;  %7715 = vmatmul.mubr.f32.gmra.mrb[6].mxu0 %v11023_v62  ;;  %v14786_v62 = vld [vmem:[#allocation11_spill] sm:$0xff] }
 0x2ac   :  { %7871 = vmatmul.mubr.f32.gmra.mrb[16].mxu1 %v14782_v29  ;;  %v12047_v59 = vpop.permute.xlu1 %5447  ;;  %7717 = vmatprep.mubr.msk.f32.mxu0 %vm9412_vm9, %v14545_v27 }
 0x2ad   :  { %7873 = vmatprep.mubr.msk.f32.mxu1 %vm9412_vm9, %v14545_v27  ;;  %8667 = vmatpush3.bf16.msra.mxu0 %v12039_v51 }
 0x2ae   :  { %4100 = vperm.xlu1 %9301, %v14783_v30   ;;  %4301 = vperm.xlu0 %9330, %v14784_v44   ;;  %v12056_v23 = vpop.permute.xlu0 %5479 }
 0x2af   :  { %14785 = vst [vmem:[#allocation137_spill] sm:$0xff] %v12056_v23  ;;  %7718 = vmatmul.mubr.f32.gmra.mrb[8].mxu0 %v14725_v47  ;;  %8668 = vmatprep.subr.bf16.mxu0 %v14498_v31  ;;  %v14790_v23 = vld [vmem:[#allocation61_spill] sm:$0xff] }
 0x2b0   :  { %7874 = vmatmul.mubr.f32.gmra.mrb[18].mxu1 %v14786_v62  ;;  %7720 = vmatprep.mubr.msk.f32.mxu0 %vm9412_vm9, %v14545_v27 }
 0x2b1   :  { %v12063_v57 = vpop.permute.xlu1 %4269  ;;  %7876 = vmatprep.mubr.msk.f32.mxu1 %vm9412_vm9, %v14545_v27 }
 0x2b2   :  { %4042 = vperm.xlu1 %9301, %v14787_v19   ;;  %4112 = vperm.xlu0 %9330, %v14788_v25   ;;  %v12069_v51 = vpop.permute.xlu0 %5420 }
 0x2b3   :  { %14789 = vst [vmem:[#allocation87_spill] sm:$0xff] %v12069_v51  ;;  %7721 = vmatmul.mubr.f32.gmra.mrb[10].mxu0 %v14728_v40  ;;  %v14792_v51 = vld [vmem:[#allocation29_spill] sm:$0xff] }
 0x2b4   :  { %7877 = vmatmul.mubr.f32.gmra.mrb[20].mxu1 %v11606_v61  ;;  %7723 = vmatprep.mubr.msk.f32.mxu0 %vm9412_vm9, %v14545_v27 }
 0x2b5   :  { %v12075_v47 = vpop.permute.xlu1 %4088  ;;  %7879 = vmatprep.mubr.msk.f32.mxu1 %vm9412_vm9, %v14545_v27 }
 0x2b6   :  { %9302 = vset.pattern.permute.xlu1 %v14617_v20  ;;  %4058 = vperm.xlu0 %9330, %v14666_v11   ;;  %v12082_v6 = vpop.permute.xlu0 %5483  ;;  %vm4120_vm13 = vcmp.eq.s32.totalorder %v12075_v47, %v10885_v3 }
 0x2b7   :  { %5408 = vperm.xlu1 %9302, %v14790_v23   ;;  %14791 = vst [vmem:[#allocation28_spill] sm:$0xff] %v12082_v6  ;;  %7724 = vmatmul.mubr.f32.gmra.mrb[12].mxu0 %v14732_v49  ;;  %v14794_v49 = vand.u32 4294901760, %v14589_v46  ;;  %v14795_v23 = vand.u32 4294901760, %v14590_v1  ;;  %v14798_v1 = vand.u32 4294901760, %v14598_v32 }
 0x2b8   :  { %7880 = vmatmul.mubr.f32.gmra.mrb[22].mxu1 %v11646_v9  ;;  %7726 = vmatprep.mubr.msk.f32.mxu0 %vm9412_vm9, %v14545_v27 }
 0x2b9   :  { %v12088_v40 = vpop.permute.xlu1 %4026  ;;  %7882 = vmatprep.mubr.msk.f32.mxu1 %vm9412_vm9, %v14545_v27  ;;  %v8651_v6 = vpack.c.bf16 %v14795_v23, %v14794_v49  ;;  %v14807_v23 = vand.u32 4294901760, %v14768_v2 }
 0x2ba   :  { %4305 = vperm.xlu0 %9330, %v14792_v51   ;;  %v12094_v11 = vpop.permute.xlu0 %5423 }
 0x2bb   :  { %5525 = vperm.xlu1 %9302, %v14783_v30   ;;  %14793 = vst [vmem:[#allocation40_spill] sm:$0xff] %v12094_v11  ;;  %7727 = vmatmul.mubr.f32.gmra.mrb[14].mxu0 %v14735_v0  ;;  %v14796_v30 = vld [vmem:[#allocation124_spill] sm:$0xff]  ;;  %v14797_v11 = vand.u32 4294901760, %v14741_v60  ;;  %v14800_v60 = vand.u32 4294901760, %v14746_v48 }
 0x2bc   :  { %7883 = vmatmul.mubr.f32.gmra.mrb[24].mxu1 %v11686_v33  ;;  %7729 = vmatprep.mubr.msk.f32.mxu0 %vm9412_vm9, %v14545_v27 }
 0x2bd   :  { %7893 = vmatprep.mubr.msk.f32.mxu1 %vm9412_vm9, %v14545_v27 }
 0x2be   :  { %v12106_v51 = vpop.permute.xlu1 %5396  ;;  %4115 = vperm.xlu0 %9330, %v14796_v30   ;;  %v12110_v0 = vpop.permute.xlu0 %5487 }
 0x2bf   :  { %5467 = vperm.xlu1 %9302, %v14787_v19   ;;  %7730 = vmatmul.mubr.f32.gmra.mrb[16].mxu0 %v14740_v50  ;;  %v14799_v50 = vand.u32 4294901760, %v14599_v24  ;;  %v14802_v24 = vld [vmem:[#allocation26_spill] sm:$0xff] }
 0x2c0   :  { %7894 = vmatmul.mubr.f32.vlgmr.msra.gmra.mrb[0].mxu1 %v14797_v11  ;;  %7732 = vmatprep.mubr.msk.f32.mxu0 %vm9412_vm9, %v14545_v27  ;;  %v14801_v11 = vld [vmem:[#allocation84_spill] sm:$0xff] }
 0x2c1   :  { %7896 = vmatprep.mubr.msk.f32.mxu1 %vm9412_vm9, %v14545_v27  ;;  %8652 = vmatpush3.bf16.msra.mxu1 %v8651_v6  ;;  %v8654_v19 = vpack.c.bf16 %v14799_v50, %v14798_v1  ;;  %v14808_v1 = vand.u32 4294901760, %v14772_v26  ;;  %v4065_v50 = vsel %vm4000_vm12, %v11758_v17, 0.0  ;;  %v14809_v26 = vand.u32 4294901760, %v14775_v12 }
 0x2c2   :  { %v12119_v46 = vpop.permute.xlu1 %5513  ;;  %4062 = vperm.xlu0 %9330, %v14673_v56   ;;  %8653 = vmatprep.subr.bf16.mxu1 %v14498_v31  ;;  %v14803_v56 = vand.u32 4294901760, %v14751_v54  ;;  %v14804_v54 = vand.u32 4294901760, %v14756_v42  ;;  %v14806_v42 = vld [vmem:[#allocation109_spill] sm:$0xff] }
 0x2c3   :  { %9303 = vset.pattern.permute.xlu1 %v14619_v58  ;;  %7733 = vmatmul.mubr.f32.gmra.mrb[18].mxu0 %v14744_v28  ;;  %v3966_v6 = vpop.permute.xlu0 %3965 }
 0x2c4   :  { %7897 = vmatmul.mubr.f32.gmra.mrb[2].mxu1 %v14800_v60  ;;  %4289 = vperm.xlu1 %9303, %v14801_v11   ;;  %vm4001_vm10 = vcmp.eq.s32.totalorder %v3966_v6, %v10885_v3 }
 0x2c5   :  { %7899 = vmatprep.mubr.msk.f32.mxu1 %vm9412_vm9, %v14545_v27  ;;  %7735 = vmatprep.mubr.msk.f32.mxu0 %vm9412_vm9, %v14545_v27  ;;  %v4066_v12 = vsel %vm4001_vm10, %v11886_v41, 0.0  ;;  %vm4005_vm10 = vcmp.eq.s32.totalorder %v11714_v18, %v10885_v3  ;;  %v14826_v18 = vld [vmem:[#allocation122_spill] sm:$0xff] }
 0x2c6   :  { %v12136_v32 = vpop.permute.xlu1 %5451  ;;  %4309 = vperm.xlu0 %9330, %v14802_v24   ;;  %8655 = vmatpush3.bf16.msra.mxu1 %v8654_v19 }
 0x2c7   :  { %7736 = vmatmul.mubr.f32.gmra.mrb[20].mxu0 %v14749_v39  ;;  %8656 = vmatprep.subr.bf16.mxu1 %v14498_v31  ;;  %v12144_v48 = vpop.permute.xlu0 %3974 }
 0x2c8   :  { %7900 = vmatmul.mubr.f32.gmra.mrb[4].mxu1 %v14803_v56  ;;  %9304 = vset.pattern.permute.xlu1 %v14617_v20  ;;  %v14810_v56 = vld [vmem:[#allocation56_spill] sm:$0xff]  ;;  %vm4004_vm7 = vcmp.eq.s32.totalorder %v12144_v48, %v10885_v3 }
 0x2c9   :  { %5655 = vperm.xlu1 %9304, %v14747_v36   ;;  %7902 = vmatprep.mubr.msk.f32.mxu1 %vm9412_vm9, %v14545_v27  ;;  %v14805_v36 = vand.u32 4294901760, %v14761_v37 }
 0x2ca   :  { %7738 = vmatprep.mubr.msk.f32.mxu0 %vm9412_vm9, %v14545_v27  ;;  %9332 = vset.pattern.permute.xlu0 %v14617_v20 }
 0x2cb   :  { %v12152_v28 = vpop.permute.xlu1 %4273  ;;  %7739 = vmatmul.mubr.f32.gmra.mrb[22].mxu0 %v14755_v43  ;;  %v12157_v39 = vpop.permute.xlu0 %3980 }
 0x2cc   :  { %7903 = vmatmul.mubr.f32.gmra.mrb[6].mxu1 %v14804_v54  ;;  %7741 = vmatprep.mubr.msk.f32.mxu0 %vm9412_vm9, %v14545_v27 }
 0x2cd   :  { %5714 = vperm.xlu1 %9304, %v14801_v11   ;;  %7905 = vmatprep.mubr.msk.f32.mxu1 %vm9412_vm9, %v14545_v27 }
 0x2cf   :  { %7742 = vmatmul.mubr.f32.gmra.mrb[24].mxu0 %v14760_v13  ;;  %v12169_v43 = vpop.permute.xlu0 %3986 }
 0x2d0   :  { %7906 = vmatmul.mubr.f32.gmra.mrb[8].mxu1 %v14805_v36  ;;  %v12167_v49 = vpop.permute.xlu1 %5643  ;;  %8034 = vmatprep.mubr.msk.f32.mxu0 %vm9412_vm9, %v14545_v27 }
 0x2d1   :  { %9305 = vset.pattern.permute.xlu1 %v14619_v58  ;;  %7908 = vmatprep.mubr.msk.f32.mxu1 %vm9412_vm9, %v14545_v27 }
 0x2d2   :  { %4046 = vperm.xlu1 %9305, %v14806_v42  }
 0x2d3   :  { %v4080_v37 = vpop.permute.xlu0 %4079 }
 0x2d4   :  { %7909 = vmatmul.mubr.f32.gmra.mrb[10].mxu1 %v14807_v23  ;;  %v12179_v13 = vpop.permute.xlu1 %5698  ;;  %vm4117_vm11 = vcmp.eq.s32.totalorder %v4080_v37, %v10885_v3  ;;  %v14811_v23 = vand.u32 4294901760, %v14782_v29 }
 0x2d5   :  { %7911 = vmatprep.mubr.msk.f32.mxu1 %vm9412_vm9, %v14545_v27 }
 0x2d6   :  { %9306 = vset.pattern.permute.xlu1 %v14617_v20 }
 0x2d7   :  { %5411 = vperm.xlu1 %9306, %v14686_v5   ;;  %v4132_v2 = vpop.permute.xlu0 %4131  ;;  %v4312_v5 = vsel %vm4247_vm14, %v11859_v7, 0.0 }
 0x2d8   :  { %7912 = vmatmul.mubr.f32.gmra.mrb[12].mxu1 %v14808_v1  ;;  %v4182_v60 = vsel %vm4117_vm11, %v4132_v2, 0.0 }
 0x2d9   :  { %v12191_v19 = vpop.permute.xlu1 %4030  ;;  %7914 = vmatprep.mubr.msk.f32.mxu1 %vm9412_vm9, %v14545_v27  ;;  %v4195_v11 = vadd.f32 %v4182_v60, %v4065_v50  ;;  %v14812_v50 = vand.u32 4294901760, %v14786_v62 }
 0x2db   :  { %9307 = vset.pattern.permute.xlu1 %v14619_v58  ;;  %v4325_v63 = vadd.f32 %v4312_v5, %v4195_v11  ;;  %v4136_v17 = vpop.permute.xlu0 %4135  ;;  %v14813_v5 = vld [vmem:[#allocation86_spill] sm:$0xff] }
 0x2dc   :  { %7915 = vmatmul.mubr.f32.gmra.mrb[14].mxu1 %v14809_v26  ;;  %4233 = vperm.xlu1 %9307, %v14810_v56   ;;  %v4183_v7 = vsel %vm4118_vm15, %v4136_v17, 0.0  ;;  %v14815_v26 = vand.u32 4294901760, %v11606_v61 }
 0x2dd   :  { %7917 = vmatprep.mubr.msk.f32.mxu1 %vm9412_vm9, %v14545_v27  ;;  %v4344_v53 = vsel %vm1491_vm8, %v4325_v63, 0  ;;  %v4196_v37 = vadd.f32 %v4183_v7, %v4066_v12  ;;  %v14816_v12 = vld [vmem:[#allocation91_spill] sm:$0xff] }
 0x2de   :  { %v12208_v54 = vpop.permute.xlu1 %5399  ;;  %v12210_v36 = vand.u32 4294901760, %v4344_v53 }
 0x2df   :  { %v4213_v6 = vpop.permute.xlu0 %4212 }
 0x2e0   :  { %7918 = vmatmul.mubr.f32.gmra.mrb[16].mxu1 %v14811_v23  ;;  %9308 = vset.pattern.permute.xlu1 %v14617_v20  ;;  %v12217_v55 = vsub.f32 %v4344_v53, %v12210_v36  ;;  %vm4248_vm0 = vcmp.eq.s32.totalorder %v4213_v6, %v10885_v3  ;;  %v4067_v53 = vsel %vm4002_vm5, %v11987_v14, 0.0  ;;  %v4314_v23 = vsel %vm4249_vm2, %v12063_v57, 0.0  ;;  %v14818_v57 = vld [vmem:[#allocation110_spill] sm:$0xff] }
 0x2e1   :  { %5471 = vperm.xlu1 %9308, %v14806_v42   ;;  %7920 = vmatprep.mubr.msk.f32.mxu1 %vm9412_vm9, %v14545_v27  ;;  %v4313_v1 = vsel %vm4248_vm0, %v11939_v8, 0.0  ;;  %v14817_v14 = vand.u32 4294901760, %v11646_v9  ;;  %vm4006_vm0 = vcmp.eq.s32.totalorder %v12157_v39, %v10885_v3 }
 0x2e2   :  { %v14054_v41 = vand.u32 4294901760, %v12217_v55  ;;  %v4326_v29 = vadd.f32 %v4313_v1, %v4196_v37 }
 0x2e3   :  { %v12225_v2 = vpop.permute.xlu1 %4221  ;;  %v4086_v60 = vpop.permute.xlu0 %4085 }
 0x2e4   :  { %7921 = vmatmul.mubr.f32.gmra.mrb[18].mxu1 %v14812_v50  ;;  %v4457_v42 = vsub.f32 %v12217_v55, %v14054_v41  ;;  %v4347_v11 = vsel %vm1491_vm8, %v4326_v29, 0  ;;  %vm4119_vm1 = vcmp.eq.s32.totalorder %v4086_v60, %v10885_v3  ;;  %vm4251_vm12 = vcmp.eq.s32.totalorder %v12225_v2, %v10885_v3  ;;  %v14836_v41 = vld [vmem:[#allocation42_spill] sm:$0xff] }
 0x2e5   :  { %9309 = vset.pattern.permute.xlu1 %v14619_v58  ;;  %7923 = vmatprep.mubr.msk.f32.mxu1 %vm9412_vm9, %v14545_v27  ;;  %v12236_v8 = vand.u32 4294901760, %v4347_v11 }
 0x2e6   :  { %4293 = vperm.xlu1 %9309, %v14813_v5   ;;  %v4458_v62 = vand.u32 4294901760, %v4457_v42  ;;  %v4068_v42 = vsel %vm4003_vm6, %v12088_v40, 0.0  ;;  %v14821_v40 = vld [vmem:[#allocation78_spill] sm:$0xff] }
 0x2e7   :  { %v12243_v63 = vsub.f32 %v4347_v11, %v12236_v8  ;;  %v4140_v17 = vpop.permute.xlu0 %4139  ;;  %v14819_v11 = vand.u32 4294901760, %v11686_v33 }
 0x2e8   :  { %7924 = vmatmul.mubr.f32.gmra.mrb[20].mxu1 %v14815_v26  ;;  %v12247_v56 = vpop.permute.xlu1 %5455  ;;  %v4184_v7 = vsel %vm4119_vm1, %v4140_v17, 0.0  ;;  %8035 = vmatmul.mubr.f32.vlgmr.msra.gmra.mrb[26].mxu0 %v4458_v62 }
 0x2e9   :  { %14814 = vst [vmem:[#allocation117_spill] sm:$0xff] %v12243_v63  ;;  %7926 = vmatprep.mubr.msk.f32.mxu1 %vm9412_vm9, %v14545_v27  ;;  %v4197_v22 = vadd.f32 %v4184_v7, %v4067_v53  ;;  %8037 = vmatprep.mubr.msk.f32.mxu0 %vm9412_vm9, %v14545_v27  ;;  %v14053_v61 = vand.u32 4294901760, %v12243_v63 }
 0x2ea   :  { %4106 = vperm.xlu1 %9309, %v14816_v12  }
 0x2eb   :  { %v4327_v6 = vadd.f32 %v4314_v23, %v4197_v22  ;;  %v4144_v37 = vpop.permute.xlu0 %4143  ;;  %v4467_v1 = vsub.f32 %v12243_v63, %v14053_v61 }
 0x2ec   :  { %7927 = vmatmul.mubr.f32.gmra.mrb[22].mxu1 %v14817_v14  ;;  %v4185_v50 = vsel %vm4120_vm13, %v4144_v37, 0.0 }
 0x2ed   :  { %v4278_v21 = vpop.permute.xlu1 %4277  ;;  %7929 = vmatprep.mubr.msk.f32.mxu1 %vm9412_vm9, %v14545_v27  ;;  %v4350_v29 = vsel %vm1491_vm8, %v4327_v6, 0  ;;  %v4468_v60 = vand.u32 4294901760, %v4467_v1  ;;  %v4198_v62 = vadd.f32 %v4185_v50, %v4068_v42 }
 0x2ee   :  { %4050 = vperm.xlu1 %9309, %v14818_v57   ;;  %v12272_v9 = vand.u32 4294901760, %v4350_v29  ;;  %v4316_v50 = vsel %vm4251_vm12, %v4278_v21, 0.0 }
 0x2ef   :  { %v4219_v47 = vpop.permute.xlu0 %4218  ;;  %8038 = vmatmul.mubr.f32.gmra.mrb[28].mxu0 %v4468_v60 }
 0x2f0   :  { %7930 = vmatmul.mubr.f32.gmra.mrb[24].mxu1 %v14819_v11  ;;  %v12278_v5 = vsub.f32 %v4350_v29, %v12272_v9  ;;  %vm4250_vm4 = vcmp.eq.s32.totalorder %v4219_v47, %v10885_v3  ;;  %8040 = vmatprep.mubr.msk.f32.mxu0 %vm9412_vm9, %v14545_v27 }
 0x2f1   :  { %v4095_v26 = vpop.permute.xlu1 %4094  ;;  %7940 = vmatprep.mubr.msk.f32.mxu1 %vm9412_vm9, %v14545_v27  ;;  %v4315_v34 = vsel %vm4250_vm4, %v12152_v28, 0.0 }
 0x2f2   :  { %14820 = vst [vmem:[#allocation22_spill] sm:$0xff] %v12278_v5  ;;  %9310 = vset.pattern.permute.xlu1 %v14617_v20  ;;  %v4328_v33 = vadd.f32 %v4315_v34, %v4198_v62  ;;  %v14052_v17 = vand.u32 4294901760, %v12278_v5  ;;  %vm4122_vm14 = vcmp.eq.s32.totalorder %v4095_v26, %v10885_v3 }
 0x2f3   :  { %5414 = vperm.xlu1 %9310, %v14821_v40   ;;  %v4092_v53 = vpop.permute.xlu0 %4091 }
 0x2f4   :  { %7941 = vmatmul.mubr.f32.vlgmr.msra.gmra.mrb[0].mxu1 %v14692_v38  ;;  %v4353_v7 = vsel %vm1491_vm8, %v4328_v33, 0  ;;  %v4477_v28 = vsub.f32 %v12278_v5, %v14052_v17  ;;  %vm4121_vm11 = vcmp.eq.s32.totalorder %v4092_v53, %v10885_v3 }
 0x2f5   :  { %v4035_v22 = vpop.permute.xlu1 %4034  ;;  %7943 = vmatprep.mubr.msk.f32.mxu1 %vm9412_vm9, %v14545_v27  ;;  %8658 = vmatpush3.bf16.msra.mxu1 %v14745_v10  ;;  %v12299_v23 = vand.u32 4294901760, %v4353_v7  ;;  %v4069_v10 = vsel %vm4004_vm7, %v12191_v19, 0.0 }
 0x2f6   :  { %8659 = vmatprep.subr.bf16.mxu1 %v14498_v31  ;;  %v4478_v6 = vand.u32 4294901760, %v4477_v28  ;;  %v4070_v53 = vsel %vm4005_vm10, %v4035_v22, 0.0 }
 0x2f7   :  { %5531 = vperm.xlu1 %9310, %v14816_v12   ;;  %v12305_v14 = vsub.f32 %v4353_v7, %v12299_v23  ;;  %v4148_v37 = vpop.permute.xlu0 %4147 }
 0x2f8   :  { %7944 = vmatmul.mubr.f32.gmra.mrb[2].mxu1 %v11319_v45  ;;  %v4186_v1 = vsel %vm4121_vm11, %v4148_v37, 0.0  ;;  %8041 = vmatmul.mubr.f32.gmra.mrb[30].mxu0 %v4478_v6 }
 0x2f9   :  { %14822 = vst [vmem:[#allocation112_spill] sm:$0xff] %v12305_v14  ;;  %7946 = vmatprep.mubr.msk.f32.mxu1 %vm9412_vm9, %v14545_v27  ;;  %v4199_v48 = vadd.f32 %v4186_v1, %v4069_v10  ;;  %8043 = vmatprep.mubr.msk.f32.mxu0 %vm9412_vm9, %v14545_v27  ;;  %v14051_v12 = vand.u32 4294901760, %v12305_v14  ;;  %v14825_v10 = vld [vmem:[#allocation94_spill] sm:$0xff] }
 0x2fa   :  { %v12313_v29 = vpop.permute.xlu1 %5402  ;;  %8661 = vmatpush3.bf16.msra.mxu1 %v14750_v4 }
 0x2fb   :  { %5475 = vperm.xlu1 %9310, %v14818_v57   ;;  %8698 = vmatprep.subr.bf16.mxu1 %v14498_v31  ;;  %v4329_v19 = vadd.f32 %v4316_v50, %v4199_v48  ;;  %v4487_v2 = vsub.f32 %v12305_v14, %v14051_v12  ;;  %v4152_v42 = vpop.permute.xlu0 %4151  ;;  %v14823_v57 = vld [vmem:[#allocation97_spill] sm:$0xff]  ;;  %v14827_v48 = vld [vmem:[#allocation95_spill] sm:$0xff]  ;;  %v12415_v12 = vld [vmem:[#allocation5 + $0x70] sm:$0xff] }
 0x2fc   :  { %7947 = vmatmul.mubr.f32.gmra.mrb[4].mxu1 %v11352_v35  ;;  %v4187_v40 = vsel %vm4122_vm14, %v4152_v42, 0.0  ;;  %v14065_v39 = vand.u32 4294901760, %v12415_v12 }
 0x2fd   :  { %7949 = vmatprep.mubr.msk.f32.mxu1 %vm9412_vm9, %v14545_v27  ;;  %v4356_v60 = vsel %vm1491_vm8, %v4329_v19, 0  ;;  %v4488_v4 = vand.u32 4294901760, %v4487_v2  ;;  %v4200_v7 = vadd.f32 %v4187_v40, %v4070_v53  ;;  %v14829_v2 = vld [vmem:[#allocation144_spill] sm:$0xff]  ;;  %v14831_v40 = vld [vmem:[#allocation143_spill] sm:$0xff]  ;;  %v14832_v53 = vld [vmem:[#allocation17_spill] sm:$0xff] }
 0x2fe   :  { %v12328_v11 = vpop.permute.xlu1 %5519  ;;  %v12330_v21 = vand.u32 4294901760, %v4356_v60 }
 0x2ff   :  { %9311 = vset.pattern.permute.xlu1 %v14619_v58  ;;  %8044 = vmatmul.mubr.f32.gmra.mrb[32].mxu0 %v4488_v4 }
 0x300   :  { %7950 = vmatmul.mubr.f32.gmra.mrb[6].mxu1 %v11377_v15  ;;  %4297 = vperm.xlu1 %9311, %v14823_v57   ;;  %v12336_v47 = vsub.f32 %v4356_v60, %v12330_v21  ;;  %v4225_v34 = vpop.permute.xlu0 %4224 }
 0x301   :  { %7952 = vmatprep.mubr.msk.f32.mxu1 %vm9412_vm9, %v14545_v27  ;;  %8046 = vmatprep.mubr.msk.f32.mxu0 %vm9412_vm9, %v14545_v27  ;;  %vm4252_vm15 = vcmp.eq.s32.totalorder %v4225_v34, %v10885_v3  ;;  %v14830_v34 = vld [vmem:[#allocation142_spill] sm:$0xff] }
 0x302   :  { %14824 = vst [vmem:[#allocation104_spill] sm:$0xff] %v12336_v47  ;;  %v12340_v62 = vpop.permute.xlu1 %5459  ;;  %v14050_v33 = vand.u32 4294901760, %v12336_v47 }
 0x304   :  { %7953 = vmatmul.mubr.f32.gmra.mrb[8].mxu1 %v11411_v52  ;;  %9312 = vset.pattern.permute.xlu1 %v14617_v20  ;;  %v4497_v26 = vsub.f32 %v12336_v47, %v14050_v33 }
 0x305   :  { %5661 = vperm.xlu1 %9312, %v14770_v16   ;;  %7955 = vmatprep.mubr.msk.f32.mxu1 %vm9412_vm9, %v14545_v27 }
 0x306   :  { %v4498_v6 = vand.u32 4294901760, %v4497_v26 }
 0x307   :  { %v4282_v28 = vpop.permute.xlu1 %4281 }
 0x308   :  { %v4317_v37 = vsel %vm4252_vm15, %v4282_v28, 0.0  ;;  %7956 = vmatmul.mubr.f32.gmra.mrb[10].mxu1 %v14825_v10  ;;  %8047 = vmatmul.mubr.f32.gmra.mrb[34].mxu0 %v4498_v6  ;;  %v14833_v28 = vld [vmem:[#allocation13_spill] sm:$0xff]  ;;  %v4098_v6 = vpop.permute.xlu0 %4097 }
 0x309   :  { %v4330_v1 = vadd.f32 %v4317_v37, %v4200_v7  ;;  %9313 = vset.pattern.permute.xlu1 %v14619_v58  ;;  %7958 = vmatprep.mubr.msk.f32.mxu1 %vm9412_vm9, %v14545_v27  ;;  %v14834_v37 = vld [vmem:[#allocation63_spill] sm:$0xff]  ;;  %vm4123_vm1 = vcmp.eq.s32.totalorder %v4098_v6, %v10885_v3 }
 0x30a   :  { %4109 = vperm.xlu1 %9313, %v14826_v18   ;;  %8049 = vmatprep.mubr.msk.f32.mxu0 %vm9412_vm9, %v14545_v27 }
 0x30b   :  { %v4359_v16 = vsel %vm1491_vm8, %v4330_v1, 0  ;;  %v12405_v1 = vld [vmem:[#allocation5 + $0x60] sm:$0xff] }
 0x30c   :  { %v12365_v22 = vand.u32 4294901760, %v4359_v16  ;;  %7959 = vmatmul.mubr.f32.gmra.mrb[12].mxu1 %v14827_v48  ;;  %v12368_v50 = vpop.permute.xlu1 %5649  ;;  %v4156_v61 = vpop.permute.xlu0 %4155  ;;  %v14837_v33 = vand.u32 4294901760, %v12405_v1 }
 0x30d   :  { %7961 = vmatprep.mubr.msk.f32.mxu1 %vm9412_vm9, %v14545_v27  ;;  %v4188_v47 = vsel %vm4123_vm1, %v4156_v61, 0.0 }
 0x30e   :  { %v12373_v19 = vsub.f32 %v4359_v16, %v12365_v22  ;;  %9314 = vset.pattern.permute.xlu1 %v14617_v20  ;;  %v12407_v16 = vld [vmem:[#allocation5 + $0x68] sm:$0xff] }
 0x30f   :  { %5722 = vperm.xlu1 %9314, %v14823_v57  }
 0x310   :  { %14828 = vst [vmem:[#allocation30_spill] sm:$0xff] %v12373_v19  ;;  %7962 = vmatmul.mubr.f32.gmra.mrb[14].mxu1 %v14829_v2  ;;  %v12378_v60 = vpop.permute.xlu1 %5706  ;;  %v14049_v42 = vand.u32 4294901760, %v12373_v19 }
 0x311   :  { %7964 = vmatprep.mubr.msk.f32.mxu1 %vm9412_vm9, %v14545_v27 }
 0x312   :  { %v4507_v4 = vsub.f32 %v12373_v19, %v14049_v42 }
 0x313   :  { %9315 = vset.pattern.permute.xlu1 %v14619_v58 }
 0x314   :  { %7965 = vmatmul.mubr.f32.gmra.mrb[16].mxu1 %v14830_v34  ;;  %4171 = vperm.xlu1 %9315, %v14831_v40   ;;  %v4508_v57 = vand.u32 4294901760, %v4507_v4  ;;  %v5767_v4 = vld [vmem:[#allocation5 + $0x78] sm:$0x7] }
 0x315   :  { %v4039_v26 = vpop.permute.xlu1 %4038  ;;  %7967 = vmatprep.mubr.msk.f32.mxu1 %vm9412_vm9, %v14545_v27  ;;  %v12418_v17 = vsel %vm1531_vm3, %v5767_v4, 0  ;;  %v14838_v4 = vand.u32 4294901760, %v12407_v16 }
 0x316   :  { %8050 = vmatmul.mubr.f32.gmra.mrb[36].mxu0 %v4508_v57  ;;  %v14835_v57 = vld [vmem:[#allocation24_spill] sm:$0xff]  ;;  %v14063_v6 = vand.u32 4294901760, %v12418_v17  ;;  %v4071_v14 = vsel %vm4006_vm0, %v4039_v26, 0.0 }
 0x317   :  { %8052 = vmatprep.mubr.msk.f32.mxu0 %vm9412_vm9, %v14545_v27  ;;  %v12433_v19 = vpack.c.bf16 %v14838_v4, %v14837_v33 }
 0x318   :  { %7968 = vmatmul.mubr.f32.gmra.mrb[18].mxu1 %v14832_v53  ;;  %9316 = vset.pattern.permute.xlu1 %v14617_v20  ;;  %v12447_v33 = vpack.c.bf16 %v14063_v6, %v14065_v39  ;;  %v14849_v6 = vld [vmem:[#allocation131_spill] sm:$0xff]  ;;  %v14857_v39 = vld [vmem:[#allocation102_spill] sm:$0xff] }
 0x319   :  { %5534 = vperm.xlu1 %9316, %v14826_v18   ;;  %7970 = vmatprep.mubr.msk.f32.mxu1 %vm9412_vm9, %v14545_v27  ;;  %14839 = vst [vmem:[#allocation113_spill] sm:$0xff] %v12433_v19 }
 0x31a   :  { %v12398_v7 = vpop.permute.xlu1 %5405  ;;  %14840 = vst [vmem:[#allocation54_spill] sm:$0xff] %v12447_v33 }
 0x31c   :  { %7971 = vmatmul.mubr.f32.gmra.mrb[20].mxu1 %v14833_v28 }
 0x31d   :  { %9317 = vset.pattern.permute.xlu1 %v14619_v58  ;;  %7973 = vmatprep.mubr.msk.f32.mxu1 %vm9412_vm9, %v14545_v27 }
 0x31e   :  { %4239 = vperm.xlu1 %9317, %v14834_v37  }
 0x31f   :  { %v4228_v18 = vpop.permute.xlu1 %4227 }
 0x320   :  { %7974 = vmatmul.mubr.f32.gmra.mrb[22].mxu1 %v14835_v57  ;;  %vm4253_vm3 = vcmp.eq.s32.totalorder %v4228_v18, %v10885_v3 }
 0x321   :  { %7976 = vmatprep.mubr.msk.f32.mxu1 %vm9412_vm9, %v14545_v27 }
 0x322   :  { %9318 = vset.pattern.permute.xlu1 %v14617_v20 }
 0x323   :  { %5596 = vperm.xlu1 %9318, %v14831_v40   ;;  %v4201_v40 = vadd.f32 %v4188_v47, %v4071_v14 }
 0x324   :  { %7977 = vmatmul.mubr.f32.gmra.mrb[24].mxu1 %v14836_v41  ;;  %v12425_v42 = vpop.permute.xlu1 %5463 }
 0x325   :  { %7987 = vmatprep.mubr.msk.f32.mxu1 %vm9412_vm9, %v14545_v27 }
 0x327   :  { %5664 = vperm.xlu1 %9318, %v14834_v37  }
 0x328   :  { %7988 = vmatmul.mubr.f32.vlgmr.msra.gmra.mrb[0].mxu1 %v14692_v38  ;;  %v14841_v38 = vld [vmem:[#allocation92_spill] sm:$0xff] }
 0x329   :  { %v4286_v5 = vpop.permute.xlu1 %4285  ;;  %7990 = vmatprep.mubr.msk.f32.mxu1 %vm9412_vm9, %v14545_v27  ;;  %8700 = vmatpush3.bf16.msra.mxu1 %v12433_v19 }
 0x32a   :  { %v4318_v61 = vsel %vm4253_vm3, %v4286_v5, 0.0  ;;  %8701 = vmatprep.subr.bf16.mxu1 %v14498_v31  ;;  %vm5428_vm3 = vcmp.eq.s32.totalorder %v12106_v51, %v10885_v3 }
 0x32b   :  { %v4331_v26 = vadd.f32 %v4318_v61, %v4201_v40  ;;  %9319 = vset.pattern.permute.xlu1 %v14619_v58  ;;  %v14844_v40 = vld [vmem:[#allocation74_spill] sm:$0xff] }
 0x32c   :  { %7991 = vmatmul.mubr.f32.gmra.mrb[2].mxu1 %v11319_v45  ;;  %3995 = vperm.xlu1 %9319, %v14841_v38   ;;  %v14843_v45 = vld [vmem:[#allocation37_spill] sm:$0xff]  ;;  %vm5425_vm2 = vcmp.eq.s32.totalorder %v14844_v40, %v10885_v3  ;;  %v14845_v61 = vld [vmem:[#allocation38_spill] sm:$0xff]  ;;  %v14846_v38 = vld [vmem:[#allocation43_spill] sm:$0xff] }
 0x32d   :  { %v4362_v14 = vsel %vm1491_vm8, %v4331_v26, 0  ;;  %v4101_v47 = vpop.permute.xlu1 %4100  ;;  %7993 = vmatprep.mubr.msk.f32.mxu1 %vm9412_vm9, %v14545_v27  ;;  %8703 = vmatpush3.bf16.msra.mxu1 %v12447_v33  ;;  %vm5542_vm5 = vcmp.eq.s32.totalorder %v14843_v45, %v10885_v3  ;;  %v14848_v45 = vld [vmem:[#allocation14_spill] sm:$0xff] }
 0x32e   :  { %v12457_v37 = vand.u32 4294901760, %v4362_v14  ;;  %8704 = vmatprep.subr.bf16.mxu1 %v14498_v31  ;;  %v5607_v26 = vsel %vm5542_vm5, %v14845_v61, 0.0  ;;  %vm4124_vm14 = vcmp.eq.s32.totalorder %v4101_v47, %v10885_v3  ;;  %vm5545_vm5 = vcmp.eq.s32.totalorder %v12119_v46, %v10885_v3 }
 0x330   :  { %v12461_v5 = vsub.f32 %v4362_v14, %v12457_v37  ;;  %7994 = vmatmul.mubr.f32.gmra.mrb[4].mxu1 %v11352_v35  ;;  %9320 = vset.pattern.permute.xlu1 %v14617_v20  ;;  %v5490_v35 = vsel %vm5425_vm2, %v14846_v38, 0.0 }
 0x331   :  { %5726 = vperm.xlu1 %9320, %v14784_v44   ;;  %v4043_v18 = vpop.permute.xlu1 %4042  ;;  %7996 = vmatprep.mubr.msk.f32.mxu1 %vm9412_vm9, %v14545_v27  ;;  %v14847_v44 = vld [vmem:[#allocation121_spill] sm:$0xff]  ;;  %v5620_v38 = vadd.f32 %v5607_v26, %v5490_v35 }
 0x332   :  { %14842 = vst [vmem:[#allocation70_spill] sm:$0xff] %v12461_v5  ;;  %v14064_v4 = vand.u32 4294901760, %v12461_v5  ;;  %vm5672_vm13 = vcmp.eq.s32.totalorder %v14847_v44, %v10885_v3  ;;  %v14852_v26 = vld [vmem:[#allocation33_spill] sm:$0xff] }
 0x333   :  { %vm5544_vm7 = vcmp.eq.s32.totalorder %v14852_v26, %v10885_v3  ;;  %v14853_v35 = vld [vmem:[#allocation69_spill] sm:$0xff] }
 0x334   :  { %7997 = vmatmul.mubr.f32.gmra.mrb[6].mxu1 %v11377_v15  ;;  %v4517_v14 = vsub.f32 %v12461_v5, %v14064_v4  ;;  %v5737_v15 = vsel %vm5672_vm13, %v14849_v6, 0.0  ;;  %v14850_v6 = vld [vmem:[#allocation116_spill] sm:$0xff]  ;;  %vm5675_vm13 = vcmp.eq.s32.totalorder %v12167_v49, %v10885_v3 }
 0x335   :  { %9321 = vset.pattern.permute.xlu1 %v14619_v58  ;;  %7999 = vmatprep.mubr.msk.f32.mxu1 %vm9412_vm9, %v14545_v27  ;;  %v5750_v4 = vadd.f32 %v5737_v15, %v5620_v38  ;;  %vm5426_vm6 = vcmp.eq.s32.totalorder %v14850_v6, %v10885_v3  ;;  %v14855_v15 = vld [vmem:[#allocation115_spill] sm:$0xff] }
 0x336   :  { %4175 = vperm.xlu1 %9321, %v14848_v45   ;;  %v12485_v40 = vpop.permute.xlu1 %5408  ;;  %v4518_v61 = vand.u32 4294901760, %v4517_v14  ;;  %v4160_v14 = vpop.permute.xlu0 %4159  ;;  %vm5673_vm12 = vcmp.eq.s32.totalorder %v14855_v15, %v10885_v3  ;;  %v14856_v6 = vld [vmem:[#allocation23_spill] sm:$0xff] }
 0x337   :  { %v5738_v26 = vsel %vm5673_vm12, %v14857_v39, 0.0  ;;  %v14861_v39 = vld [vmem:[#allocation125_spill] sm:$0xff]  ;;  %vm5677_vm12 = vcmp.eq.s32.totalorder %v12368_v50, %v10885_v3 }
 0x338   :  { %8000 = vmatmul.mubr.f32.gmra.mrb[8].mxu1 %v11411_v52  ;;  %8053 = vmatmul.mubr.f32.gmra.mrb[38].mxu0 %v4518_v61  ;;  %v14851_v52 = vld [vmem:[#allocation101_spill] sm:$0xff]  ;;  %v5491_v61 = vsel %vm5426_vm6, %v14853_v35, 0.0  ;;  %v14858_v35 = vld [vmem:[#allocation19_spill] sm:$0xff]  ;;  %vm5674_vm0 = vcmp.eq.s32.totalorder %v14861_v39, %v10885_v3  ;;  %vm5429_vm6 = vcmp.eq.s32.totalorder %v12208_v54, %v10885_v3  ;;  %v14870_v54 = vand.u32 4294901760, %v12407_v16 }
 0x339   :  { %8002 = vmatprep.mubr.msk.f32.mxu1 %vm9412_vm9, %v14545_v27  ;;  %8055 = vmatprep.mubr.msk.f32.mxu0 %vm9412_vm9, %v14545_v27  ;;  %vm5543_vm4 = vcmp.eq.s32.totalorder %v14851_v52, %v10885_v3  ;;  %vm5427_vm10 = vcmp.eq.s32.totalorder %v14858_v35, %v10885_v3 }
 0x33a   :  { %9322 = vset.pattern.permute.xlu1 %v14617_v20  ;;  %v12494_v44 = vpop.permute.xlu1 %5525  ;;  %v5608_v52 = vsel %vm5543_vm4, %v14856_v6, 0.0  ;;  %v4231_v33 = vpop.permute.xlu0 %4230  ;;  %v5492_v47 = vsel %vm5427_vm10, %v12047_v59, 0.0  ;;  %v4189_v6 = vsel %vm4124_vm14, %v4160_v14, 0.0  ;;  %vm5547_vm4 = vcmp.eq.s32.totalorder %v12328_v11, %v10885_v3 }
 0x33b   :  { %5537 = vperm.xlu1 %9322, %v14788_v25   ;;  %v14854_v25 = vld [vmem:[#allocation127_spill] sm:$0xff]  ;;  %v5621_v15 = vadd.f32 %v5608_v52, %v5491_v61  ;;  %vm4254_vm15 = vcmp.eq.s32.totalorder %v4231_v33, %v10885_v3  ;;  %v14863_v33 = vld [vmem:[#allocation48_spill] sm:$0xff]  ;;  %v5493_v52 = vsel %vm5428_vm3, %v12136_v32, 0.0  ;;  %vm5431_vm14 = vcmp.eq.s32.totalorder %v12398_v7, %v10885_v3 }
 0x33c   :  { %8003 = vmatmul.mubr.f32.gmra.mrb[10].mxu1 %v14825_v10  ;;  %vm4007_vm11 = vcmp.eq.s32.totalorder %v14854_v25, %v10885_v3  ;;  %v5769_v10 = vsel %vm1491_vm8, %v5750_v4, 0  ;;  %v14859_v25 = vld [vmem:[#allocation49_spill] sm:$0xff]  ;;  %v14860_v4 = vld [vmem:[#allocation55_spill] sm:$0xff]  ;;  %v5739_v14 = vsel %vm5674_vm0, %v14863_v33, 0.0  ;;  %vm5549_vm0 = vcmp.eq.s32.totalorder %v12494_v44, %v10885_v3 }
 0x33d   :  { %8005 = vmatprep.mubr.msk.f32.mxu1 %vm9412_vm9, %v14545_v27  ;;  %v4072_v5 = vsel %vm4007_vm11, %v4043_v18, 0.0  ;;  %v5609_v19 = vsel %vm5544_vm7, %v14860_v4, 0.0  ;;  %v12529_v18 = vand.u32 4294901760, %v5769_v10  ;;  %v5751_v35 = vadd.f32 %v5738_v26, %v5621_v15  ;;  %v14866_v26 = vld [vmem:[#allocation16_spill] sm:$0xff] }
 0x33e   :  { %v12507_v38 = vpop.permute.xlu1 %5467  ;;  %v4202_v63 = vadd.f32 %v4189_v6, %v4072_v5  ;;  %v5622_v61 = vadd.f32 %v5609_v19, %v5492_v47  ;;  %v14864_v19 = vld [vmem:[#allocation27_spill] sm:$0xff]  ;;  %v14865_v5 = vld [vmem:[#allocation41_spill] sm:$0xff]  ;;  %v5610_v15 = vsel %vm5545_vm5, %v14866_v26, 0.0  ;;  %vm5430_vm11 = vcmp.eq.s32.totalorder %v12313_v29, %v10885_v3 }
 0x33f   :  { %9323 = vset.pattern.permute.xlu1 %v14619_v58  ;;  %vm5676_vm2 = vcmp.eq.s32.totalorder %v14865_v5, %v10885_v3  ;;  %v12548_v46 = vsub.f32 %v5769_v10, %v12529_v18  ;;  %v5623_v47 = vadd.f32 %v5610_v15, %v5493_v52  ;;  %v5740_v10 = vsel %vm5675_vm13, %v12179_v13, 0.0  ;;  %v14872_v5 = vld [vmem:[#allocation100_spill] sm:$0xff] }
 0x340   :  { %8006 = vmatmul.mubr.f32.gmra.mrb[12].mxu1 %v14827_v48  ;;  %4242 = vperm.xlu1 %9323, %v14859_v25   ;;  %v14862_v48 = vld [vmem:[#allocation53_spill] sm:$0xff] }
 0x341   :  { %8008 = vmatprep.mubr.msk.f32.mxu1 %vm9412_vm9, %v14545_v27  ;;  %vm5546_vm1 = vcmp.eq.s32.totalorder %v14862_v48, %v10885_v3  ;;  %v14867_v48 = vld [vmem:[#allocation32_spill] sm:$0xff]  ;;  %v14082_v52 = vand.u32 4294901760, %v12548_v46 }
 0x342   :  { %v5611_v51 = vsel %vm5546_vm1, %v14864_v19, 0.0  ;;  %v5753_v19 = vadd.f32 %v5740_v10, %v5623_v47 }
 0x343   :  { %v4290_v4 = vpop.permute.xlu1 %4289 }
 0x344   :  { %v4319_v59 = vsel %vm4254_vm15, %v4290_v4, 0.0  ;;  %8009 = vmatmul.mubr.f32.gmra.mrb[14].mxu1 %v14829_v2  ;;  %9324 = vset.pattern.permute.xlu1 %v14617_v20  ;;  %v5772_v2 = vsel %vm1491_vm8, %v5751_v35, 0  ;;  %v14092_v35 = vand.u32 4294901760, %v14867_v48  ;;  %v14868_v4 = vld [vmem:[#allocation50_spill] sm:$0xff]  ;;  %vm5432_vm15 = vcmp.eq.s32.totalorder %v12485_v40, %v10885_v3 }
 0x345   :  { %v4332_v39 = vadd.f32 %v4319_v59, %v4202_v63  ;;  %5600 = vperm.xlu1 %9324, %v14848_v45   ;;  %8011 = vmatprep.mubr.msk.f32.mxu1 %vm9412_vm9, %v14545_v27  ;;  %v5752_v63 = vadd.f32 %v5739_v14, %v5622_v61  ;;  %v14075_v49 = vand.u32 4294901760, %v14868_v4  ;;  %v5494_v61 = vsel %vm5429_vm6, %v12247_v56, 0.0 }
 0x346   :  { %v14869_v59 = vand.u32 4294901760, %v12405_v1  ;;  %v12582_v33 = vand.u32 4294901760, %v5772_v2  ;;  %v4588_v14 = vsub.f32 %v14867_v48, %v14092_v35 }
 0x347   :  { %v4365_v32 = vsel %vm1491_vm8, %v4332_v39, 0  ;;  %v4595_v56 = vsub.f32 %v14868_v4, %v14075_v49  ;;  %v14871_v39 = vld [vmem:[#allocation77_spill] sm:$0xff]  ;;  %v5775_v15 = vsel %vm1491_vm8, %v5752_v63, 0  ;;  %v14873_v63 = vld [vmem:[#allocation130_spill] sm:$0xff] }
 0x348   :  { %v12555_v45 = vand.u32 4294901760, %v4365_v32  ;;  %8012 = vmatmul.mubr.f32.gmra.mrb[16].mxu1 %v14830_v34  ;;  %v12558_v6 = vpop.permute.xlu1 %5655  ;;  %v12575_v13 = vsub.f32 %v12405_v1, %v14869_v59  ;;  %v5741_v1 = vsel %vm5676_vm2, %v14871_v39, 0.0  ;;  %v4589_v59 = vand.u32 4294901760, %v4588_v14 }
 0x349   :  { %5667 = vperm.xlu1 %9324, %v14859_v25   ;;  %8014 = vmatprep.mubr.msk.f32.mxu1 %vm9412_vm9, %v14545_v27  ;;  %v12580_v25 = vsub.f32 %v12407_v16, %v14870_v54  ;;  %v4596_v54 = vand.u32 4294901760, %v4595_v56  ;;  %vm5548_vm7 = vcmp.eq.s32.totalorder %v14873_v63, %v10885_v3  ;;  %v12614_v10 = vsub.f32 %v5772_v2, %v12582_v33 }
 0x34a   :  { %v12570_v34 = vsub.f32 %v4365_v32, %v12555_v45  ;;  %v5624_v32 = vadd.f32 %v5611_v51, %v5494_v61  ;;  %v14085_v47 = vand.u32 4294901760, %v12575_v13  ;;  %v12618_v61 = vand.u32 4294901760, %v5775_v15 }
 0x34b   :  { %v14083_v51 = vand.u32 4294901760, %v12580_v25  ;;  %v8669_v11 = vpack.c.bf16 %v4596_v54, %v4589_v59  ;;  %v5778_v14 = vsel %vm1491_vm8, %v5753_v19, 0  ;;  %v5495_v56 = vsel %vm5430_vm11, %v12340_v62, 0.0  ;;  %v14877_v19 = vld [vmem:[#allocation132_spill] sm:$0xff] }
 0x34c   :  { %8015 = vmatmul.mubr.f32.gmra.mrb[18].mxu1 %v14832_v53  ;;  %v12596_v16 = vpop.permute.xlu1 %5714  ;;  %v14074_v26 = vand.u32 4294901760, %v12570_v34  ;;  %v5742_v62 = vsel %vm5677_vm12, %v12378_v60, 0.0  ;;  %v6013_v50 = vsub.f32 %v12575_v13, %v14085_v47  ;;  %v14876_v60 = vld [vmem:[#allocation12_spill] sm:$0xff]  ;;  %vm5678_vm10 = vcmp.eq.s32.totalorder %v14877_v19, %v10885_v3 }
 0x34d   :  { %9325 = vset.pattern.permute.xlu1 %v14619_v58  ;;  %8017 = vmatprep.mubr.msk.f32.mxu1 %vm9412_vm9, %v14545_v27  ;;  %v6020_v7 = vsub.f32 %v12580_v25, %v14083_v51  ;;  %vm5679_vm1 = vcmp.eq.s32.totalorder %v12558_v6, %v10885_v3  ;;  %vm4008_vm2 = vcmp.eq.s32.totalorder %v12169_v43, %v10885_v3 }
 0x34e   :  { %3998 = vperm.xlu1 %9325, %v14872_v5   ;;  %v4527_v53 = vsub.f32 %v12570_v34, %v14074_v26  ;;  %v5754_v5 = vadd.f32 %v5741_v1, %v5624_v32  ;;  %v14874_v26 = vld [vmem:[#allocation128_spill] sm:$0xff]  ;;  %8670 = vmatpush3.bf16.msra.mxu0 %v8669_v11  ;;  %v14875_v1 = vld [vmem:[#allocation29_spill] sm:$0xff]  ;;  %v6014_v11 = vand.u32 4294901760, %v6013_v50  ;;  %v5744_v19 = vsel %vm5679_vm1, %v12596_v16, 0.0 }
 0x34f   :  { %v5612_v49 = vsel %vm5547_vm4, %v14874_v26, 0.0  ;;  %v12651_v26 = vsub.f32 %v5775_v15, %v12618_v61  ;;  %8671 = vmatprep.subr.bf16.mxu0 %v14498_v31  ;;  %v14080_v15 = vand.u32 4294901760, %v12614_v10 }
 0x350   :  { %8018 = vmatmul.mubr.f32.gmra.mrb[20].mxu1 %v14833_v28  ;;  %v4528_v39 = vand.u32 4294901760, %v4527_v53  ;;  %v5496_v28 = vsel %vm5431_vm14, %v12425_v42, 0.0  ;;  %v5625_v2 = vadd.f32 %v5612_v49, %v5495_v56  ;;  %v5613_v42 = vsel %vm5548_vm7, %v14876_v60, 0.0  ;;  %v14878_v56 = vld [vmem:[#allocation118_spill] sm:$0xff]  ;;  %v4104_v60 = vpop.permute.xlu0 %4103 }
 0x351   :  { %v12628_v29 = vpop.permute.xlu1 %4046  ;;  %8020 = vmatprep.mubr.msk.f32.mxu1 %vm9412_vm9, %v14545_v27  ;;  %v12655_v49 = vand.u32 4294901760, %v5778_v14  ;;  %v5781_v32 = vsel %vm1491_vm8, %v5754_v5, 0  ;;  %v5626_v54 = vadd.f32 %v5613_v42, %v5496_v28  ;;  %v5882_v53 = vsub.f32 %v12548_v46, %v14082_v52  ;;  %v14879_v5 = vld [vmem:[#allocation15_spill] sm:$0xff] }
 0x352   :  { %9326 = vset.pattern.permute.xlu1 %v14617_v20  ;;  %8056 = vmatmul.mubr.f32.gmra.mrb[40].mxu0 %v4528_v39  ;;  %v5755_v59 = vadd.f32 %v5742_v62, %v5625_v2  ;;  %v5743_v39 = vsel %vm5678_vm10, %v14878_v56, 0.0  ;;  %v14079_v62 = vand.u32 4294901760, %v12651_v26  ;;  %v5497_v2 = vsel %vm5432_vm15, %v12507_v38, 0.0 }
 0x353   :  { %5730 = vperm.xlu1 %9326, %v14875_v1   ;;  %8058 = vmatprep.mubr.msk.f32.mxu0 %vm9412_vm9, %v14545_v27  ;;  %v12666_v1 = vand.u32 4294901760, %v5781_v32  ;;  %v12676_v28 = vsub.f32 %v5778_v14, %v12655_v49  ;;  %v5883_v40 = vand.u32 4294901760, %v5882_v53  ;;  %v14880_v14 = vld [vmem:[#allocation21_spill] sm:$0xff]  ;;  %v14881_v53 = vld [vmem:[#allocation88_spill] sm:$0xff]  ;;  %vm4125_vm13 = vcmp.eq.s32.totalorder %v4104_v60, %v10885_v3 }
 0x354   :  { %8021 = vmatmul.mubr.f32.gmra.mrb[22].mxu1 %v14835_v57  ;;  %v6021_v57 = vand.u32 4294901760, %v6020_v7  ;;  %v5784_v50 = vsel %vm1491_vm8, %v5755_v59, 0  ;;  %v5756_v7 = vadd.f32 %v5743_v39, %v5626_v54  ;;  %v5614_v42 = vsel %vm5549_vm0, %v14880_v14, 0.0  ;;  %v14882_v39 = vld [vmem:[#allocation120_spill] sm:$0xff]  ;;  %v4164_v14 = vpop.permute.xlu0 %4163 }
 0x355   :  { %8023 = vmatprep.mubr.msk.f32.mxu1 %vm9412_vm9, %v14545_v27  ;;  %v12690_v38 = vsub.f32 %v5781_v32, %v12666_v1  ;;  %v12692_v54 = vand.u32 4294901760, %v5784_v50  ;;  %v5627_v56 = vadd.f32 %v5614_v42, %v5497_v2  ;;  %v5902_v16 = vsub.f32 %v12651_v26, %v14079_v62 }
 0x356   :  { %v5412_v63 = vpop.permute.xlu1 %5411  ;;  %v8705_v44 = vpack.c.bf16 %v6021_v57, %v6014_v11  ;;  %v5787_v6 = vsel %vm1491_vm8, %v5756_v7, 0  ;;  %v14078_v32 = vand.u32 4294901760, %v12676_v28  ;;  %vm5550_vm3 = vcmp.eq.s32.totalorder %v14881_v53, %v10885_v3 }
 0x357   :  { %9327 = vset.pattern.permute.xlu1 %v14619_v58  ;;  %v5757_v11 = vadd.f32 %v5744_v19, %v5627_v56  ;;  %vm5680_vm5 = vcmp.eq.s32.totalorder %v14882_v39, %v10885_v3  ;;  %v12714_v7 = vand.u32 4294901760, %v5787_v6  ;;  %vm5433_vm6 = vcmp.eq.s32.totalorder %v5412_v63, %v10885_v3 }
 0x358   :  { %8024 = vmatmul.mubr.f32.gmra.mrb[24].mxu1 %v14836_v41  ;;  %4179 = vperm.xlu1 %9327, %v14879_v5   ;;  %v5892_v41 = vsub.f32 %v12614_v10, %v14080_v15  ;;  %v5903_v60 = vand.u32 4294901760, %v5902_v16  ;;  %v4190_v19 = vsel %vm4125_vm13, %v4164_v14, 0.0  ;;  %v4073_v56 = vsel %vm4008_vm2, %v12628_v29, 0.0 }
 0x359   :  { %8316 = vmatprep.mubr.msk.f32.mxu1 %vm9412_vm9, %v14545_v27  ;;  %v5790_v63 = vsel %vm1491_vm8, %v5757_v11, 0 }
 0x35a   :  { %v5893_v57 = vand.u32 4294901760, %v5892_v41  ;;  %v14883_v41 = vld [vmem:[#allocation36_spill] sm:$0xff]  ;;  %v12742_v29 = vand.u32 4294901760, %v5790_v63 }
 0x35b   :  { %v4234_v59 = vpop.permute.xlu1 %4233 }
 0x35c   :  { %8317 = vmatmul.mubr.f32.vlgmr.msra.gmra.mrb[26].mxu1 %v5883_v40  ;;  %9328 = vset.pattern.permute.xlu1 %v14617_v20  ;;  %v14077_v40 = vand.u32 4294901760, %v12690_v38  ;;  %vm4255_vm4 = vcmp.eq.s32.totalorder %v4234_v59, %v10885_v3 }
 0x35d   :  { %5540 = vperm.xlu1 %9328, %v14796_v30   ;;  %8319 = vmatprep.mubr.msk.f32.mxu1 %vm9412_vm9, %v14545_v27  ;;  %v12712_v30 = vsub.f32 %v5784_v50, %v12692_v54  ;;  %v5912_v50 = vsub.f32 %v12676_v28, %v14078_v32 }
 0x35e   :  { %8706 = vmatpush3.bf16.msra.mxu1 %v8705_v44  ;;  %v5615_v44 = vsel %vm5550_vm3, %v14883_v41, 0.0  ;;  %v5922_v11 = vsub.f32 %v12690_v38, %v14077_v40 }
 0x35f   :  { %8707 = vmatprep.subr.bf16.mxu1 %v14498_v31  ;;  %v14076_v43 = vand.u32 4294901760, %v12712_v30 }
 0x360   :  { %8320 = vmatmul.mubr.f32.gmra.mrb[28].mxu1 %v5893_v57  ;;  %v5472_v2 = vpop.permute.xlu1 %5471  ;;  %v14884_v57 = vld [vmem:[#allocation52_spill] sm:$0xff] }
 0x361   :  { %v5498_v42 = vsel %vm5433_vm6, %v5472_v2, 0.0  ;;  %9329 = vset.pattern.permute.xlu1 %v14619_v58  ;;  %8322 = vmatprep.mubr.msk.f32.mxu1 %vm9412_vm9, %v14545_v27  ;;  %v14885_v58 = vld [vmem:[#allocation66_spill] sm:$0xff]  ;;  %v12736_v2 = vsub.f32 %v5787_v6, %v12714_v7  ;;  %v14886_v6 = vand.u32 4294901760, %v12415_v12 }
 0x362   :  { %v5628_v53 = vadd.f32 %v5615_v44, %v5498_v42  ;;  %4245 = vperm.xlu1 %9329, %v14884_v57   ;;  %v5745_v16 = vsel %vm5680_vm5, %v14885_v58, 0.0  ;;  %v4203_v44 = vadd.f32 %v4190_v19, %v4073_v56  ;;  %v14887_v42 = vand.u32 4294901760, %v12418_v17 }
 0x363   :  { %v12750_v39 = vsub.f32 %v12415_v12, %v14886_v6  ;;  %v5913_v19 = vand.u32 4294901760, %v5912_v50  ;;  %v5923_v58 = vand.u32 4294901760, %v5922_v11  ;;  %v5932_v12 = vsub.f32 %v12712_v30, %v14076_v43  ;;  %v14889_v50 = vld [vmem:[#allocation129_spill] sm:$0xff] }
 0x364   :  { %v5758_v41 = vadd.f32 %v5745_v16, %v5628_v53  ;;  %8323 = vmatmul.mubr.f32.gmra.mrb[30].mxu1 %v5903_v60  ;;  %v12755_v60 = vsub.f32 %v12418_v17, %v14887_v42  ;;  %v14086_v16 = vand.u32 4294901760, %v12736_v2  ;;  %v12765_v17 = vsub.f32 %v5790_v63, %v12742_v29 }
 0x365   :  { %v4294_v14 = vpop.permute.xlu1 %4293  ;;  %8325 = vmatprep.mubr.msk.f32.mxu1 %vm9412_vm9, %v14545_v27  ;;  %v14081_v42 = vand.u32 4294901760, %v12750_v39  ;;  %v5933_v43 = vand.u32 4294901760, %v5932_v12 }
 0x366   :  { %v4320_v53 = vsel %vm4255_vm4, %v4294_v14, 0.0  ;;  %9331 = vset.pattern.permute.xlu1 %v14617_v20  ;;  %v5793_v59 = vsel %vm1491_vm8, %v5758_v41, 0  ;;  %14888 = vst [vmem:[#allocation67_spill] sm:$0xff] %v12765_v17  ;;  %v14890_v41 = vld [vmem:[#allocation20_spill] sm:$0xff]  ;;  %v14084_v63 = vand.u32 4294901760, %v12755_v60  ;;  %v5942_v62 = vsub.f32 %v12736_v2, %v14086_v16 }
 0x367   :  { %v4333_v56 = vadd.f32 %v4320_v53, %v4203_v44  ;;  %5604 = vperm.xlu1 %9331, %v14879_v5   ;;  %v14091_v5 = vand.u32 4294901760, %v14889_v50  ;;  %v14087_v11 = vand.u32 4294901760, %v14890_v41  ;;  %v12774_v44 = vand.u32 4294901760, %v5793_v59 }
 0x368   :  { %8326 = vmatmul.mubr.f32.gmra.mrb[32].mxu1 %v5913_v19  ;;  %v6027_v40 = vsub.f32 %v12750_v39, %v14081_v42 }
 0x369   :  { %v4368_v14 = vsel %vm1491_vm8, %v4333_v56, 0  ;;  %v12768_v20 = vpop.permute.xlu1 %4106  ;;  %8328 = vmatprep.mubr.msk.f32.mxu1 %vm9412_vm9, %v14545_v27  ;;  %14891 = vst [vmem:[#allocation18_spill] sm:$0xff] %v12774_v44  ;;  %v4602_v53 = vsub.f32 %v14889_v50, %v14091_v5  ;;  %v4609_v19 = vsub.f32 %v14890_v41, %v14087_v11  ;;  %v12803_v15 = vsub.f32 %v5793_v59, %v12774_v44 }
 0x36a   :  { %v12776_v6 = vand.u32 4294901760, %v4368_v14  ;;  %v6028_v52 = vand.u32 4294901760, %v6027_v40  ;;  %vm4126_vm7 = vcmp.eq.s32.totalorder %v12768_v20, %v10885_v3 }
 0x36b   :  { %5670 = vperm.xlu1 %9331, %v14884_v57   ;;  %v6034_v57 = vsub.f32 %v12755_v60, %v14084_v63  ;;  %v4610_v12 = vand.u32 4294901760, %v4609_v19  ;;  %14892 = vst [vmem:[#allocation85_spill] sm:$0xff] %v12803_v15  ;;  %v5943_v19 = vand.u32 4294901760, %v5942_v62  ;;  %v14088_v40 = vand.u32 4294901760, %v12803_v15 }
 0x36c   :  { %v12788_v56 = vsub.f32 %v4368_v14, %v12776_v6  ;;  %8329 = vmatmul.mubr.f32.gmra.mrb[34].mxu1 %v5923_v58  ;;  %v14089_v14 = vand.u32 4294901760, %v12765_v17  ;;  %v4603_v58 = vand.u32 4294901760, %v4602_v53 }
 0x36d   :  { %v4051_v32 = vpop.permute.xlu1 %4050  ;;  %8331 = vmatprep.mubr.msk.f32.mxu1 %vm9412_vm9, %v14545_v27  ;;  %v6035_v51 = vand.u32 4294901760, %v6034_v57  ;;  %v5962_v62 = vsub.f32 %v12803_v15, %v14088_v40 }
 0x36e   :  { %v14090_v42 = vand.u32 4294901760, %v12788_v56  ;;  %v8672_v63 = vpack.c.bf16 %v4610_v12, %v4603_v58 }
 0x36f   :  { %5734 = vperm.xlu1 %9331, %v14802_v24   ;;  %v8708_v16 = vpack.c.bf16 %v6035_v51, %v6028_v52  ;;  %v5952_v24 = vsub.f32 %v12765_v17, %v14089_v14  ;;  %v5963_v58 = vand.u32 4294901760, %v5962_v62 }
 0x370   :  { %8332 = vmatmul.mubr.f32.gmra.mrb[36].mxu1 %v5933_v43  ;;  %v4537_v47 = vsub.f32 %v12788_v56, %v14090_v42  ;;  %8673 = vmatpush3.bf16.msra.mxu0 %v8672_v63  ;;  %v4168_v63 = vpop.permute.xlu0 %4167 }
 0x371   :  { %8334 = vmatprep.mubr.msk.f32.mxu1 %vm9412_vm9, %v14545_v27  ;;  %v12812_v11 = vpop.f32.mrb[0].mxu0  ;;  %8709 = vmatpush3.bf16.msra.mxu1 %v8708_v16 }
 0x372   :  { %v5415_v53 = vpop.permute.xlu1 %5414  ;;  %v4538_v59 = vand.u32 4294901760, %v4537_v47  ;;  %14893 = vst [vmem:[#allocation114_spill] sm:$0xff] %v12812_v11  ;;  %8674 = vmatprep.subr.bf16.mxu0 %v14498_v31  ;;  %v7707_v43 = vpop.f32.mrb[1].mxu0  ;;  %8710 = vmatprep.subr.bf16.mxu1 %v14498_v31  ;;  %v5953_v47 = vand.u32 4294901760, %v5952_v24 }
 0x373   :  { %vm5434_vm14 = vcmp.eq.s32.totalorder %v5415_v53, %v10885_v3 }
 0x374   :  { %8059 = vmatmul.mubr.f32.gmra.mrb[42].mxu0 %v4538_v59  ;;  %8335 = vmatmul.mubr.f32.gmra.mrb[38].mxu1 %v5943_v19  ;;  %v14896_v59 = vld [vmem:[#allocation44_spill] sm:$0xff] }
 0x375   :  { %8337 = vmatprep.mubr.msk.f32.mxu1 %vm9412_vm9, %v14545_v27  ;;  %8061 = vmatprep.mubr.msk.f32.mxu0 %vm9412_vm9, %v14545_v27  ;;  %vm4009_vm11 = vcmp.eq.s32.totalorder %v14896_v59, %v10885_v3 }
 0x376   :  { %v5532_v52 = vpop.permute.xlu1 %5531  ;;  %v12824_v51 = vpop.f32.mrb[2].mxu0  ;;  %v4074_v24 = vsel %vm4009_vm11, %v4051_v32, 0.0 }
 0x377   :  { %14894 = vst [vmem:[#allocation89_spill] sm:$0xff] %v12824_v51  ;;  %v7710_v16 = vpop.f32.mrb[3].mxu0  ;;  %vm5551_vm10 = vcmp.eq.s32.totalorder %v5532_v52, %v10885_v3 }
 0x378   :  { %8338 = vmatmul.mubr.f32.gmra.mrb[40].mxu1 %v5953_v47  ;;  %v4237_v47 = vpop.permute.xlu0 %4236  ;;  %v4191_v16 = vsel %vm4126_vm7, %v4168_v63, 0.0 }
 0x379   :  { %8340 = vmatprep.mubr.msk.f32.mxu1 %vm9412_vm9, %v14545_v27  ;;  %vm4256_vm12 = vcmp.eq.s32.totalorder %v4237_v47, %v10885_v3  ;;  %v4204_v40 = vadd.f32 %v4191_v16, %v4074_v24 }
 0x37a   :  { %v5476_v57 = vpop.permute.xlu1 %5475  ;;  %v12831_v12 = vpop.f32.mrb[4].mxu0 }
 0x37b   :  { %14895 = vst [vmem:[#allocation126_spill] sm:$0xff] %v12831_v12  ;;  %v7713_v19 = vpop.f32.mrb[5].mxu0  ;;  %v5499_v16 = vsel %vm5434_vm14, %v5476_v57, 0.0 }
 0x37c   :  { %8341 = vmatmul.mubr.f32.gmra.mrb[42].mxu1 %v5963_v58 }
 0x37d   :  { %8343 = vmatprep.mubr.msk.f32.mxu1 %vm9412_vm9, %v14545_v27 }
 0x37e   :  { %v12841_v62 = vpop.f32.mrb[6].mxu0 }
 0x37f   :  { %14897 = vst [vmem:[#allocation105_spill] sm:$0xff] %v12841_v62  ;;  %v4298_v20 = vpop.permute.xlu1 %4297  ;;  %v7716_v14 = vpop.f32.mrb[7].mxu0 }
 0x380   :  { %v4321_v42 = vsel %vm4256_vm12, %v4298_v20, 0.0  ;;  %v3993_v62 = vpop.permute.xlu0 %3992 }
 0x381   :  { %v4334_v59 = vadd.f32 %v4321_v42, %v4204_v40  ;;  %vm4010_vm0 = vcmp.eq.s32.totalorder %v3993_v62, %v10885_v3 }
 0x382   :  { %v12846_v58 = vpop.f32.mrb[8].mxu0 }
 0x383   :  { %14898 = vst [vmem:[#allocation62_spill] sm:$0xff] %v12846_v58  ;;  %v4371_v19 = vsel %vm1491_vm8, %v4334_v59, 0  ;;  %v7719_v5 = vpop.f32.mrb[9].mxu0 }
 0x384   :  { %v12849_v35 = vand.u32 4294901760, %v4371_v19  ;;  %v5662_v63 = vpop.permute.xlu1 %5661 }
 0x385   :  { %vm5681_vm15 = vcmp.eq.s32.totalorder %v5662_v63, %v10885_v3 }
 0x386   :  { %v12852_v43 = vsub.f32 %v4371_v19, %v12849_v35  ;;  %v12854_v47 = vpop.f32.mrb[10].mxu0  ;;  %v14901_v19 = vld [vmem:[#allocation31_spill] sm:$0xff] }
 0x387   :  { %14899 = vst [vmem:[#allocation133_spill] sm:$0xff] %v12854_v47  ;;  %v7722_v24 = vpop.f32.mrb[11].mxu0  ;;  %v5616_v32 = vsel %vm5551_vm10, %v14901_v19, 0.0 }
 0x388   :  { %v14093_v14 = vand.u32 4294901760, %v12852_v43  ;;  %v5629_v47 = vadd.f32 %v5616_v32, %v5499_v16 }
 0x389   :  { %v4110_v42 = vpop.permute.xlu1 %4109 }
 0x38a   :  { %v12859_v40 = vpop.f32.mrb[12].mxu0  ;;  %v4547_v5 = vsub.f32 %v12852_v43, %v14093_v14  ;;  %vm4127_vm1 = vcmp.eq.s32.totalorder %v4110_v42, %v10885_v3 }
 0x38b   :  { %14900 = vst [vmem:[#allocation119_spill] sm:$0xff] %v12859_v40  ;;  %v7725_v20 = vpop.f32.mrb[13].mxu0 }
 0x38c   :  { %v4548_v59 = vand.u32 4294901760, %v4547_v5 }
 0x38e   :  { %8062 = vmatmul.mubr.f32.gmra.mrb[44].mxu0 %v4548_v59  ;;  %v5723_v24 = vpop.permute.xlu1 %5722  ;;  %v12866_v58 = vpop.f32.mrb[14].mxu0 }
 0x38f   :  { %14902 = vst [vmem:[#allocation106_spill] sm:$0xff] %v12866_v58  ;;  %v5746_v53 = vsel %vm5681_vm15, %v5723_v24, 0.0  ;;  %v7728_v52 = vpop.f32.mrb[15].mxu0  ;;  %8064 = vmatprep.mubr.msk.f32.mxu0 %vm9412_vm9, %v14545_v27 }
 0x390   :  { %v5759_v40 = vadd.f32 %v5746_v53, %v5629_v47  ;;  %v4055_v53 = vpop.permute.xlu0 %4054 }
 0x392   :  { %v5796_v57 = vsel %vm1491_vm8, %v5759_v40, 0  ;;  %v12871_v20 = vpop.f32.mrb[16].mxu0 }
 0x393   :  { %14903 = vst [vmem:[#allocation134_spill] sm:$0xff] %v12871_v20  ;;  %v12873_v5 = vand.u32 4294901760, %v5796_v57  ;;  %v4172_v32 = vpop.permute.xlu1 %4171  ;;  %v7731_v16 = vpop.f32.mrb[17].mxu0  ;;  %v4075_v20 = vsel %vm4010_vm0, %v4055_v53, 0.0 }
 0x394   :  { %v4192_v16 = vsel %vm4127_vm1, %v4172_v32, 0.0  ;;  %v4302_v58 = vpop.permute.xlu0 %4301 }
 0x395   :  { %14904 = vst [vmem:[#allocation46_spill] sm:$0xff] %v12873_v5  ;;  %v12876_v63 = vsub.f32 %v5796_v57, %v12873_v5  ;;  %v4205_v12 = vadd.f32 %v4192_v16, %v4075_v20 }
 0x396   :  { %v12878_v59 = vpop.f32.mrb[18].mxu0 }
 0x397   :  { %14905 = vst [vmem:[#allocation64_spill] sm:$0xff] %v12876_v63  ;;  %14906 = vst [vmem:[#allocation135_spill] sm:$0xff] %v12878_v59  ;;  %v7734_v19 = vpop.f32.mrb[19].mxu0  ;;  %v14094_v24 = vand.u32 4294901760, %v12876_v63 }
 0x398   :  { %v5535_v52 = vpop.permute.xlu1 %5534  ;;  %v4113_v51 = vpop.permute.xlu0 %4112 }
 0x399   :  { %v5972_v40 = vsub.f32 %v12876_v63, %v14094_v24  ;;  %vm5552_vm2 = vcmp.eq.s32.totalorder %v5535_v52, %v10885_v3  ;;  %vm4128_vm6 = vcmp.eq.s32.totalorder %v4113_v51, %v10885_v3 }
 0x39a   :  { %v12888_v57 = vpop.f32.mrb[20].mxu0 }
 0x39b   :  { %14907 = vst [vmem:[#allocation65_spill] sm:$0xff] %v12888_v57  ;;  %v5973_v14 = vand.u32 4294901760, %v5972_v40  ;;  %v7737_v19 = vpop.f32.mrb[21].mxu0 }
 0x39d   :  { %8344 = vmatmul.mubr.f32.gmra.mrb[44].mxu1 %v5973_v14  ;;  %v4240_v47 = vpop.permute.xlu1 %4239 }
 0x39e   :  { %vm4257_vm3 = vcmp.eq.s32.totalorder %v4240_v47, %v10885_v3  ;;  %v12893_v24 = vpop.f32.mrb[22].mxu0  ;;  %8346 = vmatprep.mubr.msk.f32.mxu1 %vm9412_vm9, %v14545_v27 }
 0x39f   :  { %14908 = vst [vmem:[#allocation45_spill] sm:$0xff] %v12893_v24  ;;  %v4322_v62 = vsel %vm4257_vm3, %v4302_v58, 0.0  ;;  %v7740_v42 = vpop.f32.mrb[23].mxu0 }
 0x3a0   :  { %v4335_v32 = vadd.f32 %v4322_v62, %v4205_v12  ;;  %v14910_v62 = vld [vmem:[#allocation76_spill] sm:$0xff] }
 0x3a1   :  { %vm5435_vm5 = vcmp.eq.s32.totalorder %v14910_v62, %v10885_v3 }
 0x3a2   :  { %v4374_v40 = vsel %vm1491_vm8, %v4335_v32, 0  ;;  %v5597_v19 = vpop.permute.xlu1 %5596  ;;  %v12898_v57 = vpop.f32.mrb[24].mxu0 }
 0x3a3   :  { %14909 = vst [vmem:[#allocation57_spill] sm:$0xff] %v12898_v57  ;;  %v12900_v53 = vand.u32 4294901760, %v4374_v40  ;;  %v7743_v14 = vpop.f32.mrb[25].mxu0  ;;  %v5617_v32 = vsel %vm5552_vm2, %v5597_v19, 0.0  ;;  %vm6995_vm2 = vcmask 195584  }
 0x3a5   :  { %v12903_v20 = vsub.f32 %v4374_v40, %v12900_v53  ;;  %v14911_v40 = vld [vmem:[#allocation137_spill] sm:$0xff] }
 0x3a6   :  { %v5665_v47 = vpop.permute.xlu1 %5664  ;;  %v5500_v14 = vsel %vm5435_vm5, %v14911_v40, 0.0 }
 0x3a7   :  { %v14095_v16 = vand.u32 4294901760, %v12903_v20  ;;  %v5630_v59 = vadd.f32 %v5617_v32, %v5500_v14  ;;  %vm5682_vm13 = vcmp.eq.s32.totalorder %v5665_v47, %v10885_v3 }
 0x3a9   :  { %v4557_v58 = vsub.f32 %v12903_v20, %v14095_v16 }
 0x3ab   :  { %v3996_v42 = vpop.permute.xlu1 %3995  ;;  %v4558_v12 = vand.u32 4294901760, %v4557_v58 }
 0x3ac   :  { %vm4011_vm4 = vcmp.eq.s32.totalorder %v3996_v42, %v10885_v3 }
 0x3ad   :  { %8065 = vmatmul.mubr.f32.gmra.mrb[46].mxu0 %v4558_v12  ;;  %v4059_v12 = vpop.permute.xlu0 %4058 }
 0x3ae   :  { %8067 = vmatprep.mubr.msk.f32.mxu0 %vm9412_vm9, %v14545_v27 }
 0x3b0   :  { %v5727_v57 = vpop.permute.xlu1 %5726 }
 0x3b1   :  { %v5747_v24 = vsel %vm5682_vm13, %v5727_v57, 0.0  ;;  %v4076_v57 = vsel %vm4011_vm4, %v4059_v12, 0.0  ;;  %v4306_v32 = vpop.permute.xlu0 %4305  ;;  %vm7022_vm13 = vcmask 261120  }
 0x3b2   :  { %v5760_v16 = vadd.f32 %v5747_v24, %v5630_v59 }
 0x3b4   :  { %v5799_v58 = vsel %vm1491_vm8, %v5760_v16, 0 }
 0x3b5   :  { %v12917_v11 = vand.u32 4294901760, %v5799_v58  ;;  %v4176_v62 = vpop.permute.xlu1 %4175  ;;  %v4116_v15 = vpop.permute.xlu0 %4115 }
 0x3b6   :  { %v4193_v59 = vsel %vm4128_vm6, %v4176_v62, 0.0  ;;  %vm4129_vm10 = vcmp.eq.s32.totalorder %v4116_v15, %v10885_v3 }
 0x3b7   :  { %14912 = vst [vmem:[#allocation58_spill] sm:$0xff] %v12917_v11  ;;  %v12920_v52 = vsub.f32 %v5799_v58, %v12917_v11  ;;  %v4206_v40 = vadd.f32 %v4193_v59, %v4076_v57  ;;  %v14916_v57 = vld [vmem:[#allocation87_spill] sm:$0xff] }
 0x3b8   :  { %vm5436_vm11 = vcmp.eq.s32.totalorder %v14916_v57, %v10885_v3 }
 0x3b9   :  { %14913 = vst [vmem:[#allocation93_spill] sm:$0xff] %v12920_v52  ;;  %v14098_v19 = vand.u32 4294901760, %v12920_v52 }
 0x3ba   :  { %v5538_v63 = vpop.permute.xlu1 %5537 }
 0x3bb   :  { %v5982_v47 = vsub.f32 %v12920_v52, %v14098_v19  ;;  %vm5553_vm12 = vcmp.eq.s32.totalorder %v5538_v63, %v10885_v3 }
 0x3bd   :  { %v5983_v24 = vand.u32 4294901760, %v5982_v47 }
 0x3bf   :  { %8347 = vmatmul.mubr.f32.gmra.mrb[46].mxu1 %v5983_v24  ;;  %v4243_v16 = vpop.permute.xlu1 %4242 }
 0x3c0   :  { %vm4258_vm7 = vcmp.eq.s32.totalorder %v4243_v16, %v10885_v3  ;;  %8349 = vmatprep.mubr.msk.f32.mxu1 %vm9412_vm9, %v14545_v27 }
 0x3c1   :  { %v4323_v14 = vsel %vm4258_vm7, %v4306_v32, 0.0 }
 0x3c2   :  { %v4336_v58 = vadd.f32 %v4323_v14, %v4206_v40 }
 0x3c4   :  { %v4377_v19 = vsel %vm1491_vm8, %v4336_v58, 0  ;;  %v5601_v52 = vpop.permute.xlu1 %5600 }
 0x3c5   :  { %v12932_v51 = vand.u32 4294901760, %v4377_v19  ;;  %v5618_v16 = vsel %vm5553_vm12, %v5601_v52, 0.0 }
 0x3c7   :  { %14914 = vst [vmem:[#allocation60_spill] sm:$0xff] %v12932_v51  ;;  %v12935_v42 = vsub.f32 %v4377_v19, %v12932_v51  ;;  %v14917_v19 = vld [vmem:[#allocation28_spill] sm:$0xff] }
 0x3c8   :  { %v5668_v62 = vpop.permute.xlu1 %5667  ;;  %v5501_v32 = vsel %vm5436_vm11, %v14917_v19, 0.0 }
 0x3c9   :  { %14915 = vst [vmem:[#allocation73_spill] sm:$0xff] %v12935_v42  ;;  %v14101_v12 = vand.u32 4294901760, %v12935_v42  ;;  %v5631_v40 = vadd.f32 %v5618_v16, %v5501_v32  ;;  %vm5683_vm14 = vcmp.eq.s32.totalorder %v5668_v62, %v10885_v3 }
 0x3cb   :  { %v4567_v47 = vsub.f32 %v12935_v42, %v14101_v12 }
 0x3cd   :  { %v3999_v59 = vpop.permute.xlu1 %3998  ;;  %v4568_v24 = vand.u32 4294901760, %v4567_v47 }
 0x3ce   :  { %vm4012_vm15 = vcmp.eq.s32.totalorder %v3999_v59, %v10885_v3 }
 0x3cf   :  { %8068 = vmatmul.mubr.f32.gmra.mrb[48].mxu0 %v4568_v24  ;;  %v4063_v24 = vpop.permute.xlu0 %4062 }
 0x3d0   :  { %8070 = vmatprep.mubr.msk.f32.mxu0 %vm9412_vm9, %v14545_v27  ;;  %v4077_v19 = vsel %vm4012_vm15, %v4063_v24, 0.0 }
 0x3d2   :  { %v5731_v14 = vpop.permute.xlu1 %5730 }
 0x3d3   :  { %v5748_v58 = vsel %vm5683_vm14, %v5731_v14, 0.0 }
 0x3d4   :  { %v5761_v12 = vadd.f32 %v5748_v58, %v5631_v40  ;;  %v4310_v40 = vpop.permute.xlu0 %4309 }
 0x3d6   :  { %v5802_v47 = vsel %vm1491_vm8, %v5761_v12, 0 }
 0x3d7   :  { %v12949_v42 = vand.u32 4294901760, %v5802_v47  ;;  %v4180_v57 = vpop.permute.xlu1 %4179 }
 0x3d8   :  { %v4194_v16 = vsel %vm4129_vm10, %v4180_v57, 0.0  ;;  %v14921_v57 = vld [vmem:[#allocation40_spill] sm:$0xff] }
 0x3d9   :  { %14918 = vst [vmem:[#allocation90_spill] sm:$0xff] %v12949_v42  ;;  %v12952_v63 = vsub.f32 %v5802_v47, %v12949_v42  ;;  %v4207_v14 = vadd.f32 %v4194_v16, %v4077_v19  ;;  %vm5437_vm1 = vcmp.eq.s32.totalorder %v14921_v57, %v10885_v3 }
 0x3db   :  { %14919 = vst [vmem:[#allocation138_spill] sm:$0xff] %v12952_v63  ;;  %v14108_v52 = vand.u32 4294901760, %v12952_v63 }
 0x3dc   :  { %v5541_v17 = vpop.permute.xlu1 %5540 }
 0x3dd   :  { %v5992_v62 = vsub.f32 %v12952_v63, %v14108_v52  ;;  %vm5554_vm3 = vcmp.eq.s32.totalorder %v5541_v17, %v10885_v3 }
 0x3df   :  { %v5993_v12 = vand.u32 4294901760, %v5992_v62 }
 0x3e1   :  { %8350 = vmatmul.mubr.f32.gmra.mrb[48].mxu1 %v5993_v12  ;;  %v4246_v32 = vpop.permute.xlu1 %4245  ;;  %v5502_v12 = vsel %vm5437_vm1, %v12110_v0, 0.0 }
 0x3e2   :  { %vm4259_vm0 = vcmp.eq.s32.totalorder %v4246_v32, %v10885_v3  ;;  %8352 = vmatprep.mubr.msk.f32.mxu1 %vm9412_vm9, %v14545_v27 }
 0x3e3   :  { %v4324_v58 = vsel %vm4259_vm0, %v4310_v40, 0.0 }
 0x3e4   :  { %v4337_v47 = vadd.f32 %v4324_v58, %v4207_v14 }
 0x3e6   :  { %v4380_v52 = vsel %vm1491_vm8, %v4337_v47, 0  ;;  %v5605_v63 = vpop.permute.xlu1 %5604 }
 0x3e7   :  { %v12964_v15 = vand.u32 4294901760, %v4380_v52  ;;  %v5619_v62 = vsel %vm5554_vm3, %v5605_v63, 0.0 }
 0x3e8   :  { %v5632_v32 = vadd.f32 %v5619_v62, %v5502_v12 }
 0x3e9   :  { %14920 = vst [vmem:[#allocation136_spill] sm:$0xff] %v12964_v15  ;;  %v12967_v59 = vsub.f32 %v4380_v52, %v12964_v15 }
 0x3ea   :  { %v5671_v24 = vpop.permute.xlu1 %5670 }
 0x3eb   :  { %v14112_v16 = vand.u32 4294901760, %v12967_v59  ;;  %vm5684_vm5 = vcmp.eq.s32.totalorder %v5671_v24, %v10885_v3  ;;  %v14923_v3 = vpack.c.bf16 %v14868_v4, %v14867_v48  ;;  %v14924_v24 = vpack.c.bf16 %v14890_v41, %v14889_v50 }
 0x3ed   :  { %v4577_v19 = vsub.f32 %v12967_v59, %v14112_v16  ;;  %v14940_v16 = vld [vmem:[#allocation64_spill] sm:$0xff] }
 0x3ee   :  { %v5735_v52 = vpop.permute.xlu1 %5734 }
 0x3ef   :  { %v5749_v40 = vsel %vm5684_vm5, %v5735_v52, 0.0  ;;  %v4578_v14 = vand.u32 4294901760, %v4577_v19 }
 0x3f0   :  { %v5762_v58 = vadd.f32 %v5749_v40, %v5632_v32  ;;  %v14925_v40 = vpack.c.bf16 %v12580_v25, %v12575_v13 }
 0x3f1   :  { %8071 = vmatmul.mubr.f32.gmra.mrb[50].mxu0 %v4578_v14 }
 0x3f2   :  { %v5805_v17 = vsel %vm1491_vm8, %v5762_v58, 0  ;;  %8081 = vmatprep.mubr.msk.f32.mxu0 %vm9412_vm9, %v14545_v27  ;;  %vm6981_vm8 = vcmask 130048  }
 0x3f3   :  { %v12981_v63 = vand.u32 4294901760, %v5805_v17 }
 0x3f5   :  { %14922 = vst [vmem:[#allocation35_spill] sm:$0xff] %v12981_v63  ;;  %v12984_v0 = vsub.f32 %v5805_v17, %v12981_v63  ;;  %8082 = vmatmul.mubr.f32.vlgmr.msra.gmra.mrb[26].mxu0 %v12210_v36 }
 0x3f6   :  { %8084 = vmatprep.mubr.msk.f32.mxu0 %vm9412_vm9, %v14545_v27  ;;  %8676 = vmatpush3.bf16.msra.mxu0 %v14923_v3  ;;  %v14926_v3 = vpack.c.bf16 %v12755_v60, %v12750_v39 }
 0x3f7   :  { %v14111_v47 = vand.u32 4294901760, %v12984_v0  ;;  %8677 = vmatprep.subr.bf16.mxu0 %v14498_v31 }
 0x3f9   :  { %8085 = vmatmul.mubr.f32.gmra.mrb[28].mxu0 %v12236_v8  ;;  %v6002_v57 = vsub.f32 %v12984_v0, %v14111_v47  ;;  %v14939_v47 = vld [vmem:[#allocation85_spill] sm:$0xff] }
 0x3fa   :  { %8087 = vmatprep.mubr.msk.f32.mxu0 %vm9412_vm9, %v14545_v27  ;;  %8679 = vmatpush3.bf16.msra.mxu0 %v14924_v24 }
 0x3fb   :  { %v3885_v62 = vpop.f32.mrb[0].mxu1  ;;  %v6003_v12 = vand.u32 4294901760, %v6002_v57  ;;  %8680 = vmatprep.subr.bf16.mxu0 %v14498_v31 }
 0x3fc   :  { %6824 = vrot.lane.b32.xlu0 %v3885_v62, %s9407_s20  ;;  %v7989_v19 = vpop.f32.mrb[1].mxu1 }
 0x3fd   :  { %8088 = vmatmul.mubr.f32.gmra.mrb[30].mxu0 %v12272_v9  ;;  %8353 = vmatmul.mubr.f32.gmra.mrb[50].mxu1 %v6003_v12 }
 0x3fe   :  { %8090 = vmatprep.mubr.msk.f32.mxu0 %vm9412_vm9, %v14545_v27  ;;  %8363 = vmatprep.mubr.msk.f32.mxu1 %vm9412_vm9, %v14545_v27 }
 0x3ff   :  { %v3891_v32 = vpop.f32.mrb[2].mxu1 }
 0x400   :  { %v7992_v52 = vpop.f32.mrb[3].mxu1  ;;  %6826 = vrot.lane.b32.xlu1 %v3891_v32, %s9407_s20 }
 0x401   :  { %8091 = vmatmul.mubr.f32.gmra.mrb[32].mxu0 %v12299_v23  ;;  %8364 = vmatmul.mubr.f32.vlgmr.msra.gmra.mrb[26].mxu1 %v12529_v18 }
 0x402   :  { %8712 = vmatpush3.bf16.msra.mxu1 %v14925_v40  ;;  %8093 = vmatprep.mubr.msk.f32.mxu0 %vm9412_vm9, %v14545_v27 }
 0x403   :  { %v3897_v14 = vpop.f32.mrb[4].mxu1  ;;  %8366 = vmatprep.mubr.msk.f32.mxu1 %vm9412_vm9, %v14545_v27  ;;  %8713 = vmatprep.subr.bf16.mxu1 %v14498_v31 }
 0x404   :  { %6828 = vrot.lane.b32.xlu0 %v3897_v14, %s9407_s20  ;;  %v7995_v58 = vpop.f32.mrb[5].mxu1 }
 0x405   :  { %8094 = vmatmul.mubr.f32.gmra.mrb[34].mxu0 %v12330_v21  ;;  %8367 = vmatmul.mubr.f32.gmra.mrb[28].mxu1 %v12582_v33 }
 0x406   :  { %8096 = vmatprep.mubr.msk.f32.mxu0 %vm9412_vm9, %v14545_v27  ;;  %8369 = vmatprep.mubr.msk.f32.mxu1 %vm9412_vm9, %v14545_v27 }
 0x407   :  { %v3903_v17 = vpop.f32.mrb[6].mxu1  ;;  %8715 = vmatpush3.bf16.msra.mxu1 %v14926_v3 }
 0x408   :  { %v7998_v57 = vpop.f32.mrb[7].mxu1  ;;  %6830 = vrot.lane.b32.xlu1 %v3903_v17, %s9407_s20  ;;  %8716 = vmatprep.subr.bf16.mxu1 %v14498_v31 }
 0x409   :  { %8097 = vmatmul.mubr.f32.gmra.mrb[36].mxu0 %v12365_v22  ;;  %8370 = vmatmul.mubr.f32.gmra.mrb[30].mxu1 %v12618_v61 }
 0x40a   :  { %8099 = vmatprep.mubr.msk.f32.mxu0 %vm9412_vm9, %v14545_v27  ;;  %8372 = vmatprep.mubr.msk.f32.mxu1 %vm9412_vm9, %v14545_v27 }
 0x40b   :  { %v3909_v24 = vpop.f32.mrb[8].mxu1 }
 0x40c   :  { %6832 = vrot.lane.b32.xlu0 %v3909_v24, %s9407_s20  ;;  %v8001_v62 = vpop.f32.mrb[9].mxu1 }
 0x40d   :  { %8100 = vmatmul.mubr.f32.gmra.mrb[38].mxu0 %v12457_v37  ;;  %8373 = vmatmul.mubr.f32.gmra.mrb[32].mxu1 %v12655_v49 }
 0x40e   :  { %8102 = vmatprep.mubr.msk.f32.mxu0 %vm9412_vm9, %v14545_v27  ;;  %8375 = vmatprep.mubr.msk.f32.mxu1 %vm9412_vm9, %v14545_v27 }
 0x40f   :  { %v3915_v12 = vpop.f32.mrb[10].mxu1 }
 0x410   :  { %v8004_v19 = vpop.f32.mrb[11].mxu1  ;;  %6834 = vrot.lane.b32.xlu1 %v3915_v12, %s9407_s20 }
 0x411   :  { %8103 = vmatmul.mubr.f32.gmra.mrb[40].mxu0 %v12555_v45  ;;  %8376 = vmatmul.mubr.f32.gmra.mrb[34].mxu1 %v12666_v1 }
 0x412   :  { %8105 = vmatprep.mubr.msk.f32.mxu0 %vm9412_vm9, %v14545_v27  ;;  %8378 = vmatprep.mubr.msk.f32.mxu1 %vm9412_vm9, %v14545_v27 }
 0x413   :  { %v3921_v32 = vpop.f32.mrb[12].mxu1 }
 0x414   :  { %6836 = vrot.lane.b32.xlu0 %v3921_v32, %s9407_s20  ;;  %v8007_v52 = vpop.f32.mrb[13].mxu1 }
 0x415   :  { %8106 = vmatmul.mubr.f32.gmra.mrb[42].mxu0 %v12776_v6  ;;  %8379 = vmatmul.mubr.f32.gmra.mrb[36].mxu1 %v12692_v54  ;;  %v14927_v52 = vld [vmem:[#allocation39_spill] sm:$0xff] }
 0x416   :  { %8108 = vmatprep.mubr.msk.f32.mxu0 %vm9412_vm9, %v14545_v27  ;;  %8381 = vmatprep.mubr.msk.f32.mxu1 %vm9412_vm9, %v14545_v27 }
 0x417   :  { %v3927_v40 = vpop.f32.mrb[14].mxu1 }
 0x418   :  { %v8010_v14 = vpop.f32.mrb[15].mxu1  ;;  %6838 = vrot.lane.b32.xlu1 %v3927_v40, %s9407_s20 }
 0x419   :  { %8109 = vmatmul.mubr.f32.gmra.mrb[44].mxu0 %v12849_v35  ;;  %8382 = vmatmul.mubr.f32.gmra.mrb[38].mxu1 %v12714_v7  ;;  %v14928_v14 = vld [vmem:[#allocation117_spill] sm:$0xff] }
 0x41a   :  { %8111 = vmatprep.mubr.msk.f32.mxu0 %vm9412_vm9, %v14545_v27  ;;  %8384 = vmatprep.mubr.msk.f32.mxu1 %vm9412_vm9, %v14545_v27 }
 0x41b   :  { %v3933_v58 = vpop.f32.mrb[16].mxu1 }
 0x41c   :  { %6840 = vrot.lane.b32.xlu0 %v3933_v58, %s9407_s20  ;;  %v8013_v17 = vpop.f32.mrb[17].mxu1  ;;  %v14929_v58 = vld [vmem:[#allocation103_spill] sm:$0xff] }
 0x41d   :  { %8112 = vmatmul.mubr.f32.gmra.mrb[46].mxu0 %v12900_v53  ;;  %8385 = vmatmul.mubr.f32.gmra.mrb[40].mxu1 %v12742_v29  ;;  %v14930_v17 = vld [vmem:[#allocation22_spill] sm:$0xff] }
 0x41e   :  { %8114 = vmatprep.mubr.msk.f32.mxu0 %vm9412_vm9, %v14545_v27  ;;  %8387 = vmatprep.mubr.msk.f32.mxu1 %vm9412_vm9, %v14545_v27 }
 0x41f   :  { %v3939_v3 = vpop.f32.mrb[18].mxu1 }
 0x420   :  { %v8016_v57 = vpop.f32.mrb[19].mxu1  ;;  %6842 = vrot.lane.b32.xlu1 %v3939_v3, %s9407_s20  ;;  %v14931_v3 = vld [vmem:[#allocation112_spill] sm:$0xff] }
 0x421   :  { %8115 = vmatmul.mubr.f32.gmra.mrb[48].mxu0 %v12932_v51  ;;  %8388 = vmatmul.mubr.f32.gmra.mrb[42].mxu1 %v12774_v44  ;;  %v14932_v57 = vld [vmem:[#allocation113_spill] sm:$0xff]  ;;  %v14945_v44 = vand.u32 4294901760, %v14889_v50  ;;  %v14946_v51 = vand.u32 4294901760, %v14890_v41  ;;  %v14949_v50 = vand.u32 4294901760, %v14930_v17  ;;  %v14950_v41 = vand.u32 4294901760, %v12575_v13 }
 0x422   :  { %8117 = vmatprep.mubr.msk.f32.mxu0 %vm9412_vm9, %v14545_v27  ;;  %8390 = vmatprep.mubr.msk.f32.mxu1 %vm9412_vm9, %v14545_v27  ;;  %v14954_v13 = vand.u32 4294901760, %v12750_v39 }
 0x423   :  { %v3945_v24 = vpop.f32.mrb[20].mxu1 }
 0x424   :  { %6844 = vrot.lane.b32.xlu0 %v3945_v24, %s9407_s20  ;;  %v8019_v62 = vpop.f32.mrb[21].mxu1  ;;  %v14933_v24 = vld [vmem:[#allocation104_spill] sm:$0xff] }
 0x425   :  { %8118 = vmatmul.mubr.f32.gmra.mrb[50].mxu0 %v12964_v15  ;;  %8391 = vmatmul.mubr.f32.gmra.mrb[44].mxu1 %v12873_v5  ;;  %v14934_v62 = vld [vmem:[#allocation54_spill] sm:$0xff]  ;;  %v14943_v5 = vand.u32 4294901760, %v12217_v55  ;;  %v14944_v15 = vld [vmem:[#allocation93_spill] sm:$0xff] }
 0x426   :  { %8128 = vmatprep.mubr.msk.f32.mxu0 %vm9412_vm9, %v14545_v27  ;;  %8393 = vmatprep.mubr.msk.f32.mxu1 %vm9412_vm9, %v14545_v27 }
 0x427   :  { %v3951_v12 = vpop.f32.mrb[22].mxu1 }
 0x428   :  { %v8022_v19 = vpop.f32.mrb[23].mxu1  ;;  %6846 = vrot.lane.b32.xlu1 %v3951_v12, %s9407_s20  ;;  %v14935_v12 = vld [vmem:[#allocation30_spill] sm:$0xff] }
 0x429   :  { %8129 = vmatmul.mubr.f32.vlgmr.msra.gmra.mrb[26].mxu0 %v12217_v55  ;;  %8394 = vmatmul.mubr.f32.gmra.mrb[46].mxu1 %v12917_v11  ;;  %v14936_v19 = vld [vmem:[#allocation70_spill] sm:$0xff]  ;;  %v14958_v39 = vand.u32 4294901760, %v14935_v12 }
 0x42a   :  { %8131 = vmatprep.mubr.msk.f32.mxu0 %vm9412_vm9, %v14545_v27  ;;  %8396 = vmatprep.mubr.msk.f32.mxu1 %vm9412_vm9, %v14545_v27  ;;  %v14948_v55 = vld [vmem:[#allocation138_spill] sm:$0xff] }
 0x42b   :  { %v3957_v32 = vpop.f32.mrb[24].mxu1  ;;  %8682 = vmatpush3.bf16.msra.mxu0 %v14927_v52 }
 0x42c   :  { %6848 = vrot.lane.b32.xlu0 %v3957_v32, %s9407_s20  ;;  %v8025_v40 = vpop.f32.mrb[25].mxu1  ;;  %8683 = vmatprep.subr.bf16.mxu0 %v14498_v31  ;;  %v14937_v32 = vld [vmem:[#allocation67_spill] sm:$0xff] }
 0x42d   :  { %8132 = vmatmul.mubr.f32.gmra.mrb[28].mxu0 %v14928_v14  ;;  %8397 = vmatmul.mubr.f32.gmra.mrb[48].mxu1 %v12949_v42  ;;  %v14938_v40 = vld [vmem:[#allocation73_spill] sm:$0xff]  ;;  %v14942_v42 = vand.u32 4294901760, %v14868_v4  ;;  %v14947_v4 = vand.u32 4294901760, %v14928_v14  ;;  %v14961_v14 = vand.u32 4294901760, %v12676_v28 }
 0x42e   :  { %8134 = vmatprep.mubr.msk.f32.mxu0 %vm9412_vm9, %v14545_v27  ;;  %8399 = vmatprep.mubr.msk.f32.mxu1 %vm9412_vm9, %v14545_v27 }
 0x42f   :  { %8685 = vmatpush3.bf16.msra.mxu0 %v14929_v58 }
 0x430   :  { %8686 = vmatprep.subr.bf16.mxu0 %v14498_v31 }
 0x431   :  { %8135 = vmatmul.mubr.f32.gmra.mrb[30].mxu0 %v14930_v17  ;;  %8400 = vmatmul.mubr.f32.gmra.mrb[50].mxu1 %v12981_v63  ;;  %v14941_v63 = vand.u32 4294901760, %v14867_v48  ;;  %v8690_v48 = vpack.c.bf16 %v14946_v51, %v14945_v44  ;;  %v14953_v51 = vand.u32 4294901760, %v12548_v46  ;;  %v14963_v17 = vand.u32 4294901760, %v12690_v38 }
 0x432   :  { %8137 = vmatprep.mubr.msk.f32.mxu0 %vm9412_vm9, %v14545_v27  ;;  %8410 = vmatprep.mubr.msk.f32.mxu1 %vm9412_vm9, %v14545_v27 }
 0x433   :  { %v8687_v11 = vpack.c.bf16 %v14942_v42, %v14941_v63  ;;  %v14956_v63 = vand.u32 4294901760, %v14933_v24 }
 0x435   :  { %8138 = vmatmul.mubr.f32.gmra.mrb[32].mxu0 %v14931_v3  ;;  %8411 = vmatmul.mubr.f32.vlgmr.msra.gmra.mrb[26].mxu1 %v12548_v46  ;;  %v14957_v46 = vand.u32 4294901760, %v12614_v10 }
 0x436   :  { %8718 = vmatpush3.bf16.msra.mxu1 %v14932_v57  ;;  %8140 = vmatprep.mubr.msk.f32.mxu0 %vm9412_vm9, %v14545_v27 }
 0x437   :  { %8413 = vmatprep.mubr.msk.f32.mxu1 %vm9412_vm9, %v14545_v27  ;;  %8719 = vmatprep.subr.bf16.mxu1 %v14498_v31 }
 0x439   :  { %8141 = vmatmul.mubr.f32.gmra.mrb[34].mxu0 %v14933_v24  ;;  %8414 = vmatmul.mubr.f32.gmra.mrb[28].mxu1 %v12614_v10  ;;  %v14960_v10 = vand.u32 4294901760, %v14936_v19  ;;  %v14973_v24 = vand.u32 4294901760, %v14940_v16 }
 0x43a   :  { %8143 = vmatprep.mubr.msk.f32.mxu0 %vm9412_vm9, %v14545_v27  ;;  %8416 = vmatprep.mubr.msk.f32.mxu1 %vm9412_vm9, %v14545_v27 }
 0x43b   :  { %8721 = vmatpush3.bf16.msra.mxu1 %v14934_v62 }
 0x43c   :  { %8722 = vmatprep.subr.bf16.mxu1 %v14498_v31 }
 0x43d   :  { %8144 = vmatmul.mubr.f32.gmra.mrb[36].mxu0 %v14935_v12  ;;  %8417 = vmatmul.mubr.f32.gmra.mrb[30].mxu1 %v12651_v26 }
 0x43e   :  { %8146 = vmatprep.mubr.msk.f32.mxu0 %vm9412_vm9, %v14545_v27  ;;  %8419 = vmatprep.mubr.msk.f32.mxu1 %vm9412_vm9, %v14545_v27 }
 0x441   :  { %8147 = vmatmul.mubr.f32.gmra.mrb[38].mxu0 %v14936_v19  ;;  %8420 = vmatmul.mubr.f32.gmra.mrb[32].mxu1 %v12676_v28  ;;  %v14964_v28 = vand.u32 4294901760, %v12788_v56 }
 0x442   :  { %8149 = vmatprep.mubr.msk.f32.mxu0 %vm9412_vm9, %v14545_v27  ;;  %8422 = vmatprep.mubr.msk.f32.mxu1 %vm9412_vm9, %v14545_v27 }
 0x445   :  { %8150 = vmatmul.mubr.f32.gmra.mrb[40].mxu0 %v12570_v34  ;;  %8423 = vmatmul.mubr.f32.gmra.mrb[34].mxu1 %v12690_v38  ;;  %v14967_v38 = vand.u32 4294901760, %v12736_v2 }
 0x446   :  { %8152 = vmatprep.mubr.msk.f32.mxu0 %vm9412_vm9, %v14545_v27  ;;  %8425 = vmatprep.mubr.msk.f32.mxu1 %vm9412_vm9, %v14545_v27 }
 0x449   :  { %8153 = vmatmul.mubr.f32.gmra.mrb[42].mxu0 %v12788_v56  ;;  %8426 = vmatmul.mubr.f32.gmra.mrb[36].mxu1 %v12712_v30  ;;  %v14969_v56 = vand.u32 4294901760, %v14937_v32 }
 0x44a   :  { %8155 = vmatprep.mubr.msk.f32.mxu0 %vm9412_vm9, %v14545_v27  ;;  %8428 = vmatprep.mubr.msk.f32.mxu1 %vm9412_vm9, %v14545_v27 }
 0x44d   :  { %8156 = vmatmul.mubr.f32.gmra.mrb[44].mxu0 %v12852_v43  ;;  %8429 = vmatmul.mubr.f32.gmra.mrb[38].mxu1 %v12736_v2  ;;  %v14970_v2 = vand.u32 4294901760, %v14938_v40 }
 0x44e   :  { %8158 = vmatprep.mubr.msk.f32.mxu0 %vm9412_vm9, %v14545_v27  ;;  %8431 = vmatprep.mubr.msk.f32.mxu1 %vm9412_vm9, %v14545_v27 }
 0x451   :  { %8159 = vmatmul.mubr.f32.gmra.mrb[46].mxu0 %v12903_v20  ;;  %8432 = vmatmul.mubr.f32.gmra.mrb[40].mxu1 %v14937_v32 }
 0x452   :  { %8161 = vmatprep.mubr.msk.f32.mxu0 %vm9412_vm9, %v14545_v27  ;;  %8434 = vmatprep.mubr.msk.f32.mxu1 %vm9412_vm9, %v14545_v27 }
 0x455   :  { %8162 = vmatmul.mubr.f32.gmra.mrb[48].mxu0 %v14938_v40  ;;  %8435 = vmatmul.mubr.f32.gmra.mrb[42].mxu1 %v14939_v47 }
 0x456   :  { %8164 = vmatprep.mubr.msk.f32.mxu0 %vm9412_vm9, %v14545_v27  ;;  %8437 = vmatprep.mubr.msk.f32.mxu1 %vm9412_vm9, %v14545_v27 }
 0x459   :  { %8165 = vmatmul.mubr.f32.gmra.mrb[50].mxu0 %v12967_v59  ;;  %8438 = vmatmul.mubr.f32.gmra.mrb[44].mxu1 %v14940_v16  ;;  %v14978_v16 = vld [vmem:[#allocation18_spill] sm:$0xff] }
 0x45a   :  { %8175 = vmatprep.mubr.msk.f32.mxu0 %vm9412_vm9, %v14545_v27  ;;  %8440 = vmatprep.mubr.msk.f32.mxu1 %vm9412_vm9, %v14545_v27 }
 0x45d   :  { %8176 = vmatmul.mubr.f32.vlgmr.msra.gmra.mrb[26].mxu0 %v14943_v5  ;;  %8441 = vmatmul.mubr.f32.gmra.mrb[46].mxu1 %v14944_v15  ;;  %v14952_v5 = vand.u32 4294901760, %v14931_v3  ;;  %v14965_v3 = vand.u32 4294901760, %v12712_v30  ;;  %v14968_v30 = vand.u32 4294901760, %v12903_v20  ;;  %v14972_v20 = vand.u32 4294901760, %v12967_v59 }
 0x45e   :  { %8178 = vmatprep.mubr.msk.f32.mxu0 %vm9412_vm9, %v14545_v27  ;;  %8443 = vmatprep.mubr.msk.f32.mxu1 %vm9412_vm9, %v14545_v27  ;;  %v14975_v59 = vand.u32 4294901760, %v14948_v55 }
 0x45f   :  { %8688 = vmatpush3.bf16.msra.mxu0 %v8687_v11  ;;  %v14951_v11 = vand.u32 4294901760, %v12580_v25  ;;  %v14955_v25 = vand.u32 4294901760, %v12755_v60  ;;  %v14959_v60 = vand.u32 4294901760, %v12651_v26  ;;  %v14962_v26 = vand.u32 4294901760, %v12570_v34 }
 0x460   :  { %8689 = vmatprep.subr.bf16.mxu0 %v14498_v31  ;;  %v14966_v34 = vand.u32 4294901760, %v12852_v43  ;;  %v14971_v43 = vand.u32 4294901760, %v14939_v47  ;;  %v14974_v47 = vand.u32 4294901760, %v14944_v15  ;;  %v14976_v15 = vand.u32 4294901760, %v12984_v0 }
 0x461   :  { %8179 = vmatmul.mubr.f32.gmra.mrb[28].mxu0 %v14947_v4  ;;  %8444 = vmatmul.mubr.f32.gmra.mrb[48].mxu1 %v14948_v55  ;;  %v8723_v44 = vpack.c.bf16 %v14951_v11, %v14950_v41  ;;  %v8726_v42 = vpack.c.bf16 %v14955_v25, %v14954_v13 }
 0x462   :  { %8181 = vmatprep.mubr.msk.f32.mxu0 %vm9412_vm9, %v14545_v27  ;;  %8446 = vmatprep.mubr.msk.f32.mxu1 %vm9412_vm9, %v14545_v27 }
 0x463   :  { %8691 = vmatpush3.bf16.msra.mxu0 %v8690_v48 }
 0x464   :  { %8692 = vmatprep.subr.bf16.mxu0 %v14498_v31 }
 0x465   :  { %8182 = vmatmul.mubr.f32.gmra.mrb[30].mxu0 %v14949_v50  ;;  %8447 = vmatmul.mubr.f32.gmra.mrb[50].mxu1 %v12984_v0  ;;  %v14979_v0 = vld [vmem:[#allocation136_spill] sm:$0xff] }
 0x466   :  { %8184 = vmatprep.mubr.msk.f32.mxu0 %vm9412_vm9, %v14545_v27  ;;  %8457 = vmatprep.mubr.msk.f32.mxu1 %vm9412_vm9, %v14545_v27 }
 0x469   :  { %8185 = vmatmul.mubr.f32.gmra.mrb[32].mxu0 %v14952_v5  ;;  %8458 = vmatmul.mubr.f32.vlgmr.msra.gmra.mrb[26].mxu1 %v14953_v51 }
 0x46a   :  { %8724 = vmatpush3.bf16.msra.mxu1 %v8723_v44  ;;  %8187 = vmatprep.mubr.msk.f32.mxu0 %vm9412_vm9, %v14545_v27 }
 0x46b   :  { %8460 = vmatprep.mubr.msk.f32.mxu1 %vm9412_vm9, %v14545_v27  ;;  %8725 = vmatprep.subr.bf16.mxu1 %v14498_v31 }
 0x46d   :  { %8188 = vmatmul.mubr.f32.gmra.mrb[34].mxu0 %v14956_v63  ;;  %8461 = vmatmul.mubr.f32.gmra.mrb[28].mxu1 %v14957_v46 }
 0x46e   :  { %8190 = vmatprep.mubr.msk.f32.mxu0 %vm9412_vm9, %v14545_v27  ;;  %8463 = vmatprep.mubr.msk.f32.mxu1 %vm9412_vm9, %v14545_v27 }
 0x46f   :  { %8727 = vmatpush3.bf16.msra.mxu1 %v8726_v42 }
 0x470   :  { %8728 = vmatprep.subr.bf16.mxu1 %v14498_v31 }
 0x471   :  { %8191 = vmatmul.mubr.f32.gmra.mrb[36].mxu0 %v14958_v39  ;;  %8464 = vmatmul.mubr.f32.gmra.mrb[30].mxu1 %v14959_v60 }
 0x472   :  { %8193 = vmatprep.mubr.msk.f32.mxu0 %vm9412_vm9, %v14545_v27  ;;  %8466 = vmatprep.mubr.msk.f32.mxu1 %vm9412_vm9, %v14545_v27 }
 0x475   :  { %8194 = vmatmul.mubr.f32.gmra.mrb[38].mxu0 %v14960_v10  ;;  %8467 = vmatmul.mubr.f32.gmra.mrb[32].mxu1 %v14961_v14 }
 0x476   :  { %8196 = vmatprep.mubr.msk.f32.mxu0 %vm9412_vm9, %v14545_v27  ;;  %8469 = vmatprep.mubr.msk.f32.mxu1 %vm9412_vm9, %v14545_v27 }
 0x479   :  { %8197 = vmatmul.mubr.f32.gmra.mrb[40].mxu0 %v14962_v26  ;;  %8470 = vmatmul.mubr.f32.gmra.mrb[34].mxu1 %v14963_v17 }
 0x47a   :  { %8199 = vmatprep.mubr.msk.f32.mxu0 %vm9412_vm9, %v14545_v27  ;;  %8472 = vmatprep.mubr.msk.f32.mxu1 %vm9412_vm9, %v14545_v27 }
 0x47d   :  { %8200 = vmatmul.mubr.f32.gmra.mrb[42].mxu0 %v14964_v28  ;;  %8473 = vmatmul.mubr.f32.gmra.mrb[36].mxu1 %v14965_v3 }
 0x47e   :  { %8202 = vmatprep.mubr.msk.f32.mxu0 %vm9412_vm9, %v14545_v27  ;;  %8475 = vmatprep.mubr.msk.f32.mxu1 %vm9412_vm9, %v14545_v27 }
 0x481   :  { %8203 = vmatmul.mubr.f32.gmra.mrb[44].mxu0 %v14966_v34  ;;  %8476 = vmatmul.mubr.f32.gmra.mrb[38].mxu1 %v14967_v38 }
 0x482   :  { %8205 = vmatprep.mubr.msk.f32.mxu0 %vm9412_vm9, %v14545_v27  ;;  %8478 = vmatprep.mubr.msk.f32.mxu1 %vm9412_vm9, %v14545_v27 }
 0x485   :  { %8206 = vmatmul.mubr.f32.gmra.mrb[46].mxu0 %v14968_v30  ;;  %8479 = vmatmul.mubr.f32.gmra.mrb[40].mxu1 %v14969_v56 }
 0x486   :  { %8208 = vmatprep.mubr.msk.f32.mxu0 %vm9412_vm9, %v14545_v27  ;;  %8481 = vmatprep.mubr.msk.f32.mxu1 %vm9412_vm9, %v14545_v27 }
 0x489   :  { %8209 = vmatmul.mubr.f32.gmra.mrb[48].mxu0 %v14970_v2  ;;  %8482 = vmatmul.mubr.f32.gmra.mrb[42].mxu1 %v14971_v43 }
 0x48a   :  { %8211 = vmatprep.mubr.msk.f32.mxu0 %vm9412_vm9, %v14545_v27  ;;  %8484 = vmatprep.mubr.msk.f32.mxu1 %vm9412_vm9, %v14545_v27 }
 0x48d   :  { %8212 = vmatmul.mubr.f32.gmra.mrb[50].mxu0 %v14972_v20  ;;  %8485 = vmatmul.mubr.f32.gmra.mrb[44].mxu1 %v14973_v24  ;;  %v6825_v20 = vpop.permute.xlu0 %6824  ;;  %v6827_v24 = vpop.permute.xlu1 %6826 }
 0x48e   :  { %8222 = vmatprep.mubr.msk.f32.mxu0 %vm9412_vm9, %v14545_v27  ;;  %8487 = vmatprep.mubr.msk.f32.mxu1 %vm9412_vm9, %v14545_v27 }
 0x491   :  { %8223 = vmatmul.mubr.f32.vlgmr.msra.gmra.mrb[26].mxu0 %v12210_v36  ;;  %8488 = vmatmul.mubr.f32.gmra.mrb[46].mxu1 %v14974_v47  ;;  %v6829_v47 = vpop.permute.xlu0 %6828 }
 0x492   :  { %8225 = vmatprep.mubr.msk.f32.mxu0 %vm9412_vm9, %v14545_v27  ;;  %8490 = vmatprep.mubr.msk.f32.mxu1 %vm9412_vm9, %v14545_v27 }
 0x493   :  { %8694 = vmatpush3.bf16.msra.mxu0 %v14927_v52  ;;  %v14980_v52 = vld [vmem:[#allocation46_spill] sm:$0xff] }
 0x494   :  { %8695 = vmatprep.subr.bf16.mxu0 %v14498_v31 }
 0x495   :  { %8226 = vmatmul.mubr.f32.gmra.mrb[28].mxu0 %v12236_v8  ;;  %8491 = vmatmul.mubr.f32.gmra.mrb[48].mxu1 %v14975_v59  ;;  %v6831_v59 = vpop.permute.xlu1 %6830 }
 0x496   :  { %8228 = vmatprep.mubr.msk.f32.mxu0 %vm9412_vm9, %v14545_v27  ;;  %8493 = vmatprep.mubr.msk.f32.mxu1 %vm9412_vm9, %v14545_v27 }
 0x497   :  { %8697 = vmatpush3.bf16.msra.mxu0 %v14929_v58  ;;  %v14981_v58 = vld [vmem:[#allocation58_spill] sm:$0xff] }
 0x499   :  { %8229 = vmatmul.mubr.f32.gmra.mrb[30].mxu0 %v12272_v9  ;;  %8494 = vmatmul.mubr.f32.gmra.mrb[50].mxu1 %v14976_v15  ;;  %v6833_v15 = vpop.permute.xlu0 %6832 }
 0x49a   :  { %8231 = vmatprep.mubr.msk.f32.mxu0 %vm9412_vm9, %v14545_v27  ;;  %8504 = vmatprep.mubr.msk.f32.mxu1 %vm9412_vm9, %v14545_v27 }
 0x49d   :  { %8232 = vmatmul.mubr.f32.gmra.mrb[32].mxu0 %v12299_v23  ;;  %8505 = vmatmul.mubr.f32.vlgmr.msra.gmra.mrb[26].mxu1 %v12529_v18 }
 0x49e   :  { %8730 = vmatpush3.bf16.msra.mxu1 %v14932_v57  ;;  %8234 = vmatprep.mubr.msk.f32.mxu0 %vm9412_vm9, %v14545_v27  ;;  %v14982_v57 = vld [vmem:[#allocation90_spill] sm:$0xff] }
 0x49f   :  { %8507 = vmatprep.mubr.msk.f32.mxu1 %vm9412_vm9, %v14545_v27  ;;  %8731 = vmatprep.subr.bf16.mxu1 %v14498_v31  ;;  %v14977_v31 = vld [vmem:[#allocation60_spill] sm:$0xff] }
 0x4a1   :  { %8235 = vmatmul.mubr.f32.gmra.mrb[34].mxu0 %v12330_v21  ;;  %8508 = vmatmul.mubr.f32.gmra.mrb[28].mxu1 %v12582_v33 }
 0x4a2   :  { %8237 = vmatprep.mubr.msk.f32.mxu0 %vm9412_vm9, %v14545_v27  ;;  %8510 = vmatprep.mubr.msk.f32.mxu1 %vm9412_vm9, %v14545_v27 }
 0x4a3   :  { %8733 = vmatpush3.bf16.msra.mxu1 %v14934_v62 }
 0x4a5   :  { %8238 = vmatmul.mubr.f32.gmra.mrb[36].mxu0 %v12365_v22  ;;  %8511 = vmatmul.mubr.f32.gmra.mrb[30].mxu1 %v12618_v61 }
 0x4a6   :  { %8240 = vmatprep.mubr.msk.f32.mxu0 %vm9412_vm9, %v14545_v27  ;;  %8513 = vmatprep.mubr.msk.f32.mxu1 %vm9412_vm9, %v14545_v27 }
 0x4a9   :  { %8241 = vmatmul.mubr.f32.gmra.mrb[38].mxu0 %v12457_v37  ;;  %8514 = vmatmul.mubr.f32.gmra.mrb[32].mxu1 %v12655_v49 }
 0x4aa   :  { %8243 = vmatprep.mubr.msk.f32.mxu0 %vm9412_vm9, %v14545_v27  ;;  %8516 = vmatprep.mubr.msk.f32.mxu1 %vm9412_vm9, %v14545_v27 }
 0x4ad   :  { %8244 = vmatmul.mubr.f32.gmra.mrb[40].mxu0 %v12555_v45  ;;  %8517 = vmatmul.mubr.f32.gmra.mrb[34].mxu1 %v12666_v1 }
 0x4ae   :  { %8246 = vmatprep.mubr.msk.f32.mxu0 %vm9412_vm9, %v14545_v27  ;;  %8519 = vmatprep.mubr.msk.f32.mxu1 %vm9412_vm9, %v14545_v27 }
 0x4b1   :  { %8247 = vmatmul.mubr.f32.gmra.mrb[42].mxu0 %v12776_v6  ;;  %8520 = vmatmul.mubr.f32.gmra.mrb[36].mxu1 %v12692_v54 }
 0x4b2   :  { %8249 = vmatprep.mubr.msk.f32.mxu0 %vm9412_vm9, %v14545_v27  ;;  %8522 = vmatprep.mubr.msk.f32.mxu1 %vm9412_vm9, %v14545_v27 }
 0x4b5   :  { %8250 = vmatmul.mubr.f32.gmra.mrb[44].mxu0 %v12849_v35  ;;  %8523 = vmatmul.mubr.f32.gmra.mrb[38].mxu1 %v12714_v7 }
 0x4b6   :  { %8252 = vmatprep.mubr.msk.f32.mxu0 %vm9412_vm9, %v14545_v27  ;;  %8525 = vmatprep.mubr.msk.f32.mxu1 %vm9412_vm9, %v14545_v27 }
 0x4b9   :  { %8253 = vmatmul.mubr.f32.gmra.mrb[46].mxu0 %v12900_v53  ;;  %8526 = vmatmul.mubr.f32.gmra.mrb[40].mxu1 %v12742_v29 }
 0x4ba   :  { %8255 = vmatprep.mubr.msk.f32.mxu0 %vm9412_vm9, %v14545_v27  ;;  %8528 = vmatprep.mubr.msk.f32.mxu1 %vm9412_vm9, %v14545_v27 }
 0x4bd   :  { %8256 = vmatmul.mubr.f32.gmra.mrb[48].mxu0 %v14977_v31  ;;  %8529 = vmatmul.mubr.f32.gmra.mrb[42].mxu1 %v14978_v16 }
 0x4be   :  { %8258 = vmatprep.mubr.msk.f32.mxu0 %vm9412_vm9, %v14545_v27  ;;  %8531 = vmatprep.mubr.msk.f32.mxu1 %vm9412_vm9, %v14545_v27 }
 0x4c1   :  { %8259 = vmatmul.mubr.f32.gmra.mrb[50].mxu0 %v14979_v0  ;;  %8532 = vmatmul.mubr.f32.gmra.mrb[44].mxu1 %v14980_v52 }
 0x4c2   :  { %8269 = vmatprep.mubr.msk.f32.mxu0 %vm9412_vm9, %v14545_v27  ;;  %8534 = vmatprep.mubr.msk.f32.mxu1 %vm9412_vm9, %v14545_v27 }
 0x4c5   :  { %8270 = vmatmul.mubr.f32.vlgmr.msra.gmra.mrb[26].mxu0 %v12210_v36  ;;  %8535 = vmatmul.mubr.f32.gmra.mrb[46].mxu1 %v14981_v58  ;;  %v14983_v36 = vld [vmem:[#allocation35_spill] sm:$0xff] }
 0x4c6   :  { %8272 = vmatprep.mubr.msk.f32.mxu0 %vm9412_vm9, %v14545_v27  ;;  %8537 = vmatprep.mubr.msk.f32.mxu1 %vm9412_vm9, %v14545_v27 }
 0x4c9   :  { %8273 = vmatmul.mubr.f32.gmra.mrb[28].mxu0 %v12236_v8  ;;  %8538 = vmatmul.mubr.f32.gmra.mrb[48].mxu1 %v14982_v57 }
 0x4ca   :  { %8275 = vmatprep.mubr.msk.f32.mxu0 %vm9412_vm9, %v14545_v27  ;;  %8540 = vmatprep.mubr.msk.f32.mxu1 %vm9412_vm9, %v14545_v27 }
 0x4cd   :  { %8276 = vmatmul.mubr.f32.gmra.mrb[30].mxu0 %v12272_v9  ;;  %8541 = vmatmul.mubr.f32.gmra.mrb[50].mxu1 %v14983_v36 }
 0x4ce   :  { %8278 = vmatprep.mubr.msk.f32.mxu0 %vm9412_vm9, %v14545_v27  ;;  %8551 = vmatprep.mubr.msk.f32.mxu1 %vm9412_vm9, %v14545_v27 }
 0x4d1   :  { %8279 = vmatmul.mubr.f32.gmra.mrb[32].mxu0 %v12299_v23  ;;  %8552 = vmatmul.mubr.f32.vlgmr.msra.gmra.mrb[26].mxu1 %v12529_v18 }
 0x4d2   :  { %8281 = vmatprep.mubr.msk.f32.mxu0 %vm9412_vm9, %v14545_v27  ;;  %8554 = vmatprep.mubr.msk.f32.mxu1 %vm9412_vm9, %v14545_v27 }
 0x4d5   :  { %8282 = vmatmul.mubr.f32.gmra.mrb[34].mxu0 %v12330_v21  ;;  %8555 = vmatmul.mubr.f32.gmra.mrb[28].mxu1 %v12582_v33 }
 0x4d6   :  { %8284 = vmatprep.mubr.msk.f32.mxu0 %vm9412_vm9, %v14545_v27  ;;  %8557 = vmatprep.mubr.msk.f32.mxu1 %vm9412_vm9, %v14545_v27 }
 0x4d9   :  { %8285 = vmatmul.mubr.f32.gmra.mrb[36].mxu0 %v12365_v22  ;;  %8558 = vmatmul.mubr.f32.gmra.mrb[30].mxu1 %v12618_v61 }
 0x4da   :  { %8287 = vmatprep.mubr.msk.f32.mxu0 %vm9412_vm9, %v14545_v27  ;;  %8560 = vmatprep.mubr.msk.f32.mxu1 %vm9412_vm9, %v14545_v27 }
 0x4dd   :  { %8288 = vmatmul.mubr.f32.gmra.mrb[38].mxu0 %v12457_v37  ;;  %8561 = vmatmul.mubr.f32.gmra.mrb[32].mxu1 %v12655_v49 }
 0x4de   :  { %8290 = vmatprep.mubr.msk.f32.mxu0 %vm9412_vm9, %v14545_v27  ;;  %8563 = vmatprep.mubr.msk.f32.mxu1 %vm9412_vm9, %v14545_v27 }
 0x4e1   :  { %8291 = vmatmul.mubr.f32.gmra.mrb[40].mxu0 %v12555_v45  ;;  %8564 = vmatmul.mubr.f32.gmra.mrb[34].mxu1 %v12666_v1 }
 0x4e2   :  { %8293 = vmatprep.mubr.msk.f32.mxu0 %vm9412_vm9, %v14545_v27  ;;  %8566 = vmatprep.mubr.msk.f32.mxu1 %vm9412_vm9, %v14545_v27 }
 0x4e5   :  { %8294 = vmatmul.mubr.f32.gmra.mrb[42].mxu0 %v12776_v6  ;;  %8567 = vmatmul.mubr.f32.gmra.mrb[36].mxu1 %v12692_v54 }
 0x4e6   :  { %8296 = vmatprep.mubr.msk.f32.mxu0 %vm9412_vm9, %v14545_v27  ;;  %8569 = vmatprep.mubr.msk.f32.mxu1 %vm9412_vm9, %v14545_v27 }
 0x4e9   :  { %8297 = vmatmul.mubr.f32.gmra.mrb[44].mxu0 %v12849_v35  ;;  %8570 = vmatmul.mubr.f32.gmra.mrb[38].mxu1 %v12714_v7 }
 0x4ea   :  { %8299 = vmatprep.mubr.msk.f32.mxu0 %vm9412_vm9, %v14545_v27  ;;  %8572 = vmatprep.mubr.msk.f32.mxu1 %vm9412_vm9, %v14545_v27 }
 0x4ed   :  { %8300 = vmatmul.mubr.f32.gmra.mrb[46].mxu0 %v12900_v53  ;;  %8573 = vmatmul.mubr.f32.gmra.mrb[40].mxu1 %v12742_v29 }
 0x4ee   :  { %8302 = vmatprep.mubr.msk.f32.mxu0 %vm9412_vm9, %v14545_v27  ;;  %8575 = vmatprep.mubr.msk.f32.mxu1 %vm9412_vm9, %v14545_v27 }
 0x4f1   :  { %8303 = vmatmul.mubr.f32.gmra.mrb[48].mxu0 %v14977_v31  ;;  %8576 = vmatmul.mubr.f32.gmra.mrb[42].mxu1 %v14978_v16  ;;  %v6835_v31 = vpop.permute.xlu1 %6834  ;;  %v6837_v16 = vpop.permute.xlu0 %6836 }
 0x4f2   :  { %8305 = vmatprep.mubr.msk.f32.mxu0 %vm9412_vm9, %v14545_v27  ;;  %8578 = vmatprep.mubr.msk.f32.mxu1 %vm9412_vm9, %v14545_v27 }
 0x4f5   :  { %8306 = vmatmul.mubr.f32.gmra.mrb[50].mxu0 %v14979_v0  ;;  %8579 = vmatmul.mubr.f32.gmra.mrb[44].mxu1 %v14980_v52  ;;  %v6839_v0 = vpop.permute.xlu1 %6838  ;;  %v13493_v52 = vpop.permute.xlu0 %6840 }
 0x4f6   :  { %8581 = vmatprep.mubr.msk.f32.mxu1 %vm9412_vm9, %v14545_v27 }
 0x4f9   :  { %8582 = vmatmul.mubr.f32.gmra.mrb[46].mxu1 %v14981_v58  ;;  %v13495_v58 = vpop.permute.xlu1 %6842 }
 0x4fa   :  { %8584 = vmatprep.mubr.msk.f32.mxu1 %vm9412_vm9, %v14545_v27 }
 0x4fd   :  { %8585 = vmatmul.mubr.f32.gmra.mrb[48].mxu1 %v14982_v57  ;;  %v13497_v57 = vpop.permute.xlu0 %6844 }
 0x4fe   :  { %8587 = vmatprep.mubr.msk.f32.mxu1 %vm9412_vm9, %v14545_v27  ;;  %vm6967_vm9 = vcmask 64512  }
 0x501   :  { %8588 = vmatmul.mubr.f32.gmra.mrb[50].mxu1 %v14983_v36  ;;  %v13499_v36 = vpop.permute.xlu1 %6846 }
 0x598   :  { %v5310_v8 = vpop.f32.mrb[26].mxu0 }
 0x599   :  { %6876 = vrot.lane.b32.xlu1 %v5310_v8, %s9416_s1  ;;  %v8271_v9 = vpop.f32.mrb[27].mxu0  ;;  %v13501_v8 = vpop.permute.xlu0 %6848 }
 0x59c   :  { %v5316_v23 = vpop.f32.mrb[28].mxu0 }
 0x59d   :  { %v8274_v21 = vpop.f32.mrb[29].mxu0 }
 0x5a0   :  { %v5322_v22 = vpop.f32.mrb[30].mxu0 }
 0x5a1   :  { %v8277_v37 = vpop.f32.mrb[31].mxu0 }
 0x5a4   :  { %v5328_v18 = vpop.f32.mrb[32].mxu0  ;;  %v6735_v45 = vpop.f32.mrb[26].mxu1 }
 0x5a5   :  { %v8280_v35 = vpop.f32.mrb[33].mxu0  ;;  %6928 = vrot.lane.b32.xlu0 %v6735_v45, %s9417_s6  ;;  %v8553_v33 = vpop.f32.mrb[27].mxu1 }
 0x5a6   :  { %v14985_v35 = vld [vmem:[#allocation89_spill] sm:$0xff] }
 0x5a7   :  { %v6969_v33 = vsel %vm6967_vm9, %v14985_v35, %v6827_v24 }
 0x5a8   :  { %v5334_v61 = vpop.f32.mrb[34].mxu0  ;;  %v6741_v27 = vpop.f32.mrb[28].mxu1 }
 0x5a9   :  { %v8283_v49 = vpop.f32.mrb[35].mxu0  ;;  %6878 = vrot.lane.b32.xlu0 %v5316_v23, %s9416_s1  ;;  %6930 = vrot.lane.b32.xlu1 %v6741_v27, %s9417_s6  ;;  %v8556_v1 = vpop.f32.mrb[29].mxu1  ;;  %v14984_v23 = vld [vmem:[#allocation114_spill] sm:$0xff] }
 0x5aa   :  { %v6968_v21 = vsel %vm6967_vm9, %v14984_v23, %v6825_v20 }
 0x5ac   :  { %v5340_v54 = vpop.f32.mrb[36].mxu0  ;;  %v6747_v7 = vpop.f32.mrb[30].mxu1 }
 0x5ad   :  { %v8286_v29 = vpop.f32.mrb[37].mxu0  ;;  %6880 = vrot.lane.b32.xlu1 %v5322_v22, %s9416_s1  ;;  %6932 = vrot.lane.b32.xlu0 %v6747_v7, %s9417_s6  ;;  %v8559_v6 = vpop.f32.mrb[31].mxu1  ;;  %v14986_v7 = vld [vmem:[#allocation126_spill] sm:$0xff] }
 0x5ae   :  { %v6970_v29 = vsel %vm6967_vm9, %v14986_v7, %v6829_v47 }
 0x5b0   :  { %v5346_v53 = vpop.f32.mrb[38].mxu0  ;;  %v6753_v62 = vpop.f32.mrb[32].mxu1 }
 0x5b1   :  { %v8289_v12 = vpop.f32.mrb[39].mxu0  ;;  %6882 = vrot.lane.b32.xlu0 %v5328_v18, %s9416_s1  ;;  %6934 = vrot.lane.b32.xlu1 %v6753_v62, %s9417_s6  ;;  %v8562_v19 = vpop.f32.mrb[33].mxu1 }
 0x5b4   :  { %v5352_v32 = vpop.f32.mrb[40].mxu0  ;;  %v6759_v40 = vpop.f32.mrb[34].mxu1 }
 0x5b5   :  { %v8292_v48 = vpop.f32.mrb[41].mxu0  ;;  %6884 = vrot.lane.b32.xlu1 %v5334_v61, %s9416_s1  ;;  %6936 = vrot.lane.b32.xlu0 %v6759_v40, %s9417_s6  ;;  %v8565_v4 = vpop.f32.mrb[35].mxu1 }
 0x5b8   :  { %v5358_v55 = vpop.f32.mrb[42].mxu0  ;;  %v6765_v50 = vpop.f32.mrb[36].mxu1 }
 0x5b9   :  { %v8295_v41 = vpop.f32.mrb[43].mxu0  ;;  %6886 = vrot.lane.b32.xlu0 %v5340_v54, %s9416_s1  ;;  %6938 = vrot.lane.b32.xlu1 %v6765_v50, %s9417_s6  ;;  %v8568_v11 = vpop.f32.mrb[37].mxu1 }
 0x5ba   :  { %v14988_v11 = vld [vmem:[#allocation62_spill] sm:$0xff] }
 0x5bc   :  { %v5364_v44 = vpop.f32.mrb[44].mxu0  ;;  %v6771_v5 = vpop.f32.mrb[38].mxu1 }
 0x5bd   :  { %v8298_v51 = vpop.f32.mrb[45].mxu0  ;;  %6888 = vrot.lane.b32.xlu1 %v5346_v53, %s9416_s1  ;;  %6940 = vrot.lane.b32.xlu0 %v6771_v5, %s9417_s6  ;;  %v8571_v13 = vpop.f32.mrb[39].mxu1 }
 0x5c0   :  { %v5370_v25 = vpop.f32.mrb[46].mxu0  ;;  %v6777_v42 = vpop.f32.mrb[40].mxu1 }
 0x5c1   :  { %v8301_v63 = vpop.f32.mrb[47].mxu0  ;;  %6890 = vrot.lane.b32.xlu0 %v5352_v32, %s9416_s1  ;;  %6942 = vrot.lane.b32.xlu1 %v6777_v42, %s9417_s6  ;;  %v8574_v46 = vpop.f32.mrb[41].mxu1  ;;  %v14987_v32 = vld [vmem:[#allocation105_spill] sm:$0xff] }
 0x5c2   :  { %v6971_v40 = vsel %vm6967_vm9, %v14987_v32, %v6831_v59  ;;  %v14989_v63 = vld [vmem:[#allocation133_spill] sm:$0xff] }
 0x5c3   :  { %v6973_v46 = vsel %vm6967_vm9, %v14989_v63, %v6835_v31  ;;  %v14992_v31 = vld [vmem:[#allocation134_spill] sm:$0xff] }
 0x5c4   :  { %v5376_v39 = vpop.f32.mrb[48].mxu0  ;;  %v6783_v60 = vpop.f32.mrb[42].mxu1 }
 0x5c5   :  { %v8304_v10 = vpop.f32.mrb[49].mxu0  ;;  %6892 = vrot.lane.b32.xlu1 %v5358_v55, %s9416_s1  ;;  %6944 = vrot.lane.b32.xlu0 %v6783_v60, %s9417_s6  ;;  %v8577_v14 = vpop.f32.mrb[43].mxu1 }
 0x5c8   :  { %v5382_v26 = vpop.f32.mrb[50].mxu0  ;;  %v6789_v17 = vpop.f32.mrb[44].mxu1 }
 0x5c9   :  { %v8307_v28 = vpop.f32.mrb[51].mxu0  ;;  %6894 = vrot.lane.b32.xlu0 %v5364_v44, %s9416_s1  ;;  %6946 = vrot.lane.b32.xlu1 %v6789_v17, %s9417_s6  ;;  %v8580_v3 = vpop.f32.mrb[45].mxu1  ;;  %v6972_v44 = vsel %vm6967_vm9, %v14988_v11, %v6833_v15  ;;  %v14990_v17 = vld [vmem:[#allocation119_spill] sm:$0xff] }
 0x5ca   :  { %v6974_v28 = vsel %vm6967_vm9, %v14990_v17, %v6837_v16  ;;  %v6976_v16 = vsel %vm6967_vm9, %v14992_v31, %v13493_v52 }
 0x5cc   :  { %v6795_v34 = vpop.f32.mrb[46].mxu1 }
 0x5cd   :  { %6896 = vrot.lane.b32.xlu1 %v5370_v25, %s9416_s1  ;;  %6948 = vrot.lane.b32.xlu0 %v6795_v34, %s9417_s6  ;;  %v8583_v38 = vpop.f32.mrb[47].mxu1 }
 0x5d0   :  { %v6801_v30 = vpop.f32.mrb[48].mxu1 }
 0x5d1   :  { %6900 = vrot.lane.b32.xlu1 %v5382_v26, %s9416_s1  ;;  %6898 = vrot.lane.b32.xlu0 %v5376_v39, %s9416_s1  ;;  %v8586_v56 = vpop.f32.mrb[49].mxu1 }
 0x5d4   :  { %v6807_v2 = vpop.f32.mrb[50].mxu1 }
 0x5d5   :  { %6950 = vrot.lane.b32.xlu1 %v6801_v30, %s9417_s6  ;;  %6952 = vrot.lane.b32.xlu0 %v6807_v2, %s9417_s6  ;;  %v8589_v43 = vpop.f32.mrb[51].mxu1  ;;  %v14991_v2 = vld [vmem:[#allocation106_spill] sm:$0xff] }
 0x5d6   :  { %v6975_v43 = vsel %vm6967_vm9, %v14991_v2, %v6839_v0 }
 0x60b   :  { %v6877_v9 = vpop.permute.xlu1 %6876 }
 0x60c   :  { %v6982_v22 = vsel %vm6981_vm8, %v6968_v21, %v6877_v9 }
 0x617   :  { %v6929_v37 = vpop.permute.xlu0 %6928 }
 0x618   :  { %v6996_v18 = vsel %vm6995_vm2, %v6982_v22, %v6929_v37  ;;  %v14993_v37 = vld [vmem:[#allocation135_spill] sm:$0xff] }
 0x619   :  { %v7009_v45 = vmul.f32 2.0, %v6996_v18  ;;  %v6977_v18 = vsel %vm6967_vm9, %v14993_v37, %v13495_v58 }
 0x61b   :  { %7023 = vst.msk [vmem:[#allocation7] sm:$0xff] %vm7022_vm13, %v7009_v45  ;;  %v6879_v61 = vpop.permute.xlu0 %6878  ;;  %v6931_v27 = vpop.permute.xlu1 %6930 }
 0x61c   :  { %v6983_v49 = vsel %vm6981_vm8, %v6969_v33, %v6879_v61 }
 0x61d   :  { %v6997_v1 = vsel %vm6995_vm2, %v6983_v49, %v6931_v27  ;;  %v14994_v27 = vld [vmem:[#allocation65_spill] sm:$0xff] }
 0x61e   :  { %v7010_v54 = vmul.f32 2.0, %v6997_v1  ;;  %v6978_v49 = vsel %vm6967_vm9, %v14994_v27, %v13497_v57 }
 0x61f   :  { %v6933_v6 = vpop.permute.xlu0 %6932  ;;  %v6881_v53 = vpop.permute.xlu1 %6880 }
 0x620   :  { %7024 = vst.msk [vmem:[#allocation7 + $0x8] sm:$0xff] %vm7022_vm13, %v7010_v54  ;;  %v6984_v62 = vsel %vm6981_vm8, %v6970_v29, %v6881_v53 }
 0x621   :  { %v6998_v12 = vsel %vm6995_vm2, %v6984_v62, %v6933_v6  ;;  %v14995_v62 = vld [vmem:[#allocation45_spill] sm:$0xff] }
 0x622   :  { %v7011_v19 = vmul.f32 2.0, %v6998_v12  ;;  %v6979_v12 = vsel %vm6967_vm9, %v14995_v62, %v13499_v36 }
 0x623   :  { %v6883_v48 = vpop.permute.xlu0 %6882  ;;  %v6935_v4 = vpop.permute.xlu1 %6934 }
 0x624   :  { %7025 = vst.msk [vmem:[#allocation7 + $0x10] sm:$0xff] %vm7022_vm13, %v7011_v19  ;;  %v6985_v55 = vsel %vm6981_vm8, %v6971_v40, %v6883_v48  ;;  %v14996_v19 = vld [vmem:[#allocation57_spill] sm:$0xff] }
 0x625   :  { %v6999_v50 = vsel %vm6995_vm2, %v6985_v55, %v6935_v4  ;;  %v6980_v57 = vsel %vm6967_vm9, %v14996_v19, %v13501_v8 }
 0x626   :  { %v7012_v41 = vmul.f32 2.0, %v6999_v50 }
 0x627   :  { %v6937_v5 = vpop.permute.xlu0 %6936  ;;  %v6885_v51 = vpop.permute.xlu1 %6884 }
 0x628   :  { %7026 = vst.msk [vmem:[#allocation7 + $0x18] sm:$0xff] %vm7022_vm13, %v7012_v41  ;;  %v6986_v13 = vsel %vm6981_vm8, %v6972_v44, %v6885_v51 }
 0x629   :  { %v7000_v25 = vsel %vm6995_vm2, %v6986_v13, %v6937_v5 }
 0x62a   :  { %v7013_v42 = vmul.f32 2.0, %v7000_v25 }
 0x62b   :  { %v6887_v39 = vpop.permute.xlu0 %6886  ;;  %v6939_v60 = vpop.permute.xlu1 %6938 }
 0x62c   :  { %7027 = vst.msk [vmem:[#allocation7 + $0x20] sm:$0xff] %vm7022_vm13, %v7013_v42  ;;  %v6987_v10 = vsel %vm6981_vm8, %v6973_v46, %v6887_v39 }
 0x62d   :  { %v7001_v14 = vsel %vm6995_vm2, %v6987_v10, %v6939_v60 }
 0x62e   :  { %v7014_v26 = vmul.f32 2.0, %v7001_v14 }
 0x62f   :  { %v6941_v3 = vpop.permute.xlu0 %6940  ;;  %v6889_v34 = vpop.permute.xlu1 %6888 }
 0x630   :  { %7028 = vst.msk [vmem:[#allocation7 + $0x28] sm:$0xff] %vm7022_vm13, %v7014_v26  ;;  %v6988_v38 = vsel %vm6981_vm8, %v6974_v28, %v6889_v34 }
 0x631   :  { %v7002_v30 = vsel %vm6995_vm2, %v6988_v38, %v6941_v3 }
 0x632   :  { %v7015_v56 = vmul.f32 2.0, %v7002_v30 }
 0x633   :  { %v6891_v20 = vpop.permute.xlu0 %6890  ;;  %v6943_v24 = vpop.permute.xlu1 %6942 }
 0x634   :  { %7029 = vst.msk [vmem:[#allocation7 + $0x30] sm:$0xff] %vm7022_vm13, %v7015_v56  ;;  %v6989_v47 = vsel %vm6981_vm8, %v6975_v43, %v6891_v20 }
 0x635   :  { %v7003_v59 = vsel %vm6995_vm2, %v6989_v47, %v6943_v24 }
 0x636   :  { %v7016_v15 = vmul.f32 2.0, %v7003_v59 }
 0x637   :  { %v6945_v9 = vpop.permute.xlu0 %6944  ;;  %v6893_v23 = vpop.permute.xlu1 %6892 }
 0x638   :  { %7030 = vst.msk [vmem:[#allocation7 + $0x38] sm:$0xff] %vm7022_vm13, %v7016_v15  ;;  %v6990_v21 = vsel %vm6981_vm8, %v6976_v16, %v6893_v23 }
 0x639   :  { %v7004_v0 = vsel %vm6995_vm2, %v6990_v21, %v6945_v9 }
 0x63a   :  { %v7017_v22 = vmul.f32 2.0, %v7004_v0 }
 0x63b   :  { %v6895_v45 = vpop.permute.xlu0 %6894  ;;  %v6947_v35 = vpop.permute.xlu1 %6946 }
 0x63c   :  { %7031 = vst.msk [vmem:[#allocation7 + $0x40] sm:$0xff] %vm7022_vm13, %v7017_v22  ;;  %v6991_v33 = vsel %vm6981_vm8, %v6977_v18, %v6895_v45 }
 0x63d   :  { %v7005_v52 = vsel %vm6995_vm2, %v6991_v33, %v6947_v35 }
 0x63e   :  { %v7018_v61 = vmul.f32 2.0, %v7005_v52 }
 0x63f   :  { %v6949_v1 = vpop.permute.xlu0 %6948  ;;  %v6897_v54 = vpop.permute.xlu1 %6896 }
 0x640   :  { %7032 = vst.msk [vmem:[#allocation7 + $0x48] sm:$0xff] %vm7022_vm13, %v7018_v61  ;;  %v6992_v7 = vsel %vm6981_vm8, %v6978_v49, %v6897_v54 }
 0x641   :  { %v7006_v58 = vsel %vm6995_vm2, %v6992_v7, %v6949_v1 }
 0x642   :  { %v7019_v29 = vmul.f32 2.0, %v7006_v58 }
 0x643   :  { %v6899_v6 = vpop.permute.xlu0 %6898  ;;  %v6901_v53 = vpop.permute.xlu1 %6900 }
 0x644   :  { %7033 = vst.msk [vmem:[#allocation7 + $0x50] sm:$0xff] %vm7022_vm13, %v7019_v29  ;;  %v6993_v32 = vsel %vm6981_vm8, %v6979_v12, %v6899_v6  ;;  %v6994_v40 = vsel %vm6981_vm8, %v6980_v57, %v6901_v53 }
 0x647   :  { %v6953_v48 = vpop.permute.xlu0 %6952  ;;  %v6951_v4 = vpop.permute.xlu1 %6950 }
 0x648   :  { %v7008_v55 = vsel %vm6995_vm2, %v6994_v40, %v6953_v48  ;;  %v7007_v50 = vsel %vm6995_vm2, %v6993_v32, %v6951_v4 }
 0x649   :  { %v7021_v41 = vmul.f32 2.0, %v7008_v55  ;;  %v7020_v11 = vmul.f32 2.0, %v7007_v50 }
 0x64b   :  { %7035 = vst.msk [vmem:[#allocation7 + $0x60] sm:$0xff] %vm7022_vm13, %v7021_v41  ;;  %7034 = vst.msk [vmem:[#allocation7 + $0x58] sm:$0xff] %vm7022_vm13, %v7020_v11 }
 0x64c   :  { %9388 = shalt.err (!%p9385_p6)
}
 0x64d   :  { %s9389_s12 = scalar_lea.hbm %s13590_s2, 1664 }
 0x64e   :  { %p9390_p7 = scmp.ne.s32.totalorder %s13590_s2, %s9389_s12  ;;  %p9393_p8 = scmp.lt.u32.totalorder %s9389_s12, %s13590_s2 }
 0x650   :  { %p9395_p9 = pnand %p9393_p8, %p9390_p7 }
 0x652   :  { %9398 = shalt.err (!%p9395_p9)
}
 0x653   :  { %7047 = dma.vmem_to_hbm [thread:$0]  %s7042_s8, 1664, %s13590_s2, [#allocation4], %s9406_s19, %s9406_s19, %s9407_s20  }
 0x654   :  { %9403 = dma.done.wait [#allocation4], 1664  }
 0x655   :  { %9404 = vsyncadd [#allocation4], 4294965632 }
 0x656   :  { %7051 = vsyncpa [#allocation3], 1 }
 0x657   :  { %7052 = vsyncpa [#allocation6], 1 }
 0x658   :  { %7053 = vsyncpa [#allocation4], 1 }

</bundles_post_ra>
